<compile_context>
chip_gen: v5e
topology: v5e:2x2
jax: 0.10.0
libtpu: 0.0.40
codegen_flags: <defaults>
</compile_context>

<pallas_src>
import jax
import jax.numpy as jnp
from jax.experimental import pallas as pl
from jax.experimental.pallas import tpu as pltpu

ACT_DIM = 6          # config['act_dim'] is external; fixed deterministically here.
HID = 465            # fc1 output features (torch spec)
HID_P = 512          # padded hidden (lane aligned)
K_FC = 3872          # fc1 input features (= 32*11*11)
K_FC_P = 4096        # padded fc1 K
TK = 2048            # fc1 K tile (2 grid steps, 4 MB weight block, double buffered)
HEAD_P = 128         # padded head width (cols 0..5 = Q advantage, col 6 = V)


# ----------------------------------------------------------------------------
# Pallas kernels
# ----------------------------------------------------------------------------
def _matmul_bias_relu_kernel(x_ref, w_ref, b_ref, o_ref):
    acc = jnp.dot(x_ref[...], w_ref[...], preferred_element_type=jnp.float32)
    o_ref[...] = jnp.maximum(acc + b_ref[...], 0.0)


def _fc1_head_kernel(x_ref, w_ref, b_ref, hw_ref, hb_ref, q_ref, h_acc):
    k = pl.program_id(0)

    @pl.when(k == 0)
    def _():
        h_acc[...] = jnp.zeros_like(h_acc)

    h_acc[...] += jnp.dot(x_ref[...], w_ref[...], preferred_element_type=jnp.float32)

    @pl.when(k == pl.num_programs(0) - 1)
    def _():
        h = jnp.maximum(h_acc[...] + b_ref[...], 0.0)              # (B, 512), ReLU(fc1)
        av = jnp.dot(h, hw_ref[...], preferred_element_type=jnp.float32) + hb_ref[...]
        As = av[:, :ACT_DIM]                                       # advantages
        V = av[:, ACT_DIM:ACT_DIM + 1]                             # state value
        mean_as = jnp.sum(As, axis=-1, keepdims=True) * (1.0 / ACT_DIM)
        q_ref[...] = As + (V - mean_as)


# ----------------------------------------------------------------------------
# Pallas wrappers
# ----------------------------------------------------------------------------
def _pick_block_m(m):
    # Two equal row blocks (so v7x's 2 TensorCores split the work) when the
    # matmul is big enough to be worth an extra grid step; single block else.
    if m >= 512 and (m // 2) % 8 == 0:
        return m // 2
    return m


def matmul_bias_relu(x, w, b):
    m, k = x.shape
    n = w.shape[1]
    tm = _pick_block_m(m)
    return pl.pallas_call(
        _matmul_bias_relu_kernel,
        out_shape=jax.ShapeDtypeStruct((m, n), jnp.float32),
        grid=(m // tm,),
        in_specs=[
            pl.BlockSpec((tm, k), lambda i: (i, 0)),
            pl.BlockSpec((k, n), lambda i: (0, 0)),
            pl.BlockSpec((1, n), lambda i: (0, 0)),
        ],
        out_specs=pl.BlockSpec((tm, n), lambda i: (i, 0)),
        compiler_params=pltpu.CompilerParams(dimension_semantics=("parallel",)),
    )(x, w, b)


def fc1_dueling(h, w, b, hw, hb):
    bsz = h.shape[0]
    nk = K_FC_P // TK
    return pl.pallas_call(
        _fc1_head_kernel,
        out_shape=jax.ShapeDtypeStruct((bsz, ACT_DIM), jnp.float32),
        grid=(nk,),
        in_specs=[
            pl.BlockSpec((bsz, TK), lambda k: (0, k)),
            pl.BlockSpec((TK, HID_P), lambda k: (k, 0)),
            pl.BlockSpec((1, HID_P), lambda k: (0, 0)),
            pl.BlockSpec((HID_P, HEAD_P), lambda k: (0, 0)),
            pl.BlockSpec((1, HEAD_P), lambda k: (0, 0)),
        ],
        out_specs=pl.BlockSpec((bsz, ACT_DIM), lambda k: (0, 0)),
        scratch_shapes=[pltpu.VMEM((bsz, HID_P), jnp.float32)],
        # K is a reduction axis accumulated in scratch -> must stay "arbitrary".
        compiler_params=pltpu.CompilerParams(dimension_semantics=("arbitrary",)),
    )(h, w, b, hw, hb)


# ----------------------------------------------------------------------------
# Glue: NHWC im2col for Conv2d(k=3, stride=2, pad=1) -- slices + concat only.
# Rows are grouped 4 pixels at a time so the Pallas matmul has a lane-dense
# (128-wide) output against a block-diagonal weight.
# ----------------------------------------------------------------------------
def conv_relu_nhwc(x, w_bd, b4, stride=2, pad=1, k=3):
    # x: (B, H, W, Cin) NHWC; w_bd: (4*k*k*Cin, 4*Cout) block-diagonal,
    # (ky, kx, c) row order per block; b4: (1, 4*Cout).
    B, H, W, C = x.shape
    Ho = (H + 2 * pad - k) // stride + 1
    Wo = (W + 2 * pad - k) // stride + 1
    cout = b4.shape[1] // 4
    xp = jnp.pad(x, ((0, 0), (pad, pad), (pad, pad), (0, 0)))
    taps = [
        xp[:, ky:ky + stride * Ho:stride, kx:kx + stride * Wo:stride, :]
        for ky in range(k) for kx in range(k)
    ]
    m = B * Ho * Wo
    cols = jnp.concatenate(taps, axis=-1).reshape(m, C * k * k)
    m4 = ((m + 63) // 64) * 64                          # 4-group + 8-sublane aligned
    cols = jnp.pad(cols, ((0, m4 - m), (0, 0))).reshape(m4 // 4, 4 * C * k * k)
    y = matmul_bias_relu(cols, w_bd, b4)                # (m4//4, 128) lane-dense
    y = y.reshape(m4, cout)[:m]                         # contiguous un-grouping
    return y.reshape(B, Ho, Wo, cout)                   # stays NHWC


# ----------------------------------------------------------------------------
# Parameters (PyTorch layout) + one-time prep into kernel-friendly layout
# ----------------------------------------------------------------------------
def init_params(key):
    def lin_init(key, fan_in, shape):
        bound = 1.0 / jnp.sqrt(float(fan_in))
        return jax.random.uniform(key, shape, jnp.float32, -bound, bound)

    ks = jax.random.split(key, 12)
    p = {}
    p["w1"] = lin_init(ks[0], 4 * 9, (32, 4, 3, 3))
    p["b1"] = lin_init(ks[1], 4 * 9, (32,))
    p["w2"] = lin_init(ks[2], 32 * 9, (32, 32, 3, 3))
    p["b2"] = lin_init(ks[3], 32 * 9, (32,))
    p["w3"] = lin_init(ks[4], 32 * 9, (32, 32, 3, 3))
    p["b3"] = lin_init(ks[5], 32 * 9, (32,))
    p["fc1_w"] = lin_init(ks[6], K_FC, (K_FC, HID))   # (in, out), NCHW input order
    p["fc1_b"] = lin_init(ks[7], K_FC, (1, HID))
    p["q_w"] = lin_init(ks[8], HID, (HID, ACT_DIM))
    p["q_b"] = lin_init(ks[9], HID, (1, ACT_DIM))
    p["v_w"] = lin_init(ks[10], HID, (HID, 1))
    p["v_b"] = lin_init(ks[11], HID, (1, 1))
    return p


def _block_diag4(w):
    """(K, N) -> (4K, 4N) block-diagonal with 4 copies of w."""
    kk, n = w.shape
    z = jnp.zeros((kk, n), w.dtype)
    rows = [jnp.concatenate([w if i == q else z for i in range(4)], axis=1)
            for q in range(4)]
    return jnp.concatenate(rows, axis=0)


def prepare_params(p):
    """One-time layout prep: conv OIHW -> im2col (ky,kx,c)xCout, block-diag x4
    (lane-dense matmul); fc1 rows permuted from NCHW-flatten to NHWC-flatten
    and zero padded; q/v head weights concatenated into one lane-padded
    matrix."""
    pp = {}
    for i in (1, 2, 3):
        w = p[f"w{i}"]                                         # (Cout, Cin, 3, 3)
        cout = w.shape[0]
        w2d = w.transpose(2, 3, 1, 0).reshape(-1, cout)        # (9*Cin, Cout)
        pp[f"w{i}c"] = _block_diag4(w2d)                       # (36*Cin, 4*Cout=128)
        pp[f"b{i}"] = jnp.tile(p[f"b{i}"].reshape(1, -1), (1, 4))   # (1, 128)

    # fc1: input index c*121 + h*11 + w  ->  h*(11*32) + w*32 + c (NHWC flatten)
    w = p["fc1_w"].reshape(32, 11, 11, HID).transpose(1, 2, 0, 3).reshape(K_FC, HID)
    pp["fc1_w"] = jnp.pad(w, ((0, K_FC_P - K_FC), (0, HID_P - HID)))
    pp["fc1_b"] = jnp.pad(p["fc1_b"], ((0, 0), (0, HID_P - HID)))

    hw = jnp.concatenate([p["q_w"], p["v_w"]], axis=1)         # (465, 7)
    pp["head_w"] = jnp.pad(hw, ((0, HID_P - HID), (0, HEAD_P - (ACT_DIM + 1))))
    hb = jnp.concatenate([p["q_b"], p["v_b"]], axis=1)         # (1, 7)
    pp["head_b"] = jnp.pad(hb, ((0, 0), (0, HEAD_P - (ACT_DIM + 1))))
    return pp


# ----------------------------------------------------------------------------
# Model forward (Pallas) and pure-JAX reference
# ----------------------------------------------------------------------------
def forward(x, pp):
    # x: (B, 4, 84, 84) NCHW (torch convention); single transpose to NHWC.
    x = jnp.transpose(x, (0, 2, 3, 1))
    x = conv_relu_nhwc(x, pp["w1c"], pp["b1"])                 # (B, 42, 42, 32)
    x = conv_relu_nhwc(x, pp["w2c"], pp["b2"])                 # (B, 21, 21, 32)
    x = conv_relu_nhwc(x, pp["w3c"], pp["b3"])                 # (B, 11, 11, 32)
    B = x.shape[0]
    h = x.reshape(B, -1)                                       # (B, 3872) NHWC order
    h = jnp.pad(h, ((0, 0), (0, K_FC_P - h.shape[1])))         # (B, 4096)
    return fc1_dueling(h, pp["fc1_w"], pp["fc1_b"], pp["head_w"], pp["head_b"])


def ref_forward(x, p):
    # pure-JAX reference on the ORIGINAL (torch-layout) params
    def conv(x, w, b):
        y = jax.lax.conv_general_dilated(
            x, w, (2, 2), ((1, 1), (1, 1)),
            dimension_numbers=("NCHW", "OIHW", "NCHW"))
        return jax.nn.relu(y + b.reshape(1, -1, 1, 1))

    x = conv(x, p["w1"], p["b1"])
    x = conv(x, p["w2"], p["b2"])
    x = conv(x, p["w3"], p["b3"])
    h = jax.nn.relu(x.reshape(x.shape[0], -1) @ p["fc1_w"] + p["fc1_b"][0])
    As = h @ p["q_w"] + p["q_b"][0]
    V = h @ p["v_w"] + p["v_b"][0]
    return As + (V - As.mean(-1, keepdims=True))


if __name__ == "__main__":
    key = jax.random.PRNGKey(0)
    pkey, xkey = jax.random.split(key)
    params = init_params(pkey)
    prepared = prepare_params(params)

    # fc1 expects 3872 = 32*11*11 features -> input must be (B, 4, 84, 84).
    x = jax.random.normal(xkey, (2, 4, 84, 84), jnp.float32)

    q = jax.jit(forward)(x, prepared)
    q = jax.block_until_ready(q)
    assert q.shape == (2, ACT_DIM)

    q_ref = ref_forward(x, params)
    assert jnp.allclose(q, q_ref, atol=2e-3, rtol=2e-3), "mismatch vs reference"

    print("KERNEL_OK")
</pallas_src>

<mosaic_0001>
module attributes {stable_mosaic.version = 11 : i64} {
  func.func @_matmul_bias_relu_kernel(%arg0: i32, %arg1: memref<448x144xf32, #tpu.memory_space<vmem>>, %arg2: memref<144x128xf32, #tpu.memory_space<vmem>>, %arg3: memref<1x128xf32, #tpu.memory_space<vmem>>, %arg4: memref<448x128xf32, #tpu.memory_space<vmem>>) attributes {dimension_semantics = [#tpu.dimension_semantics<parallel>], iteration_bounds = array<i64: 2>, scalar_prefetch = 0 : i64, scratch_operands = 0 : i64, tpu.core_type = #tpu.core_type<tc>, window_params = [{transform_indices = @transform_0, window_bounds = array<i64: 448, 144>}, {pipeline_mode = #tpu.pipeline_mode<synchronous>, transform_indices = @transform_1, window_bounds = array<i64: 144, 128>}, {pipeline_mode = #tpu.pipeline_mode<synchronous>, transform_indices = @transform_2, window_bounds = array<i64: 1, 128>}, {transform_indices = @transform_3, window_bounds = array<i64: 448, 128>}]} {
    %c0 = arith.constant 0 : index
    %c0_0 = arith.constant 0 : index
    %0 = vector.load %arg1[%c0, %c0_0] : memref<448x144xf32, #tpu.memory_space<vmem>>, vector<448x144xf32>
    %c0_1 = arith.constant 0 : index
    %c0_2 = arith.constant 0 : index
    %1 = vector.load %arg2[%c0_1, %c0_2] : memref<144x128xf32, #tpu.memory_space<vmem>>, vector<144x128xf32>
    %cst = arith.constant dense<0.000000e+00> : vector<448x128xf32>
    %2 = tpu.matmul %0, %1, %cst {dimension_numbers = #tpu.dot_dimension_numbers<[1], [0], [0], [1], [0, 0, 1, 1], [], []>} : vector<448x144xf32>, vector<144x128xf32>, vector<448x128xf32> -> vector<448x128xf32>
    %c0_3 = arith.constant 0 : index
    %c0_4 = arith.constant 0 : index
    %3 = vector.load %arg3[%c0_3, %c0_4] : memref<1x128xf32, #tpu.memory_space<vmem>>, vector<1x128xf32>
    %4 = vector.broadcast %3 : vector<1x128xf32> to vector<448x128xf32>
    %5 = arith.addf %2, %4 : vector<448x128xf32>
    %cst_5 = arith.constant 0.000000e+00 : f32
    %6 = vector.broadcast %cst_5 : f32 to vector<448x128xf32>
    %7 = arith.maximumf %5, %6 : vector<448x128xf32>
    %c0_6 = arith.constant 0 : index
    %c0_7 = arith.constant 0 : index
    %8 = vector.load %arg4[%c0_6, %c0_7] : memref<448x128xf32, #tpu.memory_space<vmem>>, vector<448x128xf32>
    tpu.vector_store %arg4[%c0_6, %c0_7], %7 {strides = array<i32>} : memref<448x128xf32, #tpu.memory_space<vmem>>, vector<448x128xf32>,
    return
  }
  func.func @transform_0(%arg0: i32) -> (i32, i32) {
    %c0_i32 = arith.constant 0 : i32
    %c0_i32_0 = arith.constant 0 : i32
    return %arg0, %c0_i32 : i32, i32
  }
  func.func @transform_1(%arg0: i32) -> (i32, i32) {
    %c0_i32 = arith.constant 0 : i32
    %c0_i32_0 = arith.constant 0 : i32
    %c0_i32_1 = arith.constant 0 : i32
    return %c0_i32, %c0_i32_0 : i32, i32
  }
  func.func @transform_2(%arg0: i32) -> (i32, i32) {
    %c0_i32 = arith.constant 0 : i32
    %c0_i32_0 = arith.constant 0 : i32
    %c0_i32_1 = arith.constant 0 : i32
    return %c0_i32, %c0_i32_0 : i32, i32
  }
  func.func @transform_3(%arg0: i32) -> (i32, i32) {
    %c0_i32 = arith.constant 0 : i32
    %c0_i32_0 = arith.constant 0 : i32
    return %arg0, %c0_i32 : i32, i32
  }
}

module attributes {stable_mosaic.version = 11 : i64} {
  func.func @_matmul_bias_relu_kernel(%arg0: i32, %arg1: memref<224x1152xf32, #tpu.memory_space<vmem>>, %arg2: memref<1152x128xf32, #tpu.memory_space<vmem>>, %arg3: memref<1x128xf32, #tpu.memory_space<vmem>>, %arg4: memref<224x128xf32, #tpu.memory_space<vmem>>) attributes {dimension_semantics = [#tpu.dimension_semantics<parallel>], iteration_bounds = array<i64: 1>, scalar_prefetch = 0 : i64, scratch_operands = 0 : i64, tpu.core_type = #tpu.core_type<tc>, window_params = [{transform_indices = @transform_0, window_bounds = array<i64: 224, 1152>}, {pipeline_mode = #tpu.pipeline_mode<synchronous>, transform_indices = @transform_1, window_bounds = array<i64: 1152, 128>}, {pipeline_mode = #tpu.pipeline_mode<synchronous>, transform_indices = @transform_2, window_bounds = array<i64: 1, 128>}, {transform_indices = @transform_3, window_bounds = array<i64: 224, 128>}]} {
    %c0 = arith.constant 0 : index
    %c0_0 = arith.constant 0 : index
    %0 = vector.load %arg1[%c0, %c0_0] : memref<224x1152xf32, #tpu.memory_space<vmem>>, vector<224x1152xf32>
    %c0_1 = arith.constant 0 : index
    %c0_2 = arith.constant 0 : index
    %1 = vector.load %arg2[%c0_1, %c0_2] : memref<1152x128xf32, #tpu.memory_space<vmem>>, vector<1152x128xf32>
    %cst = arith.constant dense<0.000000e+00> : vector<224x128xf32>
    %2 = tpu.matmul %0, %1, %cst {dimension_numbers = #tpu.dot_dimension_numbers<[1], [0], [0], [1], [0, 0, 1, 1], [], []>} : vector<224x1152xf32>, vector<1152x128xf32>, vector<224x128xf32> -> vector<224x128xf32>
    %c0_3 = arith.constant 0 : index
    %c0_4 = arith.constant 0 : index
    %3 = vector.load %arg3[%c0_3, %c0_4] : memref<1x128xf32, #tpu.memory_space<vmem>>, vector<1x128xf32>
    %4 = vector.broadcast %3 : vector<1x128xf32> to vector<224x128xf32>
    %5 = arith.addf %2, %4 : vector<224x128xf32>
    %cst_5 = arith.constant 0.000000e+00 : f32
    %6 = vector.broadcast %cst_5 : f32 to vector<224x128xf32>
    %7 = arith.maximumf %5, %6 : vector<224x128xf32>
    %c0_6 = arith.constant 0 : index
    %c0_7 = arith.constant 0 : index
    %8 = vector.load %arg4[%c0_6, %c0_7] : memref<224x128xf32, #tpu.memory_space<vmem>>, vector<224x128xf32>
    tpu.vector_store %arg4[%c0_6, %c0_7], %7 {strides = array<i32>} : memref<224x128xf32, #tpu.memory_space<vmem>>, vector<224x128xf32>,
    return
  }
  func.func @transform_0(%arg0: i32) -> (i32, i32) {
    %c0_i32 = arith.constant 0 : i32
    %c0_i32_0 = arith.constant 0 : i32
    return %arg0, %c0_i32 : i32, i32
  }
  func.func @transform_1(%arg0: i32) -> (i32, i32) {
    %c0_i32 = arith.constant 0 : i32
    %c0_i32_0 = arith.constant 0 : i32
    %c0_i32_1 = arith.constant 0 : i32
    return %c0_i32, %c0_i32_0 : i32, i32
  }
  func.func @transform_2(%arg0: i32) -> (i32, i32) {
    %c0_i32 = arith.constant 0 : i32
    %c0_i32_0 = arith.constant 0 : i32
    %c0_i32_1 = arith.constant 0 : i32
    return %c0_i32, %c0_i32_0 : i32, i32
  }
  func.func @transform_3(%arg0: i32) -> (i32, i32) {
    %c0_i32 = arith.constant 0 : i32
    %c0_i32_0 = arith.constant 0 : i32
    return %arg0, %c0_i32 : i32, i32
  }
}

module attributes {stable_mosaic.version = 11 : i64} {
  func.func @_matmul_bias_relu_kernel(%arg0: i32, %arg1: memref<64x1152xf32, #tpu.memory_space<vmem>>, %arg2: memref<1152x128xf32, #tpu.memory_space<vmem>>, %arg3: memref<1x128xf32, #tpu.memory_space<vmem>>, %arg4: memref<64x128xf32, #tpu.memory_space<vmem>>) attributes {dimension_semantics = [#tpu.dimension_semantics<parallel>], iteration_bounds = array<i64: 1>, scalar_prefetch = 0 : i64, scratch_operands = 0 : i64, tpu.core_type = #tpu.core_type<tc>, window_params = [{transform_indices = @transform_0, window_bounds = array<i64: 64, 1152>}, {pipeline_mode = #tpu.pipeline_mode<synchronous>, transform_indices = @transform_1, window_bounds = array<i64: 1152, 128>}, {pipeline_mode = #tpu.pipeline_mode<synchronous>, transform_indices = @transform_2, window_bounds = array<i64: 1, 128>}, {transform_indices = @transform_3, window_bounds = array<i64: 64, 128>}]} {
    %c0 = arith.constant 0 : index
    %c0_0 = arith.constant 0 : index
    %0 = vector.load %arg1[%c0, %c0_0] : memref<64x1152xf32, #tpu.memory_space<vmem>>, vector<64x1152xf32>
    %c0_1 = arith.constant 0 : index
    %c0_2 = arith.constant 0 : index
    %1 = vector.load %arg2[%c0_1, %c0_2] : memref<1152x128xf32, #tpu.memory_space<vmem>>, vector<1152x128xf32>
    %cst = arith.constant dense<0.000000e+00> : vector<64x128xf32>
    %2 = tpu.matmul %0, %1, %cst {dimension_numbers = #tpu.dot_dimension_numbers<[1], [0], [0], [1], [0, 0, 1, 1], [], []>} : vector<64x1152xf32>, vector<1152x128xf32>, vector<64x128xf32> -> vector<64x128xf32>
    %c0_3 = arith.constant 0 : index
    %c0_4 = arith.constant 0 : index
    %3 = vector.load %arg3[%c0_3, %c0_4] : memref<1x128xf32, #tpu.memory_space<vmem>>, vector<1x128xf32>
    %4 = vector.broadcast %3 : vector<1x128xf32> to vector<64x128xf32>
    %5 = arith.addf %2, %4 : vector<64x128xf32>
    %cst_5 = arith.constant 0.000000e+00 : f32
    %6 = vector.broadcast %cst_5 : f32 to vector<64x128xf32>
    %7 = arith.maximumf %5, %6 : vector<64x128xf32>
    %c0_6 = arith.constant 0 : index
    %c0_7 = arith.constant 0 : index
    %8 = vector.load %arg4[%c0_6, %c0_7] : memref<64x128xf32, #tpu.memory_space<vmem>>, vector<64x128xf32>
    tpu.vector_store %arg4[%c0_6, %c0_7], %7 {strides = array<i32>} : memref<64x128xf32, #tpu.memory_space<vmem>>, vector<64x128xf32>,
    return
  }
  func.func @transform_0(%arg0: i32) -> (i32, i32) {
    %c0_i32 = arith.constant 0 : i32
    %c0_i32_0 = arith.constant 0 : i32
    return %arg0, %c0_i32 : i32, i32
  }
  func.func @transform_1(%arg0: i32) -> (i32, i32) {
    %c0_i32 = arith.constant 0 : i32
    %c0_i32_0 = arith.constant 0 : i32
    %c0_i32_1 = arith.constant 0 : i32
    return %c0_i32, %c0_i32_0 : i32, i32
  }
  func.func @transform_2(%arg0: i32) -> (i32, i32) {
    %c0_i32 = arith.constant 0 : i32
    %c0_i32_0 = arith.constant 0 : i32
    %c0_i32_1 = arith.constant 0 : i32
    return %c0_i32, %c0_i32_0 : i32, i32
  }
  func.func @transform_3(%arg0: i32) -> (i32, i32) {
    %c0_i32 = arith.constant 0 : i32
    %c0_i32_0 = arith.constant 0 : i32
    return %arg0, %c0_i32 : i32, i32
  }
}

module attributes {stable_mosaic.version = 11 : i64} {
  func.func @_fc1_head_kernel(%arg0: i32, %arg1: memref<2x2048xf32, #tpu.memory_space<vmem>>, %arg2: memref<2048x512xf32, #tpu.memory_space<vmem>>, %arg3: memref<1x512xf32, #tpu.memory_space<vmem>>, %arg4: memref<512x128xf32, #tpu.memory_space<vmem>>, %arg5: memref<1x128xf32, #tpu.memory_space<vmem>>, %arg6: memref<2x6xf32, #tpu.memory_space<vmem>>, %arg7: memref<2x512xf32, #tpu.memory_space<vmem>>) attributes {dimension_semantics = [#tpu.dimension_semantics<arbitrary>], iteration_bounds = array<i64: 2>, scalar_prefetch = 0 : i64, scratch_operands = 1 : i64, tpu.core_type = #tpu.core_type<tc>, window_params = [{transform_indices = @transform_0, window_bounds = array<i64: 2, 2048>}, {transform_indices = @transform_1, window_bounds = array<i64: 2048, 512>}, {pipeline_mode = #tpu.pipeline_mode<synchronous>, transform_indices = @transform_2, window_bounds = array<i64: 1, 512>}, {pipeline_mode = #tpu.pipeline_mode<synchronous>, transform_indices = @transform_3, window_bounds = array<i64: 512, 128>}, {pipeline_mode = #tpu.pipeline_mode<synchronous>, transform_indices = @transform_4, window_bounds = array<i64: 1, 128>}, {pipeline_mode = #tpu.pipeline_mode<synchronous>, transform_indices = @transform_5, window_bounds = array<i64: 2, 6>}]} {
    %c0_i32 = arith.constant 0 : i32
    %0 = arith.cmpi eq, %arg0, %c0_i32 : i32
    %1 = arith.extui %0 : i1 to i32
    %c0_i32_0 = arith.constant 0 : i32
    %2 = arith.cmpi ne, %1, %c0_i32_0 : i32
    scf.if %2 {
      %cst_9 = arith.constant 0.000000e+00 : f32
      %12 = vector.broadcast %cst_9 : f32 to vector<2x512xf32>
      %c0_10 = arith.constant 0 : index
      %c0_11 = arith.constant 0 : index
      %13 = vector.load %arg7[%c0_10, %c0_11] : memref<2x512xf32, #tpu.memory_space<vmem>>, vector<2x512xf32>
      tpu.vector_store %arg7[%c0_10, %c0_11], %12 {strides = array<i32>} : memref<2x512xf32, #tpu.memory_space<vmem>>, vector<2x512xf32>,
    } else {
    }
    %c0 = arith.constant 0 : index
    %c0_1 = arith.constant 0 : index
    %3 = vector.load %arg7[%c0, %c0_1] : memref<2x512xf32, #tpu.memory_space<vmem>>, vector<2x512xf32>
    %c0_2 = arith.constant 0 : index
    %c0_3 = arith.constant 0 : index
    %4 = vector.load %arg1[%c0_2, %c0_3] : memref<2x2048xf32, #tpu.memory_space<vmem>>, vector<2x2048xf32>
    %c0_4 = arith.constant 0 : index
    %c0_5 = arith.constant 0 : index
    %5 = vector.load %arg2[%c0_4, %c0_5] : memref<2048x512xf32, #tpu.memory_space<vmem>>, vector<2048x512xf32>
    %cst = arith.constant dense<0.000000e+00> : vector<2x512xf32>
    %6 = tpu.matmul %4, %5, %cst {dimension_numbers = #tpu.dot_dimension_numbers<[1], [0], [0], [1], [0, 0, 1, 1], [], []>} : vector<2x2048xf32>, vector<2048x512xf32>, vector<2x512xf32> -> vector<2x512xf32>
    %7 = arith.addf %3, %6 : vector<2x512xf32>
    %c0_6 = arith.constant 0 : index
    %c0_7 = arith.constant 0 : index
    %8 = vector.load %arg7[%c0_6, %c0_7] : memref<2x512xf32, #tpu.memory_space<vmem>>, vector<2x512xf32>
    tpu.vector_store %arg7[%c0_6, %c0_7], %7 {strides = array<i32>} : memref<2x512xf32, #tpu.memory_space<vmem>>, vector<2x512xf32>,
    %c1_i32 = arith.constant 1 : i32
    %9 = arith.cmpi eq, %arg0, %c1_i32 : i32
    %10 = arith.extui %9 : i1 to i32
    %c0_i32_8 = arith.constant 0 : i32
    %11 = arith.cmpi ne, %10, %c0_i32_8 : i32
    scf.if %11 {
      %c0_9 = arith.constant 0 : index
      %c0_10 = arith.constant 0 : index
      %12 = vector.load %arg7[%c0_9, %c0_10] : memref<2x512xf32, #tpu.memory_space<vmem>>, vector<2x512xf32>
      %c0_11 = arith.constant 0 : index
      %c0_12 = arith.constant 0 : index
      %13 = vector.load %arg3[%c0_11, %c0_12] : memref<1x512xf32, #tpu.memory_space<vmem>>, vector<1x512xf32>
      %14 = vector.broadcast %13 : vector<1x512xf32> to vector<2x512xf32>
      %15 = arith.addf %12, %14 : vector<2x512xf32>
      %cst_13 = arith.constant 0.000000e+00 : f32
      %16 = vector.broadcast %cst_13 : f32 to vector<2x512xf32>
      %17 = arith.maximumf %15, %16 : vector<2x512xf32>
      %c0_14 = arith.constant 0 : index
      %c0_15 = arith.constant 0 : index
      %18 = vector.load %arg4[%c0_14, %c0_15] : memref<512x128xf32, #tpu.memory_space<vmem>>, vector<512x128xf32>
      %cst_16 = arith.constant dense<0.000000e+00> : vector<2x128xf32>
      %19 = tpu.matmul %17, %18, %cst_16 {dimension_numbers = #tpu.dot_dimension_numbers<[1], [0], [0], [1], [0, 0, 1, 1], [], []>} : vector<2x512xf32>, vector<512x128xf32>, vector<2x128xf32> -> vector<2x128xf32>
      %c0_17 = arith.constant 0 : index
      %c0_18 = arith.constant 0 : index
      %20 = vector.load %arg5[%c0_17, %c0_18] : memref<1x128xf32, #tpu.memory_space<vmem>>, vector<1x128xf32>
      %21 = vector.broadcast %20 : vector<1x128xf32> to vector<2x128xf32>
      %22 = arith.addf %19, %21 : vector<2x128xf32>
      %23 = vector.extract_strided_slice %22 {offsets = [0, 0], sizes = [2, 6], strides = [1, 1]} : vector<2x128xf32> to vector<2x6xf32>
      %24 = vector.extract_strided_slice %22 {offsets = [0, 6], sizes = [2, 1], strides = [1, 1]} : vector<2x128xf32> to vector<2x1xf32>
      %cst_19 = arith.constant dense<0.000000e+00> : vector<2xf32>
      %25 = vector.multi_reduction <add>, %23, %cst_19 [1] : vector<2x6xf32> to vector<2xf32>
      %26 = vector.shape_cast %25 : vector<2xf32> to vector<2x1xf32>
      %cst_20 = arith.constant 0.166666672 : f32
      %27 = vector.broadcast %cst_20 : f32 to vector<2x1xf32>
      %28 = arith.mulf %26, %27 : vector<2x1xf32>
      %29 = arith.subf %24, %28 : vector<2x1xf32>
      %30 = vector.broadcast %29 : vector<2x1xf32> to vector<2x6xf32>
      %31 = arith.addf %23, %30 : vector<2x6xf32>
      %c0_21 = arith.constant 0 : index
      %c0_22 = arith.constant 0 : index
      %32 = vector.load %arg6[%c0_21, %c0_22] : memref<2x6xf32, #tpu.memory_space<vmem>>, vector<2x6xf32>
      tpu.vector_store %arg6[%c0_21, %c0_22], %31 {strides = array<i32>} : memref<2x6xf32, #tpu.memory_space<vmem>>, vector<2x6xf32>,
    } else {
    }
    return
  }
  func.func @transform_0(%arg0: i32) -> (i32, i32) {
    %c0_i32 = arith.constant 0 : i32
    %c0_i32_0 = arith.constant 0 : i32
    return %c0_i32, %arg0 : i32, i32
  }
  func.func @transform_1(%arg0: i32) -> (i32, i32) {
    %c0_i32 = arith.constant 0 : i32
    %c0_i32_0 = arith.constant 0 : i32
    return %arg0, %c0_i32 : i32, i32
  }
  func.func @transform_2(%arg0: i32) -> (i32, i32) {
    %c0_i32 = arith.constant 0 : i32
    %c0_i32_0 = arith.constant 0 : i32
    %c0_i32_1 = arith.constant 0 : i32
    return %c0_i32, %c0_i32_0 : i32, i32
  }
  func.func @transform_3(%arg0: i32) -> (i32, i32) {
    %c0_i32 = arith.constant 0 : i32
    %c0_i32_0 = arith.constant 0 : i32
    %c0_i32_1 = arith.constant 0 : i32
    return %c0_i32, %c0_i32_0 : i32, i32
  }
  func.func @transform_4(%arg0: i32) -> (i32, i32) {
    %c0_i32 = arith.constant 0 : i32
    %c0_i32_0 = arith.constant 0 : i32
    %c0_i32_1 = arith.constant 0 : i32
    return %c0_i32, %c0_i32_0 : i32, i32
  }
  func.func @transform_5(%arg0: i32) -> (i32, i32) {
    %c0_i32 = arith.constant 0 : i32
    %c0_i32_0 = arith.constant 0 : i32
    %c0_i32_1 = arith.constant 0 : i32
    return %c0_i32, %c0_i32_0 : i32, i32
  }
}

</mosaic_0001>

<bundles_post_ra>
// kernel: forward.4
= control target key start
LH: loop header
LB: loop body
LE: loop exit
PB: predicated region body
PF: predicated region fallthrough
CT: control target
= control target key end

     0   :  { %s1156_s12 = smov 0   ;;  %s1540_s0 = inlined_call_operand.vmem [shape: f32[896,144], index: 0, kind: input, shape index: {}]   ;;  %s1541_s1 = inlined_call_operand.vmem [shape: f32[144,128], index: 1, kind: input, shape index: {}]   ;;  %s1542_s2 = inlined_call_operand.vmem [shape: f32[1,128], index: 2, kind: input, shape index: {}]   ;;  %s1543_s3 = inlined_call_operand.vmem [shape: f32[896,128], index: 3, kind: output, shape index: {}]  }
   0x1 LB: > { %s1018_s13 = sadd.s32 4294967295, %s1134_s12   ;;  %p1022_p0 = scmp.ge.s32.totalorder %s1134_s12, 1  ;;  %s1134_s12 = sphi %s1156_s12, %s13_s12  }
   0x2   : > { %p139_p1 = scmp.lt.s32.totalorder %s1134_s12, 3 }
   0x4   : > { %p140_p2 = pnand %p1022_p0, %p139_p1 }
   0x5   : > { %s164_s18 = smul.u32 (!%p140_p2), 56, %s1018_s13 }
   0x6   : > { %143 = sbr.rel (%p140_p2) target bundleno = 399 (0x18f), region = 32 }
   0x7   : > { %p165_p3 = scmp.lt.s32.totalorder (!%p140_p2), %s164_s18, 111 }
   0xb   : > { %v304_v0 = vld [vmem:[%s1541_s1 + $0x78] sm:$0xff]  ;;  %v303_v1 = vld [vmem:[%s1541_s1 + $0x70] sm:$0xff]  ;;  %v1173_v2 = vld [vmem:[%s1541_s1 + $0x88] sm:$0xff]  ;;  %s1545_s18 = smov (!%p165_p3, %s164_s18), 111  ;;  %vm311_vm0 = vcmask 130048  }
   0xc   : > { %480 = vmatpush.msra.mxu0 %v304_v0  ;;  %1085 = vmatpush.msra.mxu2 %v304_v0  ;;  %v1178_v3 = vld [vmem:[%s1541_s1 + $0x80] sm:$0xff]  ;;  %v302_v4 = vld [vmem:[%s1541_s1 + $0x68] sm:$0xff]  ;;  %v300_v6 = vld [vmem:[%s1541_s1 + $0x58] sm:$0xff]  ;;  %s1084_s29 = sshll.u32 %s1545_s18, 4  ;;  %s1025_s6 = sshll.u32 %s1545_s18, 3 }
   0xd   : > { %1086 = vmatpush.msra.mxu3 %v304_v0  ;;  %679 = vmatpush.msra.mxu1 %v1173_v2  ;;  %v301_v5 = vld [vmem:[%s1541_s1 + $0x60] sm:$0xff]  ;;  %s1197_s5 = scalar_lea.vmem %s1540_s0, %s1084_s29  ;;  %v299_v8 = vld [vmem:[%s1541_s1 + $0x50] sm:$0xff]  ;;  %v298_v9 = vld [vmem:[%s1541_s1 + $0x48] sm:$0xff]  ;;  %s1349_s9 = scalar_lea.vmem %s1543_s3, %s1025_s6 }
   0xe   : > { %481 = vmatpush.msra.mxu0 %v303_v1  ;;  %1087 = vmatpush.msra.mxu2 %v303_v1  ;;  %v178_v7 = vld [vmem:[%s1197_s5 + $0x8] sm:$0xff]  ;;  %v297_v10 = vld [vmem:[%s1541_s1 + $0x40] sm:$0xff]  ;;  %v296_v11 = vld [vmem:[%s1541_s1 + $0x38] sm:$0xff] }
   0xf   : > { %1088 = vmatpush.msra.mxu3 %v303_v1  ;;  %680 = vmatpush.msra.mxu1 %v1178_v3  ;;  %v180_v12 = vld [vmem:[%s1197_s5 + $0x18] sm:$0xff]  ;;  %v295_v13 = vld [vmem:[%s1541_s1 + $0x30] sm:$0xff]  ;;  %v294_v14 = vld [vmem:[%s1541_s1 + $0x28] sm:$0xff] }
  0x10   : > { %482 = vmatpush.msra.mxu0 %v302_v4  ;;  %1089 = vmatpush.msra.mxu2 %v302_v4  ;;  %v293_v15 = vld [vmem:[%s1541_s1 + $0x20] sm:$0xff]  ;;  %v292_v16 = vld [vmem:[%s1541_s1 + $0x18] sm:$0xff]  ;;  %v182_v17 = vld [vmem:[%s1197_s5 + $0x28] sm:$0xff] }
  0x11   : > { %1090 = vmatpush.msra.mxu3 %v302_v4  ;;  %1026 = vmatmul.msk.f32.vlgmr.msra.gmra.mxu1 %vm311_vm0, %v178_v7  ;;  %v291_v18 = vld [vmem:[%s1541_s1 + $0x10] sm:$0xff]  ;;  %v290_v19 = vld [vmem:[%s1541_s1 + $0x8] sm:$0xff]  ;;  %v289_v20 = vld [vmem:[%s1541_s1] sm:$0xff] }
  0x12   : > { %483 = vmatpush.msra.mxu0 %v301_v5  ;;  %1091 = vmatpush.msra.mxu2 %v301_v5  ;;  %v177_v21 = vld [vmem:[%s1197_s5] sm:$0xff]  ;;  %v231_v22 = vld [vmem:[%s1197_s5 + $0x1b0] sm:$0xff]  ;;  %v184_v24 = vld [vmem:[%s1197_s5 + $0x38] sm:$0xff] }
  0x13   : > { %1092 = vmatpush.msra.mxu3 %v301_v5  ;;  %v287_v23 = vld [vmem:[%s1197_s5 + $0x370] sm:$0xff]  ;;  %v233_v26 = vld [vmem:[%s1197_s5 + $0x1c0] sm:$0xff]  ;;  %v238_v27 = vld [vmem:[%s1197_s5 + $0x1e8] sm:$0xff] }
  0x14   : > { %484 = vmatpush.msra.mxu0 %v300_v6  ;;  %1093 = vmatpush.msra.mxu2 %v300_v6  ;;  %v179_v25 = vld [vmem:[%s1197_s5 + $0x10] sm:$0xff]  ;;  %v186_v28 = vld [vmem:[%s1197_s5 + $0x48] sm:$0xff]  ;;  %v181_v29 = vld [vmem:[%s1197_s5 + $0x20] sm:$0xff] }
  0x15   : > { %1094 = vmatpush.msra.mxu3 %v300_v6  ;;  %v235_v30 = vld [vmem:[%s1197_s5 + $0x1d0] sm:$0xff]  ;;  %v240_v31 = vld [vmem:[%s1197_s5 + $0x1f8] sm:$0xff]  ;;  %v237_v34 = vld [vmem:[%s1197_s5 + $0x1e0] sm:$0xff] }
  0x16   : > { %485 = vmatpush.msra.mxu0 %v299_v8  ;;  %1095 = vmatpush.msra.mxu2 %v299_v8  ;;  %v188_v32 = vld [vmem:[%s1197_s5 + $0x58] sm:$0xff]  ;;  %v183_v33 = vld [vmem:[%s1197_s5 + $0x30] sm:$0xff]  ;;  %v242_v35 = vld [vmem:[%s1197_s5 + $0x208] sm:$0xff] }
  0x17   : > { %1096 = vmatpush.msra.mxu3 %v299_v8  ;;  %v190_v36 = vld [vmem:[%s1197_s5 + $0x68] sm:$0xff]  ;;  %v185_v37 = vld [vmem:[%s1197_s5 + $0x40] sm:$0xff]  ;;  %v239_v38 = vld [vmem:[%s1197_s5 + $0x1f0] sm:$0xff] }
  0x18   : > { %486 = vmatpush.msra.mxu0 %v298_v9  ;;  %1097 = vmatpush.msra.mxu2 %v298_v9  ;;  %v244_v39 = vld [vmem:[%s1197_s5 + $0x218] sm:$0xff]  ;;  %v187_v41 = vld [vmem:[%s1197_s5 + $0x50] sm:$0xff]  ;;  %v241_v42 = vld [vmem:[%s1197_s5 + $0x200] sm:$0xff] }
  0x19   : > { %1098 = vmatpush.msra.mxu3 %v298_v9  ;;  %1027 = vmatmul.msk.f32.gmra.mxu1 %vm311_vm0, %v180_v12  ;;  %v192_v40 = vld [vmem:[%s1197_s5 + $0x78] sm:$0xff]  ;;  %v246_v43 = vld [vmem:[%s1197_s5 + $0x228] sm:$0xff]  ;;  %v189_v45 = vld [vmem:[%s1197_s5 + $0x60] sm:$0xff] }
  0x1a   : > { %487 = vmatpush.msra.mxu0 %v297_v10  ;;  %1099 = vmatpush.msra.mxu2 %v297_v10  ;;  %v194_v44 = vld [vmem:[%s1197_s5 + $0x88] sm:$0xff]  ;;  %v243_v46 = vld [vmem:[%s1197_s5 + $0x210] sm:$0xff]  ;;  %v248_v47 = vld [vmem:[%s1197_s5 + $0x238] sm:$0xff] }
  0x1b   : > { %1100 = vmatpush.msra.mxu3 %v297_v10  ;;  %v196_v48 = vld [vmem:[%s1197_s5 + $0x98] sm:$0xff]  ;;  %v191_v49 = vld [vmem:[%s1197_s5 + $0x70] sm:$0xff]  ;;  %v245_v50 = vld [vmem:[%s1197_s5 + $0x220] sm:$0xff] }
  0x1c   : > { %488 = vmatpush.msra.mxu0 %v296_v11  ;;  %1101 = vmatpush.msra.mxu2 %v296_v11  ;;  %v250_v51 = vld [vmem:[%s1197_s5 + $0x248] sm:$0xff]  ;;  %v193_v53 = vld [vmem:[%s1197_s5 + $0x80] sm:$0xff]  ;;  %v247_v54 = vld [vmem:[%s1197_s5 + $0x230] sm:$0xff] }
  0x1d   : > { %1102 = vmatpush.msra.mxu3 %v296_v11  ;;  %v198_v52 = vld [vmem:[%s1197_s5 + $0xa8] sm:$0xff]  ;;  %v252_v55 = vld [vmem:[%s1197_s5 + $0x258] sm:$0xff]  ;;  %v195_v57 = vld [vmem:[%s1197_s5 + $0x90] sm:$0xff] }
  0x1e   : > { %489 = vmatpush.msra.mxu0 %v295_v13  ;;  %1103 = vmatpush.msra.mxu2 %v295_v13  ;;  %v200_v56 = vld [vmem:[%s1197_s5 + $0xb8] sm:$0xff]  ;;  %v249_v58 = vld [vmem:[%s1197_s5 + $0x240] sm:$0xff]  ;;  %v254_v59 = vld [vmem:[%s1197_s5 + $0x268] sm:$0xff] }
  0x1f   : > { %1104 = vmatpush.msra.mxu3 %v295_v13  ;;  %v202_v60 = vld [vmem:[%s1197_s5 + $0xc8] sm:$0xff]  ;;  %v197_v61 = vld [vmem:[%s1197_s5 + $0xa0] sm:$0xff]  ;;  %v251_v62 = vld [vmem:[%s1197_s5 + $0x250] sm:$0xff] }
  0x20   : > { %490 = vmatpush.msra.mxu0 %v294_v14  ;;  %1105 = vmatpush.msra.mxu2 %v294_v14  ;;  %v256_v63 = vld [vmem:[%s1197_s5 + $0x278] sm:$0xff]  ;;  %v199_v1 = vld [vmem:[%s1197_s5 + $0xb0] sm:$0xff]  ;;  %v206_v4 = vld [vmem:[%s1197_s5 + $0xe8] sm:$0xff] }
  0x21   : > { %1106 = vmatpush.msra.mxu3 %v294_v14  ;;  %1028 = vmatmul.msk.f32.gmra.mxu1 %vm311_vm0, %v182_v17  ;;  %v204_v0 = vld [vmem:[%s1197_s5 + $0xd8] sm:$0xff]  ;;  %v201_v5 = vld [vmem:[%s1197_s5 + $0xc0] sm:$0xff]  ;;  %v255_v6 = vld [vmem:[%s1197_s5 + $0x270] sm:$0xff] }
  0x22   : > { %491 = vmatpush.msra.mxu0 %v293_v15  ;;  %1107 = vmatpush.msra.mxu2 %v293_v15  ;;  %v260_v7 = vld [vmem:[%s1197_s5 + $0x298] sm:$0xff]  ;;  %v203_v9 = vld [vmem:[%s1197_s5 + $0xd0] sm:$0xff]  ;;  %v257_v10 = vld [vmem:[%s1197_s5 + $0x280] sm:$0xff] }
  0x23   : > { %1108 = vmatpush.msra.mxu3 %v293_v15  ;;  %v208_v8 = vld [vmem:[%s1197_s5 + $0xf8] sm:$0xff]  ;;  %v262_v11 = vld [vmem:[%s1197_s5 + $0x2a8] sm:$0xff]  ;;  %v205_v14 = vld [vmem:[%s1197_s5 + $0xe0] sm:$0xff] }
  0x24   : > { %492 = vmatpush.msra.mxu0 %v292_v16  ;;  %1109 = vmatpush.msra.mxu2 %v292_v16  ;;  %v210_v13 = vld [vmem:[%s1197_s5 + $0x108] sm:$0xff]  ;;  %v259_v15 = vld [vmem:[%s1197_s5 + $0x290] sm:$0xff] }
  0x25   : > { %1110 = vmatpush.msra.mxu3 %v292_v16  ;;  %v264_v16 = vld [vmem:[%s1197_s5 + $0x2b8] sm:$0xff] }
  0x26   : > { %493 = vmatpush.msra.mxu0 %v291_v18  ;;  %1111 = vmatpush.msra.mxu2 %v291_v18 }
  0x27   : > { %1112 = vmatpush.msra.mxu3 %v291_v18  ;;  %v212_v18 = vld [vmem:[%s1197_s5 + $0x118] sm:$0xff] }
  0x28   : > { %494 = vmatpush.msra.mxu0 %v290_v19  ;;  %1113 = vmatpush.msra.mxu2 %v290_v19 }
  0x29   : > { %1114 = vmatpush.msra.mxu3 %v290_v19  ;;  %1029 = vmatmul.msk.f32.gmra.mxu1 %vm311_vm0, %v184_v24  ;;  %v207_v19 = vld [vmem:[%s1197_s5 + $0xf0] sm:$0xff]  ;;  %v1338_v24 = vld [vmem:[%s1542_s2] ss:$0 sm:$0xff] }
  0x2a   : > { %495 = vmatpush.msra.mxu0 %v289_v20  ;;  %1115 = vmatpush.msra.mxu2 %v289_v20 }
  0x2b   : > { %1116 = vmatpush.msra.mxu3 %v289_v20  ;;  %496 = vmatmul.f32.vlgmr.msra.gmra.mxu0 %v177_v21  ;;  %v261_v20 = vld [vmem:[%s1197_s5 + $0x2a0] sm:$0xff]  ;;  %v266_v21 = vld [vmem:[%s1197_s5 + $0x2c8] sm:$0xff] }
  0x2c   : > { %577 = vmatmul.f32.vlgmr.msra.gmra.mxu2 %v231_v22  ;;  %661 = vmatmul.f32.vlgmr.msra.gmra.mxu3 %v287_v23  ;;  %v214_v23 = vld [vmem:[%s1197_s5 + $0x128] sm:$0xff] }
  0x2d   : > { %1117 = vmatpush.msrb.mxu3 %v1173_v2  ;;  %v253_v2 = vld [vmem:[%s1197_s5 + $0x260] sm:$0xff] }
  0x2f   : > { %1118 = vmatpush.msrb.mxu3 %v1178_v3  ;;  %v258_v3 = vld [vmem:[%s1197_s5 + $0x288] sm:$0xff] }
  0x31   : > { %1030 = vmatmul.msk.f32.gmra.mxu1 %vm311_vm0, %v186_v28  ;;  %v263_v28 = vld [vmem:[%s1197_s5 + $0x2b0] sm:$0xff] }
  0x33   : > { %499 = vmatmul.f32.gmra.mxu0 %v179_v25 }
  0x34   : > { %580 = vmatmul.f32.gmra.mxu2 %v233_v26  ;;  %1056 = vmatmul.msk.f32.vlgmr.msrb.gmra.mxu3 %vm311_vm0, %v238_v27  ;;  %v209_v26 = vld [vmem:[%s1197_s5 + $0x100] sm:$0xff] }
  0x39   : > { %1031 = vmatmul.msk.f32.gmra.mxu1 %vm311_vm0, %v188_v32 }
  0x3b   : > { %502 = vmatmul.f32.gmra.mxu0 %v181_v29  ;;  %v268_v29 = vld [vmem:[%s1197_s5 + $0x2d8] sm:$0xff] }
  0x3c   : > { %583 = vmatmul.f32.gmra.mxu2 %v235_v30  ;;  %1057 = vmatmul.msk.f32.gmra.mxu3 %vm311_vm0, %v240_v31  ;;  %v216_v31 = vld [vmem:[%s1197_s5 + $0x138] sm:$0xff] }
  0x41   : > { %1032 = vmatmul.msk.f32.gmra.mxu1 %vm311_vm0, %v190_v36 }
  0x43   : > { %505 = vmatmul.f32.gmra.mxu0 %v183_v33 }
  0x44   : > { %586 = vmatmul.f32.gmra.mxu2 %v237_v34  ;;  %1058 = vmatmul.msk.f32.gmra.mxu3 %vm311_vm0, %v242_v35 }
  0x49   : > { %1033 = vmatmul.msk.f32.gmra.mxu1 %vm311_vm0, %v192_v40  ;;  %v270_v40 = vld [vmem:[%s1197_s5 + $0x2e8] sm:$0xff] }
  0x4b   : > { %508 = vmatmul.f32.gmra.mxu0 %v185_v37  ;;  %v211_v37 = vld [vmem:[%s1197_s5 + $0x110] sm:$0xff] }
  0x4c   : > { %589 = vmatmul.f32.gmra.mxu2 %v239_v38  ;;  %1059 = vmatmul.msk.f32.gmra.mxu3 %vm311_vm0, %v244_v39  ;;  %v265_v39 = vld [vmem:[%s1197_s5 + $0x2c0] sm:$0xff] }
  0x51   : > { %1034 = vmatmul.msk.f32.gmra.mxu1 %vm311_vm0, %v194_v44 }
  0x53   : > { %511 = vmatmul.f32.gmra.mxu0 %v187_v41 }
  0x54   : > { %592 = vmatmul.f32.gmra.mxu2 %v241_v42  ;;  %1060 = vmatmul.msk.f32.gmra.mxu3 %vm311_vm0, %v246_v43  ;;  %v218_v42 = vld [vmem:[%s1197_s5 + $0x148] sm:$0xff] }
  0x59   : > { %1035 = vmatmul.msk.f32.gmra.mxu1 %vm311_vm0, %v196_v48  ;;  %v213_v48 = vld [vmem:[%s1197_s5 + $0x120] sm:$0xff] }
  0x5b   : > { %514 = vmatmul.f32.gmra.mxu0 %v189_v45 }
  0x5c   : > { %595 = vmatmul.f32.gmra.mxu2 %v243_v46  ;;  %1061 = vmatmul.msk.f32.gmra.mxu3 %vm311_vm0, %v248_v47 }
  0x61   : > { %1036 = vmatmul.msk.f32.gmra.mxu1 %vm311_vm0, %v198_v52 }
  0x63   : > { %517 = vmatmul.f32.gmra.mxu0 %v191_v49 }
  0x64   : > { %598 = vmatmul.f32.gmra.mxu2 %v245_v50  ;;  %1062 = vmatmul.msk.f32.gmra.mxu3 %vm311_vm0, %v250_v51  ;;  %v267_v50 = vld [vmem:[%s1197_s5 + $0x2d0] sm:$0xff]  ;;  %v272_v51 = vld [vmem:[%s1197_s5 + $0x2f8] sm:$0xff] }
  0x69   : > { %1037 = vmatmul.msk.f32.gmra.mxu1 %vm311_vm0, %v200_v56 }
  0x6b   : > { %520 = vmatmul.f32.gmra.mxu0 %v193_v53  ;;  %v220_v53 = vld [vmem:[%s1197_s5 + $0x158] sm:$0xff] }
  0x6c   : > { %601 = vmatmul.f32.gmra.mxu2 %v247_v54  ;;  %1063 = vmatmul.msk.f32.gmra.mxu3 %vm311_vm0, %v252_v55 }
  0x71   : > { %1038 = vmatmul.msk.f32.gmra.mxu1 %vm311_vm0, %v202_v60 }
  0x73   : > { %523 = vmatmul.f32.gmra.mxu0 %v195_v57 }
  0x74   : > { %604 = vmatmul.f32.gmra.mxu2 %v249_v58  ;;  %1064 = vmatmul.msk.f32.gmra.mxu3 %vm311_vm0, %v254_v59  ;;  %v215_v59 = vld [vmem:[%s1197_s5 + $0x130] sm:$0xff] }
  0x79   : > { %1039 = vmatmul.msk.f32.gmra.mxu1 %vm311_vm0, %v204_v0  ;;  %v222_v0 = vld [vmem:[%s1197_s5 + $0x168] sm:$0xff] }
  0x7b   : > { %526 = vmatmul.f32.gmra.mxu0 %v197_v61  ;;  %v269_v61 = vld [vmem:[%s1197_s5 + $0x2e0] sm:$0xff] }
  0x7c   : > { %607 = vmatmul.f32.gmra.mxu2 %v251_v62  ;;  %1065 = vmatmul.msk.f32.gmra.mxu3 %vm311_vm0, %v256_v63  ;;  %v274_v62 = vld [vmem:[%s1197_s5 + $0x308] sm:$0xff] }
  0x81   : > { %1040 = vmatmul.msk.f32.gmra.mxu1 %vm311_vm0, %v206_v4 }
  0x83   : > { %529 = vmatmul.f32.gmra.mxu0 %v199_v1 }
  0x84   : > { %610 = vmatmul.f32.gmra.mxu2 %v253_v2  ;;  %1066 = vmatmul.msk.f32.gmra.mxu3 %vm311_vm0, %v258_v3 }
  0x89   : > { %1041 = vmatmul.msk.f32.gmra.mxu1 %vm311_vm0, %v208_v8 }
  0x8b   : > { %532 = vmatmul.f32.gmra.mxu0 %v201_v5 }
  0x8c   : > { %613 = vmatmul.f32.gmra.mxu2 %v255_v6  ;;  %1067 = vmatmul.msk.f32.gmra.mxu3 %vm311_vm0, %v260_v7  ;;  %v217_v7 = vld [vmem:[%s1197_s5 + $0x140] sm:$0xff] }
  0x8e   : > { %v682_v12 = vpop.f32.mrf.mxu1 }
  0x91   : > { %1042 = vmatmul.msk.f32.gmra.mxu1 %vm311_vm0, %v210_v13  ;;  %v224_v13 = vld [vmem:[%s1197_s5 + $0x178] sm:$0xff] }
  0x93   : > { %535 = vmatmul.f32.gmra.mxu0 %v203_v9  ;;  %v271_v9 = vld [vmem:[%s1197_s5 + $0x2f0] sm:$0xff] }
  0x94   : > { %616 = vmatmul.f32.gmra.mxu2 %v257_v10  ;;  %1068 = vmatmul.msk.f32.gmra.mxu3 %vm311_vm0, %v262_v11  ;;  %v276_v10 = vld [vmem:[%s1197_s5 + $0x318] sm:$0xff] }
  0x96   : > { %v685_v17 = vpop.f32.mrf.mxu1 }
  0x99   : > { %1043 = vmatmul.msk.f32.gmra.mxu1 %vm311_vm0, %v212_v18 }
  0x9b   : > { %538 = vmatmul.f32.gmra.mxu0 %v205_v14 }
  0x9c   : > { %619 = vmatmul.f32.gmra.mxu2 %v259_v15  ;;  %1069 = vmatmul.msk.f32.gmra.mxu3 %vm311_vm0, %v264_v16 }
  0x9e   : > { %v688_v22 = vpop.f32.mrf.mxu1 }
  0xa1   : > { %1044 = vmatmul.msk.f32.gmra.mxu1 %vm311_vm0, %v214_v23  ;;  %v273_v23 = vld [vmem:[%s1197_s5 + $0x300] sm:$0xff] }
  0xa3   : > { %541 = vmatmul.f32.gmra.mxu0 %v207_v19 }
  0xa4   : > { %622 = vmatmul.f32.gmra.mxu2 %v261_v20  ;;  %1070 = vmatmul.msk.f32.gmra.mxu3 %vm311_vm0, %v266_v21  ;;  %v219_v21 = vld [vmem:[%s1197_s5 + $0x150] sm:$0xff] }
  0xa6   : > { %v691_v30 = vpop.f32.mrf.mxu1 }
  0xa8   : > { %v497_v25 = vpop.f32.mrf.mxu0 }
  0xa9   : > { %v498_v27 = vadd.f32 %v1338_v24, %v497_v25  ;;  %1045 = vmatmul.msk.f32.gmra.mxu1 %vm311_vm0, %v216_v31  ;;  %v278_v25 = vld [vmem:[%s1197_s5 + $0x328] sm:$0xff] }
  0xab   : > { %v683_v32 = vadd.f32 %v682_v12, %v498_v27  ;;  %544 = vmatmul.f32.gmra.mxu0 %v209_v26 }
  0xac   : > { %625 = vmatmul.f32.gmra.mxu2 %v263_v28  ;;  %1071 = vmatmul.msk.f32.gmra.mxu3 %vm311_vm0, %v268_v29  ;;  %v226_v28 = vld [vmem:[%s1197_s5 + $0x188] sm:$0xff] }
  0xad   : > { %v850_v33 = vmax.f32 %v683_v32, 0.0 }
  0xae   : > { %v694_v41 = vpop.f32.mrf.mxu1 }
  0xaf   : > { %906 = vst [vmem:[%s1349_s9] sm:$0xff] %v850_v33  ;;  %v1354_v34 = vpop.f32.mrf.mxu2  ;;  %v1356_v35 = vpop.f32.mrf.mxu3 }
  0xb0   : > { %v500_v36 = vpop.f32.mrf.mxu0 }
  0xb1   : > { %v501_v38 = vadd.f32 %v1338_v24, %v500_v36  ;;  %1046 = vmatmul.msk.f32.gmra.mxu1 %vm311_vm0, %v218_v42 }
  0xb3   : > { %v686_v43 = vadd.f32 %v685_v17, %v501_v38  ;;  %547 = vmatmul.f32.gmra.mxu0 %v211_v37  ;;  %v221_v38 = vld [vmem:[%s1197_s5 + $0x160] sm:$0xff] }
  0xb4   : > { %628 = vmatmul.f32.gmra.mxu2 %v265_v39  ;;  %1072 = vmatmul.msk.f32.gmra.mxu3 %vm311_vm0, %v270_v40  ;;  %v275_v40 = vld [vmem:[%s1197_s5 + $0x310] sm:$0xff] }
  0xb5   : > { %v851_v44 = vmax.f32 %v686_v43, 0.0 }
  0xb6   : > { %v697_v52 = vpop.f32.mrf.mxu1 }
  0xb7   : > { %907 = vst [vmem:[%s1349_s9 + $0x8] sm:$0xff] %v851_v44  ;;  %v1366_v45 = vpop.f32.mrf.mxu2  ;;  %v772_v46 = vpop.f32.mrf.mxu3  ;;  %v228_v44 = vld [vmem:[%s1197_s5 + $0x198] sm:$0xff] }
  0xb8   : > { %v503_v47 = vpop.f32.mrf.mxu0 }
  0xb9   : > { %v504_v49 = vadd.f32 %v1338_v24, %v503_v47  ;;  %1047 = vmatmul.msk.f32.gmra.mxu1 %vm311_vm0, %v220_v53  ;;  %v223_v53 = vld [vmem:[%s1197_s5 + $0x170] sm:$0xff] }
  0xbb   : > { %v689_v54 = vadd.f32 %v688_v22, %v504_v49  ;;  %550 = vmatmul.f32.gmra.mxu0 %v213_v48 }
  0xbc   : > { %631 = vmatmul.f32.gmra.mxu2 %v267_v50  ;;  %1073 = vmatmul.msk.f32.gmra.mxu3 %vm311_vm0, %v272_v51 }
  0xbd   : > { %v852_v55 = vmax.f32 %v689_v54, 0.0 }
  0xbe   : > { %v700_v63 = vpop.f32.mrf.mxu1 }
  0xbf   : > { %908 = vst [vmem:[%s1349_s9 + $0x10] sm:$0xff] %v852_v55  ;;  %v1376_v56 = vpop.f32.mrf.mxu2  ;;  %v775_v57 = vpop.f32.mrf.mxu3  ;;  %v277_v55 = vld [vmem:[%s1197_s5 + $0x320] sm:$0xff] }
  0xc0   : > { %v506_v58 = vpop.f32.mrf.mxu0 }
  0xc1   : > { %v507_v60 = vadd.f32 %v1338_v24, %v506_v58  ;;  %1048 = vmatmul.msk.f32.gmra.mxu1 %vm311_vm0, %v222_v0 }
  0xc3   : > { %v692_v1 = vadd.f32 %v691_v30, %v507_v60  ;;  %553 = vmatmul.f32.gmra.mxu0 %v215_v59  ;;  %v230_v60 = vld [vmem:[%s1197_s5 + $0x1a8] sm:$0xff] }
  0xc4   : > { %634 = vmatmul.f32.gmra.mxu2 %v269_v61  ;;  %1074 = vmatmul.msk.f32.gmra.mxu3 %vm311_vm0, %v274_v62 }
  0xc5   : > { %v853_v2 = vmax.f32 %v692_v1, 0.0 }
  0xc6   : > { %v703_v12 = vpop.f32.mrf.mxu1 }
  0xc7   : > { %909 = vst [vmem:[%s1349_s9 + $0x18] sm:$0xff] %v853_v2  ;;  %v587_v3 = vpop.f32.mrf.mxu2  ;;  %v778_v4 = vpop.f32.mrf.mxu3 }
  0xc8   : > { %v588_v5 = vadd.f32 %v1338_v24, %v587_v3  ;;  %v509_v6 = vpop.f32.mrf.mxu0 }
  0xc9   : > { %v510_v8 = vadd.f32 %v1338_v24, %v509_v6  ;;  %1049 = vmatmul.msk.f32.gmra.mxu1 %vm311_vm0, %v224_v13  ;;  %v279_v6 = vld [vmem:[%s1197_s5 + $0x330] sm:$0xff] }
  0xca   : > { %v773_v11 = vadd.f32 %v772_v46, %v588_v5 }
  0xcb   : > { %v695_v14 = vadd.f32 %v694_v41, %v510_v8  ;;  %556 = vmatmul.f32.gmra.mxu0 %v217_v7  ;;  %v280_v41 = vld [vmem:[%s1197_s5 + $0x338] sm:$0xff] }
  0xcc   : > { %v880_v15 = vmax.f32 %v773_v11, 0.0  ;;  %637 = vmatmul.f32.gmra.mxu2 %v271_v9  ;;  %1075 = vmatmul.msk.f32.gmra.mxu3 %vm311_vm0, %v276_v10  ;;  %v284_v7 = vld [vmem:[%s1197_s5 + $0x358] sm:$0xff] }
  0xcd   : > { %v854_v16 = vmax.f32 %v695_v14, 0.0  ;;  %v232_v10 = vld [vmem:[%s1197_s5 + $0x1b8] sm:$0xff] }
  0xce   : > { %936 = vst [vmem:[%s1349_s9 + $0xf0] sm:$0xff] %v880_v15  ;;  %v706_v27 = vpop.f32.mrf.mxu1 }
  0xcf   : > { %910 = vst [vmem:[%s1349_s9 + $0x20] sm:$0xff] %v854_v16  ;;  %v590_v17 = vpop.f32.mrf.mxu2  ;;  %v781_v18 = vpop.f32.mrf.mxu3 }
  0xd0   : > { %v591_v19 = vadd.f32 %v1338_v24, %v590_v17  ;;  %v512_v20 = vpop.f32.mrf.mxu0 }
  0xd1   : > { %v513_v22 = vadd.f32 %v1338_v24, %v512_v20  ;;  %1050 = vmatmul.msk.f32.gmra.mxu1 %vm311_vm0, %v226_v28  ;;  %v281_v20 = vld [vmem:[%s1197_s5 + $0x340] sm:$0xff] }
  0xd2   : > { %v776_v26 = vadd.f32 %v775_v57, %v591_v19  ;;  %v282_v57 = vld [vmem:[%s1197_s5 + $0x348] sm:$0xff] }
  0xd3   : > { %v698_v29 = vadd.f32 %v697_v52, %v513_v22  ;;  %559 = vmatmul.f32.gmra.mxu0 %v219_v21  ;;  %v286_v21 = vld [vmem:[%s1197_s5 + $0x368] sm:$0xff] }
  0xd4   : > { %v881_v30 = vmax.f32 %v776_v26, 0.0  ;;  %640 = vmatmul.f32.gmra.mxu2 %v273_v23  ;;  %1076 = vmatmul.msk.f32.gmra.mxu3 %vm311_vm0, %v278_v25  ;;  %v234_v25 = vld [vmem:[%s1197_s5 + $0x1c8] sm:$0xff] }
  0xd5   : > { %v855_v31 = vmax.f32 %v698_v29, 0.0 }
  0xd6   : > { %937 = vst [vmem:[%s1349_s9 + $0xf8] sm:$0xff] %v881_v30  ;;  %v709_v43 = vpop.f32.mrf.mxu1 }
  0xd7   : > { %911 = vst [vmem:[%s1349_s9 + $0x28] sm:$0xff] %v855_v31  ;;  %v593_v32 = vpop.f32.mrf.mxu2  ;;  %v784_v33 = vpop.f32.mrf.mxu3 }
  0xd8   : > { %v594_v36 = vadd.f32 %v1338_v24, %v593_v32  ;;  %v515_v37 = vpop.f32.mrf.mxu0 }
  0xd9   : > { %v516_v39 = vadd.f32 %v1338_v24, %v515_v37  ;;  %1051 = vmatmul.msk.f32.gmra.mxu1 %vm311_vm0, %v228_v44  ;;  %v283_v37 = vld [vmem:[%s1197_s5 + $0x350] sm:$0xff] }
  0xda   : > { %v779_v42 = vadd.f32 %v778_v4, %v594_v36  ;;  %v225_v4 = vld [vmem:[%s1197_s5 + $0x180] sm:$0xff] }
  0xdb   : > { %v701_v46 = vadd.f32 %v700_v63, %v516_v39  ;;  %562 = vmatmul.f32.gmra.mxu0 %v221_v38  ;;  %v288_v38 = vld [vmem:[%s1197_s5 + $0x378] sm:$0xff] }
  0xdc   : > { %v882_v47 = vmax.f32 %v779_v42, 0.0  ;;  %643 = vmatmul.f32.gmra.mxu2 %v275_v40  ;;  %1077 = vmatmul.msk.f32.gmra.mxu3 %vm311_vm0, %v280_v41  ;;  %v236_v41 = vld [vmem:[%s1197_s5 + $0x1d8] sm:$0xff] }
  0xdd   : > { %v856_v48 = vmax.f32 %v701_v46, 0.0 }
  0xde   : > { %938 = vst [vmem:[%s1349_s9 + $0x100] sm:$0xff] %v882_v47  ;;  %v712_v59 = vpop.f32.mrf.mxu1 }
  0xdf   : > { %912 = vst [vmem:[%s1349_s9 + $0x30] sm:$0xff] %v856_v48  ;;  %v596_v49 = vpop.f32.mrf.mxu2  ;;  %v787_v50 = vpop.f32.mrf.mxu3 }
  0xe0   : > { %v597_v51 = vadd.f32 %v1338_v24, %v596_v49  ;;  %v518_v52 = vpop.f32.mrf.mxu0 }
  0xe1   : > { %v519_v54 = vadd.f32 %v1338_v24, %v518_v52  ;;  %1052 = vmatmul.msk.f32.gmra.mxu1 %vm311_vm0, %v230_v60 }
  0xe2   : > { %v782_v58 = vadd.f32 %v781_v18, %v597_v51  ;;  %v227_v18 = vld [vmem:[%s1197_s5 + $0x190] sm:$0xff]  ;;  %v285_v51 = vld [vmem:[%s1197_s5 + $0x360] sm:$0xff] }
  0xe3   : > { %v704_v61 = vadd.f32 %v703_v12, %v519_v54  ;;  %565 = vmatmul.f32.gmra.mxu0 %v223_v53 }
  0xe4   : > { %v883_v62 = vmax.f32 %v782_v58, 0.0  ;;  %646 = vmatmul.f32.gmra.mxu2 %v277_v55  ;;  %1078 = vmatmul.msk.f32.gmra.mxu3 %vm311_vm0, %v282_v57 }
  0xe5   : > { %v857_v63 = vmax.f32 %v704_v61, 0.0 }
  0xe6   : > { %939 = vst [vmem:[%s1349_s9 + $0x108] sm:$0xff] %v883_v62  ;;  %v715_v9 = vpop.f32.mrf.mxu1 }
  0xe7   : > { %913 = vst [vmem:[%s1349_s9 + $0x38] sm:$0xff] %v857_v63  ;;  %v599_v0 = vpop.f32.mrf.mxu2  ;;  %v790_v1 = vpop.f32.mrf.mxu3 }
  0xe8   : > { %v600_v2 = vadd.f32 %v1338_v24, %v599_v0  ;;  %v521_v3 = vpop.f32.mrf.mxu0 }
  0xe9   : > { %v522_v5 = vadd.f32 %v1338_v24, %v521_v3  ;;  %1053 = vmatmul.msk.f32.gmra.mxu1 %vm311_vm0, %v232_v10 }
  0xea   : > { %v785_v8 = vadd.f32 %v784_v33, %v600_v2  ;;  %v229_v33 = vld [vmem:[%s1197_s5 + $0x1a0] sm:$0xff] }
  0xeb   : > { %v707_v11 = vadd.f32 %v706_v27, %v522_v5  ;;  %568 = vmatmul.f32.gmra.mxu0 %v225_v4 }
  0xec   : > { %v884_v12 = vmax.f32 %v785_v8, 0.0  ;;  %649 = vmatmul.f32.gmra.mxu2 %v279_v6  ;;  %1079 = vmatmul.msk.f32.gmra.mxu3 %vm311_vm0, %v284_v7 }
  0xed   : > { %v858_v13 = vmax.f32 %v707_v11, 0.0 }
  0xee   : > { %940 = vst [vmem:[%s1349_s9 + $0x110] sm:$0xff] %v884_v12  ;;  %v718_v23 = vpop.f32.mrf.mxu1 }
  0xef   : > { %914 = vst [vmem:[%s1349_s9 + $0x40] sm:$0xff] %v858_v13  ;;  %v602_v14 = vpop.f32.mrf.mxu2  ;;  %v793_v15 = vpop.f32.mrf.mxu3 }
  0xf0   : > { %v603_v16 = vadd.f32 %v1338_v24, %v602_v14  ;;  %v524_v17 = vpop.f32.mrf.mxu0 }
  0xf1   : > { %v525_v19 = vadd.f32 %v1338_v24, %v524_v17  ;;  %1054 = vmatmul.msk.f32.gmra.mxu1 %vm311_vm0, %v234_v25 }
  0xf2   : > { %v788_v22 = vadd.f32 %v787_v50, %v603_v16 }
  0xf3   : > { %v710_v26 = vadd.f32 %v709_v43, %v525_v19  ;;  %571 = vmatmul.f32.gmra.mxu0 %v227_v18 }
  0xf4   : > { %v885_v27 = vmax.f32 %v788_v22, 0.0  ;;  %652 = vmatmul.f32.gmra.mxu2 %v281_v20  ;;  %1080 = vmatmul.msk.f32.gmra.mxu3 %vm311_vm0, %v286_v21 }
  0xf5   : > { %v859_v28 = vmax.f32 %v710_v26, 0.0 }
  0xf6   : > { %941 = vst [vmem:[%s1349_s9 + $0x118] sm:$0xff] %v885_v27  ;;  %v721_v40 = vpop.f32.mrf.mxu1 }
  0xf7   : > { %915 = vst [vmem:[%s1349_s9 + $0x48] sm:$0xff] %v859_v28  ;;  %v605_v29 = vpop.f32.mrf.mxu2  ;;  %v796_v30 = vpop.f32.mrf.mxu3 }
  0xf8   : > { %v606_v31 = vadd.f32 %v1338_v24, %v605_v29  ;;  %v527_v32 = vpop.f32.mrf.mxu0 }
  0xf9   : > { %v528_v36 = vadd.f32 %v1338_v24, %v527_v32  ;;  %1055 = vmatmul.msk.f32.gmra.mxu1 %vm311_vm0, %v236_v41 }
  0xfa   : > { %v791_v39 = vadd.f32 %v790_v1, %v606_v31 }
  0xfb   : > { %v713_v42 = vadd.f32 %v712_v59, %v528_v36  ;;  %574 = vmatmul.f32.gmra.mxu0 %v229_v33 }
  0xfc   : > { %v886_v43 = vmax.f32 %v791_v39, 0.0  ;;  %655 = vmatmul.f32.gmra.mxu2 %v283_v37  ;;  %1081 = vmatmul.msk.f32.gmra.mxu3 %vm311_vm0, %v288_v38 }
  0xfd   : > { %v860_v44 = vmax.f32 %v713_v42, 0.0 }
  0xfe   : > { %942 = vst [vmem:[%s1349_s9 + $0x120] sm:$0xff] %v886_v43  ;;  %v724_v53 = vpop.f32.mrf.mxu1 }
  0xff   : > { %916 = vst [vmem:[%s1349_s9 + $0x50] sm:$0xff] %v860_v44  ;;  %v608_v46 = vpop.f32.mrf.mxu2  ;;  %v799_v47 = vpop.f32.mrf.mxu3 }
 0x100   : > { %v609_v48 = vadd.f32 %v1338_v24, %v608_v46  ;;  %v530_v49 = vpop.f32.mrf.mxu0 }
 0x101   : > { %v531_v50 = vadd.f32 %v1338_v24, %v530_v49 }
 0x102   : > { %v794_v52 = vadd.f32 %v793_v15, %v609_v48 }
 0x103   : > { %v716_v54 = vadd.f32 %v715_v9, %v531_v50 }
 0x104   : > { %v887_v55 = vmax.f32 %v794_v52, 0.0  ;;  %658 = vmatmul.f32.gmra.mxu2 %v285_v51 }
 0x105   : > { %v861_v57 = vmax.f32 %v716_v54, 0.0 }
 0x106   : > { %943 = vst [vmem:[%s1349_s9 + $0x128] sm:$0xff] %v887_v55  ;;  %v727_v0 = vpop.f32.mrf.mxu1 }
 0x107   : > { %917 = vst [vmem:[%s1349_s9 + $0x58] sm:$0xff] %v861_v57  ;;  %v611_v58 = vpop.f32.mrf.mxu2  ;;  %v802_v59 = vpop.f32.mrf.mxu3 }
 0x108   : > { %v612_v60 = vadd.f32 %v1338_v24, %v611_v58  ;;  %v533_v61 = vpop.f32.mrf.mxu0 }
 0x109   : > { %v534_v62 = vadd.f32 %v1338_v24, %v533_v61 }
 0x10a   : > { %v797_v63 = vadd.f32 %v796_v30, %v612_v60 }
 0x10b   : > { %v719_v1 = vadd.f32 %v718_v23, %v534_v62 }
 0x10c   : > { %v888_v2 = vmax.f32 %v797_v63, 0.0 }
 0x10d   : > { %v862_v3 = vmax.f32 %v719_v1, 0.0 }
 0x10e   : > { %944 = vst [vmem:[%s1349_s9 + $0x130] sm:$0xff] %v888_v2  ;;  %v730_v10 = vpop.f32.mrf.mxu1 }
 0x10f   : > { %918 = vst [vmem:[%s1349_s9 + $0x60] sm:$0xff] %v862_v3  ;;  %v614_v4 = vpop.f32.mrf.mxu2  ;;  %v805_v5 = vpop.f32.mrf.mxu3 }
 0x110   : > { %v615_v6 = vadd.f32 %v1338_v24, %v614_v4  ;;  %v536_v7 = vpop.f32.mrf.mxu0 }
 0x111   : > { %v537_v8 = vadd.f32 %v1338_v24, %v536_v7 }
 0x112   : > { %v800_v9 = vadd.f32 %v799_v47, %v615_v6 }
 0x113   : > { %v722_v11 = vadd.f32 %v721_v40, %v537_v8 }
 0x114   : > { %v889_v12 = vmax.f32 %v800_v9, 0.0 }
 0x115   : > { %v863_v13 = vmax.f32 %v722_v11, 0.0 }
 0x116   : > { %945 = vst [vmem:[%s1349_s9 + $0x138] sm:$0xff] %v889_v12  ;;  %v733_v20 = vpop.f32.mrf.mxu1 }
 0x117   : > { %919 = vst [vmem:[%s1349_s9 + $0x68] sm:$0xff] %v863_v13  ;;  %v617_v14 = vpop.f32.mrf.mxu2  ;;  %v808_v15 = vpop.f32.mrf.mxu3 }
 0x118   : > { %v618_v16 = vadd.f32 %v1338_v24, %v617_v14  ;;  %v539_v17 = vpop.f32.mrf.mxu0 }
 0x119   : > { %v540_v18 = vadd.f32 %v1338_v24, %v539_v17 }
 0x11a   : > { %v803_v19 = vadd.f32 %v802_v59, %v618_v16 }
 0x11b   : > { %v725_v21 = vadd.f32 %v724_v53, %v540_v18 }
 0x11c   : > { %v890_v22 = vmax.f32 %v803_v19, 0.0 }
 0x11d   : > { %v864_v23 = vmax.f32 %v725_v21, 0.0 }
 0x11e   : > { %946 = vst [vmem:[%s1349_s9 + $0x140] sm:$0xff] %v890_v22  ;;  %v736_v31 = vpop.f32.mrf.mxu1 }
 0x11f   : > { %920 = vst [vmem:[%s1349_s9 + $0x70] sm:$0xff] %v864_v23  ;;  %v620_v25 = vpop.f32.mrf.mxu2  ;;  %v811_v26 = vpop.f32.mrf.mxu3 }
 0x120   : > { %v621_v27 = vadd.f32 %v1338_v24, %v620_v25  ;;  %v542_v28 = vpop.f32.mrf.mxu0 }
 0x121   : > { %v543_v29 = vadd.f32 %v1338_v24, %v542_v28 }
 0x122   : > { %v806_v30 = vadd.f32 %v805_v5, %v621_v27 }
 0x123   : > { %v728_v32 = vadd.f32 %v727_v0, %v543_v29 }
 0x124   : > { %v891_v33 = vmax.f32 %v806_v30, 0.0 }
 0x125   : > { %v865_v36 = vmax.f32 %v728_v32, 0.0 }
 0x126   : > { %947 = vst [vmem:[%s1349_s9 + $0x148] sm:$0xff] %v891_v33  ;;  %v739_v43 = vpop.f32.mrf.mxu1 }
 0x127   : > { %921 = vst [vmem:[%s1349_s9 + $0x78] sm:$0xff] %v865_v36  ;;  %v623_v37 = vpop.f32.mrf.mxu2  ;;  %v814_v38 = vpop.f32.mrf.mxu3 }
 0x128   : > { %v624_v39 = vadd.f32 %v1338_v24, %v623_v37  ;;  %v545_v40 = vpop.f32.mrf.mxu0 }
 0x129   : > { %v546_v41 = vadd.f32 %v1338_v24, %v545_v40 }
 0x12a   : > { %v809_v42 = vadd.f32 %v808_v15, %v624_v39 }
 0x12b   : > { %v731_v44 = vadd.f32 %v730_v10, %v546_v41 }
 0x12c   : > { %v892_v46 = vmax.f32 %v809_v42, 0.0 }
 0x12d   : > { %v866_v47 = vmax.f32 %v731_v44, 0.0 }
 0x12e   : > { %948 = vst [vmem:[%s1349_s9 + $0x150] sm:$0xff] %v892_v46  ;;  %v742_v54 = vpop.f32.mrf.mxu1 }
 0x12f   : > { %922 = vst [vmem:[%s1349_s9 + $0x80] sm:$0xff] %v866_v47  ;;  %v626_v48 = vpop.f32.mrf.mxu2  ;;  %v817_v49 = vpop.f32.mrf.mxu3 }
 0x130   : > { %v627_v50 = vadd.f32 %v1338_v24, %v626_v48  ;;  %v548_v51 = vpop.f32.mrf.mxu0 }
 0x131   : > { %v549_v52 = vadd.f32 %v1338_v24, %v548_v51 }
 0x132   : > { %v812_v53 = vadd.f32 %v811_v26, %v627_v50 }
 0x133   : > { %v734_v55 = vadd.f32 %v733_v20, %v549_v52 }
 0x134   : > { %v893_v57 = vmax.f32 %v812_v53, 0.0 }
 0x135   : > { %v867_v58 = vmax.f32 %v734_v55, 0.0 }
 0x136   : > { %949 = vst [vmem:[%s1349_s9 + $0x158] sm:$0xff] %v893_v57  ;;  %v745_v1 = vpop.f32.mrf.mxu1 }
 0x137   : > { %923 = vst [vmem:[%s1349_s9 + $0x88] sm:$0xff] %v867_v58  ;;  %v629_v59 = vpop.f32.mrf.mxu2  ;;  %v820_v60 = vpop.f32.mrf.mxu3 }
 0x138   : > { %v630_v61 = vadd.f32 %v1338_v24, %v629_v59  ;;  %v551_v62 = vpop.f32.mrf.mxu0 }
 0x139   : > { %v552_v63 = vadd.f32 %v1338_v24, %v551_v62 }
 0x13a   : > { %v815_v0 = vadd.f32 %v814_v38, %v630_v61 }
 0x13b   : > { %v737_v2 = vadd.f32 %v736_v31, %v552_v63 }
 0x13c   : > { %v894_v3 = vmax.f32 %v815_v0, 0.0  ;;  %v579_v0 = vadd.f32 %v1338_v24, %v1354_v34 }
 0x13d   : > { %v868_v4 = vmax.f32 %v737_v2, 0.0 }
 0x13e   : > { %950 = vst [vmem:[%s1349_s9 + $0x160] sm:$0xff] %v894_v3  ;;  %v748_v11 = vpop.f32.mrf.mxu1 }
 0x13f   : > { %924 = vst [vmem:[%s1349_s9 + $0x90] sm:$0xff] %v868_v4  ;;  %v632_v5 = vpop.f32.mrf.mxu2  ;;  %v823_v6 = vpop.f32.mrf.mxu3 }
 0x140   : > { %v633_v7 = vadd.f32 %v1338_v24, %v632_v5  ;;  %v554_v8 = vpop.f32.mrf.mxu0 }
 0x141   : > { %v555_v9 = vadd.f32 %v1338_v24, %v554_v8 }
 0x142   : > { %v818_v10 = vadd.f32 %v817_v49, %v633_v7 }
 0x143   : > { %v740_v12 = vadd.f32 %v739_v43, %v555_v9 }
 0x144   : > { %v895_v13 = vmax.f32 %v818_v10, 0.0 }
 0x145   : > { %v869_v14 = vmax.f32 %v740_v12, 0.0  ;;  %v582_v12 = vadd.f32 %v1338_v24, %v1366_v45 }
 0x146   : > { %951 = vst [vmem:[%s1349_s9 + $0x168] sm:$0xff] %v895_v13  ;;  %v751_v21 = vpop.f32.mrf.mxu1 }
 0x147   : > { %925 = vst [vmem:[%s1349_s9 + $0x98] sm:$0xff] %v869_v14  ;;  %v635_v15 = vpop.f32.mrf.mxu2  ;;  %v826_v16 = vpop.f32.mrf.mxu3 }
 0x148   : > { %v636_v17 = vadd.f32 %v1338_v24, %v635_v15  ;;  %v557_v18 = vpop.f32.mrf.mxu0 }
 0x149   : > { %v558_v19 = vadd.f32 %v1338_v24, %v557_v18 }
 0x14a   : > { %v821_v20 = vadd.f32 %v820_v60, %v636_v17 }
 0x14b   : > { %v743_v22 = vadd.f32 %v742_v54, %v558_v19 }
 0x14c   : > { %v896_v23 = vmax.f32 %v821_v20, 0.0 }
 0x14d   : > { %v870_v25 = vmax.f32 %v743_v22, 0.0 }
 0x14e   : > { %952 = vst [vmem:[%s1349_s9 + $0x170] sm:$0xff] %v896_v23  ;;  %v754_v32 = vpop.f32.mrf.mxu1 }
 0x14f   : > { %926 = vst [vmem:[%s1349_s9 + $0xa0] sm:$0xff] %v870_v25  ;;  %v638_v26 = vpop.f32.mrf.mxu2  ;;  %v829_v27 = vpop.f32.mrf.mxu3  ;;  %v585_v25 = vadd.f32 %v1338_v24, %v1376_v56 }
 0x150   : > { %v639_v28 = vadd.f32 %v1338_v24, %v638_v26  ;;  %v560_v29 = vpop.f32.mrf.mxu0 }
 0x151   : > { %v561_v30 = vadd.f32 %v1338_v24, %v560_v29 }
 0x152   : > { %v824_v31 = vadd.f32 %v823_v6, %v639_v28 }
 0x153   : > { %v746_v33 = vadd.f32 %v745_v1, %v561_v30 }
 0x154   : > { %v897_v36 = vmax.f32 %v824_v31, 0.0 }
 0x155   : > { %v871_v37 = vmax.f32 %v746_v33, 0.0 }
 0x156   : > { %953 = vst [vmem:[%s1349_s9 + $0x178] sm:$0xff] %v897_v36  ;;  %v757_v44 = vpop.f32.mrf.mxu1  ;;  %v663_v36 = vadd.f32 %v1338_v24, %v1356_v35 }
 0x157   : > { %927 = vst [vmem:[%s1349_s9 + $0xa8] sm:$0xff] %v871_v37  ;;  %v641_v38 = vpop.f32.mrf.mxu2  ;;  %v832_v39 = vpop.f32.mrf.mxu3 }
 0x158   : > { %v642_v40 = vadd.f32 %v1338_v24, %v641_v38  ;;  %v563_v41 = vpop.f32.mrf.mxu0 }
 0x159   : > { %v564_v42 = vadd.f32 %v1338_v24, %v563_v41 }
 0x15a   : > { %v827_v43 = vadd.f32 %v826_v16, %v642_v40 }
 0x15b   : > { %v749_v46 = vadd.f32 %v748_v11, %v564_v42 }
 0x15c   : > { %v898_v47 = vmax.f32 %v827_v43, 0.0 }
 0x15d   : > { %v872_v48 = vmax.f32 %v749_v46, 0.0 }
 0x15e   : > { %954 = vst [vmem:[%s1349_s9 + $0x180] sm:$0xff] %v898_v47  ;;  %v760_v55 = vpop.f32.mrf.mxu1 }
 0x15f   : > { %928 = vst [vmem:[%s1349_s9 + $0xb0] sm:$0xff] %v872_v48  ;;  %v644_v49 = vpop.f32.mrf.mxu2  ;;  %v835_v50 = vpop.f32.mrf.mxu3 }
 0x160   : > { %v645_v51 = vadd.f32 %v1338_v24, %v644_v49  ;;  %v566_v52 = vpop.f32.mrf.mxu0 }
 0x161   : > { %v567_v53 = vadd.f32 %v1338_v24, %v566_v52 }
 0x162   : > { %v830_v54 = vadd.f32 %v829_v27, %v645_v51 }
 0x163   : > { %v752_v57 = vadd.f32 %v751_v21, %v567_v53 }
 0x164   : > { %v899_v58 = vmax.f32 %v830_v54, 0.0 }
 0x165   : > { %v873_v59 = vmax.f32 %v752_v57, 0.0 }
 0x166   : > { %955 = vst [vmem:[%s1349_s9 + $0x188] sm:$0xff] %v899_v58  ;;  %v763_v3 = vpop.f32.mrf.mxu1 }
 0x167   : > { %929 = vst [vmem:[%s1349_s9 + $0xb8] sm:$0xff] %v873_v59  ;;  %v647_v60 = vpop.f32.mrf.mxu2  ;;  %v838_v61 = vpop.f32.mrf.mxu3  ;;  %v764_v5 = vadd.f32 %v763_v3, %v579_v0 }
 0x168   : > { %v648_v62 = vadd.f32 %v1338_v24, %v647_v60  ;;  %v569_v63 = vpop.f32.mrf.mxu0 }
 0x169   : > { %v570_v1 = vadd.f32 %v1338_v24, %v569_v63  ;;  %v877_v8 = vmax.f32 %v764_v5, 0.0 }
 0x16a   : > { %v833_v2 = vadd.f32 %v832_v39, %v648_v62 }
 0x16b   : > { %v755_v4 = vadd.f32 %v754_v32, %v570_v1  ;;  %933 = vst [vmem:[%s1349_s9 + $0xd8] sm:$0xff] %v877_v8 }
 0x16c   : > { %v900_v6 = vmax.f32 %v833_v2, 0.0 }
 0x16d   : > { %v874_v7 = vmax.f32 %v755_v4, 0.0 }
 0x16e   : > { %956 = vst [vmem:[%s1349_s9 + $0x190] sm:$0xff] %v900_v6  ;;  %v766_v15 = vpop.f32.mrf.mxu1 }
 0x16f   : > { %930 = vst [vmem:[%s1349_s9 + $0xc0] sm:$0xff] %v874_v7  ;;  %v650_v9 = vpop.f32.mrf.mxu2  ;;  %v841_v10 = vpop.f32.mrf.mxu3  ;;  %v767_v17 = vadd.f32 %v766_v15, %v582_v12 }
 0x170   : > { %v651_v11 = vadd.f32 %v1338_v24, %v650_v9  ;;  %v572_v34 = vpop.f32.mrf.mxu0 }
 0x171   : > { %v573_v13 = vadd.f32 %v1338_v24, %v572_v34  ;;  %v878_v20 = vmax.f32 %v767_v17, 0.0 }
 0x172   : > { %v836_v14 = vadd.f32 %v835_v50, %v651_v11 }
 0x173   : > { %v758_v16 = vadd.f32 %v757_v44, %v573_v13  ;;  %934 = vst [vmem:[%s1349_s9 + $0xe0] sm:$0xff] %v878_v20 }
 0x174   : > { %v901_v18 = vmax.f32 %v836_v14, 0.0 }
 0x175   : > { %v875_v19 = vmax.f32 %v758_v16, 0.0 }
 0x176   : > { %957 = vst [vmem:[%s1349_s9 + $0x198] sm:$0xff] %v901_v18  ;;  %v769_v28 = vpop.f32.mrf.mxu1 }
 0x177   : > { %931 = vst [vmem:[%s1349_s9 + $0xc8] sm:$0xff] %v875_v19  ;;  %v653_v21 = vpop.f32.mrf.mxu2  ;;  %v844_v22 = vpop.f32.mrf.mxu3  ;;  %v770_v30 = vadd.f32 %v769_v28, %v585_v25 }
 0x178   : > { %v654_v23 = vadd.f32 %v1338_v24, %v653_v21  ;;  %v575_v45 = vpop.f32.mrf.mxu0 }
 0x179   : > { %v576_v26 = vadd.f32 %v1338_v24, %v575_v45  ;;  %v879_v33 = vmax.f32 %v770_v30, 0.0 }
 0x17a   : > { %v839_v27 = vadd.f32 %v838_v61, %v654_v23 }
 0x17b   : > { %v761_v29 = vadd.f32 %v760_v55, %v576_v26  ;;  %935 = vst [vmem:[%s1349_s9 + $0xe8] sm:$0xff] %v879_v33 }
 0x17c   : > { %v902_v31 = vmax.f32 %v839_v27, 0.0 }
 0x17d   : > { %v876_v32 = vmax.f32 %v761_v29, 0.0 }
 0x17e   : > { %958 = vst [vmem:[%s1349_s9 + $0x1a0] sm:$0xff] %v902_v31 }
 0x17f   : > { %932 = vst [vmem:[%s1349_s9 + $0xd0] sm:$0xff] %v876_v32  ;;  %v656_v37 = vpop.f32.mrf.mxu2  ;;  %v847_v38 = vpop.f32.mrf.mxu3 }
 0x180   : > { %v657_v56 = vadd.f32 %v1338_v24, %v656_v37  ;;  %v848_v39 = vadd.f32 %v847_v38, %v663_v36 }
 0x182   : > { %v842_v40 = vadd.f32 %v841_v10, %v657_v56  ;;  %v905_v41 = vmax.f32 %v848_v39, 0.0 }
 0x184   : > { %v903_v42 = vmax.f32 %v842_v40, 0.0  ;;  %961 = vst [vmem:[%s1349_s9 + $0x1b8] sm:$0xff] %v905_v41 }
 0x186   : > { %959 = vst [vmem:[%s1349_s9 + $0x1a8] sm:$0xff] %v903_v42 }
 0x187   : > { %v659_v43 = vpop.f32.mrf.mxu2 }
 0x188   : > { %v660_v44 = vadd.f32 %v1338_v24, %v659_v43 }
 0x18a   : > { %v845_v46 = vadd.f32 %v844_v22, %v660_v44 }
 0x18c   : > { %v904_v47 = vmax.f32 %v845_v46, 0.0 }
 0x18e   : > { %960 = vst [vmem:[%s1349_s9 + $0x1b0] sm:$0xff] %v904_v47 }
 0x18f PF: > { %s13_s12 = sadd.s32 1, %s1134_s12  }
 0x190   : > { %p10_p4 = scmp.ge.s32.totalorder %s13_s12, 4  }
 0x192   :  { %12 = sbr.rel (!%p10_p4) target bundleno = 1 (0x1), region = 62 }

// kernel: forward.5
= control target key start
LH: loop header
LB: loop body
LE: loop exit
PB: predicated region body
PF: predicated region fallthrough
CT: control target
= control target key end

     0   :  { %s2925_s1 = inlined_call_operand.vmem [shape: f32[1152,128], index: 1, kind: input, shape index: {}]   ;;  %s2926_s0 = inlined_call_operand.vmem [shape: f32[224,1152], index: 0, kind: input, shape index: {}]   ;;  %s2927_s2 = inlined_call_operand.vmem [shape: f32[1,128], index: 2, kind: input, shape index: {}]   ;;  %s2928_s3 = inlined_call_operand.vmem [shape: f32[224,128], index: 3, kind: output, shape index: {}]  }
   0x1   :  { %v281_v0 = vld [vmem:[%s2925_s1 + $0x78] sm:$0xff]  ;;  %v280_v1 = vld [vmem:[%s2925_s1 + $0x70] sm:$0xff]  ;;  %v279_v2 = vld [vmem:[%s2925_s1 + $0x68] sm:$0xff] }
   0x2   :  { %1383 = vmatpush.msra.mxu1 %v281_v0  ;;  %1384 = vmatpush.msra.mxu2 %v281_v0  ;;  %v278_v3 = vld [vmem:[%s2925_s1 + $0x60] sm:$0xff]  ;;  %v277_v4 = vld [vmem:[%s2925_s1 + $0x58] sm:$0xff]  ;;  %v276_v5 = vld [vmem:[%s2925_s1 + $0x50] sm:$0xff] }
   0x3   :  { %1385 = vmatpush.msra.mxu3 %v281_v0  ;;  %414 = vmatpush.msra.mxu0 %v281_v0  ;;  %v275_v6 = vld [vmem:[%s2925_s1 + $0x48] sm:$0xff]  ;;  %v274_v7 = vld [vmem:[%s2925_s1 + $0x40] sm:$0xff]  ;;  %v273_v8 = vld [vmem:[%s2925_s1 + $0x38] sm:$0xff] }
   0x4   :  { %1386 = vmatpush.msra.mxu1 %v280_v1  ;;  %1387 = vmatpush.msra.mxu2 %v280_v1  ;;  %v272_v9 = vld [vmem:[%s2925_s1 + $0x30] sm:$0xff]  ;;  %v271_v10 = vld [vmem:[%s2925_s1 + $0x28] sm:$0xff]  ;;  %v270_v11 = vld [vmem:[%s2925_s1 + $0x20] sm:$0xff] }
   0x5   :  { %1388 = vmatpush.msra.mxu3 %v280_v1  ;;  %415 = vmatpush.msra.mxu0 %v280_v1  ;;  %v269_v12 = vld [vmem:[%s2925_s1 + $0x18] sm:$0xff]  ;;  %v268_v13 = vld [vmem:[%s2925_s1 + $0x10] sm:$0xff]  ;;  %v267_v14 = vld [vmem:[%s2925_s1 + $0x8] sm:$0xff] }
   0x6   :  { %1389 = vmatpush.msra.mxu1 %v279_v2  ;;  %1390 = vmatpush.msra.mxu2 %v279_v2  ;;  %v266_v15 = vld [vmem:[%s2925_s1] sm:$0xff]  ;;  %v77_v16 = vld [vmem:[%s2926_s0 + $0x1f8] sm:$0xff]  ;;  %v140_v17 = vld [vmem:[%s2926_s0 + $0x3f0] sm:$0xff] }
   0x7   :  { %1391 = vmatpush.msra.mxu3 %v279_v2  ;;  %416 = vmatpush.msra.mxu0 %v279_v2  ;;  %v313_v18 = vld [vmem:[%s2925_s1 + $0x178] sm:$0xff]  ;;  %v203_v19 = vld [vmem:[%s2926_s0 + $0x5e8] sm:$0xff]  ;;  %v312_v22 = vld [vmem:[%s2925_s1 + $0x170] sm:$0xff] }
   0x8   :  { %1392 = vmatpush.msra.mxu1 %v278_v3  ;;  %1393 = vmatpush.msra.mxu2 %v278_v3  ;;  %v297_v20 = vld [vmem:[%s2925_s1 + $0xf8] sm:$0xff]  ;;  %v296_v23 = vld [vmem:[%s2925_s1 + $0xf0] sm:$0xff]  ;;  %v311_v25 = vld [vmem:[%s2925_s1 + $0x168] sm:$0xff] }
   0x9   :  { %1394 = vmatpush.msra.mxu3 %v278_v3  ;;  %417 = vmatpush.msra.mxu0 %v278_v3  ;;  %v329_v21 = vld [vmem:[%s2925_s1 + $0x1f8] sm:$0xff]  ;;  %v328_v24 = vld [vmem:[%s2925_s1 + $0x1f0] sm:$0xff]  ;;  %v14_v26 = vld [vmem:[%s2926_s0] sm:$0xff] }
   0xa   :  { %1395 = vmatpush.msra.mxu1 %v277_v4  ;;  %1396 = vmatpush.msra.mxu2 %v277_v4  ;;  %v295_v27 = vld [vmem:[%s2925_s1 + $0xe8] sm:$0xff]  ;;  %v345_v29 = vld [vmem:[%s2925_s1 + $0x278] sm:$0xff]  ;;  %v86_v30 = vld [vmem:[%s2926_s0 + $0x240] sm:$0xff] }
   0xb   :  { %1397 = vmatpush.msra.mxu3 %v277_v4  ;;  %418 = vmatpush.msra.mxu0 %v277_v4  ;;  %v327_v28 = vld [vmem:[%s2925_s1 + $0x1e8] sm:$0xff]  ;;  %v149_v31 = vld [vmem:[%s2926_s0 + $0x438] sm:$0xff]  ;;  %v310_v32 = vld [vmem:[%s2925_s1 + $0x160] sm:$0xff] }
   0xc   :  { %1398 = vmatpush.msra.mxu1 %v276_v5  ;;  %1399 = vmatpush.msra.mxu2 %v276_v5  ;;  %v326_v33 = vld [vmem:[%s2925_s1 + $0x1e0] sm:$0xff]  ;;  %v212_v34 = vld [vmem:[%s2926_s0 + $0x630] sm:$0xff]  ;;  %v309_v36 = vld [vmem:[%s2925_s1 + $0x158] sm:$0xff] }
   0xd   :  { %1400 = vmatpush.msra.mxu3 %v276_v5  ;;  %419 = vmatpush.msra.mxu0 %v276_v5  ;;  %v344_v35 = vld [vmem:[%s2925_s1 + $0x270] sm:$0xff]  ;;  %v294_v37 = vld [vmem:[%s2925_s1 + $0xe0] sm:$0xff]  ;;  %v325_v38 = vld [vmem:[%s2925_s1 + $0x1d8] sm:$0xff] }
   0xe   :  { %1401 = vmatpush.msra.mxu1 %v275_v6  ;;  %1402 = vmatpush.msra.mxu2 %v275_v6  ;;  %v343_v39 = vld [vmem:[%s2925_s1 + $0x268] sm:$0xff]  ;;  %v293_v40 = vld [vmem:[%s2925_s1 + $0xd8] sm:$0xff]  ;;  %v308_v41 = vld [vmem:[%s2925_s1 + $0x150] sm:$0xff] }
   0xf   :  { %1403 = vmatpush.msra.mxu3 %v275_v6  ;;  %420 = vmatpush.msra.mxu0 %v275_v6  ;;  %v23_v42 = vld [vmem:[%s2926_s0 + $0x48] sm:$0xff]  ;;  %v324_v43 = vld [vmem:[%s2925_s1 + $0x1d0] sm:$0xff]  ;;  %v342_v45 = vld [vmem:[%s2925_s1 + $0x260] sm:$0xff] }
  0x10   :  { %1404 = vmatpush.msra.mxu1 %v274_v7  ;;  %1405 = vmatpush.msra.mxu2 %v274_v7  ;;  %v307_v44 = vld [vmem:[%s2925_s1 + $0x148] sm:$0xff]  ;;  %v158_v47 = vld [vmem:[%s2926_s0 + $0x480] sm:$0xff]  ;;  %v292_v48 = vld [vmem:[%s2925_s1 + $0xd0] sm:$0xff] }
  0x11   :  { %1406 = vmatpush.msra.mxu3 %v274_v7  ;;  %421 = vmatpush.msra.mxu0 %v274_v7  ;;  %v95_v46 = vld [vmem:[%s2926_s0 + $0x288] sm:$0xff]  ;;  %v221_v50 = vld [vmem:[%s2926_s0 + $0x678] sm:$0xff]  ;;  %v306_v53 = vld [vmem:[%s2925_s1 + $0x140] sm:$0xff] }
  0x12   :  { %1407 = vmatpush.msra.mxu1 %v273_v8  ;;  %1408 = vmatpush.msra.mxu2 %v273_v8  ;;  %v323_v49 = vld [vmem:[%s2925_s1 + $0x1c8] sm:$0xff]  ;;  %v341_v51 = vld [vmem:[%s2925_s1 + $0x258] sm:$0xff]  ;;  %v322_v54 = vld [vmem:[%s2925_s1 + $0x1c0] sm:$0xff] }
  0x13   :  { %1409 = vmatpush.msra.mxu3 %v273_v8  ;;  %422 = vmatpush.msra.mxu0 %v273_v8  ;;  %v291_v52 = vld [vmem:[%s2925_s1 + $0xc8] sm:$0xff]  ;;  %v340_v55 = vld [vmem:[%s2925_s1 + $0x250] sm:$0xff]  ;;  %v305_v56 = vld [vmem:[%s2925_s1 + $0x138] sm:$0xff] }
  0x14   :  { %1410 = vmatpush.msra.mxu1 %v272_v9  ;;  %1411 = vmatpush.msra.mxu2 %v272_v9  ;;  %v290_v57 = vld [vmem:[%s2925_s1 + $0xc0] sm:$0xff]  ;;  %v32_v58 = vld [vmem:[%s2926_s0 + $0x90] sm:$0xff]  ;;  %v321_v59 = vld [vmem:[%s2925_s1 + $0x1b8] sm:$0xff] }
  0x15   :  { %1412 = vmatpush.msra.mxu3 %v272_v9  ;;  %423 = vmatpush.msra.mxu0 %v272_v9  ;;  %v339_v60 = vld [vmem:[%s2925_s1 + $0x248] sm:$0xff]  ;;  %v289_v61 = vld [vmem:[%s2925_s1 + $0xb8] sm:$0xff]  ;;  %v104_v62 = vld [vmem:[%s2926_s0 + $0x2d0] sm:$0xff] }
  0x16   :  { %1413 = vmatpush.msra.mxu1 %v271_v10  ;;  %1414 = vmatpush.msra.mxu2 %v271_v10  ;;  %v167_v63 = vld [vmem:[%s2926_s0 + $0x4c8] sm:$0xff]  ;;  %v304_v0 = vld [vmem:[%s2925_s1 + $0x130] sm:$0xff]  ;;  %v230_v2 = vld [vmem:[%s2926_s0 + $0x6c0] sm:$0xff] }
  0x17   :  { %1415 = vmatpush.msra.mxu3 %v271_v10  ;;  %424 = vmatpush.msra.mxu0 %v271_v10  ;;  %v320_v1 = vld [vmem:[%s2925_s1 + $0x1b0] sm:$0xff]  ;;  %v338_v3 = vld [vmem:[%s2925_s1 + $0x240] sm:$0xff]  ;;  %v303_v4 = vld [vmem:[%s2925_s1 + $0x128] sm:$0xff] }
  0x18   :  { %1416 = vmatpush.msra.mxu1 %v270_v11  ;;  %1417 = vmatpush.msra.mxu2 %v270_v11  ;;  %v288_v5 = vld [vmem:[%s2925_s1 + $0xb0] sm:$0xff]  ;;  %v319_v6 = vld [vmem:[%s2925_s1 + $0x1a8] sm:$0xff]  ;;  %v337_v7 = vld [vmem:[%s2925_s1 + $0x238] sm:$0xff] }
  0x19   :  { %1418 = vmatpush.msra.mxu3 %v270_v11  ;;  %425 = vmatpush.msra.mxu0 %v270_v11  ;;  %v287_v8 = vld [vmem:[%s2925_s1 + $0xa8] sm:$0xff]  ;;  %v302_v9 = vld [vmem:[%s2925_s1 + $0x120] sm:$0xff]  ;;  %v41_v10 = vld [vmem:[%s2926_s0 + $0xd8] sm:$0xff] }
  0x1a   :  { %1419 = vmatpush.msra.mxu1 %v269_v12  ;;  %1420 = vmatpush.msra.mxu2 %v269_v12  ;;  %v318_v11 = vld [vmem:[%s2925_s1 + $0x1a0] sm:$0xff] }
  0x1b   :  { %1421 = vmatpush.msra.mxu3 %v269_v12  ;;  %426 = vmatpush.msra.mxu0 %v269_v12  ;;  %v301_v12 = vld [vmem:[%s2925_s1 + $0x118] sm:$0xff] }
  0x1c   :  { %1422 = vmatpush.msra.mxu1 %v268_v13  ;;  %1423 = vmatpush.msra.mxu2 %v268_v13 }
  0x1d   :  { %1424 = vmatpush.msra.mxu3 %v268_v13  ;;  %427 = vmatpush.msra.mxu0 %v268_v13  ;;  %v336_v13 = vld [vmem:[%s2925_s1 + $0x230] sm:$0xff] }
  0x1e   :  { %1425 = vmatpush.msra.mxu1 %v267_v14  ;;  %1426 = vmatpush.msra.mxu2 %v267_v14 }
  0x1f   :  { %1427 = vmatpush.msra.mxu3 %v267_v14  ;;  %428 = vmatpush.msra.mxu0 %v267_v14  ;;  %v113_v14 = vld [vmem:[%s2926_s0 + $0x318] sm:$0xff] }
  0x20   :  { %1428 = vmatpush.msra.mxu1 %v266_v15  ;;  %1429 = vmatpush.msra.mxu2 %v266_v15 }
  0x21   :  { %451 = vmatmul.f32.vlgmr.msra.gmra.mxu1 %v77_v16  ;;  %472 = vmatmul.f32.vlgmr.msra.gmra.mxu2 %v140_v17  ;;  %v286_v16 = vld [vmem:[%s2925_s1 + $0xa0] sm:$0xff]  ;;  %v317_v17 = vld [vmem:[%s2925_s1 + $0x198] sm:$0xff] }
  0x22   :  { %616 = vmatpush.msrb.mxu2 %v313_v18  ;;  %1430 = vmatpush.msra.mxu3 %v266_v15  ;;  %v239_v18 = vld [vmem:[%s2926_s0 + $0x708] sm:$0xff] }
  0x23   :  { %493 = vmatmul.f32.vlgmr.msra.gmra.mxu3 %v203_v19  ;;  %515 = vmatpush.msrb.mxu1 %v297_v20  ;;  %v335_v19 = vld [vmem:[%s2925_s1 + $0x228] sm:$0xff]  ;;  %v285_v20 = vld [vmem:[%s2925_s1 + $0x98] sm:$0xff] }
  0x24   :  { %717 = vmatpush.msrb.mxu3 %v329_v21  ;;  %617 = vmatpush.msrb.mxu2 %v312_v22  ;;  %v300_v21 = vld [vmem:[%s2925_s1 + $0x110] sm:$0xff] }
  0x25   :  { %516 = vmatpush.msrb.mxu1 %v296_v23  ;;  %429 = vmatpush.msra.mxu0 %v266_v15  ;;  %v176_v15 = vld [vmem:[%s2926_s0 + $0x510] sm:$0xff]  ;;  %v334_v23 = vld [vmem:[%s2925_s1 + $0x220] sm:$0xff] }
  0x26   :  { %718 = vmatpush.msrb.mxu3 %v328_v24  ;;  %618 = vmatpush.msrb.mxu2 %v311_v25  ;;  %v316_v22 = vld [vmem:[%s2925_s1 + $0x190] sm:$0xff]  ;;  %v299_v24 = vld [vmem:[%s2925_s1 + $0x108] sm:$0xff] }
  0x27   :  { %430 = vmatmul.f32.vlgmr.msra.gmra.mxu0 %v14_v26  ;;  %517 = vmatpush.msrb.mxu1 %v295_v27  ;;  %v284_v25 = vld [vmem:[%s2925_s1 + $0x90] sm:$0xff]  ;;  %v50_v26 = vld [vmem:[%s2926_s0 + $0x120] sm:$0xff]  ;;  %v315_v27 = vld [vmem:[%s2925_s1 + $0x188] sm:$0xff] }
  0x28   :  { %719 = vmatpush.msrb.mxu3 %v327_v28  ;;  %818 = vmatpush.msrb.mxu0 %v345_v29  ;;  %v333_v28 = vld [vmem:[%s2925_s1 + $0x218] sm:$0xff]  ;;  %v283_v29 = vld [vmem:[%s2925_s1 + $0x88] sm:$0xff] }
  0x29   :  { %454 = vmatmul.f32.gmra.mxu1 %v86_v30  ;;  %475 = vmatmul.f32.gmra.mxu2 %v149_v31  ;;  %v122_v30 = vld [vmem:[%s2926_s0 + $0x360] sm:$0xff]  ;;  %v185_v31 = vld [vmem:[%s2926_s0 + $0x558] sm:$0xff] }
  0x2a   :  { %619 = vmatpush.msrb.mxu2 %v310_v32  ;;  %720 = vmatpush.msrb.mxu3 %v326_v33  ;;  %v298_v32 = vld [vmem:[%s2925_s1 + $0x100] sm:$0xff] }
  0x2b   :  { %496 = vmatmul.f32.gmra.mxu3 %v212_v34  ;;  %819 = vmatpush.msrb.mxu0 %v344_v35  ;;  %v282_v33 = vld [vmem:[%s2925_s1 + $0x80] sm:$0xff]  ;;  %v248_v34 = vld [vmem:[%s2926_s0 + $0x750] sm:$0xff] }
  0x2c   :  { %620 = vmatpush.msrb.mxu2 %v309_v36  ;;  %518 = vmatpush.msrb.mxu1 %v294_v37  ;;  %v332_v35 = vld [vmem:[%s2925_s1 + $0x210] sm:$0xff]  ;;  %v314_v36 = vld [vmem:[%s2925_s1 + $0x180] sm:$0xff]  ;;  %v377_v37 = vld [vmem:[%s2925_s1 + $0x378] sm:$0xff] }
  0x2d   :  { %721 = vmatpush.msrb.mxu3 %v325_v38  ;;  %820 = vmatpush.msrb.mxu0 %v343_v39  ;;  %v393_v38 = vld [vmem:[%s2925_s1 + $0x3f8] sm:$0xff]  ;;  %v331_v39 = vld [vmem:[%s2925_s1 + $0x208] sm:$0xff] }
  0x2e   :  { %519 = vmatpush.msrb.mxu1 %v293_v40  ;;  %621 = vmatpush.msrb.mxu2 %v308_v41  ;;  %v361_v40 = vld [vmem:[%s2925_s1 + $0x2f8] sm:$0xff]  ;;  %v376_v41 = vld [vmem:[%s2925_s1 + $0x370] sm:$0xff] }
  0x2f   :  { %433 = vmatmul.f32.gmra.mxu0 %v23_v42  ;;  %722 = vmatpush.msrb.mxu3 %v324_v43  ;;  %v59_v42 = vld [vmem:[%s2926_s0 + $0x168] sm:$0xff]  ;;  %v392_v43 = vld [vmem:[%s2925_s1 + $0x3f0] sm:$0xff] }
  0x30   :  { %622 = vmatpush.msrb.mxu2 %v307_v44  ;;  %821 = vmatpush.msrb.mxu0 %v342_v45  ;;  %v330_v44 = vld [vmem:[%s2925_s1 + $0x200] sm:$0xff]  ;;  %v360_v45 = vld [vmem:[%s2925_s1 + $0x2f0] sm:$0xff] }
  0x31   :  { %457 = vmatmul.f32.gmra.mxu1 %v95_v46  ;;  %478 = vmatmul.f32.gmra.mxu2 %v158_v47  ;;  %v131_v46 = vld [vmem:[%s2926_s0 + $0x3a8] sm:$0xff]  ;;  %v194_v47 = vld [vmem:[%s2926_s0 + $0x5a0] sm:$0xff] }
  0x32   :  { %520 = vmatpush.msrb.mxu1 %v292_v48  ;;  %723 = vmatpush.msrb.mxu3 %v323_v49  ;;  %v409_v48 = vld [vmem:[%s2925_s1 + $0x478] sm:$0xff] }
  0x33   :  { %499 = vmatmul.f32.gmra.mxu3 %v221_v50  ;;  %822 = vmatpush.msrb.mxu0 %v341_v51  ;;  %v257_v49 = vld [vmem:[%s2926_s0 + $0x798] sm:$0xff]  ;;  %v408_v50 = vld [vmem:[%s2925_s1 + $0x470] sm:$0xff]  ;;  %v375_v51 = vld [vmem:[%s2925_s1 + $0x368] sm:$0xff] }
  0x34   :  { %521 = vmatpush.msrb.mxu1 %v291_v52  ;;  %623 = vmatpush.msrb.mxu2 %v306_v53  ;;  %v391_v52 = vld [vmem:[%s2925_s1 + $0x3e8] sm:$0xff]  ;;  %v68_v53 = vld [vmem:[%s2926_s0 + $0x1b0] sm:$0xff] }
  0x35   :  { %724 = vmatpush.msrb.mxu3 %v322_v54  ;;  %823 = vmatpush.msrb.mxu0 %v340_v55  ;;  %v15_v54 = vld [vmem:[%s2926_s0 + $0x8] sm:$0xff]  ;;  %v16_v55 = vld [vmem:[%s2926_s0 + $0x10] sm:$0xff] }
  0x36   :  { %624 = vmatpush.msrb.mxu2 %v305_v56  ;;  %522 = vmatpush.msrb.mxu1 %v290_v57  ;;  %v17_v56 = vld [vmem:[%s2926_s0 + $0x18] sm:$0xff]  ;;  %v359_v57 = vld [vmem:[%s2925_s1 + $0x2e8] sm:$0xff] }
  0x37   :  { %436 = vmatmul.f32.gmra.mxu0 %v32_v58  ;;  %725 = vmatpush.msrb.mxu3 %v321_v59  ;;  %v407_v58 = vld [vmem:[%s2925_s1 + $0x468] sm:$0xff]  ;;  %v18_v59 = vld [vmem:[%s2926_s0 + $0x20] sm:$0xff] }
  0x38   :  { %824 = vmatpush.msrb.mxu0 %v339_v60  ;;  %523 = vmatpush.msrb.mxu1 %v289_v61  ;;  %v24_v60 = vld [vmem:[%s2926_s0 + $0x50] sm:$0xff]  ;;  %v25_v61 = vld [vmem:[%s2926_s0 + $0x58] sm:$0xff] }
  0x39   :  { %460 = vmatmul.f32.gmra.mxu1 %v104_v62  ;;  %481 = vmatmul.f32.gmra.mxu2 %v167_v63  ;;  %v26_v62 = vld [vmem:[%s2926_s0 + $0x60] sm:$0xff] }
  0x3a   :  { %625 = vmatpush.msrb.mxu2 %v304_v0  ;;  %726 = vmatpush.msrb.mxu3 %v320_v1  ;;  %v374_v63 = vld [vmem:[%s2925_s1 + $0x360] sm:$0xff] }
  0x3b   :  { %502 = vmatmul.f32.gmra.mxu3 %v230_v2  ;;  %825 = vmatpush.msrb.mxu0 %v338_v3  ;;  %v390_v0 = vld [vmem:[%s2925_s1 + $0x3e0] sm:$0xff]  ;;  %v27_v2 = vld [vmem:[%s2926_s0 + $0x68] sm:$0xff]  ;;  %v33_v3 = vld [vmem:[%s2926_s0 + $0x98] sm:$0xff] }
  0x3c   :  { %626 = vmatpush.msrb.mxu2 %v303_v4  ;;  %524 = vmatpush.msrb.mxu1 %v288_v5  ;;  %v358_v1 = vld [vmem:[%s2925_s1 + $0x2e0] sm:$0xff]  ;;  %v35_v5 = vld [vmem:[%s2926_s0 + $0xa8] sm:$0xff] }
  0x3d   :  { %727 = vmatpush.msrb.mxu3 %v319_v6  ;;  %826 = vmatpush.msrb.mxu0 %v337_v7  ;;  %v34_v4 = vld [vmem:[%s2926_s0 + $0xa0] sm:$0xff]  ;;  %v36_v7 = vld [vmem:[%s2926_s0 + $0xb0] sm:$0xff] }
  0x3e   :  { %525 = vmatpush.msrb.mxu1 %v287_v8  ;;  %627 = vmatpush.msrb.mxu2 %v302_v9  ;;  %v406_v6 = vld [vmem:[%s2925_s1 + $0x460] sm:$0xff]  ;;  %v43_v9 = vld [vmem:[%s2926_s0 + $0xe8] sm:$0xff] }
  0x3f   :  { %439 = vmatmul.f32.gmra.mxu0 %v41_v10  ;;  %728 = vmatpush.msrb.mxu3 %v318_v11  ;;  %v42_v8 = vld [vmem:[%s2926_s0 + $0xe0] sm:$0xff]  ;;  %v44_v10 = vld [vmem:[%s2926_s0 + $0xf0] sm:$0xff]  ;;  %v373_v11 = vld [vmem:[%s2925_s1 + $0x358] sm:$0xff] }
  0x40   :  { %628 = vmatpush.msrb.mxu2 %v301_v12  ;;  %827 = vmatpush.msrb.mxu0 %v336_v13  ;;  %v389_v12 = vld [vmem:[%s2925_s1 + $0x3d8] sm:$0xff] }
  0x41   :  { %463 = vmatmul.f32.gmra.mxu1 %v113_v14  ;;  %484 = vmatmul.f32.gmra.mxu2 %v176_v15  ;;  %v357_v13 = vld [vmem:[%s2925_s1 + $0x2d8] sm:$0xff]  ;;  %v51_v15 = vld [vmem:[%s2926_s0 + $0x128] sm:$0xff] }
  0x42   :  { %526 = vmatpush.msrb.mxu1 %v286_v16  ;;  %729 = vmatpush.msrb.mxu3 %v317_v17  ;;  %v45_v14 = vld [vmem:[%s2926_s0 + $0xf8] sm:$0xff]  ;;  %v52_v16 = vld [vmem:[%s2926_s0 + $0x130] sm:$0xff] }
  0x43   :  { %505 = vmatmul.f32.gmra.mxu3 %v239_v18  ;;  %828 = vmatpush.msrb.mxu0 %v335_v19  ;;  %v53_v17 = vld [vmem:[%s2926_s0 + $0x138] sm:$0xff]  ;;  %v54_v19 = vld [vmem:[%s2926_s0 + $0x140] sm:$0xff] }
  0x44   :  { %527 = vmatpush.msrb.mxu1 %v285_v20  ;;  %629 = vmatpush.msrb.mxu2 %v300_v21  ;;  %v405_v18 = vld [vmem:[%s2925_s1 + $0x458] sm:$0xff]  ;;  %v60_v20 = vld [vmem:[%s2926_s0 + $0x170] sm:$0xff] }
  0x45   :  { %730 = vmatpush.msrb.mxu3 %v316_v22  ;;  %829 = vmatpush.msrb.mxu0 %v334_v23  ;;  %v61_v21 = vld [vmem:[%s2926_s0 + $0x178] sm:$0xff]  ;;  %v372_v22 = vld [vmem:[%s2925_s1 + $0x350] sm:$0xff]  ;;  %v62_v23 = vld [vmem:[%s2926_s0 + $0x180] sm:$0xff] }
  0x46   :  { %630 = vmatpush.msrb.mxu2 %v299_v24  ;;  %528 = vmatpush.msrb.mxu1 %v284_v25  ;;  %v388_v24 = vld [vmem:[%s2925_s1 + $0x3d0] sm:$0xff] }
  0x47   :  { %442 = vmatmul.f32.gmra.mxu0 %v50_v26  ;;  %731 = vmatpush.msrb.mxu3 %v315_v27  ;;  %v356_v25 = vld [vmem:[%s2925_s1 + $0x2d0] sm:$0xff]  ;;  %v63_v26 = vld [vmem:[%s2926_s0 + $0x188] sm:$0xff]  ;;  %v69_v27 = vld [vmem:[%s2926_s0 + $0x1b8] sm:$0xff] }
  0x48   :  { %830 = vmatpush.msrb.mxu0 %v333_v28  ;;  %529 = vmatpush.msrb.mxu1 %v283_v29  ;;  %v70_v28 = vld [vmem:[%s2926_s0 + $0x1c0] sm:$0xff]  ;;  %v71_v29 = vld [vmem:[%s2926_s0 + $0x1c8] sm:$0xff] }
  0x49   :  { %466 = vmatmul.f32.gmra.mxu1 %v122_v30  ;;  %487 = vmatmul.f32.gmra.mxu2 %v185_v31  ;;  %v404_v30 = vld [vmem:[%s2925_s1 + $0x450] sm:$0xff] }
  0x4a   :  { %631 = vmatpush.msrb.mxu2 %v298_v32  ;;  %530 = vmatpush.msrb.mxu1 %v282_v33  ;;  %v72_v31 = vld [vmem:[%s2926_s0 + $0x1d0] sm:$0xff]  ;;  %v371_v32 = vld [vmem:[%s2925_s1 + $0x348] sm:$0xff]  ;;  %v78_v33 = vld [vmem:[%s2926_s0 + $0x200] sm:$0xff] }
  0x4b   :  { %508 = vmatmul.f32.gmra.mxu3 %v248_v34  ;;  %831 = vmatpush.msrb.mxu0 %v332_v35  ;;  %v79_v34 = vld [vmem:[%s2926_s0 + $0x208] sm:$0xff] }
  0x4c   :  { %732 = vmatpush.msrb.mxu3 %v314_v36  ;;  %1020 = vmatpush.msra.mxu2 %v377_v37  ;;  %v387_v35 = vld [vmem:[%s2925_s1 + $0x3c8] sm:$0xff]  ;;  %v80_v36 = vld [vmem:[%s2926_s0 + $0x210] sm:$0xff] }
  0x4d   :  { %832 = vmatpush.msrb.mxu0 %v331_v39  ;;  %919 = vmatpush.msra.mxu1 %v361_v40  ;;  %v355_v37 = vld [vmem:[%s2925_s1 + $0x2c8] sm:$0xff]  ;;  %v88_v40 = vld [vmem:[%s2926_s0 + $0x250] sm:$0xff] }
  0x4e   :  { %1121 = vmatpush.msra.mxu3 %v393_v38  ;;  %1021 = vmatpush.msra.mxu2 %v376_v41  ;;  %v81_v38 = vld [vmem:[%s2926_s0 + $0x218] sm:$0xff]  ;;  %v87_v39 = vld [vmem:[%s2926_s0 + $0x248] sm:$0xff] }
  0x4f   :  { %445 = vmatmul.f32.gmra.mxu0 %v59_v42  ;;  %920 = vmatpush.msra.mxu1 %v360_v45  ;;  %v403_v41 = vld [vmem:[%s2925_s1 + $0x448] sm:$0xff]  ;;  %v89_v42 = vld [vmem:[%s2926_s0 + $0x258] sm:$0xff]  ;;  %v386_v45 = vld [vmem:[%s2925_s1 + $0x3c0] sm:$0xff] }
  0x50   :  { %1122 = vmatpush.msra.mxu3 %v392_v43  ;;  %833 = vmatpush.msrb.mxu0 %v330_v44  ;;  %v370_v43 = vld [vmem:[%s2925_s1 + $0x340] sm:$0xff] }
  0x51   :  { %469 = vmatmul.f32.gmra.mxu1 %v131_v46  ;;  %490 = vmatmul.f32.gmra.mxu2 %v194_v47  ;;  %v90_v44 = vld [vmem:[%s2926_s0 + $0x260] sm:$0xff]  ;;  %v96_v47 = vld [vmem:[%s2926_s0 + $0x290] sm:$0xff] }
  0x52   :  { %1222 = vmatpush.msra.mxu0 %v409_v48  ;;  %1022 = vmatpush.msra.mxu2 %v375_v51  ;;  %v97_v48 = vld [vmem:[%s2926_s0 + $0x298] sm:$0xff]  ;;  %v1991_v51 = vld [vmem:[%s2927_s2] ss:$0 sm:$0xff] }
  0x53   :  { %511 = vmatmul.f32.gmra.mxu3 %v257_v49  ;;  %921 = vmatpush.msra.mxu1 %v359_v57  ;;  %v354_v49 = vld [vmem:[%s2925_s1 + $0x2c0] sm:$0xff] }
  0x54   :  { %1223 = vmatpush.msra.mxu0 %v408_v50  ;;  %1123 = vmatpush.msra.mxu3 %v391_v52  ;;  %v98_v50 = vld [vmem:[%s2926_s0 + $0x2a0] sm:$0xff] }
  0x55   :  { %1023 = vmatpush.msra.mxu2 %v374_v63  ;;  %922 = vmatpush.msra.mxu1 %v358_v1  ;;  %v369_v63 = vld [vmem:[%s2925_s1 + $0x338] sm:$0xff] }
  0x56   :  { %1224 = vmatpush.msra.mxu0 %v407_v58  ;;  %1124 = vmatpush.msra.mxu3 %v390_v0  ;;  %v385_v0 = vld [vmem:[%s2925_s1 + $0x3b8] sm:$0xff] }
  0x57   :  { %448 = vmatmul.f32.gmra.mxu0 %v68_v53  ;;  %1024 = vmatpush.msra.mxu2 %v373_v11  ;;  %v116_v11 = vld [vmem:[%s2926_s0 + $0x330] sm:$0xff] }
  0x58   :  { %1225 = vmatpush.msra.mxu0 %v406_v6  ;;  %1125 = vmatpush.msra.mxu3 %v389_v12  ;;  %v401_v12 = vld [vmem:[%s2925_s1 + $0x438] sm:$0xff] }
  0x59   :  { %531 = vmatmul.f32.vlgmr.msrb.gmra.mxu1 %v15_v54  ;;  %632 = vmatmul.f32.vlgmr.msrb.gmra.mxu2 %v16_v55  ;;  %v99_v54 = vld [vmem:[%s2926_s0 + $0x2a8] sm:$0xff] }
  0x5a   :  { %923 = vmatpush.msra.mxu1 %v357_v13  ;;  %1226 = vmatpush.msra.mxu0 %v405_v18 }
  0x5b   :  { %733 = vmatmul.f32.vlgmr.msrb.gmra.mxu3 %v17_v56  ;;  %1025 = vmatpush.msra.mxu2 %v372_v22  ;;  %v402_v56 = vld [vmem:[%s2925_s1 + $0x440] sm:$0xff]  ;;  %v368_v22 = vld [vmem:[%s2925_s1 + $0x330] sm:$0xff] }
  0x5c   :  { %1126 = vmatpush.msra.mxu3 %v388_v24  ;;  %924 = vmatpush.msra.mxu1 %v356_v25  ;;  %v384_v24 = vld [vmem:[%s2925_s1 + $0x3b0] sm:$0xff] }
  0x5d   :  { %1227 = vmatpush.msra.mxu0 %v404_v30  ;;  %1026 = vmatpush.msra.mxu2 %v371_v32  ;;  %v352_v25 = vld [vmem:[%s2925_s1 + $0x2b0] sm:$0xff] }
  0x5e   :  { %1127 = vmatpush.msra.mxu3 %v387_v35  ;;  %925 = vmatpush.msra.mxu1 %v355_v37  ;;  %v132_v32 = vld [vmem:[%s2926_s0 + $0x3b0] sm:$0xff]  ;;  %v134_v35 = vld [vmem:[%s2926_s0 + $0x3c0] sm:$0xff] }
  0x5f   :  { %834 = vmatmul.f32.vlgmr.msrb.gmra.mxu0 %v18_v59  ;;  %1027 = vmatpush.msra.mxu2 %v370_v43  ;;  %v105_v59 = vld [vmem:[%s2926_s0 + $0x2d8] sm:$0xff] }
  0x60   :  { %1228 = vmatpush.msra.mxu0 %v403_v41  ;;  %1128 = vmatpush.msra.mxu3 %v386_v45  ;;  %v367_v41 = vld [vmem:[%s2925_s1 + $0x328] sm:$0xff]  ;;  %v142_v45 = vld [vmem:[%s2926_s0 + $0x400] sm:$0xff] }
  0x61   :  { %534 = vmatmul.f32.gmra.mxu1 %v24_v60  ;;  %635 = vmatmul.f32.gmra.mxu2 %v25_v61  ;;  %v106_v60 = vld [vmem:[%s2926_s0 + $0x2e0] sm:$0xff] }
  0x62   :  { %926 = vmatpush.msra.mxu1 %v354_v49  ;;  %1229 = vmatpush.msra.mxu0 %v402_v56  ;;  %v143_v49 = vld [vmem:[%s2926_s0 + $0x408] sm:$0xff]  ;;  %v144_v56 = vld [vmem:[%s2926_s0 + $0x410] sm:$0xff] }
  0x63   :  { %736 = vmatmul.f32.gmra.mxu3 %v26_v62  ;;  %v107_v62 = vld [vmem:[%s2926_s0 + $0x2e8] sm:$0xff]  ;;  %1028 = vmatpush.msra.mxu2 %v369_v63 }
  0x64   :  { %1129 = vmatpush.msra.mxu3 %v385_v0  ;;  %1230 = vmatpush.msra.mxu0 %v401_v12  ;;  %v151_v63 = vld [vmem:[%s2926_s0 + $0x448] sm:$0xff]  ;;  %v382_v12 = vld [vmem:[%s2925_s1 + $0x3a0] sm:$0xff] }
  0x65   :  { %1029 = vmatpush.msra.mxu2 %v368_v22  ;;  %v350_v22 = vld [vmem:[%s2925_s1 + $0x2a0] sm:$0xff] }
  0x66   :  { %1130 = vmatpush.msra.mxu3 %v384_v24 }
  0x67   :  { %837 = vmatmul.f32.gmra.mxu0 %v27_v2  ;;  %1030 = vmatpush.msra.mxu2 %v367_v41  ;;  %v170_v41 = vld [vmem:[%s2926_s0 + $0x4e0] sm:$0xff] }
  0x69   :  { %537 = vmatmul.f32.gmra.mxu1 %v33_v3  ;;  %638 = vmatmul.f32.gmra.mxu2 %v34_v4  ;;  %v108_v3 = vld [vmem:[%s2926_s0 + $0x2f0] sm:$0xff] }
  0x6b   :  { %739 = vmatmul.f32.gmra.mxu3 %v35_v5  ;;  %v353_v5 = vld [vmem:[%s2925_s1 + $0x2b8] sm:$0xff] }
  0x6c   :  { %927 = vmatpush.msra.mxu1 %v353_v5  ;;  %v366_v5 = vld [vmem:[%s2925_s1 + $0x320] sm:$0xff] }
  0x6d   :  { %1031 = vmatpush.msra.mxu2 %v366_v5 }
  0x6e   :  { %928 = vmatpush.msra.mxu1 %v352_v25 }
  0x6f   :  { %840 = vmatmul.f32.gmra.mxu0 %v36_v7 }
  0x71   :  { %540 = vmatmul.f32.gmra.mxu1 %v42_v8  ;;  %641 = vmatmul.f32.gmra.mxu2 %v43_v9  ;;  %v114_v8 = vld [vmem:[%s2926_s0 + $0x320] sm:$0xff]  ;;  %v115_v9 = vld [vmem:[%s2926_s0 + $0x328] sm:$0xff] }
  0x73   :  { %742 = vmatmul.f32.gmra.mxu3 %v44_v10 }
  0x77   :  { %843 = vmatmul.f32.gmra.mxu0 %v45_v14 }
  0x79   :  { %543 = vmatmul.f32.gmra.mxu1 %v51_v15  ;;  %644 = vmatmul.f32.gmra.mxu2 %v52_v16  ;;  %v117_v15 = vld [vmem:[%s2926_s0 + $0x338] sm:$0xff] }
  0x7b   :  { %745 = vmatmul.f32.gmra.mxu3 %v53_v17 }
  0x7f   :  { %846 = vmatmul.f32.gmra.mxu0 %v54_v19  ;;  %v123_v19 = vld [vmem:[%s2926_s0 + $0x368] sm:$0xff] }
  0x81   :  { %546 = vmatmul.f32.gmra.mxu1 %v60_v20  ;;  %647 = vmatmul.f32.gmra.mxu2 %v61_v21  ;;  %v124_v20 = vld [vmem:[%s2926_s0 + $0x370] sm:$0xff] }
  0x83   :  { %748 = vmatmul.f32.gmra.mxu3 %v62_v23  ;;  %v125_v23 = vld [vmem:[%s2926_s0 + $0x378] sm:$0xff] }
  0x87   :  { %849 = vmatmul.f32.gmra.mxu0 %v63_v26 }
  0x89   :  { %549 = vmatmul.f32.gmra.mxu1 %v69_v27  ;;  %650 = vmatmul.f32.gmra.mxu2 %v70_v28  ;;  %v126_v28 = vld [vmem:[%s2926_s0 + $0x380] sm:$0xff] }
  0x8b   :  { %751 = vmatmul.f32.gmra.mxu3 %v71_v29 }
  0x8f   :  { %852 = vmatmul.f32.gmra.mxu0 %v72_v31 }
  0x91   :  { %552 = vmatmul.f32.gmra.mxu1 %v78_v33  ;;  %653 = vmatmul.f32.gmra.mxu2 %v79_v34  ;;  %v133_v33 = vld [vmem:[%s2926_s0 + $0x3b8] sm:$0xff] }
  0x93   :  { %754 = vmatmul.f32.gmra.mxu3 %v80_v36  ;;  %v400_v36 = vld [vmem:[%s2925_s1 + $0x430] sm:$0xff] }
  0x94   :  { %1231 = vmatpush.msra.mxu0 %v400_v36 }
  0x97   :  { %855 = vmatmul.f32.gmra.mxu0 %v81_v38 }
  0x99   :  { %555 = vmatmul.f32.gmra.mxu1 %v87_v39  ;;  %656 = vmatmul.f32.gmra.mxu2 %v88_v40  ;;  %v135_v39 = vld [vmem:[%s2926_s0 + $0x3c8] sm:$0xff] }
  0x9b   :  { %757 = vmatmul.f32.gmra.mxu3 %v89_v42 }
  0x9e   :  { %v1974_v46 = vpop.f32.mrf.mxu1 }
  0x9f   :  { %858 = vmatmul.f32.gmra.mxu0 %v90_v44  ;;  %v141_v44 = vld [vmem:[%s2926_s0 + $0x3f8] sm:$0xff] }
  0xa1   :  { %558 = vmatmul.f32.gmra.mxu1 %v96_v47  ;;  %659 = vmatmul.f32.gmra.mxu2 %v97_v48  ;;  %v383_v48 = vld [vmem:[%s2925_s1 + $0x3a8] sm:$0xff] }
  0xa2   :  { %1131 = vmatpush.msra.mxu3 %v383_v48 }
  0xa3   :  { %760 = vmatmul.f32.gmra.mxu3 %v98_v50  ;;  %v351_v50 = vld [vmem:[%s2925_s1 + $0x2a8] sm:$0xff] }
  0xa4   :  { %v473_v52 = vpop.f32.mrf.mxu2  ;;  %v1993_v53 = vpop.f32.mrf.mxu0  ;;  %929 = vmatpush.msra.mxu1 %v351_v50  ;;  %1132 = vmatpush.msra.mxu3 %v382_v12 }
  0xa5   :  { %v1999_v55 = vadd.f32 %v1991_v51, %v473_v52  ;;  %v432_v24 = vadd.f32 %v1991_v51, %v1993_v53  ;;  %v168_v53 = vld [vmem:[%s2926_s0 + $0x4d0] sm:$0xff] }
  0xa6   :  { %v2004_v57 = vpop.f32.mrf.mxu1  ;;  %v494_v58 = vpop.f32.mrf.mxu3  ;;  %930 = vmatpush.msra.mxu1 %v350_v22  ;;  %v180_v22 = vld [vmem:[%s2926_s0 + $0x530] sm:$0xff] }
  0xa7   :  { %v2013_v61 = vadd.f32 %v1991_v51, %v494_v58  ;;  %861 = vmatmul.f32.gmra.mxu0 %v99_v54 }
  0xa9   :  { %561 = vmatmul.f32.gmra.mxu1 %v105_v59  ;;  %662 = vmatmul.f32.gmra.mxu2 %v106_v60 }
  0xab   :  { %763 = vmatmul.f32.gmra.mxu3 %v107_v62  ;;  %v150_v62 = vld [vmem:[%s2926_s0 + $0x440] sm:$0xff] }
  0xac   :  { %v476_v1 = vpop.f32.mrf.mxu2  ;;  %v2024_v2 = vpop.f32.mrf.mxu0 }
  0xad   :  { %v2030_v4 = vadd.f32 %v1991_v51, %v476_v1  ;;  %v399_v1 = vld [vmem:[%s2925_s1 + $0x428] sm:$0xff] }
  0xae   :  { %v2035_v6 = vpop.f32.mrf.mxu1  ;;  %v497_v7 = vpop.f32.mrf.mxu3  ;;  %1232 = vmatpush.msra.mxu0 %v399_v1  ;;  %v177_v1 = vld [vmem:[%s2926_s0 + $0x518] sm:$0xff] }
  0xaf   :  { %v2044_v10 = vadd.f32 %v1991_v51, %v497_v7  ;;  %864 = vmatmul.f32.gmra.mxu0 %v108_v3  ;;  %v152_v3 = vld [vmem:[%s2926_s0 + $0x450] sm:$0xff] }
  0xb1   :  { %564 = vmatmul.f32.gmra.mxu1 %v114_v8  ;;  %665 = vmatmul.f32.gmra.mxu2 %v115_v9  ;;  %v153_v9 = vld [vmem:[%s2926_s0 + $0x458] sm:$0xff] }
  0xb3   :  { %766 = vmatmul.f32.gmra.mxu3 %v116_v11 }
  0xb4   :  { %v479_v13 = vpop.f32.mrf.mxu2  ;;  %v2052_v14 = vpop.f32.mrf.mxu0 }
  0xb5   :  { %v2058_v16 = vadd.f32 %v1991_v51, %v479_v13 }
  0xb6   :  { %v2060_v17 = vpop.f32.mrf.mxu1  ;;  %v500_v18 = vpop.f32.mrf.mxu3 }
  0xb7   :  { %v2069_v21 = vadd.f32 %v1991_v51, %v500_v18  ;;  %867 = vmatmul.f32.gmra.mxu0 %v117_v15  ;;  %v159_v18 = vld [vmem:[%s2926_s0 + $0x488] sm:$0xff] }
  0xb9   :  { %567 = vmatmul.f32.gmra.mxu1 %v123_v19  ;;  %668 = vmatmul.f32.gmra.mxu2 %v124_v20  ;;  %v160_v19 = vld [vmem:[%s2926_s0 + $0x490] sm:$0xff] }
  0xbb   :  { %769 = vmatmul.f32.gmra.mxu3 %v125_v23  ;;  %v161_v23 = vld [vmem:[%s2926_s0 + $0x498] sm:$0xff] }
  0xbc   :  { %v482_v26 = vpop.f32.mrf.mxu2  ;;  %v2083_v27 = vpop.f32.mrf.mxu0 }
  0xbd   :  { %v2089_v29 = vadd.f32 %v1991_v51, %v482_v26 }
  0xbe   :  { %v2091_v30 = vpop.f32.mrf.mxu1  ;;  %v503_v31 = vpop.f32.mrf.mxu3 }
  0xbf   :  { %v2100_v34 = vadd.f32 %v1991_v51, %v503_v31  ;;  %870 = vmatmul.f32.gmra.mxu0 %v126_v28  ;;  %v162_v31 = vld [vmem:[%s2926_s0 + $0x4a0] sm:$0xff] }
  0xc1   :  { %570 = vmatmul.f32.gmra.mxu1 %v132_v32  ;;  %671 = vmatmul.f32.gmra.mxu2 %v133_v33  ;;  %v398_v33 = vld [vmem:[%s2925_s1 + $0x420] sm:$0xff] }
  0xc2   :  { %1233 = vmatpush.msra.mxu0 %v398_v33  ;;  %v441_v33 = vadd.f32 %v1991_v51, %v2083_v27  ;;  %v189_v27 = vld [vmem:[%s2926_s0 + $0x578] sm:$0xff] }
  0xc3   :  { %772 = vmatmul.f32.gmra.mxu3 %v134_v35 }
  0xc4   :  { %v485_v37 = vpop.f32.mrf.mxu2  ;;  %v2108_v38 = vpop.f32.mrf.mxu0 }
  0xc5   :  { %v2114_v40 = vadd.f32 %v1991_v51, %v485_v37  ;;  %v169_v37 = vld [vmem:[%s2926_s0 + $0x4d8] sm:$0xff] }
  0xc6   :  { %v2119_v42 = vpop.f32.mrf.mxu1  ;;  %v506_v43 = vpop.f32.mrf.mxu3 }
  0xc7   :  { %v2128_v47 = vadd.f32 %v1991_v51, %v506_v43  ;;  %873 = vmatmul.f32.gmra.mxu0 %v135_v39  ;;  %v435_v43 = vadd.f32 %v1991_v51, %v2024_v2  ;;  %v171_v2 = vld [vmem:[%s2926_s0 + $0x4e8] sm:$0xff] }
  0xc9   :  { %573 = vmatmul.f32.gmra.mxu1 %v141_v44  ;;  %674 = vmatmul.f32.gmra.mxu2 %v142_v45  ;;  %v365_v45 = vld [vmem:[%s2925_s1 + $0x318] sm:$0xff] }
  0xca   :  { %1032 = vmatpush.msra.mxu2 %v365_v45 }
  0xcb   :  { %775 = vmatmul.f32.gmra.mxu3 %v143_v49  ;;  %v381_v49 = vld [vmem:[%s2925_s1 + $0x398] sm:$0xff] }
  0xcc   :  { %v488_v52 = vpop.f32.mrf.mxu2  ;;  %v2139_v54 = vpop.f32.mrf.mxu0  ;;  %1133 = vmatpush.msra.mxu3 %v381_v49  ;;  %v195_v49 = vld [vmem:[%s2926_s0 + $0x5a8] sm:$0xff] }
  0xcd   :  { %v2145_v58 = vadd.f32 %v1991_v51, %v488_v52 }
  0xce   :  { %v2147_v59 = vpop.f32.mrf.mxu1  ;;  %v509_v60 = vpop.f32.mrf.mxu3 }
  0xcf   :  { %v2156_v0 = vadd.f32 %v1991_v51, %v509_v60  ;;  %876 = vmatmul.f32.gmra.mxu0 %v144_v56  ;;  %v349_v60 = vld [vmem:[%s2925_s1 + $0x298] sm:$0xff] }
  0xd0   :  { %931 = vmatpush.msra.mxu1 %v349_v60 }
  0xd1   :  { %576 = vmatmul.f32.gmra.mxu1 %v150_v62  ;;  %677 = vmatmul.f32.gmra.mxu2 %v151_v63 }
  0xd3   :  { %778 = vmatmul.f32.gmra.mxu3 %v152_v3  ;;  %v178_v3 = vld [vmem:[%s2926_s0 + $0x520] sm:$0xff] }
  0xd4   :  { %v491_v7 = vpop.f32.mrf.mxu2  ;;  %v2167_v8 = vpop.f32.mrf.mxu0 }
  0xd5   :  { %v2173_v11 = vadd.f32 %v1991_v51, %v491_v7  ;;  %v179_v7 = vld [vmem:[%s2926_s0 + $0x528] sm:$0xff] }
  0xd6   :  { %v512_v13 = vpop.f32.mrf.mxu3  ;;  %v532_v15 = vpop.f32.mrf.mxu1 }
  0xd7   :  { %v2185_v20 = vadd.f32 %v1991_v51, %v512_v13  ;;  %879 = vmatmul.f32.gmra.mxu0 %v153_v9  ;;  %v533_v25 = vadd.f32 %v532_v15, %v432_v24  ;;  %v438_v9 = vadd.f32 %v1991_v51, %v2052_v14  ;;  %v397_v15 = vld [vmem:[%s2925_s1 + $0x418] sm:$0xff] }
  0xd8   :  { %1234 = vmatpush.msra.mxu0 %v397_v15  ;;  %v204_v15 = vld [vmem:[%s2926_s0 + $0x5f0] sm:$0xff] }
  0xd9   :  { %579 = vmatmul.f32.gmra.mxu1 %v159_v18  ;;  %680 = vmatmul.f32.gmra.mxu2 %v160_v19 }
  0xdb   :  { %781 = vmatmul.f32.gmra.mxu3 %v161_v23 }
  0xdc   :  { %v633_v26 = vpop.f32.mrf.mxu2  ;;  %v835_v28 = vpop.f32.mrf.mxu0 }
  0xdd   :  { %v634_v32 = vadd.f32 %v633_v26, %v533_v25  ;;  %v186_v25 = vld [vmem:[%s2926_s0 + $0x560] sm:$0xff]  ;;  %v187_v26 = vld [vmem:[%s2926_s0 + $0x568] sm:$0xff] }
  0xde   :  { %v535_v35 = vpop.f32.mrf.mxu1  ;;  %v734_v36 = vpop.f32.mrf.mxu3 }
  0xdf   :  { %v735_v39 = vadd.f32 %v734_v36, %v634_v32  ;;  %882 = vmatmul.f32.gmra.mxu0 %v162_v31  ;;  %v536_v48 = vadd.f32 %v535_v35, %v435_v43  ;;  %v364_v31 = vld [vmem:[%s2925_s1 + $0x310] sm:$0xff] }
  0xe0   :  { %v188_v32 = vld [vmem:[%s2926_s0 + $0x570] sm:$0xff]  ;;  %1033 = vmatpush.msra.mxu2 %v364_v31 }
  0xe1   :  { %v2212_v44 = vadd.f32 %v835_v28, %v735_v39  ;;  %582 = vmatmul.f32.gmra.mxu1 %v168_v53  ;;  %683 = vmatmul.f32.gmra.mxu2 %v169_v37  ;;  %v380_v36 = vld [vmem:[%s2925_s1 + $0x390] sm:$0xff] }
  0xe2   :  { %1134 = vmatpush.msra.mxu3 %v380_v36  ;;  %v348_v37 = vld [vmem:[%s2925_s1 + $0x290] sm:$0xff] }
  0xe3   :  { %784 = vmatmul.f32.gmra.mxu3 %v170_v41  ;;  %932 = vmatpush.msra.mxu1 %v348_v37  ;;  %v214_v37 = vld [vmem:[%s2926_s0 + $0x640] sm:$0xff] }
  0xe4   :  { %v636_v50 = vpop.f32.mrf.mxu2  ;;  %v838_v52 = vpop.f32.mrf.mxu0 }
  0xe5   :  { %v637_v56 = vadd.f32 %v636_v50, %v536_v48  ;;  %v196_v50 = vld [vmem:[%s2926_s0 + $0x5b0] sm:$0xff] }
  0xe6   :  { %v538_v62 = vpop.f32.mrf.mxu1  ;;  %v737_v63 = vpop.f32.mrf.mxu3 }
  0xe7   :  { %v738_v5 = vadd.f32 %v737_v63, %v637_v56  ;;  %885 = vmatmul.f32.gmra.mxu0 %v171_v2  ;;  %v539_v13 = vadd.f32 %v538_v62, %v438_v9  ;;  %v197_v2 = vld [vmem:[%s2926_s0 + $0x5b8] sm:$0xff]  ;;  %v444_v56 = vadd.f32 %v1991_v51, %v2108_v38  ;;  %v396_v62 = vld [vmem:[%s2925_s1 + $0x410] sm:$0xff]  ;;  %v363_v38 = vld [vmem:[%s2925_s1 + $0x308] sm:$0xff] }
  0xe8   :  { %1235 = vmatpush.msra.mxu0 %v396_v62  ;;  %1034 = vmatpush.msra.mxu2 %v363_v38  ;;  %v224_v38 = vld [vmem:[%s2926_s0 + $0x690] sm:$0xff] }
  0xe9   :  { %v2237_v12 = vadd.f32 %v838_v52, %v738_v5  ;;  %585 = vmatmul.f32.gmra.mxu1 %v177_v1  ;;  %686 = vmatmul.f32.gmra.mxu2 %v178_v3  ;;  %v198_v5 = vld [vmem:[%s2926_s0 + $0x5c0] sm:$0xff] }
  0xeb   :  { %787 = vmatmul.f32.gmra.mxu3 %v179_v7 }
  0xec   :  { %v639_v18 = vpop.f32.mrf.mxu2  ;;  %v841_v19 = vpop.f32.mrf.mxu0 }
  0xed   :  { %v640_v23 = vadd.f32 %v639_v18, %v539_v13  ;;  %v205_v18 = vld [vmem:[%s2926_s0 + $0x5f8] sm:$0xff] }
  0xee   :  { %v541_v24 = vpop.f32.mrf.mxu1  ;;  %v740_v14 = vpop.f32.mrf.mxu3 }
  0xef   :  { %v741_v28 = vadd.f32 %v740_v14, %v640_v23  ;;  %888 = vmatmul.f32.gmra.mxu0 %v180_v22  ;;  %v542_v53 = vadd.f32 %v541_v24, %v441_v33  ;;  %v379_v22 = vld [vmem:[%s2925_s1 + $0x388] sm:$0xff]  ;;  %v206_v23 = vld [vmem:[%s2926_s0 + $0x600] sm:$0xff]  ;;  %v447_v24 = vadd.f32 %v1991_v51, %v2139_v54 }
  0xf0   :  { %1135 = vmatpush.msra.mxu3 %v379_v22  ;;  %v225_v22 = vld [vmem:[%s2926_s0 + $0x698] sm:$0xff] }
  0xf1   :  { %v2259_v35 = vadd.f32 %v841_v19, %v741_v28  ;;  %588 = vmatmul.f32.gmra.mxu1 %v186_v25  ;;  %689 = vmatmul.f32.gmra.mxu2 %v187_v26  ;;  %v347_v25 = vld [vmem:[%s2925_s1 + $0x288] sm:$0xff] }
  0xf2   :  { %933 = vmatpush.msra.mxu1 %v347_v25 }
  0xf3   :  { %790 = vmatmul.f32.gmra.mxu3 %v188_v32  ;;  %v207_v32 = vld [vmem:[%s2926_s0 + $0x608] sm:$0xff] }
  0xf4   :  { %v642_v39 = vpop.f32.mrf.mxu2  ;;  %v844_v41 = vpop.f32.mrf.mxu0 }
  0xf5   :  { %v643_v43 = vadd.f32 %v642_v39, %v542_v53  ;;  %v213_v53 = vld [vmem:[%s2926_s0 + $0x638] sm:$0xff] }
  0xf6   :  { %v544_v45 = vpop.f32.mrf.mxu1  ;;  %v743_v48 = vpop.f32.mrf.mxu3 }
  0xf7   :  { %v744_v52 = vadd.f32 %v743_v48, %v643_v43  ;;  %891 = vmatmul.f32.gmra.mxu0 %v189_v27  ;;  %v545_v63 = vadd.f32 %v544_v45, %v444_v56  ;;  %v215_v27 = vld [vmem:[%s2926_s0 + $0x648] sm:$0xff]  ;;  %v450_v43 = vadd.f32 %v1991_v51, %v2167_v8  ;;  %v378_v8 = vld [vmem:[%s2925_s1 + $0x380] sm:$0xff] }
  0xf8   :  { %1136 = vmatpush.msra.mxu3 %v378_v8 }
  0xf9   :  { %v2281_v60 = vadd.f32 %v844_v41, %v744_v52  ;;  %591 = vmatmul.f32.gmra.mxu1 %v195_v49  ;;  %692 = vmatmul.f32.gmra.mxu2 %v196_v50  ;;  %v395_v41 = vld [vmem:[%s2925_s1 + $0x408] sm:$0xff]  ;;  %v362_v49 = vld [vmem:[%s2925_s1 + $0x300] sm:$0xff] }
  0xfa   :  { %1236 = vmatpush.msra.mxu0 %v395_v41  ;;  %1035 = vmatpush.msra.mxu2 %v362_v49 }
  0xfb   :  { %793 = vmatmul.f32.gmra.mxu3 %v197_v2  ;;  %v216_v2 = vld [vmem:[%s2926_s0 + $0x650] sm:$0xff] }
  0xfc   :  { %v645_v1 = vpop.f32.mrf.mxu2  ;;  %v847_v3 = vpop.f32.mrf.mxu0 }
  0xfd   :  { %v646_v7 = vadd.f32 %v645_v1, %v545_v63  ;;  %v222_v1 = vld [vmem:[%s2926_s0 + $0x680] sm:$0xff] }
  0xfe   :  { %v547_v9 = vpop.f32.mrf.mxu1  ;;  %v746_v13 = vpop.f32.mrf.mxu3 }
  0xff   :  { %v747_v19 = vadd.f32 %v746_v13, %v646_v7  ;;  %894 = vmatmul.f32.gmra.mxu0 %v198_v5  ;;  %v548_v26 = vadd.f32 %v547_v9, %v447_v24  ;;  %v346_v7 = vld [vmem:[%s2925_s1 + $0x280] sm:$0xff]  ;;  %v453_v9 = vadd.f32 %v1991_v51, %v1974_v46  ;;  %v231_v46 = vld [vmem:[%s2926_s0 + $0x6c8] sm:$0xff] }
 0x100   :  { %934 = vmatpush.msra.mxu1 %v346_v7  ;;  %v394_v24 = vld [vmem:[%s2925_s1 + $0x400] sm:$0xff]  ;;  %v249_v7 = vld [vmem:[%s2926_s0 + $0x758] sm:$0xff] }
 0x101   :  { %v2306_v14 = vadd.f32 %v847_v3, %v747_v19  ;;  %594 = vmatmul.f32.gmra.mxu1 %v204_v15  ;;  %695 = vmatmul.f32.gmra.mxu2 %v205_v18  ;;  %v223_v3 = vld [vmem:[%s2926_s0 + $0x688] sm:$0xff] }
 0x102   :  { %1237 = vmatpush.msra.mxu0 %v394_v24  ;;  %v252_v24 = vld [vmem:[%s2926_s0 + $0x770] sm:$0xff] }
 0x103   :  { %796 = vmatmul.f32.gmra.mxu3 %v206_v23 }
 0x104   :  { %v648_v28 = vpop.f32.mrf.mxu2  ;;  %v850_v31 = vpop.f32.mrf.mxu0 }
 0x105   :  { %v649_v33 = vadd.f32 %v648_v28, %v548_v26  ;;  %v232_v28 = vld [vmem:[%s2926_s0 + $0x6d0] sm:$0xff] }
 0x106   :  { %v550_v36 = vpop.f32.mrf.mxu1  ;;  %v749_v54 = vpop.f32.mrf.mxu3 }
 0x107   :  { %v750_v39 = vadd.f32 %v749_v54, %v649_v33  ;;  %897 = vmatmul.f32.gmra.mxu0 %v207_v32  ;;  %v551_v48 = vadd.f32 %v550_v36, %v450_v43  ;;  %v233_v32 = vld [vmem:[%s2926_s0 + $0x6d8] sm:$0xff]  ;;  %v456_v33 = vadd.f32 %v1991_v51, %v2004_v57 }
 0x108   :  { %v241_v57 = vld [vmem:[%s2926_s0 + $0x718] sm:$0xff] }
 0x109   :  { %v2328_v45 = vadd.f32 %v850_v31, %v750_v39  ;;  %597 = vmatmul.f32.gmra.mxu1 %v213_v53  ;;  %698 = vmatmul.f32.gmra.mxu2 %v214_v37  ;;  %v234_v39 = vld [vmem:[%s2926_s0 + $0x6e0] sm:$0xff] }
 0x10b   :  { %799 = vmatmul.f32.gmra.mxu3 %v215_v27 }
 0x10c   :  { %v651_v50 = vpop.f32.mrf.mxu2  ;;  %v853_v52 = vpop.f32.mrf.mxu0 }
 0x10d   :  { %v652_v56 = vadd.f32 %v651_v50, %v551_v48  ;;  %v240_v48 = vld [vmem:[%s2926_s0 + $0x710] sm:$0xff]  ;;  %v242_v50 = vld [vmem:[%s2926_s0 + $0x720] sm:$0xff] }
 0x10e   :  { %v553_v62 = vpop.f32.mrf.mxu1  ;;  %v752_v63 = vpop.f32.mrf.mxu3 }
 0x10f   :  { %v753_v5 = vadd.f32 %v752_v63, %v652_v56  ;;  %900 = vmatmul.f32.gmra.mxu0 %v216_v2  ;;  %v554_v15 = vadd.f32 %v553_v62, %v453_v9  ;;  %v243_v63 = vld [vmem:[%s2926_s0 + $0x728] sm:$0xff] }
 0x110   :  { %v251_v9 = vld [vmem:[%s2926_s0 + $0x768] sm:$0xff] }
 0x111   :  { %v2353_v13 = vadd.f32 %v853_v52, %v753_v5  ;;  %600 = vmatmul.f32.gmra.mxu1 %v222_v1  ;;  %701 = vmatmul.f32.gmra.mxu2 %v223_v3  ;;  %v459_v52 = vadd.f32 %v1991_v51, %v2035_v6  ;;  %v250_v6 = vld [vmem:[%s2926_s0 + $0x760] sm:$0xff] }
 0x113   :  { %802 = vmatmul.f32.gmra.mxu3 %v224_v38 }
 0x114   :  { %v654_v18 = vpop.f32.mrf.mxu2  ;;  %v856_v19 = vpop.f32.mrf.mxu0 }
 0x115   :  { %v655_v23 = vadd.f32 %v654_v18, %v554_v15  ;;  %v462_v15 = vadd.f32 %v1991_v51, %v2060_v17  ;;  %v259_v17 = vld [vmem:[%s2926_s0 + $0x7a8] sm:$0xff] }
 0x116   :  { %v556_v25 = vpop.f32.mrf.mxu1  ;;  %v755_v26 = vpop.f32.mrf.mxu3 }
 0x117   :  { %v756_v31 = vadd.f32 %v755_v26, %v655_v23  ;;  %903 = vmatmul.f32.gmra.mxu0 %v225_v22  ;;  %v557_v54 = vadd.f32 %v556_v25, %v456_v33  ;;  %v465_v33 = vadd.f32 %v1991_v51, %v2091_v30  ;;  %v20_v30 = vld [vmem:[%s2926_s0 + $0x30] sm:$0xff] }
 0x119   :  { %v2372_v36 = vadd.f32 %v856_v19, %v756_v31  ;;  %603 = vmatmul.f32.gmra.mxu1 %v231_v46  ;;  %704 = vmatmul.f32.gmra.mxu2 %v232_v28  ;;  %v258_v28 = vld [vmem:[%s2926_s0 + $0x7a0] sm:$0xff] }
 0x11b   :  { %805 = vmatmul.f32.gmra.mxu3 %v233_v32  ;;  %v260_v32 = vld [vmem:[%s2926_s0 + $0x7b0] sm:$0xff] }
 0x11c   :  { %v657_v53 = vpop.f32.mrf.mxu2  ;;  %v859_v37 = vpop.f32.mrf.mxu0 }
 0x11d   :  { %v658_v41 = vadd.f32 %v657_v53, %v557_v54 }
 0x11e   :  { %v559_v27 = vpop.f32.mrf.mxu1  ;;  %v758_v43 = vpop.f32.mrf.mxu3 }
 0x11f   :  { %v759_v49 = vadd.f32 %v758_v43, %v658_v41  ;;  %906 = vmatmul.f32.gmra.mxu0 %v234_v39  ;;  %v560_v56 = vadd.f32 %v559_v27, %v459_v52  ;;  %v261_v41 = vld [vmem:[%s2926_s0 + $0x7b8] sm:$0xff]  ;;  %v468_v52 = vadd.f32 %v1991_v51, %v2119_v42 }
 0x120   :  { %v29_v42 = vld [vmem:[%s2926_s0 + $0x78] sm:$0xff] }
 0x121   :  { %v2388_v2 = vadd.f32 %v859_v37, %v759_v49  ;;  %606 = vmatmul.f32.gmra.mxu1 %v240_v48  ;;  %707 = vmatmul.f32.gmra.mxu2 %v241_v57  ;;  %v19_v57 = vld [vmem:[%s2926_s0 + $0x28] sm:$0xff] }
 0x123   :  { %808 = vmatmul.f32.gmra.mxu3 %v242_v50  ;;  %v21_v50 = vld [vmem:[%s2926_s0 + $0x38] sm:$0xff] }
 0x124   :  { %v660_v8 = vpop.f32.mrf.mxu2  ;;  %v862_v62 = vpop.f32.mrf.mxu0 }
 0x125   :  { %v661_v1 = vadd.f32 %v660_v8, %v560_v56 }
 0x126   :  { %v562_v3 = vpop.f32.mrf.mxu1  ;;  %v761_v5 = vpop.f32.mrf.mxu3 }
 0x127   :  { %v762_v38 = vadd.f32 %v761_v5, %v661_v1  ;;  %909 = vmatmul.f32.gmra.mxu0 %v243_v63  ;;  %v563_v19 = vadd.f32 %v562_v3, %v462_v15  ;;  %v22_v1 = vld [vmem:[%s2926_s0 + $0x40] sm:$0xff]  ;;  %v471_v15 = vadd.f32 %v1991_v51, %v2147_v59 }
 0x128   :  { %v38_v51 = vld [vmem:[%s2926_s0 + $0xc0] sm:$0xff] }
 0x129   :  { %v2404_v18 = vadd.f32 %v862_v62, %v762_v38  ;;  %609 = vmatmul.f32.gmra.mxu1 %v249_v7  ;;  %710 = vmatmul.f32.gmra.mxu2 %v250_v6  ;;  %v28_v6 = vld [vmem:[%s2926_s0 + $0x70] sm:$0xff] }
 0x12b   :  { %811 = vmatmul.f32.gmra.mxu3 %v251_v9  ;;  %v30_v9 = vld [vmem:[%s2926_s0 + $0x80] sm:$0xff] }
 0x12c   :  { %v663_v22 = vpop.f32.mrf.mxu2  ;;  %v865_v23 = vpop.f32.mrf.mxu0 }
 0x12d   :  { %v664_v25 = vadd.f32 %v663_v22, %v563_v19 }
 0x12e   :  { %v565_v26 = vpop.f32.mrf.mxu1  ;;  %v764_v46 = vpop.f32.mrf.mxu3 }
 0x12f   :  { %v765_v31 = vadd.f32 %v764_v46, %v664_v25  ;;  %912 = vmatmul.f32.gmra.mxu0 %v252_v24  ;;  %v566_v53 = vadd.f32 %v565_v26, %v465_v33  ;;  %v31_v25 = vld [vmem:[%s2926_s0 + $0x88] sm:$0xff] }
 0x131   :  { %v2420_v54 = vadd.f32 %v865_v23, %v765_v31  ;;  %612 = vmatmul.f32.gmra.mxu1 %v258_v28  ;;  %713 = vmatmul.f32.gmra.mxu2 %v259_v17  ;;  %v37_v17 = vld [vmem:[%s2926_s0 + $0xb8] sm:$0xff]  ;;  %v39_v31 = vld [vmem:[%s2926_s0 + $0xc8] sm:$0xff] }
 0x133   :  { %814 = vmatmul.f32.gmra.mxu3 %v260_v32 }
 0x134   :  { %v666_v37 = vpop.f32.mrf.mxu2  ;;  %v868_v39 = vpop.f32.mrf.mxu0 }
 0x135   :  { %v667_v27 = vadd.f32 %v666_v37, %v566_v53 }
 0x136   :  { %v568_v43 = vpop.f32.mrf.mxu1  ;;  %v767_v48 = vpop.f32.mrf.mxu3 }
 0x137   :  { %v768_v49 = vadd.f32 %v767_v48, %v667_v27  ;;  %915 = vmatmul.f32.gmra.mxu0 %v261_v41  ;;  %v569_v8 = vadd.f32 %v568_v43, %v468_v52  ;;  %v46_v48 = vld [vmem:[%s2926_s0 + $0x100] sm:$0xff] }
 0x139   :  { %v2436_v56 = vadd.f32 %v868_v39, %v768_v49  ;;  %935 = vmatmul.f32.vlgmr.msra.gmra.mxu1 %v19_v57  ;;  %1036 = vmatmul.f32.vlgmr.msra.gmra.mxu2 %v20_v30  ;;  %v40_v39 = vld [vmem:[%s2926_s0 + $0xd0] sm:$0xff]  ;;  %v47_v57 = vld [vmem:[%s2926_s0 + $0x108] sm:$0xff] }
 0x13b   :  { %1137 = vmatmul.f32.vlgmr.msra.gmra.mxu3 %v21_v50 }
 0x13c   :  { %v669_v62 = vpop.f32.mrf.mxu2  ;;  %v871_v63 = vpop.f32.mrf.mxu0 }
 0x13d   :  { %v670_v3 = vadd.f32 %v669_v62, %v569_v8  ;;  %v49_v62 = vld [vmem:[%s2926_s0 + $0x118] sm:$0xff] }
 0x13e   :  { %v571_v5 = vpop.f32.mrf.mxu1  ;;  %v770_v7 = vpop.f32.mrf.mxu3 }
 0x13f   :  { %v771_v38 = vadd.f32 %v770_v7, %v670_v3  ;;  %1238 = vmatmul.f32.vlgmr.msra.gmra.mxu0 %v22_v1  ;;  %v572_v22 = vadd.f32 %v571_v5, %v471_v15  ;;  %v55_v5 = vld [vmem:[%s2926_s0 + $0x148] sm:$0xff]  ;;  %v56_v7 = vld [vmem:[%s2926_s0 + $0x150] sm:$0xff] }
 0x141   :  { %v2452_v19 = vadd.f32 %v871_v63, %v771_v38  ;;  %938 = vmatmul.f32.gmra.mxu1 %v28_v6  ;;  %1039 = vmatmul.f32.gmra.mxu2 %v29_v42 }
 0x143   :  { %1140 = vmatmul.f32.gmra.mxu3 %v30_v9 }
 0x144   :  { %v672_v23 = vpop.f32.mrf.mxu2  ;;  %v874_v24 = vpop.f32.mrf.mxu0 }
 0x145   :  { %v673_v26 = vadd.f32 %v672_v23, %v572_v22  ;;  %v58_v22 = vld [vmem:[%s2926_s0 + $0x160] sm:$0xff] }
 0x146   :  { %v574_v46 = vpop.f32.mrf.mxu1  ;;  %v773_v28 = vpop.f32.mrf.mxu3 }
 0x147   :  { %v774_v59 = vadd.f32 %v773_v28, %v673_v26  ;;  %1241 = vmatmul.f32.gmra.mxu0 %v31_v25  ;;  %v575_v33 = vadd.f32 %v574_v46, %v1999_v55  ;;  %v48_v55 = vld [vmem:[%s2926_s0 + $0x110] sm:$0xff]  ;;  %v65_v46 = vld [vmem:[%s2926_s0 + $0x198] sm:$0xff] }
 0x148   :  { %v64_v26 = vld [vmem:[%s2926_s0 + $0x190] sm:$0xff] }
 0x149   :  { %v2466_v32 = vadd.f32 %v874_v24, %v774_v59  ;;  %941 = vmatmul.f32.gmra.mxu1 %v37_v17  ;;  %1042 = vmatmul.f32.gmra.mxu2 %v38_v51 }
 0x14b   :  { %1143 = vmatmul.f32.gmra.mxu3 %v39_v31 }
 0x14c   :  { %v675_v53 = vpop.f32.mrf.mxu2  ;;  %v877_v37 = vpop.f32.mrf.mxu0 }
 0x14d   :  { %v676_v41 = vadd.f32 %v675_v53, %v575_v33  ;;  %v67_v33 = vld [vmem:[%s2926_s0 + $0x1a8] sm:$0xff] }
 0x14e   :  { %v577_v27 = vpop.f32.mrf.mxu1  ;;  %v776_v43 = vpop.f32.mrf.mxu3 }
 0x14f   :  { %v777_v30 = vadd.f32 %v776_v43, %v676_v41  ;;  %1244 = vmatmul.f32.gmra.mxu0 %v40_v39  ;;  %v578_v50 = vadd.f32 %v577_v27, %v2030_v4  ;;  %v57_v4 = vld [vmem:[%s2926_s0 + $0x158] sm:$0xff]  ;;  %v74_v27 = vld [vmem:[%s2926_s0 + $0x1e0] sm:$0xff] }
 0x150   :  { %v73_v41 = vld [vmem:[%s2926_s0 + $0x1d8] sm:$0xff] }
 0x151   :  { %v2481_v49 = vadd.f32 %v877_v37, %v777_v30  ;;  %944 = vmatmul.f32.gmra.mxu1 %v46_v48  ;;  %1045 = vmatmul.f32.gmra.mxu2 %v47_v57 }
 0x153   :  { %1146 = vmatmul.f32.gmra.mxu3 %v48_v55 }
 0x154   :  { %v678_v52 = vpop.f32.mrf.mxu2  ;;  %v880_v8 = vpop.f32.mrf.mxu0 }
 0x155   :  { %v679_v63 = vadd.f32 %v678_v52, %v578_v50  ;;  %v76_v50 = vld [vmem:[%s2926_s0 + $0x1f0] sm:$0xff] }
 0x156   :  { %v580_v1 = vpop.f32.mrf.mxu1  ;;  %v779_v3 = vpop.f32.mrf.mxu3 }
 0x157   :  { %v780_v6 = vadd.f32 %v779_v3, %v679_v63  ;;  %1247 = vmatmul.f32.gmra.mxu0 %v49_v62  ;;  %v581_v38 = vadd.f32 %v580_v1, %v2058_v16  ;;  %v66_v16 = vld [vmem:[%s2926_s0 + $0x1a0] sm:$0xff]  ;;  %v83_v1 = vld [vmem:[%s2926_s0 + $0x228] sm:$0xff] }
 0x158   :  { %v82_v63 = vld [vmem:[%s2926_s0 + $0x220] sm:$0xff] }
 0x159   :  { %v2496_v42 = vadd.f32 %v880_v8, %v780_v6  ;;  %947 = vmatmul.f32.gmra.mxu1 %v55_v5  ;;  %1048 = vmatmul.f32.gmra.mxu2 %v56_v7 }
 0x15b   :  { %1149 = vmatmul.f32.gmra.mxu3 %v57_v4 }
 0x15c   :  { %v681_v9 = vpop.f32.mrf.mxu2  ;;  %v883_v15 = vpop.f32.mrf.mxu0 }
 0x15d   :  { %v682_v23 = vadd.f32 %v681_v9, %v581_v38  ;;  %v85_v38 = vld [vmem:[%s2926_s0 + $0x238] sm:$0xff] }
 0x15e   :  { %v583_v24 = vpop.f32.mrf.mxu1  ;;  %v782_v25 = vpop.f32.mrf.mxu3 }
 0x15f   :  { %v783_v28 = vadd.f32 %v782_v25, %v682_v23  ;;  %1250 = vmatmul.f32.gmra.mxu0 %v58_v22  ;;  %v584_v51 = vadd.f32 %v583_v24, %v2089_v29  ;;  %v75_v29 = vld [vmem:[%s2926_s0 + $0x1e8] sm:$0xff]  ;;  %v92_v24 = vld [vmem:[%s2926_s0 + $0x270] sm:$0xff] }
 0x160   :  { %v91_v23 = vld [vmem:[%s2926_s0 + $0x268] sm:$0xff] }
 0x161   :  { %v2511_v17 = vadd.f32 %v883_v15, %v783_v28  ;;  %950 = vmatmul.f32.gmra.mxu1 %v64_v26  ;;  %1051 = vmatmul.f32.gmra.mxu2 %v65_v46 }
 0x163   :  { %1152 = vmatmul.f32.gmra.mxu3 %v66_v16 }
 0x164   :  { %v684_v59 = vpop.f32.mrf.mxu2  ;;  %v886_v31 = vpop.f32.mrf.mxu0 }
 0x165   :  { %v685_v53 = vadd.f32 %v684_v59, %v584_v51  ;;  %v94_v51 = vld [vmem:[%s2926_s0 + $0x280] sm:$0xff] }
 0x166   :  { %v586_v37 = vpop.f32.mrf.mxu1  ;;  %v785_v39 = vpop.f32.mrf.mxu3 }
 0x167   :  { %v786_v43 = vadd.f32 %v785_v39, %v685_v53  ;;  %1253 = vmatmul.f32.gmra.mxu0 %v67_v33  ;;  %v587_v57 = vadd.f32 %v586_v37, %v2114_v40  ;;  %v84_v40 = vld [vmem:[%s2926_s0 + $0x230] sm:$0xff]  ;;  %v101_v37 = vld [vmem:[%s2926_s0 + $0x2b8] sm:$0xff] }
 0x168   :  { %v100_v53 = vld [vmem:[%s2926_s0 + $0x2b0] sm:$0xff] }
 0x169   :  { %v2526_v48 = vadd.f32 %v886_v31, %v786_v43  ;;  %953 = vmatmul.f32.gmra.mxu1 %v73_v41  ;;  %1054 = vmatmul.f32.gmra.mxu2 %v74_v27 }
 0x16b   :  { %1155 = vmatmul.f32.gmra.mxu3 %v75_v29 }
 0x16c   :  { %v687_v30 = vpop.f32.mrf.mxu2  ;;  %v889_v55 = vpop.f32.mrf.mxu0 }
 0x16d   :  { %v688_v52 = vadd.f32 %v687_v30, %v587_v57  ;;  %v103_v57 = vld [vmem:[%s2926_s0 + $0x2c8] sm:$0xff] }
 0x16e   :  { %v589_v8 = vpop.f32.mrf.mxu1  ;;  %v788_v62 = vpop.f32.mrf.mxu3 }
 0x16f   :  { %v789_v3 = vadd.f32 %v788_v62, %v688_v52  ;;  %1256 = vmatmul.f32.gmra.mxu0 %v76_v50  ;;  %v590_v7 = vadd.f32 %v589_v8, %v2145_v58  ;;  %v93_v58 = vld [vmem:[%s2926_s0 + $0x278] sm:$0xff]  ;;  %v110_v8 = vld [vmem:[%s2926_s0 + $0x300] sm:$0xff] }
 0x170   :  { %v109_v52 = vld [vmem:[%s2926_s0 + $0x2f8] sm:$0xff] }
 0x171   :  { %v2541_v5 = vadd.f32 %v889_v55, %v789_v3  ;;  %956 = vmatmul.f32.gmra.mxu1 %v82_v63  ;;  %1057 = vmatmul.f32.gmra.mxu2 %v83_v1 }
 0x173   :  { %1158 = vmatmul.f32.gmra.mxu3 %v84_v40 }
 0x174   :  { %v690_v6 = vpop.f32.mrf.mxu2  ;;  %v892_v4 = vpop.f32.mrf.mxu0 }
 0x175   :  { %v691_v9 = vadd.f32 %v690_v6, %v590_v7  ;;  %v112_v7 = vld [vmem:[%s2926_s0 + $0x310] sm:$0xff] }
 0x176   :  { %v592_v15 = vpop.f32.mrf.mxu1  ;;  %v791_v22 = vpop.f32.mrf.mxu3 }
 0x177   :  { %v792_v25 = vadd.f32 %v791_v22, %v691_v9  ;;  %1259 = vmatmul.f32.gmra.mxu0 %v85_v38  ;;  %v593_v46 = vadd.f32 %v592_v15, %v2173_v11  ;;  %v102_v11 = vld [vmem:[%s2926_s0 + $0x2c0] sm:$0xff]  ;;  %v119_v15 = vld [vmem:[%s2926_s0 + $0x348] sm:$0xff] }
 0x178   :  { %v118_v9 = vld [vmem:[%s2926_s0 + $0x340] sm:$0xff] }
 0x179   :  { %v2556_v26 = vadd.f32 %v892_v4, %v792_v25  ;;  %959 = vmatmul.f32.gmra.mxu1 %v91_v23  ;;  %1060 = vmatmul.f32.gmra.mxu2 %v92_v24 }
 0x17b   :  { %1161 = vmatmul.f32.gmra.mxu3 %v93_v58 }
 0x17c   :  { %v693_v28 = vpop.f32.mrf.mxu2  ;;  %v895_v16 = vpop.f32.mrf.mxu0 }
 0x17d   :  { %v694_v59 = vadd.f32 %v693_v28, %v593_v46  ;;  %v121_v46 = vld [vmem:[%s2926_s0 + $0x358] sm:$0xff] }
 0x17e   :  { %v595_v31 = vpop.f32.mrf.mxu1  ;;  %v794_v33 = vpop.f32.mrf.mxu3 }
 0x17f   :  { %v795_v39 = vadd.f32 %v794_v33, %v694_v59  ;;  %1262 = vmatmul.f32.gmra.mxu0 %v94_v51  ;;  %v596_v27 = vadd.f32 %v595_v31, %v2013_v61  ;;  %v111_v61 = vld [vmem:[%s2926_s0 + $0x308] sm:$0xff]  ;;  %v128_v31 = vld [vmem:[%s2926_s0 + $0x390] sm:$0xff] }
 0x180   :  { %v127_v59 = vld [vmem:[%s2926_s0 + $0x388] sm:$0xff] }
 0x181   :  { %v2571_v41 = vadd.f32 %v895_v16, %v795_v39  ;;  %962 = vmatmul.f32.gmra.mxu1 %v100_v53  ;;  %1063 = vmatmul.f32.gmra.mxu2 %v101_v37 }
 0x183   :  { %1164 = vmatmul.f32.gmra.mxu3 %v102_v11 }
 0x184   :  { %v696_v43 = vpop.f32.mrf.mxu2  ;;  %v898_v29 = vpop.f32.mrf.mxu0 }
 0x185   :  { %v697_v30 = vadd.f32 %v696_v43, %v596_v27  ;;  %v130_v27 = vld [vmem:[%s2926_s0 + $0x3a0] sm:$0xff] }
 0x186   :  { %v598_v55 = vpop.f32.mrf.mxu1  ;;  %v797_v50 = vpop.f32.mrf.mxu3 }
 0x187   :  { %v798_v62 = vadd.f32 %v797_v50, %v697_v30  ;;  %1265 = vmatmul.f32.gmra.mxu0 %v103_v57  ;;  %v599_v1 = vadd.f32 %v598_v55, %v2044_v10  ;;  %v120_v10 = vld [vmem:[%s2926_s0 + $0x350] sm:$0xff]  ;;  %v137_v55 = vld [vmem:[%s2926_s0 + $0x3d8] sm:$0xff] }
 0x188   :  { %v136_v30 = vld [vmem:[%s2926_s0 + $0x3d0] sm:$0xff] }
 0x189   :  { %v2586_v63 = vadd.f32 %v898_v29, %v798_v62  ;;  %965 = vmatmul.f32.gmra.mxu1 %v109_v52  ;;  %1066 = vmatmul.f32.gmra.mxu2 %v110_v8 }
 0x18b   :  { %1167 = vmatmul.f32.gmra.mxu3 %v111_v61 }
 0x18c   :  { %v699_v3 = vpop.f32.mrf.mxu2  ;;  %v901_v40 = vpop.f32.mrf.mxu0 }
 0x18d   :  { %v700_v6 = vadd.f32 %v699_v3, %v599_v1  ;;  %v139_v1 = vld [vmem:[%s2926_s0 + $0x3e8] sm:$0xff] }
 0x18e   :  { %v601_v4 = vpop.f32.mrf.mxu1  ;;  %v800_v38 = vpop.f32.mrf.mxu3 }
 0x18f   :  { %v801_v22 = vadd.f32 %v800_v38, %v700_v6  ;;  %1268 = vmatmul.f32.gmra.mxu0 %v112_v7  ;;  %v602_v24 = vadd.f32 %v601_v4, %v2069_v21  ;;  %v129_v21 = vld [vmem:[%s2926_s0 + $0x398] sm:$0xff]  ;;  %v146_v4 = vld [vmem:[%s2926_s0 + $0x420] sm:$0xff] }
 0x190   :  { %v145_v6 = vld [vmem:[%s2926_s0 + $0x418] sm:$0xff] }
 0x191   :  { %v2601_v23 = vadd.f32 %v901_v40, %v801_v22  ;;  %968 = vmatmul.f32.gmra.mxu1 %v118_v9  ;;  %1069 = vmatmul.f32.gmra.mxu2 %v119_v15 }
 0x193   :  { %1170 = vmatmul.f32.gmra.mxu3 %v120_v10 }
 0x194   :  { %v702_v25 = vpop.f32.mrf.mxu2  ;;  %v904_v58 = vpop.f32.mrf.mxu0 }
 0x195   :  { %v703_v28 = vadd.f32 %v702_v25, %v602_v24  ;;  %v148_v24 = vld [vmem:[%s2926_s0 + $0x430] sm:$0xff] }
 0x196   :  { %v604_v16 = vpop.f32.mrf.mxu1  ;;  %v803_v51 = vpop.f32.mrf.mxu3 }
 0x197   :  { %v804_v33 = vadd.f32 %v803_v51, %v703_v28  ;;  %1271 = vmatmul.f32.gmra.mxu0 %v121_v46  ;;  %v605_v37 = vadd.f32 %v604_v16, %v2100_v34  ;;  %v138_v34 = vld [vmem:[%s2926_s0 + $0x3e0] sm:$0xff]  ;;  %v155_v16 = vld [vmem:[%s2926_s0 + $0x468] sm:$0xff] }
 0x198   :  { %v154_v28 = vld [vmem:[%s2926_s0 + $0x460] sm:$0xff] }
 0x199   :  { %v2616_v53 = vadd.f32 %v904_v58, %v804_v33  ;;  %971 = vmatmul.f32.gmra.mxu1 %v127_v59  ;;  %1072 = vmatmul.f32.gmra.mxu2 %v128_v31 }
 0x19b   :  { %1173 = vmatmul.f32.gmra.mxu3 %v129_v21 }
 0x19c   :  { %v705_v39 = vpop.f32.mrf.mxu2  ;;  %v907_v11 = vpop.f32.mrf.mxu0 }
 0x19d   :  { %v706_v43 = vadd.f32 %v705_v39, %v605_v37  ;;  %v157_v37 = vld [vmem:[%s2926_s0 + $0x478] sm:$0xff] }
 0x19e   :  { %v607_v29 = vpop.f32.mrf.mxu1  ;;  %v806_v57 = vpop.f32.mrf.mxu3 }
 0x19f   :  { %v807_v50 = vadd.f32 %v806_v57, %v706_v43  ;;  %1274 = vmatmul.f32.gmra.mxu0 %v130_v27  ;;  %v608_v8 = vadd.f32 %v607_v29, %v2128_v47  ;;  %v147_v47 = vld [vmem:[%s2926_s0 + $0x428] sm:$0xff]  ;;  %v164_v29 = vld [vmem:[%s2926_s0 + $0x4b0] sm:$0xff] }
 0x1a0   :  { %v163_v43 = vld [vmem:[%s2926_s0 + $0x4a8] sm:$0xff] }
 0x1a1   :  { %v2631_v52 = vadd.f32 %v907_v11, %v807_v50  ;;  %974 = vmatmul.f32.gmra.mxu1 %v136_v30  ;;  %1075 = vmatmul.f32.gmra.mxu2 %v137_v55 }
 0x1a3   :  { %1176 = vmatmul.f32.gmra.mxu3 %v138_v34 }
 0x1a4   :  { %v708_v62 = vpop.f32.mrf.mxu2  ;;  %v910_v61 = vpop.f32.mrf.mxu0 }
 0x1a5   :  { %v709_v3 = vadd.f32 %v708_v62, %v608_v8  ;;  %v166_v8 = vld [vmem:[%s2926_s0 + $0x4c0] sm:$0xff] }
 0x1a6   :  { %v610_v40 = vpop.f32.mrf.mxu1  ;;  %v809_v7 = vpop.f32.mrf.mxu3 }
 0x1a7   :  { %v810_v38 = vadd.f32 %v809_v7, %v709_v3  ;;  %1277 = vmatmul.f32.gmra.mxu0 %v139_v1  ;;  %v611_v15 = vadd.f32 %v610_v40, %v2156_v0  ;;  %v156_v0 = vld [vmem:[%s2926_s0 + $0x470] sm:$0xff]  ;;  %v173_v40 = vld [vmem:[%s2926_s0 + $0x4f8] sm:$0xff] }
 0x1a8   :  { %v172_v3 = vld [vmem:[%s2926_s0 + $0x4f0] sm:$0xff] }
 0x1a9   :  { %v2646_v9 = vadd.f32 %v910_v61, %v810_v38  ;;  %977 = vmatmul.f32.gmra.mxu1 %v145_v6  ;;  %1078 = vmatmul.f32.gmra.mxu2 %v146_v4 }
 0x1ab   :  { %1179 = vmatmul.f32.gmra.mxu3 %v147_v47 }
 0x1ac   :  { %v711_v22 = vpop.f32.mrf.mxu2  ;;  %v913_v10 = vpop.f32.mrf.mxu0 }
 0x1ad   :  { %v712_v25 = vadd.f32 %v711_v22, %v611_v15  ;;  %v175_v22 = vld [vmem:[%s2926_s0 + $0x508] sm:$0xff] }
 0x1ae   :  { %v613_v58 = vpop.f32.mrf.mxu1  ;;  %v812_v46 = vpop.f32.mrf.mxu3 }
 0x1af   :  { %v813_v51 = vadd.f32 %v812_v46, %v712_v25  ;;  %1280 = vmatmul.f32.gmra.mxu0 %v148_v24  ;;  %v614_v31 = vadd.f32 %v613_v58, %v2185_v20  ;;  %v165_v20 = vld [vmem:[%s2926_s0 + $0x4b8] sm:$0xff] }
 0x1b0   :  { %v181_v58 = vld [vmem:[%s2926_s0 + $0x538] sm:$0xff] }
 0x1b1   :  { %v2661_v59 = vadd.f32 %v913_v10, %v813_v51  ;;  %980 = vmatmul.f32.gmra.mxu1 %v154_v28  ;;  %1081 = vmatmul.f32.gmra.mxu2 %v155_v16  ;;  %v183_v28 = vld [vmem:[%s2926_s0 + $0x548] sm:$0xff] }
 0x1b3   :  { %1182 = vmatmul.f32.gmra.mxu3 %v156_v0 }
 0x1b4   :  { %v714_v33 = vpop.f32.mrf.mxu2  ;;  %v916_v21 = vpop.f32.mrf.mxu0 }
 0x1b5   :  { %v715_v39 = vadd.f32 %v714_v33, %v614_v31 }
 0x1b6   :  { %v815_v11 = vpop.f32.mrf.mxu3  ;;  %v936_v27 = vpop.f32.mrf.mxu1 }
 0x1b7   :  { %v816_v57 = vadd.f32 %v815_v11, %v715_v39  ;;  %1283 = vmatmul.f32.gmra.mxu0 %v157_v37  ;;  %v937_v55 = vadd.f32 %v936_v27, %v2212_v44  ;;  %v174_v44 = vld [vmem:[%s2926_s0 + $0x500] sm:$0xff] }
 0x1b8   :  { %v190_v27 = vld [vmem:[%s2926_s0 + $0x580] sm:$0xff] }
 0x1b9   :  { %v2676_v30 = vadd.f32 %v916_v21, %v816_v57  ;;  %983 = vmatmul.f32.gmra.mxu1 %v163_v43  ;;  %1084 = vmatmul.f32.gmra.mxu2 %v164_v29  ;;  %v184_v21 = vld [vmem:[%s2926_s0 + $0x550] sm:$0xff] }
 0x1ba   :  { %v192_v29 = vld [vmem:[%s2926_s0 + $0x590] sm:$0xff] }
 0x1bb   :  { %1185 = vmatmul.f32.gmra.mxu3 %v165_v20 }
 0x1bc   :  { %v1037_v50 = vpop.f32.mrf.mxu2  ;;  %v1239_v34 = vpop.f32.mrf.mxu0 }
 0x1bd   :  { %v1038_v62 = vadd.f32 %v1037_v50, %v937_v55 }
 0x1be   :  { %v939_v61 = vpop.f32.mrf.mxu1  ;;  %v1138_v1 = vpop.f32.mrf.mxu3 }
 0x1bf   :  { %v1139_v7 = vadd.f32 %v1138_v1, %v1038_v62  ;;  %1286 = vmatmul.f32.gmra.mxu0 %v166_v8  ;;  %v940_v4 = vadd.f32 %v939_v61, %v2237_v12  ;;  %v182_v12 = vld [vmem:[%s2926_s0 + $0x540] sm:$0xff]  ;;  %v193_v8 = vld [vmem:[%s2926_s0 + $0x598] sm:$0xff] }
 0x1c1   :  { %v1240_v6 = vadd.f32 %v1239_v34, %v1139_v7  ;;  %986 = vmatmul.f32.gmra.mxu1 %v172_v3  ;;  %1087 = vmatmul.f32.gmra.mxu2 %v173_v40  ;;  %v199_v3 = vld [vmem:[%s2926_s0 + $0x5c8] sm:$0xff]  ;;  %v201_v7 = vld [vmem:[%s2926_s0 + $0x5d8] sm:$0xff] }
 0x1c3   :  { %v1323_v38 = vmax.f32 %v1240_v6, 0.0  ;;  %1188 = vmatmul.f32.gmra.mxu3 %v174_v44 }
 0x1c4   :  { %v1040_v47 = vpop.f32.mrf.mxu2  ;;  %v1242_v15 = vpop.f32.mrf.mxu0 }
 0x1c5   :  { %1351 = vst [vmem:[%s2928_s3] sm:$0xff] %v1323_v38  ;;  %v1041_v10 = vadd.f32 %v1040_v47, %v940_v4 }
 0x1c6   :  { %v942_v24 = vpop.f32.mrf.mxu1  ;;  %v1141_v25 = vpop.f32.mrf.mxu3 }
 0x1c7   :  { %v1142_v46 = vadd.f32 %v1141_v25, %v1041_v10  ;;  %1289 = vmatmul.f32.gmra.mxu0 %v175_v22  ;;  %v943_v51 = vadd.f32 %v942_v24, %v2259_v35  ;;  %v191_v35 = vld [vmem:[%s2926_s0 + $0x588] sm:$0xff]  ;;  %v208_v25 = vld [vmem:[%s2926_s0 + $0x610] sm:$0xff] }
 0x1c9   :  { %v1243_v16 = vadd.f32 %v1242_v15, %v1142_v46  ;;  %989 = vmatmul.f32.gmra.mxu1 %v181_v58  ;;  %1090 = vmatmul.f32.gmra.mxu2 %v182_v12  ;;  %v202_v15 = vld [vmem:[%s2926_s0 + $0x5e0] sm:$0xff] }
 0x1ca   :  { %v210_v12 = vld [vmem:[%s2926_s0 + $0x620] sm:$0xff] }
 0x1cb   :  { %v1324_v0 = vmax.f32 %v1243_v16, 0.0  ;;  %1191 = vmatmul.f32.gmra.mxu3 %v183_v28 }
 0x1cc   :  { %v1043_v31 = vpop.f32.mrf.mxu2  ;;  %v1245_v33 = vpop.f32.mrf.mxu0 }
 0x1cd   :  { %1352 = vst [vmem:[%s2928_s3 + $0x8] sm:$0xff] %v1324_v0  ;;  %v1044_v37 = vadd.f32 %v1043_v31, %v943_v51  ;;  %v211_v31 = vld [vmem:[%s2926_s0 + $0x628] sm:$0xff] }
 0x1ce   :  { %v945_v39 = vpop.f32.mrf.mxu1  ;;  %v1144_v11 = vpop.f32.mrf.mxu3 }
 0x1cf   :  { %v1145_v43 = vadd.f32 %v1144_v11, %v1044_v37  ;;  %1292 = vmatmul.f32.gmra.mxu0 %v184_v21  ;;  %v946_v20 = vadd.f32 %v945_v39, %v2281_v60  ;;  %v200_v60 = vld [vmem:[%s2926_s0 + $0x5d0] sm:$0xff]  ;;  %v217_v39 = vld [vmem:[%s2926_s0 + $0x658] sm:$0xff] }
 0x1d1   :  { %v1246_v57 = vadd.f32 %v1245_v33, %v1145_v43  ;;  %992 = vmatmul.f32.gmra.mxu1 %v190_v27  ;;  %1093 = vmatmul.f32.gmra.mxu2 %v191_v35  ;;  %v219_v27 = vld [vmem:[%s2926_s0 + $0x668] sm:$0xff] }
 0x1d3   :  { %v1325_v55 = vmax.f32 %v1246_v57, 0.0  ;;  %1194 = vmatmul.f32.gmra.mxu3 %v192_v29 }
 0x1d4   :  { %v1046_v50 = vpop.f32.mrf.mxu2  ;;  %v1248_v34 = vpop.f32.mrf.mxu0 }
 0x1d5   :  { %1353 = vst [vmem:[%s2928_s3 + $0x10] sm:$0xff] %v1325_v55  ;;  %v1047_v62 = vadd.f32 %v1046_v50, %v946_v20  ;;  %v220_v55 = vld [vmem:[%s2926_s0 + $0x670] sm:$0xff] }
 0x1d6   :  { %v948_v61 = vpop.f32.mrf.mxu1  ;;  %v1147_v1 = vpop.f32.mrf.mxu3 }
 0x1d7   :  { %v1148_v40 = vadd.f32 %v1147_v1, %v1047_v62  ;;  %1295 = vmatmul.f32.gmra.mxu0 %v193_v8  ;;  %v949_v6 = vadd.f32 %v948_v61, %v2306_v14  ;;  %v209_v14 = vld [vmem:[%s2926_s0 + $0x618] sm:$0xff]  ;;  %v226_v62 = vld [vmem:[%s2926_s0 + $0x6a0] sm:$0xff]  ;;  %v228_v1 = vld [vmem:[%s2926_s0 + $0x6b0] sm:$0xff] }
 0x1d9   :  { %v1249_v44 = vadd.f32 %v1248_v34, %v1148_v40  ;;  %995 = vmatmul.f32.gmra.mxu1 %v199_v3  ;;  %1096 = vmatmul.f32.gmra.mxu2 %v200_v60 }
 0x1db   :  { %v1326_v4 = vmax.f32 %v1249_v44, 0.0  ;;  %1197 = vmatmul.f32.gmra.mxu3 %v201_v7 }
 0x1dc   :  { %v1049_v38 = vpop.f32.mrf.mxu2  ;;  %v1251_v47 = vpop.f32.mrf.mxu0 }
 0x1dd   :  { %1354 = vst [vmem:[%s2928_s3 + $0x18] sm:$0xff] %v1326_v4  ;;  %v1050_v22 = vadd.f32 %v1049_v38, %v949_v6  ;;  %v229_v6 = vld [vmem:[%s2926_s0 + $0x6b8] sm:$0xff] }
 0x1de   :  { %v951_v10 = vpop.f32.mrf.mxu1  ;;  %v1150_v24 = vpop.f32.mrf.mxu3 }
 0x1df   :  { %v1151_v58 = vadd.f32 %v1150_v24, %v1050_v22  ;;  %1298 = vmatmul.f32.gmra.mxu0 %v202_v15  ;;  %v952_v28 = vadd.f32 %v951_v10, %v2328_v45  ;;  %v218_v45 = vld [vmem:[%s2926_s0 + $0x660] sm:$0xff]  ;;  %v235_v15 = vld [vmem:[%s2926_s0 + $0x6e8] sm:$0xff]  ;;  %v237_v10 = vld [vmem:[%s2926_s0 + $0x6f8] sm:$0xff] }
 0x1e1   :  { %v1252_v46 = vadd.f32 %v1251_v47, %v1151_v58  ;;  %998 = vmatmul.f32.gmra.mxu1 %v208_v25  ;;  %1099 = vmatmul.f32.gmra.mxu2 %v209_v14 }
 0x1e3   :  { %v1327_v16 = vmax.f32 %v1252_v46, 0.0  ;;  %1200 = vmatmul.f32.gmra.mxu3 %v210_v12  ;;  %v238_v46 = vld [vmem:[%s2926_s0 + $0x700] sm:$0xff] }
 0x1e4   :  { %v1052_v51 = vpop.f32.mrf.mxu2  ;;  %v1254_v0 = vpop.f32.mrf.mxu0 }
 0x1e5   :  { %1355 = vst [vmem:[%s2928_s3 + $0x20] sm:$0xff] %v1327_v16  ;;  %v1053_v33 = vadd.f32 %v1052_v51, %v952_v28 }
 0x1e6   :  { %v954_v21 = vpop.f32.mrf.mxu1  ;;  %v1153_v37 = vpop.f32.mrf.mxu3 }
 0x1e7   :  { %v1154_v11 = vadd.f32 %v1153_v37, %v1053_v33  ;;  %1301 = vmatmul.f32.gmra.mxu0 %v211_v31  ;;  %v955_v43 = vadd.f32 %v954_v21, %v2353_v13  ;;  %v227_v13 = vld [vmem:[%s2926_s0 + $0x6a8] sm:$0xff]  ;;  %v246_v33 = vld [vmem:[%s2926_s0 + $0x740] sm:$0xff] }
 0x1e9   :  { %v1255_v35 = vadd.f32 %v1254_v0, %v1154_v11  ;;  %1001 = vmatmul.f32.gmra.mxu1 %v217_v39  ;;  %1102 = vmatmul.f32.gmra.mxu2 %v218_v45  ;;  %v244_v0 = vld [vmem:[%s2926_s0 + $0x730] sm:$0xff] }
 0x1eb   :  { %v1328_v29 = vmax.f32 %v1255_v35, 0.0  ;;  %1203 = vmatmul.f32.gmra.mxu3 %v219_v27  ;;  %v247_v27 = vld [vmem:[%s2926_s0 + $0x748] sm:$0xff] }
 0x1ec   :  { %v1055_v57 = vpop.f32.mrf.mxu2  ;;  %v1257_v20 = vpop.f32.mrf.mxu0 }
 0x1ed   :  { %1356 = vst [vmem:[%s2928_s3 + $0x28] sm:$0xff] %v1328_v29  ;;  %v1056_v50 = vadd.f32 %v1055_v57, %v955_v43  ;;  %v253_v57 = vld [vmem:[%s2926_s0 + $0x778] sm:$0xff] }
 0x1ee   :  { %v957_v34 = vpop.f32.mrf.mxu1  ;;  %v1156_v8 = vpop.f32.mrf.mxu3 }
 0x1ef   :  { %v1157_v61 = vadd.f32 %v1156_v8, %v1056_v50  ;;  %1304 = vmatmul.f32.gmra.mxu0 %v220_v55  ;;  %v958_v60 = vadd.f32 %v957_v34, %v2372_v36  ;;  %v236_v36 = vld [vmem:[%s2926_s0 + $0x6f0] sm:$0xff]  ;;  %v255_v55 = vld [vmem:[%s2926_s0 + $0x788] sm:$0xff] }
 0x1f1   :  { %v1258_v3 = vadd.f32 %v1257_v20, %v1157_v61  ;;  %1004 = vmatmul.f32.gmra.mxu1 %v226_v62  ;;  %1105 = vmatmul.f32.gmra.mxu2 %v227_v13  ;;  %v256_v61 = vld [vmem:[%s2926_s0 + $0x790] sm:$0xff] }
 0x1f3   :  { %v1329_v40 = vmax.f32 %v1258_v3, 0.0  ;;  %1206 = vmatmul.f32.gmra.mxu3 %v228_v1 }
 0x1f4   :  { %v1058_v7 = vpop.f32.mrf.mxu2  ;;  %v1260_v44 = vpop.f32.mrf.mxu0 }
 0x1f5   :  { %1357 = vst [vmem:[%s2928_s3 + $0x30] sm:$0xff] %v1329_v40  ;;  %v1059_v4 = vadd.f32 %v1058_v7, %v958_v60  ;;  %v262_v40 = vld [vmem:[%s2926_s0 + $0x7c0] sm:$0xff] }
 0x1f6   :  { %v960_v38 = vpop.f32.mrf.mxu1  ;;  %v1159_v47 = vpop.f32.mrf.mxu3 }
 0x1f7   :  { %v1160_v22 = vadd.f32 %v1159_v47, %v1059_v4  ;;  %1307 = vmatmul.f32.gmra.mxu0 %v229_v6  ;;  %v961_v25 = vadd.f32 %v960_v38, %v2388_v2  ;;  %v245_v2 = vld [vmem:[%s2926_s0 + $0x738] sm:$0xff] }
 0x1f9   :  { %v1261_v24 = vadd.f32 %v1260_v44, %v1160_v22  ;;  %1007 = vmatmul.f32.gmra.mxu1 %v235_v15  ;;  %1108 = vmatmul.f32.gmra.mxu2 %v236_v36  ;;  %v264_v44 = vld [vmem:[%s2926_s0 + $0x7d0] sm:$0xff]  ;;  %v265_v36 = vld [vmem:[%s2926_s0 + $0x7d8] sm:$0xff] }
 0x1fb   :  { %v1330_v14 = vmax.f32 %v1261_v24, 0.0  ;;  %1209 = vmatmul.f32.gmra.mxu3 %v237_v10 }
 0x1fc   :  { %v1061_v58 = vpop.f32.mrf.mxu2  ;;  %v1263_v12 = vpop.f32.mrf.mxu0 }
 0x1fd   :  { %1358 = vst [vmem:[%s2928_s3 + $0x38] sm:$0xff] %v1330_v14  ;;  %v1062_v28 = vadd.f32 %v1061_v58, %v961_v25 }
 0x1fe   :  { %v963_v16 = vpop.f32.mrf.mxu1  ;;  %v1162_v51 = vpop.f32.mrf.mxu3 }
 0x1ff   :  { %v1163_v31 = vadd.f32 %v1162_v51, %v1062_v28  ;;  %1310 = vmatmul.f32.gmra.mxu0 %v238_v46  ;;  %v964_v37 = vadd.f32 %v963_v16, %v2404_v18  ;;  %v254_v18 = vld [vmem:[%s2926_s0 + $0x780] sm:$0xff] }
 0x201   :  { %v1264_v21 = vadd.f32 %v1263_v12, %v1163_v31  ;;  %1010 = vmatmul.f32.gmra.mxu1 %v244_v0  ;;  %1111 = vmatmul.f32.gmra.mxu2 %v245_v2 }
 0x203   :  { %v1331_v39 = vmax.f32 %v1264_v21, 0.0  ;;  %1212 = vmatmul.f32.gmra.mxu3 %v246_v33 }
 0x204   :  { %v1064_v45 = vpop.f32.mrf.mxu2  ;;  %v1266_v11 = vpop.f32.mrf.mxu0 }
 0x205   :  { %1359 = vst [vmem:[%s2928_s3 + $0x40] sm:$0xff] %v1331_v39  ;;  %v1065_v35 = vadd.f32 %v1064_v45, %v964_v37 }
 0x206   :  { %v966_v43 = vpop.f32.mrf.mxu1  ;;  %v1165_v29 = vpop.f32.mrf.mxu3 }
 0x207   :  { %v1166_v20 = vadd.f32 %v1165_v29, %v1065_v35  ;;  %1313 = vmatmul.f32.gmra.mxu0 %v247_v27  ;;  %v967_v34 = vadd.f32 %v966_v43, %v2420_v54  ;;  %v263_v54 = vld [vmem:[%s2926_s0 + $0x7c8] sm:$0xff] }
 0x209   :  { %v1267_v50 = vadd.f32 %v1266_v11, %v1166_v20  ;;  %1013 = vmatmul.f32.gmra.mxu1 %v253_v57  ;;  %1114 = vmatmul.f32.gmra.mxu2 %v254_v18 }
 0x20b   :  { %v1332_v8 = vmax.f32 %v1267_v50, 0.0  ;;  %1215 = vmatmul.f32.gmra.mxu3 %v255_v55 }
 0x20c   :  { %v1067_v62 = vpop.f32.mrf.mxu2  ;;  %v1269_v13 = vpop.f32.mrf.mxu0 }
 0x20d   :  { %1360 = vst [vmem:[%s2928_s3 + $0x48] sm:$0xff] %v1332_v8  ;;  %v1068_v1 = vadd.f32 %v1067_v62, %v967_v34 }
 0x20e   :  { %v969_v3 = vpop.f32.mrf.mxu1  ;;  %v1168_v60 = vpop.f32.mrf.mxu3 }
 0x20f   :  { %v1169_v7 = vadd.f32 %v1168_v60, %v1068_v1  ;;  %1316 = vmatmul.f32.gmra.mxu0 %v256_v61  ;;  %v970_v4 = vadd.f32 %v969_v3, %v2436_v56 }
 0x211   :  { %v1270_v6 = vadd.f32 %v1269_v13, %v1169_v7  ;;  %1016 = vmatmul.f32.gmra.mxu1 %v262_v40  ;;  %1117 = vmatmul.f32.gmra.mxu2 %v263_v54 }
 0x213   :  { %v1333_v38 = vmax.f32 %v1270_v6, 0.0  ;;  %1218 = vmatmul.f32.gmra.mxu3 %v264_v44 }
 0x214   :  { %v1070_v47 = vpop.f32.mrf.mxu2  ;;  %v1272_v15 = vpop.f32.mrf.mxu0 }
 0x215   :  { %1361 = vst [vmem:[%s2928_s3 + $0x50] sm:$0xff] %v1333_v38  ;;  %v1071_v22 = vadd.f32 %v1070_v47, %v970_v4 }
 0x216   :  { %v972_v10 = vpop.f32.mrf.mxu1  ;;  %v1171_v24 = vpop.f32.mrf.mxu3 }
 0x217   :  { %v1172_v25 = vadd.f32 %v1171_v24, %v1071_v22  ;;  %1319 = vmatmul.f32.gmra.mxu0 %v265_v36  ;;  %v973_v56 = vadd.f32 %v972_v10, %v2452_v19 }
 0x219   :  { %v1273_v14 = vadd.f32 %v1272_v15, %v1172_v25 }
 0x21b   :  { %v1334_v58 = vmax.f32 %v1273_v14, 0.0 }
 0x21c   :  { %v1073_v12 = vpop.f32.mrf.mxu2  ;;  %v1275_v46 = vpop.f32.mrf.mxu0 }
 0x21d   :  { %1362 = vst [vmem:[%s2928_s3 + $0x58] sm:$0xff] %v1334_v58  ;;  %v1074_v28 = vadd.f32 %v1073_v12, %v973_v56 }
 0x21e   :  { %v975_v16 = vpop.f32.mrf.mxu1  ;;  %v1174_v51 = vpop.f32.mrf.mxu3 }
 0x21f   :  { %v1175_v0 = vadd.f32 %v1174_v51, %v1074_v28  ;;  %v976_v31 = vadd.f32 %v975_v16, %v2466_v32 }
 0x221   :  { %v1276_v2 = vadd.f32 %v1275_v46, %v1175_v0 }
 0x223   :  { %v1335_v33 = vmax.f32 %v1276_v2, 0.0 }
 0x224   :  { %v1076_v21 = vpop.f32.mrf.mxu2  ;;  %v1278_v37 = vpop.f32.mrf.mxu0 }
 0x225   :  { %1363 = vst [vmem:[%s2928_s3 + $0x60] sm:$0xff] %v1335_v33  ;;  %v1077_v19 = vadd.f32 %v1076_v21, %v976_v31 }
 0x226   :  { %v978_v39 = vpop.f32.mrf.mxu1  ;;  %v1177_v45 = vpop.f32.mrf.mxu3 }
 0x227   :  { %v1178_v11 = vadd.f32 %v1177_v45, %v1077_v19  ;;  %v979_v35 = vadd.f32 %v978_v39, %v2481_v49 }
 0x229   :  { %v1279_v27 = vadd.f32 %v1278_v37, %v1178_v11 }
 0x22b   :  { %v1336_v43 = vmax.f32 %v1279_v27, 0.0 }
 0x22c   :  { %v1079_v29 = vpop.f32.mrf.mxu2  ;;  %v1281_v57 = vpop.f32.mrf.mxu0 }
 0x22d   :  { %1364 = vst [vmem:[%s2928_s3 + $0x68] sm:$0xff] %v1336_v43  ;;  %v1080_v32 = vadd.f32 %v1079_v29, %v979_v35 }
 0x22e   :  { %v981_v18 = vpop.f32.mrf.mxu1  ;;  %v1180_v20 = vpop.f32.mrf.mxu3 }
 0x22f   :  { %v1181_v55 = vadd.f32 %v1180_v20, %v1080_v32  ;;  %v982_v34 = vadd.f32 %v981_v18, %v2496_v42 }
 0x231   :  { %v1282_v50 = vadd.f32 %v1281_v57, %v1181_v55 }
 0x233   :  { %v1337_v8 = vmax.f32 %v1282_v50, 0.0 }
 0x234   :  { %v1082_v62 = vpop.f32.mrf.mxu2  ;;  %v1284_v13 = vpop.f32.mrf.mxu0 }
 0x235   :  { %1365 = vst [vmem:[%s2928_s3 + $0x70] sm:$0xff] %v1337_v8  ;;  %v1083_v49 = vadd.f32 %v1082_v62, %v982_v34 }
 0x236   :  { %v984_v61 = vpop.f32.mrf.mxu1  ;;  %v1183_v1 = vpop.f32.mrf.mxu3 }
 0x237   :  { %v1184_v3 = vadd.f32 %v1183_v1, %v1083_v49  ;;  %v985_v40 = vadd.f32 %v984_v61, %v2511_v17 }
 0x239   :  { %v1285_v60 = vadd.f32 %v1284_v13, %v1184_v3 }
 0x23b   :  { %v1338_v54 = vmax.f32 %v1285_v60, 0.0 }
 0x23c   :  { %v1085_v7 = vpop.f32.mrf.mxu2  ;;  %v1287_v44 = vpop.f32.mrf.mxu0 }
 0x23d   :  { %1366 = vst [vmem:[%s2928_s3 + $0x78] sm:$0xff] %v1338_v54  ;;  %v1086_v42 = vadd.f32 %v1085_v7, %v985_v40 }
 0x23e   :  { %v987_v6 = vpop.f32.mrf.mxu1  ;;  %v1186_v4 = vpop.f32.mrf.mxu3 }
 0x23f   :  { %v1187_v38 = vadd.f32 %v1186_v4, %v1086_v42  ;;  %v988_v15 = vadd.f32 %v987_v6, %v2526_v48 }
 0x241   :  { %v1288_v47 = vadd.f32 %v1287_v44, %v1187_v38 }
 0x243   :  { %v1339_v36 = vmax.f32 %v1288_v47, 0.0 }
 0x244   :  { %v1088_v22 = vpop.f32.mrf.mxu2  ;;  %v1290_v10 = vpop.f32.mrf.mxu0 }
 0x245   :  { %1367 = vst [vmem:[%s2928_s3 + $0x80] sm:$0xff] %v1339_v36  ;;  %v1089_v17 = vadd.f32 %v1088_v22, %v988_v15 }
 0x246   :  { %v990_v24 = vpop.f32.mrf.mxu1  ;;  %v1189_v25 = vpop.f32.mrf.mxu3 }
 0x247   :  { %v1190_v14 = vadd.f32 %v1189_v25, %v1089_v17  ;;  %v991_v58 = vadd.f32 %v990_v24, %v2541_v5 }
 0x249   :  { %v1291_v56 = vadd.f32 %v1290_v10, %v1190_v14 }
 0x24b   :  { %v1340_v12 = vmax.f32 %v1291_v56, 0.0 }
 0x24c   :  { %v1091_v46 = vpop.f32.mrf.mxu2  ;;  %v1293_v28 = vpop.f32.mrf.mxu0 }
 0x24d   :  { %1368 = vst [vmem:[%s2928_s3 + $0x88] sm:$0xff] %v1340_v12  ;;  %v1092_v48 = vadd.f32 %v1091_v46, %v991_v58 }
 0x24e   :  { %v993_v16 = vpop.f32.mrf.mxu1  ;;  %v1192_v51 = vpop.f32.mrf.mxu3 }
 0x24f   :  { %v1193_v0 = vadd.f32 %v1192_v51, %v1092_v48  ;;  %v994_v31 = vadd.f32 %v993_v16, %v2556_v26 }
 0x251   :  { %v1294_v2 = vadd.f32 %v1293_v28, %v1193_v0 }
 0x253   :  { %v1341_v33 = vmax.f32 %v1294_v2, 0.0 }
 0x254   :  { %v1094_v21 = vpop.f32.mrf.mxu2  ;;  %v1296_v37 = vpop.f32.mrf.mxu0 }
 0x255   :  { %1369 = vst [vmem:[%s2928_s3 + $0x90] sm:$0xff] %v1341_v33  ;;  %v1095_v5 = vadd.f32 %v1094_v21, %v994_v31 }
 0x256   :  { %v996_v19 = vpop.f32.mrf.mxu1  ;;  %v1195_v39 = vpop.f32.mrf.mxu3 }
 0x257   :  { %v1196_v45 = vadd.f32 %v1195_v39, %v1095_v5  ;;  %v997_v27 = vadd.f32 %v996_v19, %v2571_v41 }
 0x259   :  { %v1297_v11 = vadd.f32 %v1296_v37, %v1196_v45 }
 0x25b   :  { %v1342_v35 = vmax.f32 %v1297_v11, 0.0 }
 0x25c   :  { %v1097_v43 = vpop.f32.mrf.mxu2  ;;  %v1299_v29 = vpop.f32.mrf.mxu0 }
 0x25d   :  { %1370 = vst [vmem:[%s2928_s3 + $0x98] sm:$0xff] %v1342_v35  ;;  %v1098_v26 = vadd.f32 %v1097_v43, %v997_v27 }
 0x25e   :  { %v999_v57 = vpop.f32.mrf.mxu1  ;;  %v1198_v32 = vpop.f32.mrf.mxu3 }
 0x25f   :  { %v1199_v18 = vadd.f32 %v1198_v32, %v1098_v26  ;;  %v1000_v55 = vadd.f32 %v999_v57, %v2586_v63 }
 0x261   :  { %v1300_v20 = vadd.f32 %v1299_v29, %v1199_v18 }
 0x263   :  { %v1343_v50 = vmax.f32 %v1300_v20, 0.0 }
 0x264   :  { %v1100_v34 = vpop.f32.mrf.mxu2  ;;  %v1302_v8 = vpop.f32.mrf.mxu0 }
 0x265   :  { %1371 = vst [vmem:[%s2928_s3 + $0xa0] sm:$0xff] %v1343_v50  ;;  %v1101_v41 = vadd.f32 %v1100_v34, %v1000_v55 }
 0x266   :  { %v1002_v62 = vpop.f32.mrf.mxu1  ;;  %v1201_v13 = vpop.f32.mrf.mxu3 }
 0x267   :  { %v1202_v49 = vadd.f32 %v1201_v13, %v1101_v41  ;;  %v1003_v1 = vadd.f32 %v1002_v62, %v2601_v23 }
 0x269   :  { %v1303_v61 = vadd.f32 %v1302_v8, %v1202_v49 }
 0x26b   :  { %v1344_v3 = vmax.f32 %v1303_v61, 0.0 }
 0x26c   :  { %v1103_v60 = vpop.f32.mrf.mxu2  ;;  %v1305_v40 = vpop.f32.mrf.mxu0 }
 0x26d   :  { %1372 = vst [vmem:[%s2928_s3 + $0xa8] sm:$0xff] %v1344_v3  ;;  %v1104_v63 = vadd.f32 %v1103_v60, %v1003_v1 }
 0x26e   :  { %v1005_v54 = vpop.f32.mrf.mxu1  ;;  %v1204_v7 = vpop.f32.mrf.mxu3 }
 0x26f   :  { %v1205_v44 = vadd.f32 %v1204_v7, %v1104_v63  ;;  %v1006_v6 = vadd.f32 %v1005_v54, %v2616_v53 }
 0x271   :  { %v1306_v42 = vadd.f32 %v1305_v40, %v1205_v44 }
 0x273   :  { %v1345_v4 = vmax.f32 %v1306_v42, 0.0 }
 0x274   :  { %v1106_v38 = vpop.f32.mrf.mxu2  ;;  %v1308_v47 = vpop.f32.mrf.mxu0 }
 0x275   :  { %1373 = vst [vmem:[%s2928_s3 + $0xb0] sm:$0xff] %v1345_v4  ;;  %v1107_v23 = vadd.f32 %v1106_v38, %v1006_v6 }
 0x276   :  { %v1008_v15 = vpop.f32.mrf.mxu1  ;;  %v1207_v36 = vpop.f32.mrf.mxu3 }
 0x277   :  { %v1208_v22 = vadd.f32 %v1207_v36, %v1107_v23  ;;  %v1009_v17 = vadd.f32 %v1008_v15, %v2631_v52 }
 0x279   :  { %v1309_v10 = vadd.f32 %v1308_v47, %v1208_v22 }
 0x27b   :  { %v1346_v24 = vmax.f32 %v1309_v10, 0.0 }
 0x27c   :  { %v1109_v25 = vpop.f32.mrf.mxu2  ;;  %v1311_v14 = vpop.f32.mrf.mxu0 }
 0x27d   :  { %1374 = vst [vmem:[%s2928_s3 + $0xb8] sm:$0xff] %v1346_v24  ;;  %v1110_v53 = vadd.f32 %v1109_v25, %v1009_v17 }
 0x27e   :  { %v1011_v56 = vpop.f32.mrf.mxu1  ;;  %v1210_v58 = vpop.f32.mrf.mxu3 }
 0x27f   :  { %v1211_v12 = vadd.f32 %v1210_v58, %v1110_v53  ;;  %v1012_v28 = vadd.f32 %v1011_v56, %v2646_v9 }
 0x281   :  { %v1312_v46 = vadd.f32 %v1311_v14, %v1211_v12 }
 0x283   :  { %v1347_v48 = vmax.f32 %v1312_v46, 0.0 }
 0x284   :  { %v1112_v16 = vpop.f32.mrf.mxu2  ;;  %v1314_v51 = vpop.f32.mrf.mxu0 }
 0x285   :  { %1375 = vst [vmem:[%s2928_s3 + $0xc0] sm:$0xff] %v1347_v48  ;;  %v1113_v52 = vadd.f32 %v1112_v16, %v1012_v28 }
 0x286   :  { %v1014_v0 = vpop.f32.mrf.mxu1  ;;  %v1213_v2 = vpop.f32.mrf.mxu3 }
 0x287   :  { %v1214_v31 = vadd.f32 %v1213_v2, %v1113_v52  ;;  %v1015_v21 = vadd.f32 %v1014_v0, %v2661_v59 }
 0x289   :  { %v1315_v33 = vadd.f32 %v1314_v51, %v1214_v31 }
 0x28b   :  { %v1348_v37 = vmax.f32 %v1315_v33, 0.0 }
 0x28c   :  { %v1115_v5 = vpop.f32.mrf.mxu2  ;;  %v1317_v19 = vpop.f32.mrf.mxu0 }
 0x28d   :  { %1376 = vst [vmem:[%s2928_s3 + $0xc8] sm:$0xff] %v1348_v37  ;;  %v1116_v9 = vadd.f32 %v1115_v5, %v1015_v21 }
 0x28e   :  { %v1216_v39 = vpop.f32.mrf.mxu3  ;;  %v1017_v11 = vpop.f32.mrf.mxu1 }
 0x28f   :  { %v1217_v45 = vadd.f32 %v1216_v39, %v1116_v9  ;;  %v1018_v35 = vadd.f32 %v1017_v11, %v2676_v30 }
 0x291   :  { %v1318_v27 = vadd.f32 %v1317_v19, %v1217_v45 }
 0x293   :  { %v1349_v43 = vmax.f32 %v1318_v27, 0.0 }
 0x294   :  { %v1118_v29 = vpop.f32.mrf.mxu2  ;;  %v1320_v57 = vpop.f32.mrf.mxu0 }
 0x295   :  { %1377 = vst [vmem:[%s2928_s3 + $0xd0] sm:$0xff] %v1349_v43  ;;  %v1119_v59 = vadd.f32 %v1118_v29, %v1018_v35 }
 0x296   :  { %v1219_v26 = vpop.f32.mrf.mxu3 }
 0x297   :  { %v1220_v32 = vadd.f32 %v1219_v26, %v1119_v59 }
 0x299   :  { %v1321_v18 = vadd.f32 %v1320_v57, %v1220_v32 }
 0x29b   :  { %v1350_v20 = vmax.f32 %v1321_v18, 0.0 }
 0x29d   :  { %1378 = vst [vmem:[%s2928_s3 + $0xd8] sm:$0xff] %v1350_v20 }

// kernel: forward.6
= control target key start
LH: loop header
LB: loop body
LE: loop exit
PB: predicated region body
PF: predicated region fallthrough
CT: control target
= control target key end

     0   :  { %s1423_s1 = inlined_call_operand.vmem [shape: f32[1152,128], index: 1, kind: input, shape index: {}]   ;;  %s1424_s0 = inlined_call_operand.vmem [shape: f32[64,1152], index: 0, kind: input, shape index: {}]   ;;  %s1425_s2 = inlined_call_operand.vmem [shape: f32[1,128], index: 2, kind: input, shape index: {}]   ;;  %s1426_s3 = inlined_call_operand.vmem [shape: f32[64,128], index: 3, kind: output, shape index: {}]  }
   0x1   :  { %v101_v0 = vld [vmem:[%s1423_s1 + $0x78] sm:$0xff]  ;;  %v100_v1 = vld [vmem:[%s1423_s1 + $0x70] sm:$0xff]  ;;  %v99_v2 = vld [vmem:[%s1423_s1 + $0x68] sm:$0xff] }
   0x2   :  { %623 = vmatpush.msra.mxu1 %v101_v0  ;;  %234 = vmatpush.msra.mxu0 %v101_v0  ;;  %v133_v3 = vld [vmem:[%s1423_s1 + $0x178] sm:$0xff]  ;;  %v132_v4 = vld [vmem:[%s1423_s1 + $0x170] sm:$0xff]  ;;  %v98_v5 = vld [vmem:[%s1423_s1 + $0x60] sm:$0xff] }
   0x3   :  { %316 = vmatpush.msra.mxu2 %v133_v3  ;;  %v131_v6 = vld [vmem:[%s1423_s1 + $0x168] sm:$0xff]  ;;  %v97_v7 = vld [vmem:[%s1423_s1 + $0x58] sm:$0xff]  ;;  %v130_v8 = vld [vmem:[%s1423_s1 + $0x160] sm:$0xff] }
   0x4   :  { %624 = vmatpush.msra.mxu1 %v100_v1  ;;  %235 = vmatpush.msra.mxu0 %v100_v1  ;;  %v96_v9 = vld [vmem:[%s1423_s1 + $0x50] sm:$0xff]  ;;  %v149_v10 = vld [vmem:[%s1423_s1 + $0x1f8] sm:$0xff]  ;;  %v95_v13 = vld [vmem:[%s1423_s1 + $0x48] sm:$0xff] }
   0x5   :  { %317 = vmatpush.msra.mxu2 %v132_v4  ;;  %v129_v11 = vld [vmem:[%s1423_s1 + $0x158] sm:$0xff]  ;;  %v148_v12 = vld [vmem:[%s1423_s1 + $0x1f0] sm:$0xff]  ;;  %357 = vmatpush.msra.mxu3 %v149_v10  ;;  %v147_v15 = vld [vmem:[%s1423_s1 + $0x1e8] sm:$0xff] }
   0x6   :  { %625 = vmatpush.msra.mxu1 %v99_v2  ;;  %236 = vmatpush.msra.mxu0 %v99_v2  ;;  %v128_v14 = vld [vmem:[%s1423_s1 + $0x150] sm:$0xff]  ;;  %v94_v16 = vld [vmem:[%s1423_s1 + $0x40] sm:$0xff]  ;;  %v127_v17 = vld [vmem:[%s1423_s1 + $0x148] sm:$0xff] }
   0x7   :  { %318 = vmatpush.msra.mxu2 %v131_v6  ;;  %358 = vmatpush.msra.mxu3 %v148_v12  ;;  %v146_v18 = vld [vmem:[%s1423_s1 + $0x1e0] sm:$0xff]  ;;  %v93_v19 = vld [vmem:[%s1423_s1 + $0x38] sm:$0xff]  ;;  %v92_v22 = vld [vmem:[%s1423_s1 + $0x30] sm:$0xff] }
   0x8   :  { %626 = vmatpush.msra.mxu1 %v98_v5  ;;  %237 = vmatpush.msra.mxu0 %v98_v5  ;;  %v126_v20 = vld [vmem:[%s1423_s1 + $0x140] sm:$0xff]  ;;  %v145_v21 = vld [vmem:[%s1423_s1 + $0x1d8] sm:$0xff]  ;;  %v144_v24 = vld [vmem:[%s1423_s1 + $0x1d0] sm:$0xff] }
   0x9   :  { %319 = vmatpush.msra.mxu2 %v130_v8  ;;  %359 = vmatpush.msra.mxu3 %v147_v15  ;;  %v125_v23 = vld [vmem:[%s1423_s1 + $0x138] sm:$0xff]  ;;  %v91_v25 = vld [vmem:[%s1423_s1 + $0x28] sm:$0xff]  ;;  %v124_v26 = vld [vmem:[%s1423_s1 + $0x130] sm:$0xff] }
   0xa   :  { %627 = vmatpush.msra.mxu1 %v97_v7  ;;  %238 = vmatpush.msra.mxu0 %v97_v7  ;;  %v143_v27 = vld [vmem:[%s1423_s1 + $0x1c8] sm:$0xff]  ;;  %v90_v28 = vld [vmem:[%s1423_s1 + $0x20] sm:$0xff]  ;;  %v89_v31 = vld [vmem:[%s1423_s1 + $0x18] sm:$0xff] }
   0xb   :  { %320 = vmatpush.msra.mxu2 %v129_v11  ;;  %360 = vmatpush.msra.mxu3 %v146_v18  ;;  %v123_v29 = vld [vmem:[%s1423_s1 + $0x128] sm:$0xff]  ;;  %v142_v30 = vld [vmem:[%s1423_s1 + $0x1c0] sm:$0xff]  ;;  %v141_v33 = vld [vmem:[%s1423_s1 + $0x1b8] sm:$0xff] }
   0xc   :  { %628 = vmatpush.msra.mxu1 %v96_v9  ;;  %239 = vmatpush.msra.mxu0 %v96_v9  ;;  %v122_v32 = vld [vmem:[%s1423_s1 + $0x120] sm:$0xff]  ;;  %v88_v34 = vld [vmem:[%s1423_s1 + $0x10] sm:$0xff]  ;;  %v121_v35 = vld [vmem:[%s1423_s1 + $0x118] sm:$0xff] }
   0xd   :  { %321 = vmatpush.msra.mxu2 %v128_v14  ;;  %361 = vmatpush.msra.mxu3 %v145_v21  ;;  %v140_v36 = vld [vmem:[%s1423_s1 + $0x1b0] sm:$0xff]  ;;  %v87_v37 = vld [vmem:[%s1423_s1 + $0x8] sm:$0xff]  ;;  %v86_v40 = vld [vmem:[%s1423_s1] sm:$0xff] }
   0xe   :  { %629 = vmatpush.msra.mxu1 %v95_v13  ;;  %240 = vmatpush.msra.mxu0 %v95_v13  ;;  %v120_v38 = vld [vmem:[%s1423_s1 + $0x110] sm:$0xff]  ;;  %v139_v39 = vld [vmem:[%s1423_s1 + $0x1a8] sm:$0xff]  ;;  %v50_v41 = vld [vmem:[%s1424_s0 + $0x120] sm:$0xff] }
   0xf   :  { %322 = vmatpush.msra.mxu2 %v127_v17  ;;  %362 = vmatpush.msra.mxu3 %v144_v24  ;;  %v14_v42 = vld [vmem:[%s1424_s0] sm:$0xff]  ;;  %v117_v43 = vld [vmem:[%s1423_s1 + $0xf8] sm:$0xff]  ;;  %v119_v45 = vld [vmem:[%s1423_s1 + $0x108] sm:$0xff] }
  0x10   :  { %630 = vmatpush.msra.mxu1 %v94_v16  ;;  %241 = vmatpush.msra.mxu0 %v94_v16  ;;  %v165_v44 = vld [vmem:[%s1423_s1 + $0x278] sm:$0xff]  ;;  %v138_v46 = vld [vmem:[%s1423_s1 + $0x1a0] sm:$0xff]  ;;  %v116_v47 = vld [vmem:[%s1423_s1 + $0xf0] sm:$0xff] }
  0x11   :  { %323 = vmatpush.msra.mxu2 %v126_v20  ;;  %363 = vmatpush.msra.mxu3 %v143_v27  ;;  %v164_v48 = vld [vmem:[%s1423_s1 + $0x270] sm:$0xff]  ;;  %v118_v49 = vld [vmem:[%s1423_s1 + $0x100] sm:$0xff]  ;;  %v137_v50 = vld [vmem:[%s1423_s1 + $0x198] sm:$0xff] }
  0x12   :  { %631 = vmatpush.msra.mxu1 %v93_v19  ;;  %242 = vmatpush.msra.mxu0 %v93_v19  ;;  %v115_v51 = vld [vmem:[%s1423_s1 + $0xe8] sm:$0xff]  ;;  %v16_v53 = vld [vmem:[%s1424_s0 + $0x10] sm:$0xff]  ;;  %v114_v55 = vld [vmem:[%s1423_s1 + $0xe0] sm:$0xff] }
  0x13   :  { %324 = vmatpush.msra.mxu2 %v125_v23  ;;  %364 = vmatpush.msra.mxu3 %v142_v30  ;;  %v163_v52 = vld [vmem:[%s1423_s1 + $0x268] sm:$0xff]  ;;  %v136_v54 = vld [vmem:[%s1423_s1 + $0x190] sm:$0xff]  ;;  %v162_v56 = vld [vmem:[%s1423_s1 + $0x260] sm:$0xff] }
  0x14   :  { %632 = vmatpush.msra.mxu1 %v92_v22  ;;  %243 = vmatpush.msra.mxu0 %v92_v22  ;;  %v59_v57 = vld [vmem:[%s1424_s0 + $0x168] sm:$0xff]  ;;  %v113_v59 = vld [vmem:[%s1423_s1 + $0xd8] sm:$0xff]  ;;  %v112_v63 = vld [vmem:[%s1423_s1 + $0xd0] sm:$0xff] }
  0x15   :  { %325 = vmatpush.msra.mxu2 %v124_v26  ;;  %365 = vmatpush.msra.mxu3 %v141_v33  ;;  %v23_v58 = vld [vmem:[%s1424_s0 + $0x48] sm:$0xff]  ;;  %v161_v60 = vld [vmem:[%s1423_s1 + $0x258] sm:$0xff]  ;;  %v160_v0 = vld [vmem:[%s1423_s1 + $0x250] sm:$0xff] }
  0x16   :  { %633 = vmatpush.msra.mxu1 %v91_v25  ;;  %244 = vmatpush.msra.mxu0 %v91_v25  ;;  %v197_v61 = vld [vmem:[%s1423_s1 + $0x378] sm:$0xff]  ;;  %v135_v62 = vld [vmem:[%s1423_s1 + $0x188] sm:$0xff]  ;;  %v196_v1 = vld [vmem:[%s1423_s1 + $0x370] sm:$0xff] }
  0x17   :  { %326 = vmatpush.msra.mxu2 %v123_v29  ;;  %366 = vmatpush.msra.mxu3 %v140_v36  ;;  %v134_v2 = vld [vmem:[%s1423_s1 + $0x180] sm:$0xff]  ;;  %v111_v3 = vld [vmem:[%s1423_s1 + $0xc8] sm:$0xff]  ;;  %v25_v5 = vld [vmem:[%s1424_s0 + $0x58] sm:$0xff] }
  0x18   :  { %634 = vmatpush.msra.mxu1 %v90_v28  ;;  %245 = vmatpush.msra.mxu0 %v90_v28  ;;  %v159_v4 = vld [vmem:[%s1423_s1 + $0x248] sm:$0xff]  ;;  %v17_v6 = vld [vmem:[%s1424_s0 + $0x18] sm:$0xff]  ;;  %v110_v7 = vld [vmem:[%s1423_s1 + $0xc0] sm:$0xff] }
  0x19   :  { %327 = vmatpush.msra.mxu2 %v122_v32  ;;  %367 = vmatpush.msra.mxu3 %v139_v39  ;;  %v158_v8 = vld [vmem:[%s1423_s1 + $0x240] sm:$0xff]  ;;  %v68_v9 = vld [vmem:[%s1424_s0 + $0x1b0] sm:$0xff]  ;;  %v109_v11 = vld [vmem:[%s1423_s1 + $0xb8] sm:$0xff] }
  0x1a   :  { %635 = vmatpush.msra.mxu1 %v89_v31  ;;  %246 = vmatpush.msra.mxu0 %v89_v31  ;;  %v32_v10 = vld [vmem:[%s1424_s0 + $0x90] sm:$0xff]  ;;  %v157_v12 = vld [vmem:[%s1423_s1 + $0x238] sm:$0xff]  ;;  %v195_v13 = vld [vmem:[%s1423_s1 + $0x368] sm:$0xff] }
  0x1b   :  { %328 = vmatpush.msra.mxu2 %v121_v35  ;;  %368 = vmatpush.msra.mxu3 %v138_v46  ;;  %v213_v14 = vld [vmem:[%s1423_s1 + $0x3f8] sm:$0xff]  ;;  %v108_v15 = vld [vmem:[%s1423_s1 + $0xb0] sm:$0xff]  ;;  %v194_v17 = vld [vmem:[%s1423_s1 + $0x360] sm:$0xff] }
  0x1c   :  { %636 = vmatpush.msra.mxu1 %v88_v34  ;;  %247 = vmatpush.msra.mxu0 %v88_v34  ;;  %v156_v16 = vld [vmem:[%s1423_s1 + $0x230] sm:$0xff]  ;;  %v107_v19 = vld [vmem:[%s1423_s1 + $0xa8] sm:$0xff]  ;;  %v34_v21 = vld [vmem:[%s1424_s0 + $0xa0] sm:$0xff] }
  0x1d   :  { %329 = vmatpush.msra.mxu2 %v120_v38  ;;  %369 = vmatpush.msra.mxu3 %v137_v50  ;;  %v212_v18 = vld [vmem:[%s1423_s1 + $0x3f0] sm:$0xff]  ;;  %v155_v20 = vld [vmem:[%s1423_s1 + $0x228] sm:$0xff]  ;;  %v26_v22 = vld [vmem:[%s1424_s0 + $0x60] sm:$0xff] }
  0x1e   :  { %637 = vmatpush.msra.mxu1 %v87_v37  ;;  %248 = vmatpush.msra.mxu0 %v87_v37  ;;  %v106_v23 = vld [vmem:[%s1423_s1 + $0xa0] sm:$0xff]  ;;  %v77_v25 = vld [vmem:[%s1424_s0 + $0x1f8] sm:$0xff]  ;;  %v211_v30 = vld [vmem:[%s1423_s1 + $0x3e8] sm:$0xff] }
  0x1f   :  { %330 = vmatpush.msra.mxu2 %v119_v45  ;;  %370 = vmatpush.msra.mxu3 %v136_v54  ;;  %v154_v24 = vld [vmem:[%s1423_s1 + $0x220] sm:$0xff]  ;;  %v41_v26 = vld [vmem:[%s1424_s0 + $0xd8] sm:$0xff]  ;;  %v104_v31 = vld [vmem:[%s1423_s1 + $0x90] sm:$0xff] }
  0x20   :  { %638 = vmatpush.msra.mxu1 %v86_v40  ;;  %249 = vmatpush.msra.mxu0 %v86_v40  ;;  %v105_v27 = vld [vmem:[%s1423_s1 + $0x98] sm:$0xff]  ;;  %v152_v32 = vld [vmem:[%s1423_s1 + $0x210] sm:$0xff]  ;;  %v210_v34 = vld [vmem:[%s1423_s1 + $0x3e0] sm:$0xff] }
  0x21   :  { %262 = vmatmul.f32.vlgmr.msra.gmra.mxu1 %v50_v41  ;;  %250 = vmatmul.f32.vlgmr.msra.gmra.mxu0 %v14_v42  ;;  %v153_v28 = vld [vmem:[%s1423_s1 + $0x218] sm:$0xff]  ;;  %v192_v33 = vld [vmem:[%s1423_s1 + $0x350] sm:$0xff]  ;;  %v103_v35 = vld [vmem:[%s1423_s1 + $0x88] sm:$0xff] }
  0x22   :  { %275 = vmatpush.msrb.mxu1 %v117_v43  ;;  %398 = vmatpush.msrb.mxu0 %v165_v44  ;;  %v193_v29 = vld [vmem:[%s1423_s1 + $0x358] sm:$0xff]  ;;  %v151_v36 = vld [vmem:[%s1423_s1 + $0x208] sm:$0xff]  ;;  %v102_v39 = vld [vmem:[%s1423_s1 + $0x80] sm:$0xff] }
  0x23   :  { %331 = vmatpush.msra.mxu2 %v118_v49  ;;  %371 = vmatpush.msra.mxu3 %v135_v62  ;;  %v43_v37 = vld [vmem:[%s1424_s0 + $0xe8] sm:$0xff]  ;;  %v150_v40 = vld [vmem:[%s1423_s1 + $0x200] sm:$0xff]  ;;  %v181_v43 = vld [vmem:[%s1423_s1 + $0x2f8] sm:$0xff] }
  0x24   :  { %276 = vmatpush.msrb.mxu1 %v116_v47  ;;  %399 = vmatpush.msrb.mxu0 %v164_v48  ;;  %v35_v38 = vld [vmem:[%s1424_s0 + $0xa8] sm:$0xff]  ;;  %v18_v42 = vld [vmem:[%s1424_s0 + $0x20] sm:$0xff]  ;;  %v209_v45 = vld [vmem:[%s1423_s1 + $0x3d8] sm:$0xff] }
  0x25   :  { %332 = vmatmul.f32.vlgmr.msra.gmra.mxu2 %v16_v53  ;;  %372 = vmatpush.msra.mxu3 %v134_v2  ;;  %v15_v41 = vld [vmem:[%s1424_s0 + $0x8] sm:$0xff]  ;;  %v1009_v46 = vld [vmem:[%s1423_s1 + $0x478] sm:$0xff]  ;;  %v180_v47 = vld [vmem:[%s1423_s1 + $0x2f0] sm:$0xff] }
  0x26   :  { %277 = vmatpush.msrb.mxu1 %v115_v51  ;;  %400 = vmatpush.msrb.mxu0 %v163_v52  ;;  %v191_v44 = vld [vmem:[%s1423_s1 + $0x348] sm:$0xff]  ;;  %v190_v48 = vld [vmem:[%s1423_s1 + $0x340] sm:$0xff]  ;;  %v208_v49 = vld [vmem:[%s1423_s1 + $0x3d0] sm:$0xff] }
  0x27   :  { %480 = vmatpush.msrb.mxu2 %v197_v61  ;;  %373 = vmatmul.f32.vlgmr.msra.gmra.mxu3 %v17_v6  ;;  %v1023_v50 = vld [vmem:[%s1423_s1 + $0x470] sm:$0xff]  ;;  %v179_v51 = vld [vmem:[%s1423_s1 + $0x2e8] sm:$0xff]  ;;  %v189_v52 = vld [vmem:[%s1423_s1 + $0x338] sm:$0xff] }
  0x28   :  { %278 = vmatpush.msrb.mxu1 %v114_v55  ;;  %401 = vmatpush.msrb.mxu0 %v162_v56  ;;  %v52_v53 = vld [vmem:[%s1424_s0 + $0x130] sm:$0xff]  ;;  %v178_v55 = vld [vmem:[%s1423_s1 + $0x2e0] sm:$0xff]  ;;  %v187_v61 = vld [vmem:[%s1423_s1 + $0x328] sm:$0xff] }
  0x29   :  { %265 = vmatmul.f32.gmra.mxu1 %v59_v57  ;;  %253 = vmatmul.f32.gmra.mxu0 %v23_v58  ;;  %v44_v54 = vld [vmem:[%s1424_s0 + $0xf0] sm:$0xff]  ;;  %v27_v58 = vld [vmem:[%s1424_s0 + $0x68] sm:$0xff]  ;;  %v1077_v2 = vld [vmem:[%s1423_s1 + $0x460] sm:$0xff] }
  0x2a   :  { %279 = vmatpush.msrb.mxu1 %v113_v59  ;;  %402 = vmatpush.msrb.mxu0 %v161_v60  ;;  %v188_v56 = vld [vmem:[%s1423_s1 + $0x330] sm:$0xff]  ;;  %v177_v59 = vld [vmem:[%s1423_s1 + $0x2d8] sm:$0xff]  ;;  %v207_v60 = vld [vmem:[%s1423_s1 + $0x3c8] sm:$0xff] }
  0x2b   :  { %481 = vmatpush.msrb.mxu2 %v196_v1  ;;  %521 = vmatpush.msrb.mxu3 %v213_v14  ;;  %v24_v57 = vld [vmem:[%s1424_s0 + $0x50] sm:$0xff]  ;;  %v1063_v62 = vld [vmem:[%s1423_s1 + $0x468] sm:$0xff]  ;;  %v186_v1 = vld [vmem:[%s1423_s1 + $0x320] sm:$0xff] }
  0x2c   :  { %280 = vmatpush.msrb.mxu1 %v112_v63  ;;  %403 = vmatpush.msrb.mxu0 %v160_v0  ;;  %v176_v63 = vld [vmem:[%s1423_s1 + $0x2d0] sm:$0xff]  ;;  %v206_v0 = vld [vmem:[%s1423_s1 + $0x3c0] sm:$0xff]  ;;  %v53_v6 = vld [vmem:[%s1424_s0 + $0x138] sm:$0xff] }
  0x2d   :  { %335 = vmatmul.f32.gmra.mxu2 %v25_v5  ;;  %522 = vmatpush.msrb.mxu3 %v212_v18  ;;  %v61_v5 = vld [vmem:[%s1424_s0 + $0x178] sm:$0xff]  ;;  %v1131_v18 = vld [vmem:[%s1423_s1 + $0x450] sm:$0xff] }
  0x2e   :  { %281 = vmatpush.msrb.mxu1 %v111_v3  ;;  %404 = vmatpush.msrb.mxu0 %v159_v4  ;;  %v175_v3 = vld [vmem:[%s1423_s1 + $0x2c8] sm:$0xff]  ;;  %v205_v4 = vld [vmem:[%s1423_s1 + $0x3b8] sm:$0xff] }
  0x2f   :  { %482 = vmatpush.msrb.mxu2 %v195_v13  ;;  %376 = vmatmul.f32.gmra.mxu3 %v26_v22  ;;  %v184_v13 = vld [vmem:[%s1423_s1 + $0x310] sm:$0xff]  ;;  %v1117_v14 = vld [vmem:[%s1423_s1 + $0x458] sm:$0xff]  ;;  %v62_v22 = vld [vmem:[%s1424_s0 + $0x180] sm:$0xff] }
  0x30   :  { %282 = vmatpush.msrb.mxu1 %v110_v7  ;;  %405 = vmatpush.msrb.mxu0 %v158_v8  ;;  %v174_v7 = vld [vmem:[%s1423_s1 + $0x2c0] sm:$0xff]  ;;  %v185_v8 = vld [vmem:[%s1423_s1 + $0x318] sm:$0xff] }
  0x31   :  { %268 = vmatmul.f32.gmra.mxu1 %v68_v9  ;;  %256 = vmatmul.f32.gmra.mxu0 %v32_v10  ;;  %v33_v9 = vld [vmem:[%s1424_s0 + $0x98] sm:$0xff]  ;;  %v36_v10 = vld [vmem:[%s1424_s0 + $0xb0] sm:$0xff] }
  0x32   :  { %283 = vmatpush.msrb.mxu1 %v109_v11  ;;  %406 = vmatpush.msrb.mxu0 %v157_v12  ;;  %v173_v11 = vld [vmem:[%s1423_s1 + $0x2b8] sm:$0xff]  ;;  %v204_v12 = vld [vmem:[%s1423_s1 + $0x3b0] sm:$0xff] }
  0x33   :  { %483 = vmatpush.msrb.mxu2 %v194_v17  ;;  %523 = vmatpush.msrb.mxu3 %v211_v30  ;;  %v183_v17 = vld [vmem:[%s1423_s1 + $0x308] sm:$0xff]  ;;  %v200_v30 = vld [vmem:[%s1423_s1 + $0x390] sm:$0xff] }
  0x34   :  { %284 = vmatpush.msrb.mxu1 %v108_v15  ;;  %407 = vmatpush.msrb.mxu0 %v156_v16  ;;  %v172_v15 = vld [vmem:[%s1423_s1 + $0x2b0] sm:$0xff]  ;;  %v203_v16 = vld [vmem:[%s1423_s1 + $0x3a8] sm:$0xff] }
  0x35   :  { %338 = vmatmul.f32.gmra.mxu2 %v34_v21  ;;  %524 = vmatpush.msrb.mxu3 %v210_v34  ;;  %v70_v21 = vld [vmem:[%s1424_s0 + $0x1c0] sm:$0xff]  ;;  %v221_v34 = vld [vmem:[%s1423_s1 + $0x438] sm:$0xff] }
  0x36   :  { %285 = vmatpush.msrb.mxu1 %v107_v19  ;;  %408 = vmatpush.msrb.mxu0 %v155_v20  ;;  %v171_v19 = vld [vmem:[%s1423_s1 + $0x2a8] sm:$0xff]  ;;  %v202_v20 = vld [vmem:[%s1423_s1 + $0x3a0] sm:$0xff] }
  0x37   :  { %484 = vmatpush.msrb.mxu2 %v193_v29  ;;  %379 = vmatmul.f32.gmra.mxu3 %v35_v38  ;;  %v169_v29 = vld [vmem:[%s1423_s1 + $0x298] sm:$0xff]  ;;  %v51_v38 = vld [vmem:[%s1424_s0 + $0x128] sm:$0xff] }
  0x38   :  { %286 = vmatpush.msrb.mxu1 %v106_v23  ;;  %409 = vmatpush.msrb.mxu0 %v154_v24  ;;  %v170_v23 = vld [vmem:[%s1423_s1 + $0x2a0] sm:$0xff] }
  0x39   :  { %271 = vmatmul.f32.gmra.mxu1 %v77_v25  ;;  %259 = vmatmul.f32.gmra.mxu0 %v41_v26  ;;  %v182_v24 = vld [vmem:[%s1423_s1 + $0x300] sm:$0xff]  ;;  %v45_v26 = vld [vmem:[%s1424_s0 + $0xf8] sm:$0xff] }
  0x3a   :  { %287 = vmatpush.msrb.mxu1 %v105_v27  ;;  %410 = vmatpush.msrb.mxu0 %v153_v28  ;;  %v42_v25 = vld [vmem:[%s1424_s0 + $0xe0] sm:$0xff]  ;;  %v201_v27 = vld [vmem:[%s1423_s1 + $0x398] sm:$0xff]  ;;  %v223_v28 = vld [vmem:[%s1423_s1 + $0x448] sm:$0xff] }
  0x3b   :  { %485 = vmatpush.msrb.mxu2 %v192_v33  ;;  %525 = vmatpush.msrb.mxu3 %v209_v45  ;;  %v199_v33 = vld [vmem:[%s1423_s1 + $0x388] sm:$0xff]  ;;  %v20_v45 = vld [vmem:[%s1424_s0 + $0x30] sm:$0xff] }
  0x3c   :  { %288 = vmatpush.msrb.mxu1 %v104_v31  ;;  %411 = vmatpush.msrb.mxu0 %v152_v32  ;;  %v222_v31 = vld [vmem:[%s1423_s1 + $0x440] sm:$0xff]  ;;  %v168_v32 = vld [vmem:[%s1423_s1 + $0x290] sm:$0xff] }
  0x3d   :  { %341 = vmatmul.f32.gmra.mxu2 %v43_v37  ;;  %526 = vmatpush.msrb.mxu3 %v208_v49  ;;  %v167_v37 = vld [vmem:[%s1423_s1 + $0x288] sm:$0xff] }
  0x3e   :  { %289 = vmatpush.msrb.mxu1 %v103_v35  ;;  %412 = vmatpush.msrb.mxu0 %v151_v36  ;;  %v79_v35 = vld [vmem:[%s1424_s0 + $0x208] sm:$0xff] }
  0x3f   :  { %486 = vmatpush.msrb.mxu2 %v191_v44  ;;  %382 = vmatmul.f32.gmra.mxu3 %v44_v54  ;;  %v71_v36 = vld [vmem:[%s1424_s0 + $0x1c8] sm:$0xff]  ;;  %v218_v44 = vld [vmem:[%s1423_s1 + $0x420] sm:$0xff]  ;;  %v21_v54 = vld [vmem:[%s1424_s0 + $0x38] sm:$0xff] }
  0x40   :  { %290 = vmatpush.msrb.mxu1 %v102_v39  ;;  %413 = vmatpush.msrb.mxu0 %v150_v40  ;;  %v54_v39 = vld [vmem:[%s1424_s0 + $0x140] sm:$0xff]  ;;  %v220_v40 = vld [vmem:[%s1423_s1 + $0x430] sm:$0xff]  ;;  %v63_v49 = vld [vmem:[%s1424_s0 + $0x188] sm:$0xff] }
  0x41   :  { %291 = vmatmul.f32.vlgmr.msrb.gmra.mxu1 %v15_v41  ;;  %414 = vmatmul.f32.vlgmr.msrb.gmra.mxu0 %v18_v42  ;;  %v198_v41 = vld [vmem:[%s1423_s1 + $0x380] sm:$0xff] }
  0x42   :  { %439 = vmatpush.msra.mxu1 %v181_v43  ;;  %562 = vmatpush.msra.mxu0 %v1009_v46  ;;  %v166_v42 = vld [vmem:[%s1423_s1 + $0x280] sm:$0xff]  ;;  %v219_v43 = vld [vmem:[%s1423_s1 + $0x428] sm:$0xff] }
  0x43   :  { %487 = vmatpush.msrb.mxu2 %v190_v48  ;;  %527 = vmatpush.msrb.mxu3 %v207_v60  ;;  %v60_v48 = vld [vmem:[%s1424_s0 + $0x170] sm:$0xff]  ;;  %v81_v60 = vld [vmem:[%s1424_s0 + $0x218] sm:$0xff] }
  0x44   :  { %440 = vmatpush.msra.mxu1 %v180_v47  ;;  %563 = vmatpush.msra.mxu0 %v1023_v50  ;;  %v217_v47 = vld [vmem:[%s1423_s1 + $0x418] sm:$0xff] }
  0x45   :  { %488 = vmatpush.msrb.mxu2 %v189_v52  ;;  %528 = vmatpush.msrb.mxu3 %v206_v0  ;;  %v214_v52 = vld [vmem:[%s1423_s1 + $0x400] sm:$0xff] }
  0x46   :  { %441 = vmatpush.msra.mxu1 %v179_v51  ;;  %344 = vmatmul.f32.gmra.mxu2 %v52_v53  ;;  %v215_v51 = vld [vmem:[%s1423_s1 + $0x408] sm:$0xff]  ;;  %v29_v53 = vld [vmem:[%s1424_s0 + $0x78] sm:$0xff]  ;;  %v22_v0 = vld [vmem:[%s1424_s0 + $0x40] sm:$0xff] }
  0x47   :  { %489 = vmatpush.msrb.mxu2 %v188_v56  ;;  %564 = vmatpush.msra.mxu0 %v1063_v62  ;;  %v72_v56 = vld [vmem:[%s1424_s0 + $0x1d0] sm:$0xff] }
  0x48   :  { %442 = vmatpush.msra.mxu1 %v178_v55  ;;  %529 = vmatpush.msrb.mxu3 %v205_v4  ;;  %v69_v55 = vld [vmem:[%s1424_s0 + $0x1b8] sm:$0xff]  ;;  %v31_v4 = vld [vmem:[%s1424_s0 + $0x88] sm:$0xff] }
  0x49   :  { %294 = vmatmul.f32.gmra.mxu1 %v24_v57  ;;  %417 = vmatmul.f32.gmra.mxu0 %v27_v58  ;;  %v38_v57 = vld [vmem:[%s1424_s0 + $0xc0] sm:$0xff] }
  0x4a   :  { %443 = vmatpush.msra.mxu1 %v177_v59  ;;  %490 = vmatpush.msrb.mxu2 %v187_v61  ;;  %v30_v58 = vld [vmem:[%s1424_s0 + $0x80] sm:$0xff]  ;;  %v47_v61 = vld [vmem:[%s1424_s0 + $0x108] sm:$0xff] }
  0x4b   :  { %565 = vmatpush.msra.mxu0 %v1077_v2  ;;  %385 = vmatmul.f32.gmra.mxu3 %v53_v6  ;;  %v78_v59 = vld [vmem:[%s1424_s0 + $0x200] sm:$0xff]  ;;  %v57_v6 = vld [vmem:[%s1424_s0 + $0x158] sm:$0xff] }
  0x4c   :  { %444 = vmatpush.msra.mxu1 %v176_v63  ;;  %491 = vmatpush.msrb.mxu2 %v186_v1  ;;  %v19_v63 = vld [vmem:[%s1424_s0 + $0x28] sm:$0xff]  ;;  %v56_v1 = vld [vmem:[%s1424_s0 + $0x150] sm:$0xff] }
  0x4d   :  { %530 = vmatpush.msrb.mxu3 %v204_v12  ;;  %566 = vmatpush.msra.mxu0 %v1117_v14  ;;  %v49_v12 = vld [vmem:[%s1424_s0 + $0x118] sm:$0xff] }
  0x4e   :  { %445 = vmatpush.msra.mxu1 %v175_v3  ;;  %347 = vmatmul.f32.gmra.mxu2 %v61_v5  ;;  %v28_v3 = vld [vmem:[%s1424_s0 + $0x70] sm:$0xff]  ;;  %v65_v5 = vld [vmem:[%s1424_s0 + $0x198] sm:$0xff] }
  0x4f   :  { %492 = vmatpush.msrb.mxu2 %v185_v8  ;;  %531 = vmatpush.msrb.mxu3 %v203_v16  ;;  %v40_v8 = vld [vmem:[%s1424_s0 + $0xd0] sm:$0xff]  ;;  %v55_v16 = vld [vmem:[%s1424_s0 + $0x148] sm:$0xff] }
  0x50   :  { %446 = vmatpush.msra.mxu1 %v174_v7  ;;  %567 = vmatpush.msra.mxu0 %v1131_v18  ;;  %v37_v7 = vld [vmem:[%s1424_s0 + $0xb8] sm:$0xff] }
  0x51   :  { %297 = vmatmul.f32.gmra.mxu1 %v33_v9  ;;  %420 = vmatmul.f32.gmra.mxu0 %v36_v10  ;;  %v74_v9 = vld [vmem:[%s1424_s0 + $0x1e0] sm:$0xff] }
  0x52   :  { %447 = vmatpush.msra.mxu1 %v173_v11  ;;  %493 = vmatpush.msrb.mxu2 %v184_v13  ;;  %v66_v10 = vld [vmem:[%s1424_s0 + $0x1a0] sm:$0xff]  ;;  %v83_v13 = vld [vmem:[%s1424_s0 + $0x228] sm:$0xff] }
  0x53   :  { %532 = vmatpush.msrb.mxu3 %v202_v20  ;;  %568 = vmatpush.msra.mxu0 %v223_v28  ;;  %v46_v11 = vld [vmem:[%s1424_s0 + $0x100] sm:$0xff]  ;;  %v84_v20 = vld [vmem:[%s1424_s0 + $0x230] sm:$0xff] }
  0x54   :  { %448 = vmatpush.msra.mxu1 %v172_v15  ;;  %494 = vmatpush.msrb.mxu2 %v183_v17 }
  0x55   :  { %388 = vmatmul.f32.gmra.mxu3 %v62_v22  ;;  %569 = vmatpush.msra.mxu0 %v222_v31  ;;  %v64_v22 = vld [vmem:[%s1424_s0 + $0x190] sm:$0xff] }
  0x56   :  { %449 = vmatpush.msra.mxu1 %v171_v19  ;;  %350 = vmatmul.f32.gmra.mxu2 %v70_v21  ;;  %v76_v19 = vld [vmem:[%s1424_s0 + $0x1f0] sm:$0xff] }
  0x57   :  { %495 = vmatpush.msrb.mxu2 %v182_v24  ;;  %533 = vmatpush.msrb.mxu3 %v201_v27  ;;  %v67_v24 = vld [vmem:[%s1424_s0 + $0x1a8] sm:$0xff] }
  0x58   :  { %450 = vmatpush.msra.mxu1 %v170_v23  ;;  %570 = vmatpush.msra.mxu0 %v221_v34 }
  0x59   :  { %300 = vmatmul.f32.gmra.mxu1 %v42_v25  ;;  %423 = vmatmul.f32.gmra.mxu0 %v45_v26  ;;  %v85_v26 = vld [vmem:[%s1424_s0 + $0x238] sm:$0xff] }
  0x5a   :  { %451 = vmatpush.msra.mxu1 %v169_v29  ;;  %639 = vmatpush.msra.mxu2 %v1009_v46  ;;  %v80_v46 = vld [vmem:[%s1424_s0 + $0x210] sm:$0xff] }
  0x5b   :  { %534 = vmatpush.msrb.mxu3 %v200_v30  ;;  %571 = vmatpush.msra.mxu0 %v220_v40 }
  0x5c   :  { %452 = vmatpush.msra.mxu1 %v168_v32  ;;  %640 = vmatpush.msra.mxu2 %v1023_v50  ;;  %v216_v50 = vld [vmem:[%s1423_s1 + $0x410] sm:$0xff] }
  0x5d   :  { %535 = vmatpush.msrb.mxu3 %v199_v33  ;;  %572 = vmatpush.msra.mxu0 %v219_v43  ;;  %v82_v33 = vld [vmem:[%s1424_s0 + $0x220] sm:$0xff] }
  0x5e   :  { %353 = vmatmul.f32.gmra.mxu2 %v79_v35  ;;  %391 = vmatmul.f32.gmra.mxu3 %v71_v36 }
  0x5f   :  { %453 = vmatpush.msra.mxu1 %v167_v37  ;;  %641 = vmatpush.msra.mxu2 %v1063_v62  ;;  %v39_v62 = vld [vmem:[%s1424_s0 + $0xc8] sm:$0xff]  ;;  %v655_v37 = vld [vmem:[%s1425_s2] ss:$0 sm:$0xff] }
  0x60   :  { %536 = vmatpush.msrb.mxu3 %v198_v41  ;;  %573 = vmatpush.msra.mxu0 %v218_v44 }
  0x61   :  { %303 = vmatmul.f32.gmra.mxu1 %v51_v38  ;;  %426 = vmatmul.f32.gmra.mxu0 %v54_v39 }
  0x62   :  { %454 = vmatpush.msra.mxu1 %v166_v42  ;;  %642 = vmatpush.msra.mxu2 %v1077_v2  ;;  %v48_v2 = vld [vmem:[%s1424_s0 + $0x110] sm:$0xff] }
  0x63   :  { %574 = vmatpush.msra.mxu0 %v217_v47 }
  0x64   :  { %643 = vmatpush.msra.mxu2 %v1117_v14  ;;  %v75_v14 = vld [vmem:[%s1424_s0 + $0x1e8] sm:$0xff] }
  0x65   :  { %575 = vmatpush.msra.mxu0 %v216_v50 }
  0x66   :  { %496 = vmatmul.f32.vlgmr.msrb.gmra.mxu2 %v20_v45  ;;  %394 = vmatmul.f32.gmra.mxu3 %v80_v46 }
  0x67   :  { %644 = vmatpush.msra.mxu2 %v1131_v18  ;;  %576 = vmatpush.msra.mxu0 %v215_v51  ;;  %v58_v18 = vld [vmem:[%s1424_s0 + $0x160] sm:$0xff] }
  0x69   :  { %306 = vmatmul.f32.gmra.mxu1 %v60_v48  ;;  %429 = vmatmul.f32.gmra.mxu0 %v63_v49 }
  0x6a   :  { %645 = vmatpush.msra.mxu2 %v223_v28  ;;  %577 = vmatpush.msra.mxu0 %v214_v52  ;;  %v73_v28 = vld [vmem:[%s1424_s0 + $0x1d8] sm:$0xff] }
  0x6c   :  { %646 = vmatpush.msra.mxu2 %v222_v31 }
  0x6e   :  { %647 = vmatpush.msra.mxu2 %v221_v34  ;;  %537 = vmatmul.f32.vlgmr.msrb.gmra.mxu3 %v21_v54 }
  0x6f   :  { %499 = vmatmul.f32.gmra.mxu2 %v29_v53 }
  0x70   :  { %648 = vmatpush.msra.mxu2 %v220_v40 }
  0x71   :  { %309 = vmatmul.f32.gmra.mxu1 %v69_v55  ;;  %432 = vmatmul.f32.gmra.mxu0 %v72_v56 }
  0x72   :  { %649 = vmatpush.msra.mxu2 %v219_v43 }
  0x74   :  { %650 = vmatpush.msra.mxu2 %v218_v44 }
  0x76   :  { %651 = vmatpush.msra.mxu2 %v217_v47  ;;  %540 = vmatmul.f32.gmra.mxu3 %v30_v58 }
  0x77   :  { %502 = vmatmul.f32.gmra.mxu2 %v38_v57 }
  0x78   :  { %652 = vmatpush.msra.mxu2 %v216_v50 }
  0x79   :  { %312 = vmatmul.f32.gmra.mxu1 %v78_v59  ;;  %435 = vmatmul.f32.gmra.mxu0 %v81_v60 }
  0x7a   :  { %653 = vmatpush.msra.mxu2 %v215_v51 }
  0x7c   :  { %654 = vmatpush.msra.mxu2 %v214_v52 }
  0x7e   :  { %543 = vmatmul.f32.gmra.mxu3 %v39_v62 }
  0x7f   :  { %505 = vmatmul.f32.gmra.mxu2 %v47_v61 }
  0x81   :  { %455 = vmatmul.f32.vlgmr.msra.gmra.mxu1 %v19_v63  ;;  %578 = vmatmul.f32.vlgmr.msra.gmra.mxu0 %v22_v0 }
  0x86   :  { %546 = vmatmul.f32.gmra.mxu3 %v48_v2 }
  0x87   :  { %508 = vmatmul.f32.gmra.mxu2 %v56_v1 }
  0x89   :  { %458 = vmatmul.f32.gmra.mxu1 %v28_v3  ;;  %581 = vmatmul.f32.gmra.mxu0 %v31_v4 }
  0x8e   :  { %549 = vmatmul.f32.gmra.mxu3 %v57_v6 }
  0x8f   :  { %511 = vmatmul.f32.gmra.mxu2 %v65_v5 }
  0x91   :  { %461 = vmatmul.f32.gmra.mxu1 %v37_v7  ;;  %584 = vmatmul.f32.gmra.mxu0 %v40_v8 }
  0x96   :  { %552 = vmatmul.f32.gmra.mxu3 %v66_v10 }
  0x97   :  { %514 = vmatmul.f32.gmra.mxu2 %v74_v9 }
  0x99   :  { %464 = vmatmul.f32.gmra.mxu1 %v46_v11  ;;  %587 = vmatmul.f32.gmra.mxu0 %v49_v12 }
  0x9e   :  { %v263_v15 = vpop.f32.mrf.mxu1  ;;  %v251_v17 = vpop.f32.mrf.mxu0  ;;  %555 = vmatmul.f32.gmra.mxu3 %v75_v14 }
  0x9f   :  { %517 = vmatmul.f32.gmra.mxu2 %v83_v13  ;;  %v252_v38 = vadd.f32 %v655_v37, %v251_v17  ;;  %v264_v2 = vadd.f32 %v655_v37, %v263_v15 }
  0xa1   :  { %467 = vmatmul.f32.gmra.mxu1 %v55_v16  ;;  %590 = vmatmul.f32.gmra.mxu0 %v58_v18 }
  0xa6   :  { %v266_v21 = vpop.f32.mrf.mxu1  ;;  %v254_v23 = vpop.f32.mrf.mxu0  ;;  %558 = vmatmul.f32.gmra.mxu3 %v84_v20 }
  0xa7   :  { %596 = vmatmul.f32.vlgmr.msra.gmra.mxu2 %v76_v19  ;;  %v255_v45 = vadd.f32 %v655_v37, %v254_v23  ;;  %v267_v9 = vadd.f32 %v655_v37, %v266_v21 }
  0xa8   :  { %v333_v25 = vpop.f32.mrf.mxu2 }
  0xa9   :  { %470 = vmatmul.f32.gmra.mxu1 %v64_v22  ;;  %593 = vmatmul.f32.gmra.mxu0 %v67_v24 }
  0xaa   :  { %v374_v31 = vpop.f32.mrf.mxu3 }
  0xae   :  { %v269_v27 = vpop.f32.mrf.mxu1  ;;  %v257_v29 = vpop.f32.mrf.mxu0 }
  0xaf   :  { %599 = vmatmul.f32.gmra.mxu2 %v85_v26  ;;  %v258_v52 = vadd.f32 %v655_v37, %v257_v29  ;;  %v270_v15 = vadd.f32 %v655_v37, %v269_v27 }
  0xb0   :  { %v336_v30 = vpop.f32.mrf.mxu2 }
  0xb1   :  { %473 = vmatmul.f32.gmra.mxu1 %v73_v28 }
  0xb2   :  { %v1348_v36 = vpop.f32.mrf.mxu3 }
  0xb6   :  { %v272_v32 = vpop.f32.mrf.mxu1  ;;  %v260_v34 = vpop.f32.mrf.mxu0 }
  0xb7   :  { %v261_v59 = vadd.f32 %v655_v37, %v260_v34  ;;  %v273_v24 = vadd.f32 %v655_v37, %v272_v32 }
  0xb8   :  { %v339_v35 = vpop.f32.mrf.mxu2 }
  0xb9   :  { %476 = vmatmul.f32.gmra.mxu1 %v82_v33 }
  0xba   :  { %v1353_v44 = vpop.f32.mrf.mxu3 }
  0xbe   :  { %v292_v39 = vpop.f32.mrf.mxu1  ;;  %v415_v40 = vpop.f32.mrf.mxu0 }
  0xbf   :  { %v293_v41 = vadd.f32 %v292_v39, %v252_v38 }
  0xc0   :  { %v342_v43 = vpop.f32.mrf.mxu2 }
  0xc1   :  { %v334_v42 = vadd.f32 %v333_v25, %v293_v41 }
  0xc2   :  { %v1355_v51 = vpop.f32.mrf.mxu3 }
  0xc3   :  { %v375_v28 = vadd.f32 %v374_v31, %v334_v42 }
  0xc5   :  { %v416_v34 = vadd.f32 %v415_v40, %v375_v28 }
  0xc6   :  { %v295_v46 = vpop.f32.mrf.mxu1  ;;  %v418_v47 = vpop.f32.mrf.mxu0 }
  0xc7   :  { %v296_v48 = vadd.f32 %v295_v46, %v255_v45 }
  0xc9   :  { %v337_v49 = vadd.f32 %v336_v30, %v296_v48  ;;  %v345_v50 = vpop.f32.mrf.mxu2 }
  0xcb   :  { %v378_v39 = vadd.f32 %v1348_v36, %v337_v49 }
  0xcd   :  { %v419_v46 = vadd.f32 %v418_v47, %v378_v39 }
  0xce   :  { %v298_v53 = vpop.f32.mrf.mxu1  ;;  %v421_v54 = vpop.f32.mrf.mxu0 }
  0xcf   :  { %v299_v55 = vadd.f32 %v298_v53, %v258_v52  ;;  %v1357_v58 = vpop.f32.mrf.mxu3 }
  0xd1   :  { %v340_v56 = vadd.f32 %v339_v35, %v299_v55  ;;  %v348_v57 = vpop.f32.mrf.mxu2 }
  0xd3   :  { %v381_v42 = vadd.f32 %v1353_v44, %v340_v56 }
  0xd5   :  { %v422_v36 = vadd.f32 %v421_v54, %v381_v42 }
  0xd6   :  { %v301_v60 = vpop.f32.mrf.mxu1  ;;  %v1359_v61 = vpop.f32.mrf.mxu0 }
  0xd7   :  { %v302_v62 = vadd.f32 %v301_v60, %v261_v59 }
  0xd8   :  { %v1361_v1 = vpop.f32.mrf.mxu3 }
  0xd9   :  { %v343_v63 = vadd.f32 %v342_v43, %v302_v62  ;;  %v351_v0 = vpop.f32.mrf.mxu2 }
  0xde   :  { %v304_v3 = vpop.f32.mrf.mxu1  ;;  %v1363_v4 = vpop.f32.mrf.mxu0 }
  0xdf   :  { %v305_v5 = vadd.f32 %v304_v3, %v264_v2 }
  0xe1   :  { %v1365_v6 = vadd.f32 %v345_v50, %v305_v5  ;;  %v354_v7 = vpop.f32.mrf.mxu2  ;;  %v1367_v8 = vpop.f32.mrf.mxu3 }
  0xe6   :  { %v307_v10 = vpop.f32.mrf.mxu1  ;;  %v1369_v11 = vpop.f32.mrf.mxu0 }
  0xe7   :  { %v308_v12 = vadd.f32 %v307_v10, %v267_v9 }
  0xe9   :  { %v1371_v13 = vadd.f32 %v348_v57, %v308_v12  ;;  %v497_v14 = vpop.f32.mrf.mxu2  ;;  %v1373_v16 = vpop.f32.mrf.mxu3  ;;  %v387_v12 = vadd.f32 %v1357_v58, %v1365_v6 }
  0xee   :  { %v310_v17 = vpop.f32.mrf.mxu1  ;;  %v1375_v18 = vpop.f32.mrf.mxu0 }
  0xef   :  { %v311_v19 = vadd.f32 %v310_v17, %v270_v15  ;;  %v428_v17 = vadd.f32 %v1363_v4, %v387_v12 }
  0xf1   :  { %v1377_v20 = vadd.f32 %v351_v0, %v311_v19  ;;  %v538_v23 = vpop.f32.mrf.mxu3  ;;  %v384_v0 = vadd.f32 %v1355_v51, %v343_v63 }
  0xf2   :  { %v500_v22 = vpop.f32.mrf.mxu2 }
  0xf3   :  { %v425_v3 = vadd.f32 %v1359_v61, %v384_v0 }
  0xf6   :  { %v313_v21 = vpop.f32.mrf.mxu1  ;;  %v1379_v25 = vpop.f32.mrf.mxu0 }
  0xf7   :  { %v314_v26 = vadd.f32 %v313_v21, %v273_v24  ;;  %v390_v21 = vadd.f32 %v1361_v1, %v1371_v13 }
  0xf9   :  { %v1381_v29 = vadd.f32 %v354_v7, %v314_v26  ;;  %v541_v33 = vpop.f32.mrf.mxu3  ;;  %v431_v28 = vadd.f32 %v1369_v11, %v390_v21 }
  0xfa   :  { %v503_v30 = vpop.f32.mrf.mxu2 }
  0xfe   :  { %v456_v27 = vpop.f32.mrf.mxu1  ;;  %v579_v35 = vpop.f32.mrf.mxu0 }
  0xff   :  { %v457_v38 = vadd.f32 %v456_v27, %v416_v34 }
 0x101   :  { %v498_v41 = vadd.f32 %v497_v14, %v457_v38  ;;  %v544_v37 = vpop.f32.mrf.mxu3 }
 0x102   :  { %v506_v43 = vpop.f32.mrf.mxu2 }
 0x103   :  { %v539_v45 = vadd.f32 %v538_v23, %v498_v41 }
 0x105   :  { %v580_v32 = vadd.f32 %v579_v35, %v539_v45  ;;  %v393_v35 = vadd.f32 %v1367_v8, %v1377_v20 }
 0x106   :  { %v459_v48 = vpop.f32.mrf.mxu1  ;;  %v582_v50 = vpop.f32.mrf.mxu0 }
 0x107   :  { %v603_v52 = vmax.f32 %v580_v32, 0.0  ;;  %v460_v31 = vadd.f32 %v459_v48, %v419_v46  ;;  %v434_v39 = vadd.f32 %v1375_v18, %v393_v35 }
 0x109   :  { %611 = vst [vmem:[%s1426_s3] sm:$0xff] %v603_v52  ;;  %v501_v40 = vadd.f32 %v500_v22, %v460_v31  ;;  %v547_v62 = vpop.f32.mrf.mxu3 }
 0x10a   :  { %v509_v53 = vpop.f32.mrf.mxu2 }
 0x10b   :  { %v542_v55 = vadd.f32 %v541_v33, %v501_v40 }
 0x10d   :  { %v583_v49 = vadd.f32 %v582_v50, %v542_v55 }
 0x10e   :  { %v462_v57 = vpop.f32.mrf.mxu1  ;;  %v585_v59 = vpop.f32.mrf.mxu0 }
 0x10f   :  { %v604_v47 = vmax.f32 %v583_v49, 0.0  ;;  %v463_v60 = vadd.f32 %v462_v57, %v422_v36 }
 0x111   :  { %612 = vst [vmem:[%s1426_s3 + $0x8] sm:$0xff] %v604_v47  ;;  %v504_v44 = vadd.f32 %v503_v30, %v463_v60  ;;  %v550_v63 = vpop.f32.mrf.mxu3 }
 0x112   :  { %v512_v56 = vpop.f32.mrf.mxu2 }
 0x113   :  { %v545_v2 = vadd.f32 %v544_v37, %v504_v44  ;;  %v396_v37 = vadd.f32 %v1373_v16, %v1381_v29 }
 0x115   :  { %v586_v5 = vadd.f32 %v585_v59, %v545_v2  ;;  %v437_v48 = vadd.f32 %v1379_v25, %v396_v37 }
 0x116   :  { %v465_v7 = vpop.f32.mrf.mxu1  ;;  %v588_v54 = vpop.f32.mrf.mxu0 }
 0x117   :  { %v605_v9 = vmax.f32 %v586_v5, 0.0  ;;  %v466_v10 = vadd.f32 %v465_v7, %v425_v3 }
 0x119   :  { %613 = vst [vmem:[%s1426_s3 + $0x10] sm:$0xff] %v605_v9  ;;  %v507_v51 = vadd.f32 %v506_v43, %v466_v10  ;;  %v553_v26 = vpop.f32.mrf.mxu3 }
 0x11a   :  { %v515_v15 = vpop.f32.mrf.mxu2 }
 0x11b   :  { %v548_v14 = vadd.f32 %v547_v62, %v507_v51 }
 0x11d   :  { %v589_v19 = vadd.f32 %v588_v54, %v548_v14 }
 0x11e   :  { %v468_v61 = vpop.f32.mrf.mxu1  ;;  %v591_v24 = vpop.f32.mrf.mxu0 }
 0x11f   :  { %v606_v22 = vmax.f32 %v589_v19, 0.0  ;;  %v469_v23 = vadd.f32 %v468_v61, %v428_v17 }
 0x121   :  { %614 = vst [vmem:[%s1426_s3 + $0x18] sm:$0xff] %v606_v22  ;;  %v510_v58 = vadd.f32 %v509_v53, %v469_v23  ;;  %v556_v11 = vpop.f32.mrf.mxu3 }
 0x122   :  { %v518_v4 = vpop.f32.mrf.mxu2 }
 0x123   :  { %v551_v6 = vadd.f32 %v550_v63, %v510_v58 }
 0x125   :  { %v592_v30 = vadd.f32 %v591_v24, %v551_v6 }
 0x126   :  { %v471_v33 = vpop.f32.mrf.mxu1  ;;  %v594_v13 = vpop.f32.mrf.mxu0 }
 0x127   :  { %v607_v34 = vmax.f32 %v592_v30, 0.0  ;;  %v472_v27 = vadd.f32 %v471_v33, %v431_v28 }
 0x129   :  { %615 = vst [vmem:[%s1426_s3 + $0x20] sm:$0xff] %v607_v34  ;;  %v513_v1 = vadd.f32 %v512_v56, %v472_v27  ;;  %v559_v42 = vpop.f32.mrf.mxu3 }
 0x12a   :  { %v597_v32 = vpop.f32.mrf.mxu2 }
 0x12b   :  { %v554_v38 = vadd.f32 %v553_v26, %v513_v1 }
 0x12d   :  { %v595_v41 = vadd.f32 %v594_v13, %v554_v38 }
 0x12e   :  { %v474_v43 = vpop.f32.mrf.mxu1 }
 0x12f   :  { %v608_v45 = vmax.f32 %v595_v41, 0.0  ;;  %v475_v46 = vadd.f32 %v474_v43, %v434_v39 }
 0x131   :  { %616 = vst [vmem:[%s1426_s3 + $0x28] sm:$0xff] %v608_v45  ;;  %v516_v8 = vadd.f32 %v515_v15, %v475_v46 }
 0x132   :  { %v600_v53 = vpop.f32.mrf.mxu2 }
 0x133   :  { %v557_v20 = vadd.f32 %v556_v11, %v516_v8 }
 0x135   :  { %v598_v50 = vadd.f32 %v597_v32, %v557_v20 }
 0x136   :  { %v477_v52 = vpop.f32.mrf.mxu1 }
 0x137   :  { %v609_v18 = vmax.f32 %v598_v50, 0.0  ;;  %v478_v31 = vadd.f32 %v477_v52, %v437_v48 }
 0x139   :  { %617 = vst [vmem:[%s1426_s3 + $0x30] sm:$0xff] %v609_v18  ;;  %v519_v40 = vadd.f32 %v518_v4, %v478_v31 }
 0x13b   :  { %v560_v16 = vadd.f32 %v559_v42, %v519_v40 }
 0x13d   :  { %v601_v29 = vadd.f32 %v600_v53, %v560_v16 }
 0x13f   :  { %v610_v55 = vmax.f32 %v601_v29, 0.0 }
 0x141   :  { %618 = vst [vmem:[%s1426_s3 + $0x38] sm:$0xff] %v610_v55 }

// kernel: forward.7
= control target key start
LH: loop header
LB: loop body
LE: loop exit
PB: predicated region body
PF: predicated region fallthrough
CT: control target
= control target key end

     0   :  { %10 = vsyncpa [#allocation4], 0  ;;  %s2992_s18 = smov 0   ;;  %s4321_s0 = inlined_call_operand.vmem [shape: f32[2,4096], index: 0, kind: input, shape index: {}]   ;;  %s4322_s1 = inlined_call_operand.vmem [shape: f32[4096,512], index: 1, kind: input, shape index: {}]   ;;  %s4323_s2 = inlined_call_operand.vmem [shape: f32[1,512], index: 2, kind: input, shape index: {}]   ;;  %s4324_s3 = inlined_call_operand.vmem [shape: f32[512,128], index: 3, kind: input, shape index: {}]   ;;  %s4325_s4 = inlined_call_operand.vmem [shape: f32[1,128], index: 4, kind: input, shape index: {}]   ;;  %s4326_s5 = inlined_call_operand.hbm [shape: f32[2,6], index: 5, kind: output, shape index: {}]  }
   0x1 LB: > { %s2998_s19 = sadd.s32 4294967295, %s2957_s18   ;;  %p2863_p0 = scmp.ge.s32.totalorder %s2957_s18, 1  ;;  %s2957_s18 = sphi %s2992_s18, %s16_s18  }
   0x2   : > { %p196_p1 = scmp.lt.s32.totalorder %s2957_s18, 3 }
   0x4   : > { %p197_p2 = pnand %p2863_p0, %p196_p1 }
   0x5   : > { %s2864_s20 = sshll.u32 (!%p197_p2), %s2998_s19, 4  ;;  %s2866_s21 = sshll.u32 (!%p197_p2), %s2998_s19, 8 }
   0x6   : > { %200 = sbr.rel (%p197_p2) target bundleno = 1458 (0x5b2), region = 40  ;;  %p226_p3 = scmp.lt.s32.totalorder (!%p197_p2), %s2864_s20, 31 }
   0x7   : > { %p232_p4 = scmp.lt.s32.totalorder (!%p197_p2), %s2866_s21, 511  ;;  %p2869_p5 = scmp.ne.s32.totalorder (!%p197_p2), %s2998_s19, 0 }
   0xb   : > { %s4328_s20 = smov (!%p226_p3, %s2864_s20), 31  ;;  %s4330_s21 = smov (!%p232_p4, %s2866_s21), 511 }
   0xc   : > { %s2865_s22 = sshll.u32 %s4328_s20, 1  ;;  %s2875_s26 = sshll.u32 %s4330_s21, 5 }
   0xd   : > { %s3007_s25 = scalar_lea.vmem %s4321_s0, %s2865_s22  ;;  %s3012_s29 = scalar_lea.vmem %s4322_s1, %s2875_s26 }
   0xe   : > { %241 = sbr.rel (%p2869_p5) target bundleno = 21 (0x15), region = 44 }
  0x13   : > { %v2959_v0 = vmov 0.0  }
  0x14   : > { %242 = vst [vmem:[#allocation2] sm:$0xff] %v2959_v0 }
  0x15 PF: > { %v308_v1 = vld [vmem:[%s3012_s29 + $0x1e0] sm:$0xff]  ;;  %vm2600_vm0 = vcmask 1041408   ;;  %vm2602_vm1 = vcmask 1045508   ;;  %vm2604_vm2 = vcmask 1043456   ;;  %p2870_p6 = scmp.ne.s32.totalorder %s2998_s19, 1 }
  0x16   : > { %v436_v2 = vld [vmem:[%s3012_s29 + $0x5e0] sm:$0xff]  ;;  %1313 = vmatpush.msra.mxu0 %v308_v1 }
  0x17   : > { %v304_v3 = vld [vmem:[%s3012_s29 + $0x1c0] sm:$0xff]  ;;  %1353 = vmatpush.msra.mxu2 %v436_v2 }
  0x18   : > { %v372_v4 = vld [vmem:[%s3012_s29 + $0x3e0] sm:$0xff]  ;;  %1314 = vmatpush.msra.mxu0 %v304_v3 }
  0x19   : > { %v432_v5 = vld [vmem:[%s3012_s29 + $0x5c0] sm:$0xff]  ;;  %1333 = vmatpush.msra.mxu1 %v372_v4 }
  0x1a   : > { %v500_v6 = vld [vmem:[%s3012_s29 + $0x7e0] sm:$0xff]  ;;  %1354 = vmatpush.msra.mxu2 %v432_v5 }
  0x1b   : > { %1373 = vmatpush.msra.mxu3 %v500_v6  ;;  %v300_v7 = vld [vmem:[%s3012_s29 + $0x1a0] sm:$0xff] }
  0x1c   : > { %v368_v8 = vld [vmem:[%s3012_s29 + $0x3c0] sm:$0xff]  ;;  %1315 = vmatpush.msra.mxu0 %v300_v7 }
  0x1d   : > { %v428_v9 = vld [vmem:[%s3012_s29 + $0x5a0] sm:$0xff]  ;;  %1334 = vmatpush.msra.mxu1 %v368_v8 }
  0x1e   : > { %v496_v10 = vld [vmem:[%s3012_s29 + $0x7c0] sm:$0xff]  ;;  %1355 = vmatpush.msra.mxu2 %v428_v9 }
  0x1f   : > { %v364_v11 = vld [vmem:[%s3012_s29 + $0x3a0] sm:$0xff]  ;;  %1374 = vmatpush.msra.mxu3 %v496_v10 }
  0x20   : > { %v296_v12 = vld [vmem:[%s3012_s29 + $0x180] sm:$0xff]  ;;  %1335 = vmatpush.msra.mxu1 %v364_v11 }
  0x21   : > { %v424_v13 = vld [vmem:[%s3012_s29 + $0x580] sm:$0xff]  ;;  %1316 = vmatpush.msra.mxu0 %v296_v12 }
  0x22   : > { %v492_v14 = vld [vmem:[%s3012_s29 + $0x7a0] sm:$0xff]  ;;  %1356 = vmatpush.msra.mxu2 %v424_v13 }
  0x23   : > { %v360_v15 = vld [vmem:[%s3012_s29 + $0x380] sm:$0xff]  ;;  %1375 = vmatpush.msra.mxu3 %v492_v14 }
  0x24   : > { %v488_v16 = vld [vmem:[%s3012_s29 + $0x780] sm:$0xff]  ;;  %1336 = vmatpush.msra.mxu1 %v360_v15 }
  0x25   : > { %v292_v17 = vld [vmem:[%s3012_s29 + $0x160] sm:$0xff]  ;;  %1376 = vmatpush.msra.mxu3 %v488_v16 }
  0x26   : > { %v420_v18 = vld [vmem:[%s3012_s29 + $0x560] sm:$0xff]  ;;  %1317 = vmatpush.msra.mxu0 %v292_v17 }
  0x27   : > { %v356_v19 = vld [vmem:[%s3012_s29 + $0x360] sm:$0xff]  ;;  %1357 = vmatpush.msra.mxu2 %v420_v18 }
  0x28   : > { %v484_v20 = vld [vmem:[%s3012_s29 + $0x760] sm:$0xff]  ;;  %1337 = vmatpush.msra.mxu1 %v356_v19 }
  0x29   : > { %v288_v21 = vld [vmem:[%s3012_s29 + $0x140] sm:$0xff]  ;;  %1377 = vmatpush.msra.mxu3 %v484_v20 }
  0x2a   : > { %v416_v22 = vld [vmem:[%s3012_s29 + $0x540] sm:$0xff]  ;;  %1318 = vmatpush.msra.mxu0 %v288_v21 }
  0x2b   : > { %v352_v23 = vld [vmem:[%s3012_s29 + $0x340] sm:$0xff]  ;;  %1358 = vmatpush.msra.mxu2 %v416_v22 }
  0x2c   : > { %v480_v24 = vld [vmem:[%s3012_s29 + $0x740] sm:$0xff]  ;;  %1338 = vmatpush.msra.mxu1 %v352_v23 }
  0x2d   : > { %v284_v25 = vld [vmem:[%s3012_s29 + $0x120] sm:$0xff]  ;;  %1378 = vmatpush.msra.mxu3 %v480_v24 }
  0x2e   : > { %v412_v26 = vld [vmem:[%s3012_s29 + $0x520] sm:$0xff]  ;;  %1319 = vmatpush.msra.mxu0 %v284_v25 }
  0x2f   : > { %v348_v27 = vld [vmem:[%s3012_s29 + $0x320] sm:$0xff]  ;;  %1359 = vmatpush.msra.mxu2 %v412_v26 }
  0x30   : > { %v476_v28 = vld [vmem:[%s3012_s29 + $0x720] sm:$0xff]  ;;  %1339 = vmatpush.msra.mxu1 %v348_v27 }
  0x31   : > { %v280_v29 = vld [vmem:[%s3012_s29 + $0x100] sm:$0xff]  ;;  %1379 = vmatpush.msra.mxu3 %v476_v28 }
  0x32   : > { %v408_v30 = vld [vmem:[%s3012_s29 + $0x500] sm:$0xff]  ;;  %1320 = vmatpush.msra.mxu0 %v280_v29 }
  0x33   : > { %v344_v31 = vld [vmem:[%s3012_s29 + $0x300] sm:$0xff]  ;;  %1360 = vmatpush.msra.mxu2 %v408_v30 }
  0x34   : > { %v472_v32 = vld [vmem:[%s3012_s29 + $0x700] sm:$0xff]  ;;  %1340 = vmatpush.msra.mxu1 %v344_v31 }
  0x35   : > { %v276_v33 = vld [vmem:[%s3012_s29 + $0xe0] sm:$0xff]  ;;  %1380 = vmatpush.msra.mxu3 %v472_v32 }
  0x36   : > { %v404_v34 = vld [vmem:[%s3012_s29 + $0x4e0] sm:$0xff]  ;;  %1321 = vmatpush.msra.mxu0 %v276_v33 }
  0x37   : > { %v340_v35 = vld [vmem:[%s3012_s29 + $0x2e0] sm:$0xff]  ;;  %1361 = vmatpush.msra.mxu2 %v404_v34 }
  0x38   : > { %v468_v36 = vld [vmem:[%s3012_s29 + $0x6e0] sm:$0xff]  ;;  %1341 = vmatpush.msra.mxu1 %v340_v35 }
  0x39   : > { %v272_v37 = vld [vmem:[%s3012_s29 + $0xc0] sm:$0xff]  ;;  %1381 = vmatpush.msra.mxu3 %v468_v36 }
  0x3a   : > { %v400_v38 = vld [vmem:[%s3012_s29 + $0x4c0] sm:$0xff]  ;;  %1322 = vmatpush.msra.mxu0 %v272_v37 }
  0x3b   : > { %v336_v39 = vld [vmem:[%s3012_s29 + $0x2c0] sm:$0xff]  ;;  %1362 = vmatpush.msra.mxu2 %v400_v38 }
  0x3c   : > { %v464_v40 = vld [vmem:[%s3012_s29 + $0x6c0] sm:$0xff]  ;;  %1342 = vmatpush.msra.mxu1 %v336_v39 }
  0x3d   : > { %v268_v41 = vld [vmem:[%s3012_s29 + $0xa0] sm:$0xff]  ;;  %1382 = vmatpush.msra.mxu3 %v464_v40  ;;  %v245_v40 = vld [vmem:[%s3007_s25 + $0x8] sm:$0xff] }
  0x3e   : > { %v396_v42 = vld [vmem:[%s3012_s29 + $0x4a0] sm:$0xff]  ;;  %1323 = vmatpush.msra.mxu0 %v268_v41  ;;  %1278 = vst [vmem:[#allocation1 + $0x20] ss:$4 sm:$0xff] %v245_v40 }
  0x3f   : > { %v332_v43 = vld [vmem:[%s3012_s29 + $0x2a0] sm:$0xff]  ;;  %1363 = vmatpush.msra.mxu2 %v396_v42 }
  0x40   : > { %v460_v44 = vld [vmem:[%s3012_s29 + $0x6a0] sm:$0xff]  ;;  %1343 = vmatpush.msra.mxu1 %v332_v43  ;;  %v246_v43 = vld [vmem:[%s3007_s25 + $0x10] sm:$0xff] }
  0x41   : > { %v264_v45 = vld [vmem:[%s3012_s29 + $0x80] sm:$0xff]  ;;  %1383 = vmatpush.msra.mxu3 %v460_v44 }
  0x42   : > { %v392_v46 = vld [vmem:[%s3012_s29 + $0x480] sm:$0xff]  ;;  %1324 = vmatpush.msra.mxu0 %v264_v45 }
  0x43   : > { %v328_v47 = vld [vmem:[%s3012_s29 + $0x280] sm:$0xff]  ;;  %1364 = vmatpush.msra.mxu2 %v392_v46 }
  0x44   : > { %v456_v48 = vld [vmem:[%s3012_s29 + $0x680] sm:$0xff]  ;;  %1344 = vmatpush.msra.mxu1 %v328_v47 }
  0x45   : > { %v260_v49 = vld [vmem:[%s3012_s29 + $0x60] sm:$0xff]  ;;  %1384 = vmatpush.msra.mxu3 %v456_v48 }
  0x46   : > { %v388_v50 = vld [vmem:[%s3012_s29 + $0x460] sm:$0xff]  ;;  %1325 = vmatpush.msra.mxu0 %v260_v49 }
  0x47   : > { %v324_v51 = vld [vmem:[%s3012_s29 + $0x260] sm:$0xff]  ;;  %1365 = vmatpush.msra.mxu2 %v388_v50 }
  0x48   : > { %v452_v52 = vld [vmem:[%s3012_s29 + $0x660] sm:$0xff]  ;;  %1345 = vmatpush.msra.mxu1 %v324_v51 }
  0x49   : > { %v256_v53 = vld [vmem:[%s3012_s29 + $0x40] sm:$0xff]  ;;  %1385 = vmatpush.msra.mxu3 %v452_v52 }
  0x4a   : > { %v384_v54 = vld [vmem:[%s3012_s29 + $0x440] sm:$0xff]  ;;  %1326 = vmatpush.msra.mxu0 %v256_v53 }
  0x4b   : > { %v320_v55 = vld [vmem:[%s3012_s29 + $0x240] sm:$0xff]  ;;  %1366 = vmatpush.msra.mxu2 %v384_v54 }
  0x4c   : > { %v448_v56 = vld [vmem:[%s3012_s29 + $0x640] sm:$0xff]  ;;  %1346 = vmatpush.msra.mxu1 %v320_v55 }
  0x4d   : > { %v252_v57 = vld [vmem:[%s3012_s29 + $0x20] sm:$0xff]  ;;  %1386 = vmatpush.msra.mxu3 %v448_v56 }
  0x4e   : > { %v380_v58 = vld [vmem:[%s3012_s29 + $0x420] sm:$0xff]  ;;  %1327 = vmatpush.msra.mxu0 %v252_v57 }
  0x4f   : > { %v316_v59 = vld [vmem:[%s3012_s29 + $0x220] sm:$0xff]  ;;  %1367 = vmatpush.msra.mxu2 %v380_v58 }
  0x50   : > { %v444_v60 = vld [vmem:[%s3012_s29 + $0x620] sm:$0xff]  ;;  %1347 = vmatpush.msra.mxu1 %v316_v59 }
  0x51   : > { %v248_v61 = vld [vmem:[%s3012_s29] sm:$0xff]  ;;  %1387 = vmatpush.msra.mxu3 %v444_v60  ;;  %v247_v60 = vld [vmem:[%s3007_s25 + $0x18] sm:$0xff] }
  0x52   : > { %v376_v62 = vld [vmem:[%s3012_s29 + $0x400] sm:$0xff]  ;;  %1328 = vmatpush.msra.mxu0 %v248_v61  ;;  %v3143_v61 = vld.sshfl [vmem:[#allocation1 + $0x30] sm:$0xff pattern:$0x73625140] }
  0x53   : > { %v564_v63 = vld [vmem:[%s3012_s29 + $0x9e0] sm:$0xff]  ;;  %1368 = vmatpush.msra.mxu2 %v376_v62 }
  0x54   : > { %v692_v0 = vld [vmem:[%s3012_s29 + $0xde0] sm:$0xff]  ;;  %1393 = vmatpush.msrb.mxu0 %v564_v63  ;;  %v3147_v63 = vld.sshfl [vmem:[#allocation1 + $0x38] sm:$0xff pattern:$0x73625140] }
  0x55   : > { %v312_v1 = vld [vmem:[%s3012_s29 + $0x200] sm:$0xff]  ;;  %1433 = vmatpush.msrb.mxu2 %v692_v0  ;;  %v3149_v0 = vld.sshfl [vmem:[#allocation1 + $0x28] sm:$0xff pattern:$0x73625140] }
  0x56   : > { %v440_v2 = vld [vmem:[%s3012_s29 + $0x600] sm:$0xff]  ;;  %1348 = vmatpush.msra.mxu1 %v312_v1 }
  0x57   : > { %v560_v3 = vld [vmem:[%s3012_s29 + $0x9c0] sm:$0xff]  ;;  %1388 = vmatpush.msra.mxu3 %v440_v2 }
  0x58   : > { %v628_v4 = vld [vmem:[%s3012_s29 + $0xbe0] sm:$0xff]  ;;  %1394 = vmatpush.msrb.mxu0 %v560_v3 }
  0x59   : > { %v688_v5 = vld [vmem:[%s3012_s29 + $0xdc0] sm:$0xff]  ;;  %1413 = vmatpush.msrb.mxu1 %v628_v4 }
  0x5a   : > { %v756_v6 = vld [vmem:[%s3012_s29 + $0xfe0] sm:$0xff]  ;;  %1434 = vmatpush.msrb.mxu2 %v688_v5 }
  0x5b   : > { %v556_v7 = vld [vmem:[%s3012_s29 + $0x9a0] sm:$0xff]  ;;  %1453 = vmatpush.msrb.mxu3 %v756_v6 }
  0x5c   : > { %v624_v8 = vld [vmem:[%s3012_s29 + $0xbc0] sm:$0xff]  ;;  %1395 = vmatpush.msrb.mxu0 %v556_v7 }
  0x5d   : > { %v684_v9 = vld [vmem:[%s3012_s29 + $0xda0] sm:$0xff]  ;;  %1414 = vmatpush.msrb.mxu1 %v624_v8 }
  0x5e   : > { %v752_v10 = vld [vmem:[%s3012_s29 + $0xfc0] sm:$0xff]  ;;  %1435 = vmatpush.msrb.mxu2 %v684_v9 }
  0x5f   : > { %v552_v11 = vld [vmem:[%s3012_s29 + $0x980] sm:$0xff]  ;;  %1454 = vmatpush.msrb.mxu3 %v752_v10 }
  0x60   : > { %v620_v12 = vld [vmem:[%s3012_s29 + $0xba0] sm:$0xff]  ;;  %1396 = vmatpush.msrb.mxu0 %v552_v11 }
  0x61   : > { %v680_v13 = vld [vmem:[%s3012_s29 + $0xd80] sm:$0xff]  ;;  %1415 = vmatpush.msrb.mxu1 %v620_v12 }
  0x62   : > { %v748_v14 = vld [vmem:[%s3012_s29 + $0xfa0] sm:$0xff]  ;;  %1436 = vmatpush.msrb.mxu2 %v680_v13 }
  0x63   : > { %v548_v15 = vld [vmem:[%s3012_s29 + $0x960] sm:$0xff]  ;;  %1455 = vmatpush.msrb.mxu3 %v748_v14 }
  0x64   : > { %v616_v16 = vld [vmem:[%s3012_s29 + $0xb80] sm:$0xff]  ;;  %1397 = vmatpush.msrb.mxu0 %v548_v15 }
  0x65   : > { %v676_v17 = vld [vmem:[%s3012_s29 + $0xd60] sm:$0xff]  ;;  %1416 = vmatpush.msrb.mxu1 %v616_v16 }
  0x66   : > { %v744_v18 = vld [vmem:[%s3012_s29 + $0xf80] sm:$0xff]  ;;  %1437 = vmatpush.msrb.mxu2 %v676_v17 }
  0x67   : > { %v544_v19 = vld [vmem:[%s3012_s29 + $0x940] sm:$0xff]  ;;  %1456 = vmatpush.msrb.mxu3 %v744_v18 }
  0x68   : > { %v612_v20 = vld [vmem:[%s3012_s29 + $0xb60] sm:$0xff]  ;;  %1398 = vmatpush.msrb.mxu0 %v544_v19 }
  0x69   : > { %v672_v21 = vld [vmem:[%s3012_s29 + $0xd40] sm:$0xff]  ;;  %1417 = vmatpush.msrb.mxu1 %v612_v20 }
  0x6a   : > { %v740_v22 = vld [vmem:[%s3012_s29 + $0xf60] sm:$0xff]  ;;  %1438 = vmatpush.msrb.mxu2 %v672_v21 }
  0x6b   : > { %v244_v23 = vld [vmem:[%s3007_s25] sm:$0xff]  ;;  %1457 = vmatpush.msrb.mxu3 %v740_v22 }
  0x6c   : > { %v540_v24 = vld [vmem:[%s3012_s29 + $0x920] sm:$0xff]  ;;  %1276 = vst [vmem:[#allocation1] ss:$4 sm:$0xff] %v244_v23 }
  0x6d   : > { %v608_v25 = vld [vmem:[%s3012_s29 + $0xb40] sm:$0xff]  ;;  %1399 = vmatpush.msrb.mxu0 %v540_v24 }
  0x6e   : > { %v668_v26 = vld [vmem:[%s3012_s29 + $0xd20] sm:$0xff]  ;;  %1418 = vmatpush.msrb.mxu1 %v608_v25 }
  0x6f   : > { %v736_v27 = vld [vmem:[%s3012_s29 + $0xf40] sm:$0xff]  ;;  %1439 = vmatpush.msrb.mxu2 %v668_v26 }
  0x70   : > { %v536_v28 = vld [vmem:[%s3012_s29 + $0x900] sm:$0xff]  ;;  %1458 = vmatpush.msrb.mxu3 %v736_v27 }
  0x71   : > { %v604_v29 = vld [vmem:[%s3012_s29 + $0xb20] sm:$0xff]  ;;  %1400 = vmatpush.msrb.mxu0 %v536_v28 }
  0x72   : > { %v664_v30 = vld [vmem:[%s3012_s29 + $0xd00] sm:$0xff]  ;;  %1419 = vmatpush.msrb.mxu1 %v604_v29 }
  0x73   : > { %v732_v31 = vld [vmem:[%s3012_s29 + $0xf20] sm:$0xff]  ;;  %1440 = vmatpush.msrb.mxu2 %v664_v30  ;;  %v3123_v45 = vld.sshfl [vmem:[#allocation1 + $0x10] sm:$0xff pattern:$0x73625140] }
  0x74   : > { %v532_v32 = vld [vmem:[%s3012_s29 + $0x8e0] sm:$0xff]  ;;  %1459 = vmatpush.msrb.mxu3 %v732_v31  ;;  %v3127_v47 = vld.sshfl [vmem:[#allocation1 + $0x18] sm:$0xff pattern:$0x73625140]  ;;  %1369 = vmatmul.f32.vlgmr.msra.gmra.mxu2 %v3123_v45 }
  0x75   : > { %v600_v33 = vld [vmem:[%s3012_s29 + $0xb00] sm:$0xff]  ;;  %1401 = vmatpush.msrb.mxu0 %v532_v32  ;;  %v3129_v48 = vld.sshfl [vmem:[#allocation1 + $0x8] sm:$0xff pattern:$0x73625140]  ;;  %1389 = vmatmul.f32.vlgmr.msra.gmra.mxu3 %v3127_v47 }
  0x76   : > { %v660_v34 = vld [vmem:[%s3012_s29 + $0xce0] sm:$0xff]  ;;  %1420 = vmatpush.msrb.mxu1 %v600_v33 }
  0x77   : > { %v728_v35 = vld [vmem:[%s3012_s29 + $0xf00] sm:$0xff]  ;;  %1441 = vmatpush.msrb.mxu2 %v660_v34  ;;  %1349 = vmatmul.f32.vlgmr.msra.gmra.mxu1 %v3129_v48 }
  0x78   : > { %v528_v36 = vld [vmem:[%s3012_s29 + $0x8c0] sm:$0xff]  ;;  %1460 = vmatpush.msrb.mxu3 %v728_v35 }
  0x79   : > { %v596_v37 = vld [vmem:[%s3012_s29 + $0xae0] sm:$0xff]  ;;  %1402 = vmatpush.msrb.mxu0 %v528_v36 }
  0x7a   : > { %v656_v38 = vld [vmem:[%s3012_s29 + $0xcc0] sm:$0xff]  ;;  %1421 = vmatpush.msrb.mxu1 %v596_v37 }
  0x7b   : > { %v724_v39 = vld [vmem:[%s3012_s29 + $0xee0] sm:$0xff]  ;;  %1442 = vmatpush.msrb.mxu2 %v656_v38 }
  0x7c   : > { %v524_v41 = vld [vmem:[%s3012_s29 + $0x8a0] sm:$0xff]  ;;  %1461 = vmatpush.msrb.mxu3 %v724_v39 }
  0x7d   : > { %v592_v42 = vld [vmem:[%s3012_s29 + $0xac0] sm:$0xff]  ;;  %1403 = vmatpush.msrb.mxu0 %v524_v41 }
  0x7e   : > { %v652_v44 = vld [vmem:[%s3012_s29 + $0xca0] sm:$0xff]  ;;  %1422 = vmatpush.msrb.mxu1 %v592_v42 }
  0x7f   : > { %v3125_v46 = vld.sshfl [vmem:[#allocation1] sm:$0xff pattern:$0x73625140]  ;;  %1443 = vmatpush.msrb.mxu2 %v652_v44 }
  0x80   : > { %v720_v49 = vld [vmem:[%s3012_s29 + $0xec0] sm:$0xff]  ;;  %1287 = vst [vmem:[#allocation1] ss:$4 sm:$0xff] %v246_v43  ;;  %1329 = vmatmul.f32.vlgmr.msra.gmra.mxu0 %v3125_v46 }
  0x81   : > { %v520_v50 = vld [vmem:[%s3012_s29 + $0x880] sm:$0xff]  ;;  %1462 = vmatpush.msrb.mxu3 %v720_v49 }
  0x82   : > { %v588_v51 = vld [vmem:[%s3012_s29 + $0xaa0] sm:$0xff]  ;;  %1404 = vmatpush.msrb.mxu0 %v520_v50 }
  0x83   : > { %v648_v52 = vld [vmem:[%s3012_s29 + $0xc80] sm:$0xff]  ;;  %1423 = vmatpush.msrb.mxu1 %v588_v51 }
  0x84   : > { %v716_v53 = vld [vmem:[%s3012_s29 + $0xea0] sm:$0xff]  ;;  %1444 = vmatpush.msrb.mxu2 %v648_v52 }
  0x85   : > { %v516_v54 = vld [vmem:[%s3012_s29 + $0x860] sm:$0xff]  ;;  %1463 = vmatpush.msrb.mxu3 %v716_v53 }
  0x86   : > { %v584_v55 = vld [vmem:[%s3012_s29 + $0xa80] sm:$0xff]  ;;  %1405 = vmatpush.msrb.mxu0 %v516_v54 }
  0x87   : > { %v644_v56 = vld [vmem:[%s3012_s29 + $0xc60] sm:$0xff]  ;;  %1424 = vmatpush.msrb.mxu1 %v584_v55 }
  0x88   : > { %v712_v57 = vld [vmem:[%s3012_s29 + $0xe80] sm:$0xff]  ;;  %1445 = vmatpush.msrb.mxu2 %v644_v56 }
  0x89   : > { %v512_v58 = vld [vmem:[%s3012_s29 + $0x840] sm:$0xff]  ;;  %1464 = vmatpush.msrb.mxu3 %v712_v57 }
  0x8a   : > { %v580_v59 = vld [vmem:[%s3012_s29 + $0xa60] sm:$0xff]  ;;  %1406 = vmatpush.msrb.mxu0 %v512_v58 }
  0x8b   : > { %v3145_v62 = vld.sshfl [vmem:[#allocation1 + $0x20] sm:$0xff pattern:$0x73625140]  ;;  %1425 = vmatpush.msrb.mxu1 %v580_v59 }
  0x8c   : > { %v640_v1 = vld [vmem:[%s3012_s29 + $0xc40] sm:$0xff]  ;;  %1288 = vst [vmem:[#allocation1 + $0x20] ss:$4 sm:$0xff] %v247_v60 }
  0x8d   : > { %v708_v2 = vld [vmem:[%s3012_s29 + $0xe60] sm:$0xff]  ;;  %1446 = vmatpush.msrb.mxu2 %v640_v1 }
  0x8e   : > { %v508_v3 = vld [vmem:[%s3012_s29 + $0x820] sm:$0xff]  ;;  %1465 = vmatpush.msrb.mxu3 %v708_v2 }
  0x8f   : > { %v576_v4 = vld [vmem:[%s3012_s29 + $0xa40] sm:$0xff]  ;;  %1407 = vmatpush.msrb.mxu0 %v508_v3 }
  0x90   : > { %v636_v5 = vld [vmem:[%s3012_s29 + $0xc20] sm:$0xff]  ;;  %1426 = vmatpush.msrb.mxu1 %v576_v4 }
  0x91   : > { %v704_v6 = vld [vmem:[%s3012_s29 + $0xe40] sm:$0xff]  ;;  %1447 = vmatpush.msrb.mxu2 %v636_v5 }
  0x92   : > { %v504_v7 = vld [vmem:[%s3012_s29 + $0x800] sm:$0xff]  ;;  %1466 = vmatpush.msrb.mxu3 %v704_v6 }
  0x93   : > { %v572_v8 = vld [vmem:[%s3012_s29 + $0xa20] sm:$0xff]  ;;  %1408 = vmatpush.msrb.mxu0 %v504_v7 }
  0x94   : > { %v632_v9 = vld [vmem:[%s3012_s29 + $0xc00] sm:$0xff]  ;;  %1427 = vmatpush.msrb.mxu1 %v572_v8  ;;  %1409 = vmatmul.f32.vlgmr.msrb.gmra.mxu0 %v3145_v62 }
  0x95   : > { %v700_v10 = vld [vmem:[%s3012_s29 + $0xe20] sm:$0xff]  ;;  %1448 = vmatpush.msrb.mxu2 %v632_v9 }
  0x96   : > { %v820_v11 = vld [vmem:[%s3012_s29 + $0x11e0] sm:$0xff]  ;;  %1467 = vmatpush.msrb.mxu3 %v700_v10  ;;  %1449 = vmatmul.f32.vlgmr.msrb.gmra.mxu2 %v3143_v61 }
  0x97   : > { %v948_v12 = vld [vmem:[%s3012_s29 + $0x15e0] sm:$0xff]  ;;  %1473 = vmatpush.msra.mxu0 %v820_v11 }
  0x98   : > { %v568_v13 = vld [vmem:[%s3012_s29 + $0xa00] sm:$0xff]  ;;  %1513 = vmatpush.msra.mxu2 %v948_v12 }
  0x99   : > { %v696_v14 = vld [vmem:[%s3012_s29 + $0xe00] sm:$0xff]  ;;  %1428 = vmatpush.msrb.mxu1 %v568_v13 }
  0x9a   : > { %v816_v15 = vld [vmem:[%s3012_s29 + $0x11c0] sm:$0xff]  ;;  %1468 = vmatpush.msrb.mxu3 %v696_v14  ;;  %1429 = vmatmul.f32.vlgmr.msrb.gmra.mxu1 %v3149_v0 }
  0x9b   : > { %v884_v16 = vld [vmem:[%s3012_s29 + $0x13e0] sm:$0xff]  ;;  %1474 = vmatpush.msra.mxu0 %v816_v15  ;;  %1469 = vmatmul.f32.vlgmr.msrb.gmra.mxu3 %v3147_v63 }
  0x9c   : > { %v944_v17 = vld [vmem:[%s3012_s29 + $0x15c0] sm:$0xff]  ;;  %1493 = vmatpush.msra.mxu1 %v884_v16 }
  0x9d   : > { %v1012_v18 = vld [vmem:[%s3012_s29 + $0x17e0] sm:$0xff]  ;;  %1514 = vmatpush.msra.mxu2 %v944_v17 }
  0x9e   : > { %v812_v19 = vld [vmem:[%s3012_s29 + $0x11a0] sm:$0xff]  ;;  %1533 = vmatpush.msra.mxu3 %v1012_v18 }
  0x9f   : > { %v880_v20 = vld [vmem:[%s3012_s29 + $0x13c0] sm:$0xff]  ;;  %1475 = vmatpush.msra.mxu0 %v812_v19 }
  0xa0   : > { %v940_v21 = vld [vmem:[%s3012_s29 + $0x15a0] sm:$0xff]  ;;  %1494 = vmatpush.msra.mxu1 %v880_v20  ;;  %v1291_v20 = vld.sshfl [vmem:[#allocation1 + $0x10] sm:$0xff pattern:$0x73625140] }
  0xa1   : > { %v1008_v22 = vld [vmem:[%s3012_s29 + $0x17c0] sm:$0xff]  ;;  %1515 = vmatpush.msra.mxu2 %v940_v21 }
  0xa2   : > { %v808_v23 = vld [vmem:[%s3012_s29 + $0x1180] sm:$0xff]  ;;  %1534 = vmatpush.msra.mxu3 %v1008_v22 }
  0xa3   : > { %v876_v24 = vld [vmem:[%s3012_s29 + $0x13a0] sm:$0xff]  ;;  %1476 = vmatpush.msra.mxu0 %v808_v23 }
  0xa4   : > { %v936_v25 = vld [vmem:[%s3012_s29 + $0x1580] sm:$0xff]  ;;  %1495 = vmatpush.msra.mxu1 %v876_v24 }
  0xa5   : > { %v1004_v26 = vld [vmem:[%s3012_s29 + $0x17a0] sm:$0xff]  ;;  %1516 = vmatpush.msra.mxu2 %v936_v25  ;;  %v1290_v25 = vld.sshfl [vmem:[#allocation1 + $0x8] sm:$0xff pattern:$0x73625140] }
  0xa6   : > { %v804_v27 = vld [vmem:[%s3012_s29 + $0x1160] sm:$0xff]  ;;  %1535 = vmatpush.msra.mxu3 %v1004_v26  ;;  %v1292_v26 = vld.sshfl [vmem:[#allocation1 + $0x18] sm:$0xff pattern:$0x73625140] }
  0xa7   : > { %v872_v28 = vld [vmem:[%s3012_s29 + $0x1380] sm:$0xff]  ;;  %1477 = vmatpush.msra.mxu0 %v804_v27 }
  0xa8   : > { %v932_v29 = vld [vmem:[%s3012_s29 + $0x1560] sm:$0xff]  ;;  %1496 = vmatpush.msra.mxu1 %v872_v28 }
  0xa9   : > { %v1000_v30 = vld [vmem:[%s3012_s29 + $0x1780] sm:$0xff]  ;;  %1517 = vmatpush.msra.mxu2 %v932_v29 }
  0xaa   : > { %v800_v31 = vld [vmem:[%s3012_s29 + $0x1140] sm:$0xff]  ;;  %1536 = vmatpush.msra.mxu3 %v1000_v30 }
  0xab   : > { %v868_v32 = vld [vmem:[%s3012_s29 + $0x1360] sm:$0xff]  ;;  %1478 = vmatpush.msra.mxu0 %v800_v31 }
  0xac   : > { %v928_v33 = vld [vmem:[%s3012_s29 + $0x1540] sm:$0xff]  ;;  %1497 = vmatpush.msra.mxu1 %v868_v32 }
  0xad   : > { %v996_v34 = vld [vmem:[%s3012_s29 + $0x1760] sm:$0xff]  ;;  %1518 = vmatpush.msra.mxu2 %v928_v33 }
  0xae   : > { %v796_v35 = vld [vmem:[%s3012_s29 + $0x1120] sm:$0xff]  ;;  %1537 = vmatpush.msra.mxu3 %v996_v34 }
  0xaf   : > { %v864_v36 = vld [vmem:[%s3012_s29 + $0x1340] sm:$0xff]  ;;  %1479 = vmatpush.msra.mxu0 %v796_v35 }
  0xb0   : > { %v924_v37 = vld [vmem:[%s3012_s29 + $0x1520] sm:$0xff]  ;;  %1498 = vmatpush.msra.mxu1 %v864_v36 }
  0xb1   : > { %v992_v38 = vld [vmem:[%s3012_s29 + $0x1740] sm:$0xff]  ;;  %1519 = vmatpush.msra.mxu2 %v924_v37 }
  0xb2   : > { %v792_v39 = vld [vmem:[%s3012_s29 + $0x1100] sm:$0xff]  ;;  %1538 = vmatpush.msra.mxu3 %v992_v38 }
  0xb3   : > { %v860_v40 = vld [vmem:[%s3012_s29 + $0x1320] sm:$0xff]  ;;  %1480 = vmatpush.msra.mxu0 %v792_v39 }
  0xb4   : > { %v920_v41 = vld [vmem:[%s3012_s29 + $0x1500] sm:$0xff]  ;;  %1499 = vmatpush.msra.mxu1 %v860_v40 }
  0xb5   : > { %v988_v42 = vld [vmem:[%s3012_s29 + $0x1720] sm:$0xff]  ;;  %1520 = vmatpush.msra.mxu2 %v920_v41 }
  0xb6   : > { %v788_v43 = vld [vmem:[%s3012_s29 + $0x10e0] sm:$0xff]  ;;  %1539 = vmatpush.msra.mxu3 %v988_v42 }
  0xb7   : > { %v856_v44 = vld [vmem:[%s3012_s29 + $0x1300] sm:$0xff]  ;;  %1481 = vmatpush.msra.mxu0 %v788_v43 }
  0xb8   : > { %v916_v49 = vld [vmem:[%s3012_s29 + $0x14e0] sm:$0xff]  ;;  %1500 = vmatpush.msra.mxu1 %v856_v44 }
  0xb9   : > { %v984_v50 = vld [vmem:[%s3012_s29 + $0x1700] sm:$0xff]  ;;  %1521 = vmatpush.msra.mxu2 %v916_v49 }
  0xba   : > { %v784_v51 = vld [vmem:[%s3012_s29 + $0x10c0] sm:$0xff]  ;;  %1540 = vmatpush.msra.mxu3 %v984_v50 }
  0xbb   : > { %v852_v52 = vld [vmem:[%s3012_s29 + $0x12e0] sm:$0xff]  ;;  %1482 = vmatpush.msra.mxu0 %v784_v51 }
  0xbc   : > { %v912_v53 = vld [vmem:[%s3012_s29 + $0x14c0] sm:$0xff]  ;;  %1501 = vmatpush.msra.mxu1 %v852_v52 }
  0xbd   : > { %v980_v54 = vld [vmem:[%s3012_s29 + $0x16e0] sm:$0xff]  ;;  %1522 = vmatpush.msra.mxu2 %v912_v53 }
  0xbe   : > { %v780_v55 = vld [vmem:[%s3012_s29 + $0x10a0] sm:$0xff]  ;;  %1541 = vmatpush.msra.mxu3 %v980_v54 }
  0xbf   : > { %v848_v56 = vld [vmem:[%s3012_s29 + $0x12c0] sm:$0xff]  ;;  %1483 = vmatpush.msra.mxu0 %v780_v55 }
  0xc0   : > { %v908_v57 = vld [vmem:[%s3012_s29 + $0x14a0] sm:$0xff]  ;;  %1502 = vmatpush.msra.mxu1 %v848_v56 }
  0xc1   : > { %v976_v58 = vld [vmem:[%s3012_s29 + $0x16c0] sm:$0xff]  ;;  %1523 = vmatpush.msra.mxu2 %v908_v57 }
  0xc2   : > { %v776_v59 = vld [vmem:[%s3012_s29 + $0x1080] sm:$0xff]  ;;  %1542 = vmatpush.msra.mxu3 %v976_v58 }
  0xc3   : > { %v844_v60 = vld [vmem:[%s3012_s29 + $0x12a0] sm:$0xff]  ;;  %1484 = vmatpush.msra.mxu0 %v776_v59 }
  0xc4   : > { %v904_v1 = vld [vmem:[%s3012_s29 + $0x1480] sm:$0xff]  ;;  %1503 = vmatpush.msra.mxu1 %v844_v60 }
  0xc5   : > { %v972_v2 = vld [vmem:[%s3012_s29 + $0x16a0] sm:$0xff]  ;;  %1524 = vmatpush.msra.mxu2 %v904_v1 }
  0xc6   : > { %v772_v3 = vld [vmem:[%s3012_s29 + $0x1060] sm:$0xff]  ;;  %1543 = vmatpush.msra.mxu3 %v972_v2 }
  0xc7   : > { %v840_v4 = vld [vmem:[%s3012_s29 + $0x1280] sm:$0xff]  ;;  %1485 = vmatpush.msra.mxu0 %v772_v3 }
  0xc8   : > { %v900_v5 = vld [vmem:[%s3012_s29 + $0x1460] sm:$0xff]  ;;  %1504 = vmatpush.msra.mxu1 %v840_v4 }
  0xc9   : > { %v968_v6 = vld [vmem:[%s3012_s29 + $0x1680] sm:$0xff]  ;;  %1525 = vmatpush.msra.mxu2 %v900_v5 }
  0xca   : > { %v768_v7 = vld [vmem:[%s3012_s29 + $0x1040] sm:$0xff]  ;;  %1544 = vmatpush.msra.mxu3 %v968_v6 }
  0xcb   : > { %v836_v8 = vld [vmem:[%s3012_s29 + $0x1260] sm:$0xff]  ;;  %1486 = vmatpush.msra.mxu0 %v768_v7 }
  0xcc   : > { %v896_v9 = vld [vmem:[%s3012_s29 + $0x1440] sm:$0xff]  ;;  %1505 = vmatpush.msra.mxu1 %v836_v8 }
  0xcd   : > { %v964_v10 = vld [vmem:[%s3012_s29 + $0x1660] sm:$0xff]  ;;  %1526 = vmatpush.msra.mxu2 %v896_v9 }
  0xce   : > { %v764_v11 = vld [vmem:[%s3012_s29 + $0x1020] sm:$0xff]  ;;  %1545 = vmatpush.msra.mxu3 %v964_v10 }
  0xcf   : > { %v832_v12 = vld [vmem:[%s3012_s29 + $0x1240] sm:$0xff]  ;;  %1487 = vmatpush.msra.mxu0 %v764_v11 }
  0xd0   : > { %v892_v13 = vld [vmem:[%s3012_s29 + $0x1420] sm:$0xff]  ;;  %1506 = vmatpush.msra.mxu1 %v832_v12 }
  0xd1   : > { %v960_v14 = vld [vmem:[%s3012_s29 + $0x1640] sm:$0xff]  ;;  %1527 = vmatpush.msra.mxu2 %v892_v13 }
  0xd2   : > { %v760_v15 = vld [vmem:[%s3012_s29 + $0x1000] sm:$0xff]  ;;  %1546 = vmatpush.msra.mxu3 %v960_v14 }
  0xd3   : > { %v828_v16 = vld [vmem:[%s3012_s29 + $0x1220] sm:$0xff]  ;;  %1488 = vmatpush.msra.mxu0 %v760_v15 }
  0xd4   : > { %v888_v17 = vld [vmem:[%s3012_s29 + $0x1400] sm:$0xff]  ;;  %1507 = vmatpush.msra.mxu1 %v828_v16 }
  0xd5   : > { %v956_v18 = vld [vmem:[%s3012_s29 + $0x1620] sm:$0xff]  ;;  %1528 = vmatpush.msra.mxu2 %v888_v17 }
  0xd6   : > { %v1289_v19 = vld.sshfl [vmem:[#allocation1] sm:$0xff pattern:$0x73625140]  ;;  %1547 = vmatpush.msra.mxu3 %v956_v18  ;;  %1529 = vmatmul.f32.vlgmr.msra.gmra.mxu2 %v1291_v20 }
  0xd7   : > { %v1076_v21 = vld [vmem:[%s3012_s29 + $0x19e0] sm:$0xff]  ;;  %1489 = vmatmul.f32.vlgmr.msra.gmra.mxu0 %v1289_v19 }
  0xd8   : > { %v1204_v22 = vld [vmem:[%s3012_s29 + $0x1de0] sm:$0xff]  ;;  %1553 = vmatpush.msrb.mxu0 %v1076_v21 }
  0xd9   : > { %v824_v23 = vld [vmem:[%s3012_s29 + $0x1200] sm:$0xff]  ;;  %1593 = vmatpush.msrb.mxu2 %v1204_v22 }
  0xda   : > { %v952_v24 = vld [vmem:[%s3012_s29 + $0x1600] sm:$0xff]  ;;  %1508 = vmatpush.msra.mxu1 %v824_v23 }
  0xdb   : > { %v1072_v27 = vld [vmem:[%s3012_s29 + $0x19c0] sm:$0xff]  ;;  %1548 = vmatpush.msra.mxu3 %v952_v24  ;;  %1509 = vmatmul.f32.vlgmr.msra.gmra.mxu1 %v1290_v25 }
  0xdc   : > { %v1140_v28 = vld [vmem:[%s3012_s29 + $0x1be0] sm:$0xff]  ;;  %1549 = vmatmul.f32.vlgmr.msra.gmra.mxu3 %v1292_v26  ;;  %1554 = vmatpush.msrb.mxu0 %v1072_v27 }
  0xdd   : > { %v1200_v29 = vld [vmem:[%s3012_s29 + $0x1dc0] sm:$0xff]  ;;  %1573 = vmatpush.msrb.mxu1 %v1140_v28 }
  0xde   : > { %v1268_v30 = vld [vmem:[%s3012_s29 + $0x1fe0] sm:$0xff]  ;;  %1594 = vmatpush.msrb.mxu2 %v1200_v29 }
  0xdf   : > { %v1068_v31 = vld [vmem:[%s3012_s29 + $0x19a0] sm:$0xff]  ;;  %1613 = vmatpush.msrb.mxu3 %v1268_v30 }
  0xe0   : > { %v1136_v32 = vld [vmem:[%s3012_s29 + $0x1bc0] sm:$0xff]  ;;  %1555 = vmatpush.msrb.mxu0 %v1068_v31 }
  0xe1   : > { %v1196_v33 = vld [vmem:[%s3012_s29 + $0x1da0] sm:$0xff]  ;;  %1574 = vmatpush.msrb.mxu1 %v1136_v32  ;;  %v1295_v32 = vld.sshfl [vmem:[#allocation1 + $0x30] sm:$0xff pattern:$0x73625140] }
  0xe2   : > { %v1264_v34 = vld [vmem:[%s3012_s29 + $0x1fc0] sm:$0xff]  ;;  %1595 = vmatpush.msrb.mxu2 %v1196_v33  ;;  %v309_v33 = vld [vmem:[%s3012_s29 + $0x1e8] sm:$0xff] }
  0xe3   : > { %v1064_v35 = vld [vmem:[%s3012_s29 + $0x1980] sm:$0xff]  ;;  %1614 = vmatpush.msrb.mxu3 %v1264_v34  ;;  %v437_v34 = vld [vmem:[%s3012_s29 + $0x5e8] sm:$0xff] }
  0xe4   : > { %v1132_v36 = vld [vmem:[%s3012_s29 + $0x1ba0] sm:$0xff]  ;;  %1556 = vmatpush.msrb.mxu0 %v1064_v35 }
  0xe5   : > { %v1192_v37 = vld [vmem:[%s3012_s29 + $0x1d80] sm:$0xff]  ;;  %1575 = vmatpush.msrb.mxu1 %v1132_v36 }
  0xe6   : > { %v1260_v38 = vld [vmem:[%s3012_s29 + $0x1fa0] sm:$0xff]  ;;  %1596 = vmatpush.msrb.mxu2 %v1192_v37  ;;  %v1294_v37 = vld.sshfl [vmem:[#allocation1 + $0x28] sm:$0xff pattern:$0x73625140] }
  0xe7   : > { %v1060_v39 = vld [vmem:[%s3012_s29 + $0x1960] sm:$0xff]  ;;  %1615 = vmatpush.msrb.mxu3 %v1260_v38  ;;  %v1296_v38 = vld.sshfl [vmem:[#allocation1 + $0x38] sm:$0xff pattern:$0x73625140] }
  0xe8   : > { %v1128_v40 = vld [vmem:[%s3012_s29 + $0x1b80] sm:$0xff]  ;;  %1557 = vmatpush.msrb.mxu0 %v1060_v39  ;;  %v305_v39 = vld [vmem:[%s3012_s29 + $0x1c8] sm:$0xff] }
  0xe9   : > { %v1188_v41 = vld [vmem:[%s3012_s29 + $0x1d60] sm:$0xff]  ;;  %1576 = vmatpush.msrb.mxu1 %v1128_v40  ;;  %v373_v40 = vld [vmem:[%s3012_s29 + $0x3e8] sm:$0xff] }
  0xea   : > { %v1256_v42 = vld [vmem:[%s3012_s29 + $0x1f80] sm:$0xff]  ;;  %1597 = vmatpush.msrb.mxu2 %v1188_v41  ;;  %v433_v41 = vld [vmem:[%s3012_s29 + $0x5c8] sm:$0xff] }
  0xeb   : > { %v1056_v43 = vld [vmem:[%s3012_s29 + $0x1940] sm:$0xff]  ;;  %1616 = vmatpush.msrb.mxu3 %v1256_v42  ;;  %v501_v42 = vld [vmem:[%s3012_s29 + $0x7e8] sm:$0xff] }
  0xec   : > { %v1124_v44 = vld [vmem:[%s3012_s29 + $0x1b60] sm:$0xff]  ;;  %1558 = vmatpush.msrb.mxu0 %v1056_v43  ;;  %v301_v43 = vld [vmem:[%s3012_s29 + $0x1a8] sm:$0xff] }
  0xed   : > { %v1184_v49 = vld [vmem:[%s3012_s29 + $0x1d40] sm:$0xff]  ;;  %1577 = vmatpush.msrb.mxu1 %v1124_v44  ;;  %v369_v44 = vld [vmem:[%s3012_s29 + $0x3c8] sm:$0xff] }
  0xee   : > { %v1252_v50 = vld [vmem:[%s3012_s29 + $0x1f60] sm:$0xff]  ;;  %1598 = vmatpush.msrb.mxu2 %v1184_v49  ;;  %v429_v49 = vld [vmem:[%s3012_s29 + $0x5a8] sm:$0xff] }
  0xef   : > { %v1052_v51 = vld [vmem:[%s3012_s29 + $0x1920] sm:$0xff]  ;;  %1617 = vmatpush.msrb.mxu3 %v1252_v50  ;;  %v497_v50 = vld [vmem:[%s3012_s29 + $0x7c8] sm:$0xff] }
  0xf0   : > { %v1120_v52 = vld [vmem:[%s3012_s29 + $0x1b40] sm:$0xff]  ;;  %1559 = vmatpush.msrb.mxu0 %v1052_v51  ;;  %v297_v51 = vld [vmem:[%s3012_s29 + $0x188] sm:$0xff] }
  0xf1   : > { %v1180_v53 = vld [vmem:[%s3012_s29 + $0x1d20] sm:$0xff]  ;;  %1578 = vmatpush.msrb.mxu1 %v1120_v52  ;;  %v365_v52 = vld [vmem:[%s3012_s29 + $0x3a8] sm:$0xff] }
  0xf2   : > { %v1248_v54 = vld [vmem:[%s3012_s29 + $0x1f40] sm:$0xff]  ;;  %1599 = vmatpush.msrb.mxu2 %v1180_v53  ;;  %v425_v53 = vld [vmem:[%s3012_s29 + $0x588] sm:$0xff] }
  0xf3   : > { %v1048_v55 = vld [vmem:[%s3012_s29 + $0x1900] sm:$0xff]  ;;  %1618 = vmatpush.msrb.mxu3 %v1248_v54  ;;  %v493_v54 = vld [vmem:[%s3012_s29 + $0x7a8] sm:$0xff] }
  0xf4   : > { %v1116_v56 = vld [vmem:[%s3012_s29 + $0x1b20] sm:$0xff]  ;;  %1560 = vmatpush.msrb.mxu0 %v1048_v55  ;;  %v293_v55 = vld [vmem:[%s3012_s29 + $0x168] sm:$0xff] }
  0xf5   : > { %v1176_v57 = vld [vmem:[%s3012_s29 + $0x1d00] sm:$0xff]  ;;  %1579 = vmatpush.msrb.mxu1 %v1116_v56  ;;  %v361_v56 = vld [vmem:[%s3012_s29 + $0x388] sm:$0xff] }
  0xf6   : > { %v1244_v58 = vld [vmem:[%s3012_s29 + $0x1f20] sm:$0xff]  ;;  %1600 = vmatpush.msrb.mxu2 %v1176_v57  ;;  %v421_v57 = vld [vmem:[%s3012_s29 + $0x568] sm:$0xff] }
  0xf7   : > { %v1044_v59 = vld [vmem:[%s3012_s29 + $0x18e0] sm:$0xff]  ;;  %1619 = vmatpush.msrb.mxu3 %v1244_v58  ;;  %v489_v58 = vld [vmem:[%s3012_s29 + $0x788] sm:$0xff] }
  0xf8   : > { %v1112_v60 = vld [vmem:[%s3012_s29 + $0x1b00] sm:$0xff]  ;;  %1561 = vmatpush.msrb.mxu0 %v1044_v59  ;;  %v289_v59 = vld [vmem:[%s3012_s29 + $0x148] sm:$0xff] }
  0xf9   : > { %v1172_v1 = vld [vmem:[%s3012_s29 + $0x1ce0] sm:$0xff]  ;;  %1580 = vmatpush.msrb.mxu1 %v1112_v60  ;;  %v357_v60 = vld [vmem:[%s3012_s29 + $0x368] sm:$0xff] }
  0xfa   : > { %v1240_v2 = vld [vmem:[%s3012_s29 + $0x1f00] sm:$0xff]  ;;  %1601 = vmatpush.msrb.mxu2 %v1172_v1  ;;  %v417_v1 = vld [vmem:[%s3012_s29 + $0x548] sm:$0xff] }
  0xfb   : > { %v1040_v3 = vld [vmem:[%s3012_s29 + $0x18c0] sm:$0xff]  ;;  %1620 = vmatpush.msrb.mxu3 %v1240_v2  ;;  %v485_v2 = vld [vmem:[%s3012_s29 + $0x768] sm:$0xff] }
  0xfc   : > { %v1108_v4 = vld [vmem:[%s3012_s29 + $0x1ae0] sm:$0xff]  ;;  %1562 = vmatpush.msrb.mxu0 %v1040_v3  ;;  %v285_v3 = vld [vmem:[%s3012_s29 + $0x128] sm:$0xff] }
  0xfd   : > { %v1168_v5 = vld [vmem:[%s3012_s29 + $0x1cc0] sm:$0xff]  ;;  %1581 = vmatpush.msrb.mxu1 %v1108_v4  ;;  %v353_v4 = vld [vmem:[%s3012_s29 + $0x348] sm:$0xff] }
  0xfe   : > { %v1236_v6 = vld [vmem:[%s3012_s29 + $0x1ee0] sm:$0xff]  ;;  %1602 = vmatpush.msrb.mxu2 %v1168_v5  ;;  %v413_v5 = vld [vmem:[%s3012_s29 + $0x528] sm:$0xff] }
  0xff   : > { %v1036_v7 = vld [vmem:[%s3012_s29 + $0x18a0] sm:$0xff]  ;;  %1621 = vmatpush.msrb.mxu3 %v1236_v6  ;;  %v481_v6 = vld [vmem:[%s3012_s29 + $0x748] sm:$0xff] }
 0x100   : > { %v1104_v8 = vld [vmem:[%s3012_s29 + $0x1ac0] sm:$0xff]  ;;  %1563 = vmatpush.msrb.mxu0 %v1036_v7  ;;  %v281_v7 = vld [vmem:[%s3012_s29 + $0x108] sm:$0xff] }
 0x101   : > { %v1164_v9 = vld [vmem:[%s3012_s29 + $0x1ca0] sm:$0xff]  ;;  %1582 = vmatpush.msrb.mxu1 %v1104_v8  ;;  %v349_v8 = vld [vmem:[%s3012_s29 + $0x328] sm:$0xff] }
 0x102   : > { %v1232_v10 = vld [vmem:[%s3012_s29 + $0x1ec0] sm:$0xff]  ;;  %1603 = vmatpush.msrb.mxu2 %v1164_v9  ;;  %v409_v9 = vld [vmem:[%s3012_s29 + $0x508] sm:$0xff] }
 0x103   : > { %v1032_v11 = vld [vmem:[%s3012_s29 + $0x1880] sm:$0xff]  ;;  %1622 = vmatpush.msrb.mxu3 %v1232_v10  ;;  %v477_v10 = vld [vmem:[%s3012_s29 + $0x728] sm:$0xff] }
 0x104   : > { %v1100_v12 = vld [vmem:[%s3012_s29 + $0x1aa0] sm:$0xff]  ;;  %1564 = vmatpush.msrb.mxu0 %v1032_v11  ;;  %v277_v11 = vld [vmem:[%s3012_s29 + $0xe8] sm:$0xff] }
 0x105   : > { %v1160_v13 = vld [vmem:[%s3012_s29 + $0x1c80] sm:$0xff]  ;;  %1583 = vmatpush.msrb.mxu1 %v1100_v12  ;;  %v345_v12 = vld [vmem:[%s3012_s29 + $0x308] sm:$0xff] }
 0x106   : > { %v1228_v14 = vld [vmem:[%s3012_s29 + $0x1ea0] sm:$0xff]  ;;  %1604 = vmatpush.msrb.mxu2 %v1160_v13  ;;  %v405_v13 = vld [vmem:[%s3012_s29 + $0x4e8] sm:$0xff] }
 0x107   : > { %v1028_v15 = vld [vmem:[%s3012_s29 + $0x1860] sm:$0xff]  ;;  %1623 = vmatpush.msrb.mxu3 %v1228_v14  ;;  %v473_v14 = vld [vmem:[%s3012_s29 + $0x708] sm:$0xff] }
 0x108   : > { %v1096_v16 = vld [vmem:[%s3012_s29 + $0x1a80] sm:$0xff]  ;;  %1565 = vmatpush.msrb.mxu0 %v1028_v15  ;;  %v273_v15 = vld [vmem:[%s3012_s29 + $0xc8] sm:$0xff] }
 0x109   : > { %v1156_v17 = vld [vmem:[%s3012_s29 + $0x1c60] sm:$0xff]  ;;  %1584 = vmatpush.msrb.mxu1 %v1096_v16  ;;  %v341_v16 = vld [vmem:[%s3012_s29 + $0x2e8] sm:$0xff] }
 0x10a   : > { %v1224_v18 = vld [vmem:[%s3012_s29 + $0x1e80] sm:$0xff]  ;;  %1605 = vmatpush.msrb.mxu2 %v1156_v17  ;;  %v401_v17 = vld [vmem:[%s3012_s29 + $0x4c8] sm:$0xff] }
 0x10b   : > { %v1024_v19 = vld [vmem:[%s3012_s29 + $0x1840] sm:$0xff]  ;;  %1624 = vmatpush.msrb.mxu3 %v1224_v18  ;;  %v469_v18 = vld [vmem:[%s3012_s29 + $0x6e8] sm:$0xff] }
 0x10c   : > { %v1092_v20 = vld [vmem:[%s3012_s29 + $0x1a60] sm:$0xff]  ;;  %1566 = vmatpush.msrb.mxu0 %v1024_v19  ;;  %v269_v19 = vld [vmem:[%s3012_s29 + $0xa8] sm:$0xff] }
 0x10d   : > { %v1152_v21 = vld [vmem:[%s3012_s29 + $0x1c40] sm:$0xff]  ;;  %1585 = vmatpush.msrb.mxu1 %v1092_v20  ;;  %v337_v20 = vld [vmem:[%s3012_s29 + $0x2c8] sm:$0xff] }
 0x10e   : > { %v1220_v22 = vld [vmem:[%s3012_s29 + $0x1e60] sm:$0xff]  ;;  %1606 = vmatpush.msrb.mxu2 %v1152_v21  ;;  %v397_v21 = vld [vmem:[%s3012_s29 + $0x4a8] sm:$0xff] }
 0x10f   : > { %v1020_v23 = vld [vmem:[%s3012_s29 + $0x1820] sm:$0xff]  ;;  %1625 = vmatpush.msrb.mxu3 %v1220_v22  ;;  %v465_v22 = vld [vmem:[%s3012_s29 + $0x6c8] sm:$0xff] }
 0x110   : > { %v1088_v24 = vld [vmem:[%s3012_s29 + $0x1a40] sm:$0xff]  ;;  %1567 = vmatpush.msrb.mxu0 %v1020_v23  ;;  %v265_v23 = vld [vmem:[%s3012_s29 + $0x88] sm:$0xff] }
 0x111   : > { %v1148_v25 = vld [vmem:[%s3012_s29 + $0x1c20] sm:$0xff]  ;;  %1586 = vmatpush.msrb.mxu1 %v1088_v24  ;;  %v333_v24 = vld [vmem:[%s3012_s29 + $0x2a8] sm:$0xff] }
 0x112   : > { %v1216_v26 = vld [vmem:[%s3012_s29 + $0x1e40] sm:$0xff]  ;;  %1607 = vmatpush.msrb.mxu2 %v1148_v25  ;;  %v393_v25 = vld [vmem:[%s3012_s29 + $0x488] sm:$0xff] }
 0x113   : > { %v1016_v27 = vld [vmem:[%s3012_s29 + $0x1800] sm:$0xff]  ;;  %1626 = vmatpush.msrb.mxu3 %v1216_v26  ;;  %v461_v26 = vld [vmem:[%s3012_s29 + $0x6a8] sm:$0xff] }
 0x114   : > { %v1084_v28 = vld [vmem:[%s3012_s29 + $0x1a20] sm:$0xff]  ;;  %1568 = vmatpush.msrb.mxu0 %v1016_v27  ;;  %v261_v27 = vld [vmem:[%s3012_s29 + $0x68] sm:$0xff] }
 0x115   : > { %v1144_v29 = vld [vmem:[%s3012_s29 + $0x1c00] sm:$0xff]  ;;  %1587 = vmatpush.msrb.mxu1 %v1084_v28  ;;  %v329_v28 = vld [vmem:[%s3012_s29 + $0x288] sm:$0xff] }
 0x116   : > { %v1212_v30 = vld [vmem:[%s3012_s29 + $0x1e20] sm:$0xff]  ;;  %1608 = vmatpush.msrb.mxu2 %v1144_v29  ;;  %1633 = vmatpush.msra.mxu0 %v309_v33  ;;  %v389_v29 = vld [vmem:[%s3012_s29 + $0x468] sm:$0xff] }
 0x117   : > { %v1293_v31 = vld.sshfl [vmem:[#allocation1 + $0x20] sm:$0xff pattern:$0x73625140]  ;;  %1627 = vmatpush.msrb.mxu3 %v1212_v30  ;;  %1609 = vmatmul.f32.vlgmr.msrb.gmra.mxu2 %v1295_v32  ;;  %v457_v30 = vld [vmem:[%s3012_s29 + $0x688] sm:$0xff] }
 0x118   : > { %v1080_v35 = vld [vmem:[%s3012_s29 + $0x1a00] sm:$0xff]  ;;  %1569 = vmatmul.f32.vlgmr.msrb.gmra.mxu0 %v1293_v31  ;;  %1673 = vmatpush.msra.mxu2 %v437_v34  ;;  %v257_v31 = vld [vmem:[%s3012_s29 + $0x48] sm:$0xff] }
 0x119   : > { %v1208_v36 = vld [vmem:[%s3012_s29 + $0x1e00] sm:$0xff]  ;;  %1588 = vmatpush.msrb.mxu1 %v1080_v35  ;;  %1634 = vmatpush.msra.mxu0 %v305_v39  ;;  %v325_v32 = vld [vmem:[%s3012_s29 + $0x268] sm:$0xff] }
 0x11a   : > { %1628 = vmatpush.msrb.mxu3 %v1208_v36  ;;  %1589 = vmatmul.f32.vlgmr.msrb.gmra.mxu1 %v1294_v37  ;;  %v385_v33 = vld [vmem:[%s3012_s29 + $0x448] sm:$0xff] }
 0x11b   : > { %1629 = vmatmul.f32.vlgmr.msrb.gmra.mxu3 %v1296_v38  ;;  %1653 = vmatpush.msra.mxu1 %v373_v40  ;;  %v453_v34 = vld [vmem:[%s3012_s29 + $0x668] sm:$0xff] }
 0x11c   : > { %1674 = vmatpush.msra.mxu2 %v433_v41  ;;  %1693 = vmatpush.msra.mxu3 %v501_v42  ;;  %v253_v35 = vld [vmem:[%s3012_s29 + $0x28] sm:$0xff] }
 0x11d   : > { %1635 = vmatpush.msra.mxu0 %v301_v43  ;;  %1654 = vmatpush.msra.mxu1 %v369_v44  ;;  %v321_v36 = vld [vmem:[%s3012_s29 + $0x248] sm:$0xff] }
 0x11e   : > { %1675 = vmatpush.msra.mxu2 %v429_v49  ;;  %1694 = vmatpush.msra.mxu3 %v497_v50  ;;  %v381_v37 = vld [vmem:[%s3012_s29 + $0x428] sm:$0xff] }
 0x11f   : > { %1636 = vmatpush.msra.mxu0 %v297_v51  ;;  %1655 = vmatpush.msra.mxu1 %v365_v52  ;;  %v449_v38 = vld [vmem:[%s3012_s29 + $0x648] sm:$0xff] }
 0x120   : > { %1676 = vmatpush.msra.mxu2 %v425_v53  ;;  %1695 = vmatpush.msra.mxu3 %v493_v54  ;;  %v249_v39 = vld [vmem:[%s3012_s29 + $0x8] sm:$0xff] }
 0x121   : > { %1637 = vmatpush.msra.mxu0 %v293_v55  ;;  %1656 = vmatpush.msra.mxu1 %v361_v56  ;;  %v317_v40 = vld [vmem:[%s3012_s29 + $0x228] sm:$0xff] }
 0x122   : > { %1677 = vmatpush.msra.mxu2 %v421_v57  ;;  %1696 = vmatpush.msra.mxu3 %v489_v58  ;;  %v377_v41 = vld [vmem:[%s3012_s29 + $0x408] sm:$0xff] }
 0x123   : > { %1638 = vmatpush.msra.mxu0 %v289_v59  ;;  %1657 = vmatpush.msra.mxu1 %v357_v60  ;;  %v445_v42 = vld [vmem:[%s3012_s29 + $0x628] sm:$0xff] }
 0x124   : > { %1678 = vmatpush.msra.mxu2 %v417_v1  ;;  %1697 = vmatpush.msra.mxu3 %v485_v2  ;;  %v565_v43 = vld [vmem:[%s3012_s29 + $0x9e8] sm:$0xff] }
 0x125   : > { %1639 = vmatpush.msra.mxu0 %v285_v3  ;;  %1658 = vmatpush.msra.mxu1 %v353_v4  ;;  %v693_v44 = vld [vmem:[%s3012_s29 + $0xde8] sm:$0xff] }
 0x126   : > { %1679 = vmatpush.msra.mxu2 %v413_v5  ;;  %1698 = vmatpush.msra.mxu3 %v481_v6  ;;  %v313_v49 = vld [vmem:[%s3012_s29 + $0x208] sm:$0xff] }
 0x127   : > { %1640 = vmatpush.msra.mxu0 %v281_v7  ;;  %1659 = vmatpush.msra.mxu1 %v349_v8  ;;  %v441_v50 = vld [vmem:[%s3012_s29 + $0x608] sm:$0xff] }
 0x128   : > { %1680 = vmatpush.msra.mxu2 %v409_v9  ;;  %1699 = vmatpush.msra.mxu3 %v477_v10  ;;  %v561_v51 = vld [vmem:[%s3012_s29 + $0x9c8] sm:$0xff] }
 0x129   : > { %1641 = vmatpush.msra.mxu0 %v277_v11  ;;  %1660 = vmatpush.msra.mxu1 %v345_v12  ;;  %v629_v52 = vld [vmem:[%s3012_s29 + $0xbe8] sm:$0xff] }
 0x12a   : > { %1681 = vmatpush.msra.mxu2 %v405_v13  ;;  %1700 = vmatpush.msra.mxu3 %v473_v14  ;;  %v689_v53 = vld [vmem:[%s3012_s29 + $0xdc8] sm:$0xff] }
 0x12b   : > { %1642 = vmatpush.msra.mxu0 %v273_v15  ;;  %1661 = vmatpush.msra.mxu1 %v341_v16  ;;  %v757_v54 = vld [vmem:[%s3012_s29 + $0xfe8] sm:$0xff] }
 0x12c   : > { %1682 = vmatpush.msra.mxu2 %v401_v17  ;;  %1701 = vmatpush.msra.mxu3 %v469_v18  ;;  %v557_v55 = vld [vmem:[%s3012_s29 + $0x9a8] sm:$0xff] }
 0x12d   : > { %1643 = vmatpush.msra.mxu0 %v269_v19  ;;  %1662 = vmatpush.msra.mxu1 %v337_v20  ;;  %v625_v56 = vld [vmem:[%s3012_s29 + $0xbc8] sm:$0xff] }
 0x12e   : > { %1683 = vmatpush.msra.mxu2 %v397_v21  ;;  %1702 = vmatpush.msra.mxu3 %v465_v22  ;;  %v685_v57 = vld [vmem:[%s3012_s29 + $0xda8] sm:$0xff] }
 0x12f   : > { %1644 = vmatpush.msra.mxu0 %v265_v23  ;;  %1663 = vmatpush.msra.mxu1 %v333_v24  ;;  %v753_v58 = vld [vmem:[%s3012_s29 + $0xfc8] sm:$0xff] }
 0x130   : > { %1684 = vmatpush.msra.mxu2 %v393_v25  ;;  %1703 = vmatpush.msra.mxu3 %v461_v26  ;;  %v553_v59 = vld [vmem:[%s3012_s29 + $0x988] sm:$0xff] }
 0x131   : > { %1645 = vmatpush.msra.mxu0 %v261_v27  ;;  %1664 = vmatpush.msra.mxu1 %v329_v28  ;;  %v621_v60 = vld [vmem:[%s3012_s29 + $0xba8] sm:$0xff] }
 0x132   : > { %1685 = vmatpush.msra.mxu2 %v389_v29  ;;  %1704 = vmatpush.msra.mxu3 %v457_v30  ;;  %v681_v1 = vld [vmem:[%s3012_s29 + $0xd88] sm:$0xff] }
 0x133   : > { %1646 = vmatpush.msra.mxu0 %v257_v31  ;;  %1665 = vmatpush.msra.mxu1 %v325_v32  ;;  %v749_v2 = vld [vmem:[%s3012_s29 + $0xfa8] sm:$0xff] }
 0x134   : > { %1686 = vmatpush.msra.mxu2 %v385_v33  ;;  %1705 = vmatpush.msra.mxu3 %v453_v34  ;;  %v549_v3 = vld [vmem:[%s3012_s29 + $0x968] sm:$0xff] }
 0x135   : > { %1647 = vmatpush.msra.mxu0 %v253_v35  ;;  %1666 = vmatpush.msra.mxu1 %v321_v36  ;;  %v617_v4 = vld [vmem:[%s3012_s29 + $0xb88] sm:$0xff] }
 0x136   : > { %1687 = vmatpush.msra.mxu2 %v381_v37  ;;  %1706 = vmatpush.msra.mxu3 %v449_v38  ;;  %v677_v5 = vld [vmem:[%s3012_s29 + $0xd68] sm:$0xff]  ;;  %v1330_v37 = vpop.f32.mrf.mxu0 }
 0x137   : > { %1648 = vmatpush.msra.mxu0 %v249_v39  ;;  %1667 = vmatpush.msra.mxu1 %v317_v40  ;;  %v745_v6 = vld [vmem:[%s3012_s29 + $0xf88] sm:$0xff] }
 0x138   : > { %1688 = vmatpush.msra.mxu2 %v377_v41  ;;  %1707 = vmatpush.msra.mxu3 %v445_v42  ;;  %v545_v7 = vld [vmem:[%s3012_s29 + $0x948] sm:$0xff] }
 0x139   : > { %1713 = vmatpush.msrb.mxu0 %v565_v43  ;;  %1668 = vmatpush.msra.mxu1 %v313_v49  ;;  %v613_v8 = vld [vmem:[%s3012_s29 + $0xb68] sm:$0xff] }
 0x13a   : > { %1753 = vmatpush.msrb.mxu2 %v693_v44  ;;  %1708 = vmatpush.msra.mxu3 %v441_v50  ;;  %v673_v9 = vld [vmem:[%s3012_s29 + $0xd48] sm:$0xff]  ;;  %v1350_v44 = vpop.f32.mrf.mxu1 }
 0x13b   : > { %1714 = vmatpush.msrb.mxu0 %v561_v51  ;;  %1733 = vmatpush.msrb.mxu1 %v629_v52  ;;  %v741_v10 = vld [vmem:[%s3012_s29 + $0xf68] sm:$0xff]  ;;  %v1351_v51 = vadd.f32 %v1350_v44, %v1330_v37  ;;  %v1370_v52 = vpop.f32.mrf.mxu2 }
 0x13c   : > { %1754 = vmatpush.msrb.mxu2 %v689_v53  ;;  %1773 = vmatpush.msrb.mxu3 %v757_v54  ;;  %v541_v11 = vld [vmem:[%s3012_s29 + $0x928] sm:$0xff] }
 0x13d   : > { %1715 = vmatpush.msrb.mxu0 %v557_v55  ;;  %1734 = vmatpush.msrb.mxu1 %v625_v56  ;;  %v609_v12 = vld [vmem:[%s3012_s29 + $0xb48] sm:$0xff]  ;;  %v1371_v56 = vadd.f32 %v1370_v52, %v1351_v51 }
 0x13e   : > { %1755 = vmatpush.msrb.mxu2 %v685_v57  ;;  %1774 = vmatpush.msrb.mxu3 %v753_v58  ;;  %v669_v13 = vld [vmem:[%s3012_s29 + $0xd28] sm:$0xff] }
 0x13f   : > { %1716 = vmatpush.msrb.mxu0 %v553_v59  ;;  %1735 = vmatpush.msrb.mxu1 %v621_v60  ;;  %v737_v14 = vld [vmem:[%s3012_s29 + $0xf48] sm:$0xff]  ;;  %v1390_v59 = vpop.f32.mrf.mxu3 }
 0x140   : > { %1756 = vmatpush.msrb.mxu2 %v681_v1  ;;  %1775 = vmatpush.msrb.mxu3 %v749_v2  ;;  %v537_v15 = vld [vmem:[%s3012_s29 + $0x908] sm:$0xff]  ;;  %v1391_v1 = vadd.f32 %v1390_v59, %v1371_v56 }
 0x141   : > { %1717 = vmatpush.msrb.mxu0 %v549_v3  ;;  %1736 = vmatpush.msrb.mxu1 %v617_v4  ;;  %v605_v16 = vld [vmem:[%s3012_s29 + $0xb28] sm:$0xff] }
 0x142   : > { %1757 = vmatpush.msrb.mxu2 %v677_v5  ;;  %1776 = vmatpush.msrb.mxu3 %v745_v6  ;;  %v665_v17 = vld [vmem:[%s3012_s29 + $0xd08] sm:$0xff]  ;;  %v1410_v5 = vpop.f32.mrf.mxu0 }
 0x143   : > { %1718 = vmatpush.msrb.mxu0 %v545_v7  ;;  %1737 = vmatpush.msrb.mxu1 %v613_v8  ;;  %v733_v18 = vld [vmem:[%s3012_s29 + $0xf28] sm:$0xff]  ;;  %v1411_v7 = vadd.f32 %v1410_v5, %v1391_v1 }
 0x144   : > { %1758 = vmatpush.msrb.mxu2 %v673_v9  ;;  %1777 = vmatpush.msrb.mxu3 %v741_v10  ;;  %v533_v19 = vld [vmem:[%s3012_s29 + $0x8e8] sm:$0xff] }
 0x145   : > { %1719 = vmatpush.msrb.mxu0 %v541_v11  ;;  %1738 = vmatpush.msrb.mxu1 %v609_v12  ;;  %v601_v20 = vld [vmem:[%s3012_s29 + $0xb08] sm:$0xff]  ;;  %v1430_v12 = vpop.f32.mrf.mxu1 }
 0x146   : > { %1759 = vmatpush.msrb.mxu2 %v669_v13  ;;  %1778 = vmatpush.msrb.mxu3 %v737_v14  ;;  %v661_v21 = vld [vmem:[%s3012_s29 + $0xce8] sm:$0xff] }
 0x147   : > { %1720 = vmatpush.msrb.mxu0 %v537_v15  ;;  %1739 = vmatpush.msrb.mxu1 %v605_v16  ;;  %v729_v22 = vld [vmem:[%s3012_s29 + $0xf08] sm:$0xff]  ;;  %v1431_v15 = vadd.f32 %v1430_v12, %v1411_v7  ;;  %v1450_v16 = vpop.f32.mrf.mxu2 }
 0x148   : > { %1760 = vmatpush.msrb.mxu2 %v665_v17  ;;  %1779 = vmatpush.msrb.mxu3 %v733_v18  ;;  %v529_v23 = vld [vmem:[%s3012_s29 + $0x8c8] sm:$0xff] }
 0x149   : > { %v597_v24 = vld [vmem:[%s3012_s29 + $0xae8] sm:$0xff]  ;;  %1721 = vmatpush.msrb.mxu0 %v533_v19  ;;  %1740 = vmatpush.msrb.mxu1 %v601_v20  ;;  %v1451_v20 = vadd.f32 %v1450_v16, %v1431_v15 }
 0x14a   : > { %v657_v25 = vld [vmem:[%s3012_s29 + $0xcc8] sm:$0xff]  ;;  %1761 = vmatpush.msrb.mxu2 %v661_v21  ;;  %1780 = vmatpush.msrb.mxu3 %v729_v22 }
 0x14b   : > { %v725_v26 = vld [vmem:[%s3012_s29 + $0xee8] sm:$0xff]  ;;  %1722 = vmatpush.msrb.mxu0 %v529_v23  ;;  %1741 = vmatpush.msrb.mxu1 %v597_v24  ;;  %v1470_v23 = vpop.f32.mrf.mxu3 }
 0x14c   : > { %v525_v27 = vld [vmem:[%s3012_s29 + $0x8a8] sm:$0xff]  ;;  %1762 = vmatpush.msrb.mxu2 %v657_v25  ;;  %1781 = vmatpush.msrb.mxu3 %v725_v26  ;;  %v3445_v25 = vadd.f32 %v1470_v23, %v1451_v20 }
 0x14d   : > { %v593_v28 = vld [vmem:[%s3012_s29 + $0xac8] sm:$0xff]  ;;  %1723 = vmatpush.msrb.mxu0 %v525_v27  ;;  %1689 = vmatmul.f32.vlgmr.msra.gmra.mxu2 %v3123_v45 }
 0x14e   : > { %v653_v29 = vld [vmem:[%s3012_s29 + $0xca8] sm:$0xff]  ;;  %1742 = vmatpush.msrb.mxu1 %v593_v28  ;;  %1649 = vmatmul.f32.vlgmr.msra.gmra.mxu0 %v3125_v46 }
 0x14f   : > { %v721_v30 = vld [vmem:[%s3012_s29 + $0xec8] sm:$0xff]  ;;  %1763 = vmatpush.msrb.mxu2 %v653_v29  ;;  %1709 = vmatmul.f32.vlgmr.msra.gmra.mxu3 %v3127_v47 }
 0x150   : > { %v521_v31 = vld [vmem:[%s3012_s29 + $0x888] sm:$0xff]  ;;  %1782 = vmatpush.msrb.mxu3 %v721_v30  ;;  %1669 = vmatmul.f32.vlgmr.msra.gmra.mxu1 %v3129_v48 }
 0x151   : > { %v589_v32 = vld [vmem:[%s3012_s29 + $0xaa8] sm:$0xff]  ;;  %1724 = vmatpush.msrb.mxu0 %v521_v31 }
 0x152   : > { %v649_v33 = vld [vmem:[%s3012_s29 + $0xc88] sm:$0xff]  ;;  %1743 = vmatpush.msrb.mxu1 %v589_v32 }
 0x153   : > { %v717_v34 = vld [vmem:[%s3012_s29 + $0xea8] sm:$0xff]  ;;  %1764 = vmatpush.msrb.mxu2 %v649_v33 }
 0x154   : > { %v517_v35 = vld [vmem:[%s3012_s29 + $0x868] sm:$0xff]  ;;  %1783 = vmatpush.msrb.mxu3 %v717_v34 }
 0x155   : > { %v585_v36 = vld [vmem:[%s3012_s29 + $0xa88] sm:$0xff]  ;;  %1725 = vmatpush.msrb.mxu0 %v517_v35 }
 0x156   : > { %v645_v38 = vld [vmem:[%s3012_s29 + $0xc68] sm:$0xff]  ;;  %1744 = vmatpush.msrb.mxu1 %v585_v36 }
 0x157   : > { %v713_v39 = vld [vmem:[%s3012_s29 + $0xe88] sm:$0xff]  ;;  %1765 = vmatpush.msrb.mxu2 %v645_v38 }
 0x158   : > { %v513_v40 = vld [vmem:[%s3012_s29 + $0x848] sm:$0xff]  ;;  %1784 = vmatpush.msrb.mxu3 %v713_v39  ;;  %v1510_v12 = vpop.f32.mrf.mxu1 }
 0x159   : > { %v581_v41 = vld [vmem:[%s3012_s29 + $0xa68] sm:$0xff]  ;;  %1726 = vmatpush.msrb.mxu0 %v513_v40  ;;  %v1530_v20 = vpop.f32.mrf.mxu2 }
 0x15a   : > { %v641_v42 = vld [vmem:[%s3012_s29 + $0xc48] sm:$0xff]  ;;  %1745 = vmatpush.msrb.mxu1 %v581_v41 }
 0x15b   : > { %v709_v43 = vld [vmem:[%s3012_s29 + $0xe68] sm:$0xff]  ;;  %1766 = vmatpush.msrb.mxu2 %v641_v42 }
 0x15c   : > { %v509_v49 = vld [vmem:[%s3012_s29 + $0x828] sm:$0xff]  ;;  %1785 = vmatpush.msrb.mxu3 %v709_v43 }
 0x15d   : > { %v577_v50 = vld [vmem:[%s3012_s29 + $0xa48] sm:$0xff]  ;;  %1727 = vmatpush.msrb.mxu0 %v509_v49 }
 0x15e   : > { %v637_v53 = vld [vmem:[%s3012_s29 + $0xc28] sm:$0xff]  ;;  %1746 = vmatpush.msrb.mxu1 %v577_v50 }
 0x15f   : > { %v705_v54 = vld [vmem:[%s3012_s29 + $0xe48] sm:$0xff]  ;;  %1767 = vmatpush.msrb.mxu2 %v637_v53 }
 0x160   : > { %v505_v55 = vld [vmem:[%s3012_s29 + $0x808] sm:$0xff]  ;;  %1786 = vmatpush.msrb.mxu3 %v705_v54 }
 0x161   : > { %v573_v57 = vld [vmem:[%s3012_s29 + $0xa28] sm:$0xff]  ;;  %1728 = vmatpush.msrb.mxu0 %v505_v55 }
 0x162   : > { %v633_v58 = vld [vmem:[%s3012_s29 + $0xc08] sm:$0xff]  ;;  %1747 = vmatpush.msrb.mxu1 %v573_v57  ;;  %1729 = vmatmul.f32.vlgmr.msrb.gmra.mxu0 %v3145_v62 }
 0x163   : > { %v701_v60 = vld [vmem:[%s3012_s29 + $0xe28] sm:$0xff]  ;;  %1768 = vmatpush.msrb.mxu2 %v633_v58 }
 0x164   : > { %v821_v2 = vld [vmem:[%s3012_s29 + $0x11e8] sm:$0xff]  ;;  %1787 = vmatpush.msrb.mxu3 %v701_v60  ;;  %1769 = vmatmul.f32.vlgmr.msrb.gmra.mxu2 %v3143_v61 }
 0x165   : > { %v949_v3 = vld [vmem:[%s3012_s29 + $0x15e8] sm:$0xff]  ;;  %1793 = vmatpush.msra.mxu0 %v821_v2 }
 0x166   : > { %v569_v4 = vld [vmem:[%s3012_s29 + $0xa08] sm:$0xff]  ;;  %1833 = vmatpush.msra.mxu2 %v949_v3 }
 0x167   : > { %v697_v6 = vld [vmem:[%s3012_s29 + $0xe08] sm:$0xff]  ;;  %1748 = vmatpush.msrb.mxu1 %v569_v4  ;;  %v1490_v4 = vpop.f32.mrf.mxu0 }
 0x168   : > { %v817_v8 = vld [vmem:[%s3012_s29 + $0x11c8] sm:$0xff]  ;;  %1788 = vmatpush.msrb.mxu3 %v697_v6  ;;  %1749 = vmatmul.f32.vlgmr.msrb.gmra.mxu1 %v3149_v0  ;;  %v1491_v7 = vadd.f32 %v1490_v4, %v3445_v25 }
 0x169   : > { %v885_v9 = vld [vmem:[%s3012_s29 + $0x13e8] sm:$0xff]  ;;  %1794 = vmatpush.msra.mxu0 %v817_v8  ;;  %1789 = vmatmul.f32.vlgmr.msrb.gmra.mxu3 %v3147_v63 }
 0x16a   : > { %v945_v10 = vld [vmem:[%s3012_s29 + $0x15c8] sm:$0xff]  ;;  %1813 = vmatpush.msra.mxu1 %v885_v9  ;;  %v1511_v15 = vadd.f32 %v1510_v12, %v1491_v7 }
 0x16b   : > { %v1013_v11 = vld [vmem:[%s3012_s29 + $0x17e8] sm:$0xff]  ;;  %1834 = vmatpush.msra.mxu2 %v945_v10 }
 0x16c   : > { %v813_v13 = vld [vmem:[%s3012_s29 + $0x11a8] sm:$0xff]  ;;  %1853 = vmatpush.msra.mxu3 %v1013_v11  ;;  %v1531_v23 = vadd.f32 %v1530_v20, %v1511_v15 }
 0x16d   : > { %v881_v14 = vld [vmem:[%s3012_s29 + $0x13c8] sm:$0xff]  ;;  %1795 = vmatpush.msra.mxu0 %v813_v13 }
 0x16e   : > { %v941_v17 = vld [vmem:[%s3012_s29 + $0x15a8] sm:$0xff]  ;;  %1814 = vmatpush.msra.mxu1 %v881_v14 }
 0x16f   : > { %v1009_v18 = vld [vmem:[%s3012_s29 + $0x17c8] sm:$0xff]  ;;  %1835 = vmatpush.msra.mxu2 %v941_v17 }
 0x170   : > { %v809_v19 = vld [vmem:[%s3012_s29 + $0x1188] sm:$0xff]  ;;  %1854 = vmatpush.msra.mxu3 %v1009_v18 }
 0x171   : > { %v877_v21 = vld [vmem:[%s3012_s29 + $0x13a8] sm:$0xff]  ;;  %1796 = vmatpush.msra.mxu0 %v809_v19 }
 0x172   : > { %v937_v22 = vld [vmem:[%s3012_s29 + $0x1588] sm:$0xff]  ;;  %1815 = vmatpush.msra.mxu1 %v877_v21 }
 0x173   : > { %v1005_v24 = vld [vmem:[%s3012_s29 + $0x17a8] sm:$0xff]  ;;  %1836 = vmatpush.msra.mxu2 %v937_v22 }
 0x174   : > { %v805_v26 = vld [vmem:[%s3012_s29 + $0x1168] sm:$0xff]  ;;  %1855 = vmatpush.msra.mxu3 %v1005_v24 }
 0x175   : > { %v873_v27 = vld [vmem:[%s3012_s29 + $0x1388] sm:$0xff]  ;;  %1797 = vmatpush.msra.mxu0 %v805_v26  ;;  %v1550_v26 = vpop.f32.mrf.mxu3 }
 0x176   : > { %v933_v28 = vld [vmem:[%s3012_s29 + $0x1568] sm:$0xff]  ;;  %1816 = vmatpush.msra.mxu1 %v873_v27 }
 0x177   : > { %v1001_v29 = vld [vmem:[%s3012_s29 + $0x1788] sm:$0xff]  ;;  %1837 = vmatpush.msra.mxu2 %v933_v28 }
 0x178   : > { %v801_v30 = vld [vmem:[%s3012_s29 + $0x1148] sm:$0xff]  ;;  %1856 = vmatpush.msra.mxu3 %v1001_v29  ;;  %v3504_v29 = vadd.f32 %v1550_v26, %v1531_v23 }
 0x179   : > { %v869_v31 = vld [vmem:[%s3012_s29 + $0x1368] sm:$0xff]  ;;  %1798 = vmatpush.msra.mxu0 %v801_v30  ;;  %v2893_v30 = vld.sshfl [vmem:[#allocation1] sm:$0xff pattern:$0x73625140] }
 0x17a   : > { %v929_v32 = vld [vmem:[%s3012_s29 + $0x1548] sm:$0xff]  ;;  %1817 = vmatpush.msra.mxu1 %v869_v31  ;;  %v2894_v31 = vld.sshfl [vmem:[#allocation1 + $0x10] sm:$0xff pattern:$0x73625140] }
 0x17b   : > { %v997_v33 = vld [vmem:[%s3012_s29 + $0x1768] sm:$0xff]  ;;  %1838 = vmatpush.msra.mxu2 %v929_v32 }
 0x17c   : > { %v797_v34 = vld [vmem:[%s3012_s29 + $0x1128] sm:$0xff]  ;;  %1857 = vmatpush.msra.mxu3 %v997_v33 }
 0x17d   : > { %v865_v35 = vld [vmem:[%s3012_s29 + $0x1348] sm:$0xff]  ;;  %1799 = vmatpush.msra.mxu0 %v797_v34 }
 0x17e   : > { %v925_v36 = vld [vmem:[%s3012_s29 + $0x1528] sm:$0xff]  ;;  %1818 = vmatpush.msra.mxu1 %v865_v35 }
 0x17f   : > { %v993_v37 = vld [vmem:[%s3012_s29 + $0x1748] sm:$0xff]  ;;  %1839 = vmatpush.msra.mxu2 %v925_v36 }
 0x180   : > { %v793_v38 = vld [vmem:[%s3012_s29 + $0x1108] sm:$0xff]  ;;  %1858 = vmatpush.msra.mxu3 %v993_v37  ;;  %v2896_v37 = vld.sshfl [vmem:[#allocation1 + $0x18] sm:$0xff pattern:$0x73625140] }
 0x181   : > { %v861_v39 = vld [vmem:[%s3012_s29 + $0x1328] sm:$0xff]  ;;  %1800 = vmatpush.msra.mxu0 %v793_v38 }
 0x182   : > { %v921_v40 = vld [vmem:[%s3012_s29 + $0x1508] sm:$0xff]  ;;  %1819 = vmatpush.msra.mxu1 %v861_v39 }
 0x183   : > { %v989_v41 = vld [vmem:[%s3012_s29 + $0x1728] sm:$0xff]  ;;  %1840 = vmatpush.msra.mxu2 %v921_v40 }
 0x184   : > { %v789_v42 = vld [vmem:[%s3012_s29 + $0x10e8] sm:$0xff]  ;;  %1859 = vmatpush.msra.mxu3 %v989_v41 }
 0x185   : > { %v857_v43 = vld [vmem:[%s3012_s29 + $0x1308] sm:$0xff]  ;;  %1801 = vmatpush.msra.mxu0 %v789_v42 }
 0x186   : > { %v917_v44 = vld [vmem:[%s3012_s29 + $0x14e8] sm:$0xff]  ;;  %1820 = vmatpush.msra.mxu1 %v857_v43 }
 0x187   : > { %v985_v49 = vld [vmem:[%s3012_s29 + $0x1708] sm:$0xff]  ;;  %1841 = vmatpush.msra.mxu2 %v917_v44 }
 0x188   : > { %v785_v50 = vld [vmem:[%s3012_s29 + $0x10c8] sm:$0xff]  ;;  %1860 = vmatpush.msra.mxu3 %v985_v49 }
 0x189   : > { %v853_v51 = vld [vmem:[%s3012_s29 + $0x12e8] sm:$0xff]  ;;  %1802 = vmatpush.msra.mxu0 %v785_v50 }
 0x18a   : > { %v913_v52 = vld [vmem:[%s3012_s29 + $0x14c8] sm:$0xff]  ;;  %1821 = vmatpush.msra.mxu1 %v853_v51 }
 0x18b   : > { %v981_v53 = vld [vmem:[%s3012_s29 + $0x16e8] sm:$0xff]  ;;  %1842 = vmatpush.msra.mxu2 %v913_v52 }
 0x18c   : > { %v781_v54 = vld [vmem:[%s3012_s29 + $0x10a8] sm:$0xff]  ;;  %1861 = vmatpush.msra.mxu3 %v981_v53 }
 0x18d   : > { %v849_v55 = vld [vmem:[%s3012_s29 + $0x12c8] sm:$0xff]  ;;  %1803 = vmatpush.msra.mxu0 %v781_v54 }
 0x18e   : > { %v909_v56 = vld [vmem:[%s3012_s29 + $0x14a8] sm:$0xff]  ;;  %1822 = vmatpush.msra.mxu1 %v849_v55 }
 0x18f   : > { %v977_v57 = vld [vmem:[%s3012_s29 + $0x16c8] sm:$0xff]  ;;  %1843 = vmatpush.msra.mxu2 %v909_v56 }
 0x190   : > { %v777_v58 = vld [vmem:[%s3012_s29 + $0x1088] sm:$0xff]  ;;  %1862 = vmatpush.msra.mxu3 %v977_v57 }
 0x191   : > { %v845_v59 = vld [vmem:[%s3012_s29 + $0x12a8] sm:$0xff]  ;;  %1804 = vmatpush.msra.mxu0 %v777_v58 }
 0x192   : > { %v905_v60 = vld [vmem:[%s3012_s29 + $0x1488] sm:$0xff]  ;;  %1823 = vmatpush.msra.mxu1 %v845_v59 }
 0x193   : > { %v973_v1 = vld [vmem:[%s3012_s29 + $0x16a8] sm:$0xff]  ;;  %1844 = vmatpush.msra.mxu2 %v905_v60 }
 0x194   : > { %v773_v2 = vld [vmem:[%s3012_s29 + $0x1068] sm:$0xff]  ;;  %1863 = vmatpush.msra.mxu3 %v973_v1 }
 0x195   : > { %v841_v3 = vld [vmem:[%s3012_s29 + $0x1288] sm:$0xff]  ;;  %1805 = vmatpush.msra.mxu0 %v773_v2 }
 0x196   : > { %v901_v5 = vld [vmem:[%s3012_s29 + $0x1468] sm:$0xff]  ;;  %1824 = vmatpush.msra.mxu1 %v841_v3 }
 0x197   : > { %v969_v6 = vld [vmem:[%s3012_s29 + $0x1688] sm:$0xff]  ;;  %1845 = vmatpush.msra.mxu2 %v901_v5 }
 0x198   : > { %v769_v8 = vld [vmem:[%s3012_s29 + $0x1048] sm:$0xff]  ;;  %1864 = vmatpush.msra.mxu3 %v969_v6 }
 0x199   : > { %v837_v9 = vld [vmem:[%s3012_s29 + $0x1268] sm:$0xff]  ;;  %1806 = vmatpush.msra.mxu0 %v769_v8 }
 0x19a   : > { %v897_v10 = vld [vmem:[%s3012_s29 + $0x1448] sm:$0xff]  ;;  %1825 = vmatpush.msra.mxu1 %v837_v9 }
 0x19b   : > { %v965_v11 = vld [vmem:[%s3012_s29 + $0x1668] sm:$0xff]  ;;  %1846 = vmatpush.msra.mxu2 %v897_v10 }
 0x19c   : > { %v765_v13 = vld [vmem:[%s3012_s29 + $0x1028] sm:$0xff]  ;;  %1865 = vmatpush.msra.mxu3 %v965_v11 }
 0x19d   : > { %v833_v14 = vld [vmem:[%s3012_s29 + $0x1248] sm:$0xff]  ;;  %1807 = vmatpush.msra.mxu0 %v765_v13 }
 0x19e   : > { %v893_v16 = vld [vmem:[%s3012_s29 + $0x1428] sm:$0xff]  ;;  %1826 = vmatpush.msra.mxu1 %v833_v14 }
 0x19f   : > { %v961_v17 = vld [vmem:[%s3012_s29 + $0x1648] sm:$0xff]  ;;  %1847 = vmatpush.msra.mxu2 %v893_v16 }
 0x1a0   : > { %v761_v18 = vld [vmem:[%s3012_s29 + $0x1008] sm:$0xff]  ;;  %1866 = vmatpush.msra.mxu3 %v961_v17 }
 0x1a1   : > { %v829_v19 = vld [vmem:[%s3012_s29 + $0x1228] sm:$0xff]  ;;  %1808 = vmatpush.msra.mxu0 %v761_v18 }
 0x1a2   : > { %v889_v21 = vld [vmem:[%s3012_s29 + $0x1408] sm:$0xff]  ;;  %1827 = vmatpush.msra.mxu1 %v829_v19  ;;  %1809 = vmatmul.f32.vlgmr.msra.gmra.mxu0 %v2893_v30 }
 0x1a3   : > { %v957_v22 = vld [vmem:[%s3012_s29 + $0x1628] sm:$0xff]  ;;  %1848 = vmatpush.msra.mxu2 %v889_v21 }
 0x1a4   : > { %v1077_v24 = vld [vmem:[%s3012_s29 + $0x19e8] sm:$0xff]  ;;  %1867 = vmatpush.msra.mxu3 %v957_v22  ;;  %1849 = vmatmul.f32.vlgmr.msra.gmra.mxu2 %v2894_v31 }
 0x1a5   : > { %v1205_v25 = vld [vmem:[%s3012_s29 + $0x1de8] sm:$0xff]  ;;  %1873 = vmatpush.msrb.mxu0 %v1077_v24  ;;  %v1570_v24 = vpop.f32.mrf.mxu0 }
 0x1a6   : > { %v825_v27 = vld [vmem:[%s3012_s29 + $0x1208] sm:$0xff]  ;;  %1913 = vmatpush.msrb.mxu2 %v1205_v25 }
 0x1a7   : > { %v953_v28 = vld [vmem:[%s3012_s29 + $0x1608] sm:$0xff]  ;;  %1828 = vmatpush.msra.mxu1 %v825_v27  ;;  %v1571_v27 = vadd.f32 %v1570_v24, %v3504_v29  ;;  %v410_v24 = vld [vmem:[%s3012_s29 + $0x510] sm:$0xff] }
 0x1a8   : > { %v1073_v32 = vld [vmem:[%s3012_s29 + $0x19c8] sm:$0xff]  ;;  %1868 = vmatpush.msra.mxu3 %v953_v28 }
 0x1a9   : > { %v1141_v33 = vld [vmem:[%s3012_s29 + $0x1be8] sm:$0xff]  ;;  %1869 = vmatmul.f32.vlgmr.msra.gmra.mxu3 %v2896_v37  ;;  %1874 = vmatpush.msrb.mxu0 %v1073_v32 }
 0x1aa   : > { %v1201_v34 = vld [vmem:[%s3012_s29 + $0x1dc8] sm:$0xff]  ;;  %1893 = vmatpush.msrb.mxu1 %v1141_v33  ;;  %v1590_v33 = vpop.f32.mrf.mxu1 }
 0x1ab   : > { %v1269_v35 = vld [vmem:[%s3012_s29 + $0x1fe8] sm:$0xff]  ;;  %1914 = vmatpush.msrb.mxu2 %v1201_v34  ;;  %v1591_v37 = vadd.f32 %v1590_v33, %v1571_v27  ;;  %v346_v27 = vld [vmem:[%s3012_s29 + $0x310] sm:$0xff] }
 0x1ac   : > { %v2895_v36 = vld.sshfl [vmem:[#allocation1 + $0x8] sm:$0xff pattern:$0x73625140]  ;;  %1933 = vmatpush.msrb.mxu3 %v1269_v35  ;;  %v402_v33 = vld [vmem:[%s3012_s29 + $0x4d0] sm:$0xff] }
 0x1ad   : > { %1829 = vmatmul.f32.vlgmr.msra.gmra.mxu1 %v2895_v36  ;;  %v1069_v38 = vld [vmem:[%s3012_s29 + $0x19a8] sm:$0xff] }
 0x1ae   : > { %v1137_v39 = vld [vmem:[%s3012_s29 + $0x1bc8] sm:$0xff]  ;;  %1875 = vmatpush.msrb.mxu0 %v1069_v38 }
 0x1af   : > { %v1197_v40 = vld [vmem:[%s3012_s29 + $0x1da8] sm:$0xff]  ;;  %1894 = vmatpush.msrb.mxu1 %v1137_v39 }
 0x1b0   : > { %v1265_v41 = vld [vmem:[%s3012_s29 + $0x1fc8] sm:$0xff]  ;;  %1915 = vmatpush.msrb.mxu2 %v1197_v40  ;;  %v1610_v40 = vpop.f32.mrf.mxu2 }
 0x1b1   : > { %v1065_v42 = vld [vmem:[%s3012_s29 + $0x1988] sm:$0xff]  ;;  %1934 = vmatpush.msrb.mxu3 %v1265_v41 }
 0x1b2   : > { %v1133_v43 = vld [vmem:[%s3012_s29 + $0x1ba8] sm:$0xff]  ;;  %1876 = vmatpush.msrb.mxu0 %v1065_v42 }
 0x1b3   : > { %v1193_v44 = vld [vmem:[%s3012_s29 + $0x1d88] sm:$0xff]  ;;  %1895 = vmatpush.msrb.mxu1 %v1133_v43  ;;  %v1611_v43 = vadd.f32 %v1610_v40, %v1591_v37  ;;  %v466_v37 = vld [vmem:[%s3012_s29 + $0x6d0] sm:$0xff] }
 0x1b4   : > { %v1261_v49 = vld [vmem:[%s3012_s29 + $0x1fa8] sm:$0xff]  ;;  %1916 = vmatpush.msrb.mxu2 %v1193_v44  ;;  %v310_v44 = vld [vmem:[%s3012_s29 + $0x1f0] sm:$0xff] }
 0x1b5   : > { %v1061_v50 = vld [vmem:[%s3012_s29 + $0x1968] sm:$0xff]  ;;  %1935 = vmatpush.msrb.mxu3 %v1261_v49  ;;  %v438_v49 = vld [vmem:[%s3012_s29 + $0x5f0] sm:$0xff] }
 0x1b6   : > { %v1129_v51 = vld [vmem:[%s3012_s29 + $0x1b88] sm:$0xff]  ;;  %1877 = vmatpush.msrb.mxu0 %v1061_v50  ;;  %v1630_v50 = vpop.f32.mrf.mxu3  ;;  %v394_v40 = vld [vmem:[%s3012_s29 + $0x490] sm:$0xff] }
 0x1b7   : > { %v1189_v52 = vld [vmem:[%s3012_s29 + $0x1d68] sm:$0xff]  ;;  %1896 = vmatpush.msrb.mxu1 %v1129_v51 }
 0x1b8   : > { %v1257_v53 = vld [vmem:[%s3012_s29 + $0x1f88] sm:$0xff]  ;;  %1917 = vmatpush.msrb.mxu2 %v1189_v52 }
 0x1b9   : > { %v1057_v54 = vld [vmem:[%s3012_s29 + $0x1948] sm:$0xff]  ;;  %1936 = vmatpush.msrb.mxu3 %v1257_v53  ;;  %v3571_v53 = vadd.f32 %v1630_v50, %v1611_v43  ;;  %v330_v43 = vld [vmem:[%s3012_s29 + $0x290] sm:$0xff] }
 0x1ba   : > { %v1125_v55 = vld [vmem:[%s3012_s29 + $0x1b68] sm:$0xff]  ;;  %1878 = vmatpush.msrb.mxu0 %v1057_v54  ;;  %v2897_v54 = vld.sshfl [vmem:[#allocation1 + $0x20] sm:$0xff pattern:$0x73625140]  ;;  %v258_v50 = vld [vmem:[%s3012_s29 + $0x50] sm:$0xff] }
 0x1bb   : > { %v1185_v56 = vld [vmem:[%s3012_s29 + $0x1d48] sm:$0xff]  ;;  %1897 = vmatpush.msrb.mxu1 %v1125_v55  ;;  %v2898_v55 = vld.sshfl [vmem:[#allocation1 + $0x30] sm:$0xff pattern:$0x73625140] }
 0x1bc   : > { %v1253_v57 = vld [vmem:[%s3012_s29 + $0x1f68] sm:$0xff]  ;;  %1918 = vmatpush.msrb.mxu2 %v1185_v56  ;;  %v306_v56 = vld [vmem:[%s3012_s29 + $0x1d0] sm:$0xff] }
 0x1bd   : > { %v1053_v58 = vld [vmem:[%s3012_s29 + $0x1928] sm:$0xff]  ;;  %1937 = vmatpush.msrb.mxu3 %v1253_v57  ;;  %v374_v57 = vld [vmem:[%s3012_s29 + $0x3f0] sm:$0xff] }
 0x1be   : > { %v1121_v59 = vld [vmem:[%s3012_s29 + $0x1b48] sm:$0xff]  ;;  %1879 = vmatpush.msrb.mxu0 %v1053_v58  ;;  %v434_v58 = vld [vmem:[%s3012_s29 + $0x5d0] sm:$0xff] }
 0x1bf   : > { %v1181_v60 = vld [vmem:[%s3012_s29 + $0x1d28] sm:$0xff]  ;;  %1898 = vmatpush.msrb.mxu1 %v1121_v59  ;;  %v502_v59 = vld [vmem:[%s3012_s29 + $0x7f0] sm:$0xff] }
 0x1c0   : > { %v1249_v1 = vld [vmem:[%s3012_s29 + $0x1f48] sm:$0xff]  ;;  %1919 = vmatpush.msrb.mxu2 %v1181_v60 }
 0x1c1   : > { %v1049_v2 = vld [vmem:[%s3012_s29 + $0x1908] sm:$0xff]  ;;  %1938 = vmatpush.msrb.mxu3 %v1249_v1  ;;  %v2900_v1 = vld.sshfl [vmem:[#allocation1 + $0x38] sm:$0xff pattern:$0x73625140] }
 0x1c2   : > { %v1117_v3 = vld [vmem:[%s3012_s29 + $0x1b28] sm:$0xff]  ;;  %1880 = vmatpush.msrb.mxu0 %v1049_v2  ;;  %v302_v2 = vld [vmem:[%s3012_s29 + $0x1b0] sm:$0xff] }
 0x1c3   : > { %v1177_v4 = vld [vmem:[%s3012_s29 + $0x1d08] sm:$0xff]  ;;  %1899 = vmatpush.msrb.mxu1 %v1117_v3  ;;  %v370_v3 = vld [vmem:[%s3012_s29 + $0x3d0] sm:$0xff] }
 0x1c4   : > { %v1245_v5 = vld [vmem:[%s3012_s29 + $0x1f28] sm:$0xff]  ;;  %1920 = vmatpush.msrb.mxu2 %v1177_v4  ;;  %v430_v4 = vld [vmem:[%s3012_s29 + $0x5b0] sm:$0xff] }
 0x1c5   : > { %v1045_v6 = vld [vmem:[%s3012_s29 + $0x18e8] sm:$0xff]  ;;  %1939 = vmatpush.msrb.mxu3 %v1245_v5  ;;  %v498_v5 = vld [vmem:[%s3012_s29 + $0x7d0] sm:$0xff] }
 0x1c6   : > { %v1113_v7 = vld [vmem:[%s3012_s29 + $0x1b08] sm:$0xff]  ;;  %1881 = vmatpush.msrb.mxu0 %v1045_v6  ;;  %v298_v6 = vld [vmem:[%s3012_s29 + $0x190] sm:$0xff] }
 0x1c7   : > { %v1173_v8 = vld [vmem:[%s3012_s29 + $0x1ce8] sm:$0xff]  ;;  %1900 = vmatpush.msrb.mxu1 %v1113_v7  ;;  %v366_v7 = vld [vmem:[%s3012_s29 + $0x3b0] sm:$0xff] }
 0x1c8   : > { %v1241_v9 = vld [vmem:[%s3012_s29 + $0x1f08] sm:$0xff]  ;;  %1921 = vmatpush.msrb.mxu2 %v1173_v8  ;;  %v426_v8 = vld [vmem:[%s3012_s29 + $0x590] sm:$0xff] }
 0x1c9   : > { %v1041_v10 = vld [vmem:[%s3012_s29 + $0x18c8] sm:$0xff]  ;;  %1940 = vmatpush.msrb.mxu3 %v1241_v9  ;;  %v494_v9 = vld [vmem:[%s3012_s29 + $0x7b0] sm:$0xff] }
 0x1ca   : > { %v1109_v11 = vld [vmem:[%s3012_s29 + $0x1ae8] sm:$0xff]  ;;  %1882 = vmatpush.msrb.mxu0 %v1041_v10  ;;  %v294_v10 = vld [vmem:[%s3012_s29 + $0x170] sm:$0xff] }
 0x1cb   : > { %v1169_v12 = vld [vmem:[%s3012_s29 + $0x1cc8] sm:$0xff]  ;;  %1901 = vmatpush.msrb.mxu1 %v1109_v11  ;;  %v362_v11 = vld [vmem:[%s3012_s29 + $0x390] sm:$0xff] }
 0x1cc   : > { %v1237_v13 = vld [vmem:[%s3012_s29 + $0x1ee8] sm:$0xff]  ;;  %1922 = vmatpush.msrb.mxu2 %v1169_v12  ;;  %v422_v12 = vld [vmem:[%s3012_s29 + $0x570] sm:$0xff] }
 0x1cd   : > { %v1037_v14 = vld [vmem:[%s3012_s29 + $0x18a8] sm:$0xff]  ;;  %1941 = vmatpush.msrb.mxu3 %v1237_v13  ;;  %v490_v13 = vld [vmem:[%s3012_s29 + $0x790] sm:$0xff] }
 0x1ce   : > { %v1105_v15 = vld [vmem:[%s3012_s29 + $0x1ac8] sm:$0xff]  ;;  %1883 = vmatpush.msrb.mxu0 %v1037_v14  ;;  %v290_v14 = vld [vmem:[%s3012_s29 + $0x150] sm:$0xff] }
 0x1cf   : > { %v1165_v16 = vld [vmem:[%s3012_s29 + $0x1ca8] sm:$0xff]  ;;  %1902 = vmatpush.msrb.mxu1 %v1105_v15  ;;  %v358_v15 = vld [vmem:[%s3012_s29 + $0x370] sm:$0xff] }
 0x1d0   : > { %v1233_v17 = vld [vmem:[%s3012_s29 + $0x1ec8] sm:$0xff]  ;;  %1923 = vmatpush.msrb.mxu2 %v1165_v16  ;;  %v418_v16 = vld [vmem:[%s3012_s29 + $0x550] sm:$0xff] }
 0x1d1   : > { %v1033_v18 = vld [vmem:[%s3012_s29 + $0x1888] sm:$0xff]  ;;  %1942 = vmatpush.msrb.mxu3 %v1233_v17  ;;  %v486_v17 = vld [vmem:[%s3012_s29 + $0x770] sm:$0xff] }
 0x1d2   : > { %v1101_v19 = vld [vmem:[%s3012_s29 + $0x1aa8] sm:$0xff]  ;;  %1884 = vmatpush.msrb.mxu0 %v1033_v18  ;;  %v286_v18 = vld [vmem:[%s3012_s29 + $0x130] sm:$0xff] }
 0x1d3   : > { %v1161_v20 = vld [vmem:[%s3012_s29 + $0x1c88] sm:$0xff]  ;;  %1903 = vmatpush.msrb.mxu1 %v1101_v19  ;;  %v354_v19 = vld [vmem:[%s3012_s29 + $0x350] sm:$0xff] }
 0x1d4   : > { %v1229_v21 = vld [vmem:[%s3012_s29 + $0x1ea8] sm:$0xff]  ;;  %1924 = vmatpush.msrb.mxu2 %v1161_v20  ;;  %v414_v20 = vld [vmem:[%s3012_s29 + $0x530] sm:$0xff] }
 0x1d5   : > { %v1029_v22 = vld [vmem:[%s3012_s29 + $0x1868] sm:$0xff]  ;;  %1943 = vmatpush.msrb.mxu3 %v1229_v21  ;;  %v482_v21 = vld [vmem:[%s3012_s29 + $0x750] sm:$0xff] }
 0x1d6   : > { %v1097_v23 = vld [vmem:[%s3012_s29 + $0x1a88] sm:$0xff]  ;;  %1885 = vmatpush.msrb.mxu0 %v1029_v22  ;;  %v282_v22 = vld [vmem:[%s3012_s29 + $0x110] sm:$0xff] }
 0x1d7   : > { %v1157_v25 = vld [vmem:[%s3012_s29 + $0x1c68] sm:$0xff]  ;;  %1904 = vmatpush.msrb.mxu1 %v1097_v23  ;;  %v350_v23 = vld [vmem:[%s3012_s29 + $0x330] sm:$0xff] }
 0x1d8   : > { %v1225_v26 = vld [vmem:[%s3012_s29 + $0x1e88] sm:$0xff]  ;;  %1925 = vmatpush.msrb.mxu2 %v1157_v25  ;;  %v478_v25 = vld [vmem:[%s3012_s29 + $0x730] sm:$0xff] }
 0x1d9   : > { %v1025_v28 = vld [vmem:[%s3012_s29 + $0x1848] sm:$0xff]  ;;  %1944 = vmatpush.msrb.mxu3 %v1225_v26  ;;  %v278_v26 = vld [vmem:[%s3012_s29 + $0xf0] sm:$0xff] }
 0x1da   : > { %v1093_v30 = vld [vmem:[%s3012_s29 + $0x1a68] sm:$0xff]  ;;  %1886 = vmatpush.msrb.mxu0 %v1025_v28  ;;  %v406_v28 = vld [vmem:[%s3012_s29 + $0x4f0] sm:$0xff] }
 0x1db   : > { %v1153_v31 = vld [vmem:[%s3012_s29 + $0x1c48] sm:$0xff]  ;;  %1905 = vmatpush.msrb.mxu1 %v1093_v30  ;;  %v474_v30 = vld [vmem:[%s3012_s29 + $0x710] sm:$0xff] }
 0x1dc   : > { %v1221_v32 = vld [vmem:[%s3012_s29 + $0x1e68] sm:$0xff]  ;;  %1926 = vmatpush.msrb.mxu2 %v1153_v31  ;;  %v274_v31 = vld [vmem:[%s3012_s29 + $0xd0] sm:$0xff] }
 0x1dd   : > { %v1021_v34 = vld [vmem:[%s3012_s29 + $0x1828] sm:$0xff]  ;;  %1945 = vmatpush.msrb.mxu3 %v1221_v32  ;;  %v342_v32 = vld [vmem:[%s3012_s29 + $0x2f0] sm:$0xff] }
 0x1de   : > { %v1089_v35 = vld [vmem:[%s3012_s29 + $0x1a48] sm:$0xff]  ;;  %1887 = vmatpush.msrb.mxu0 %v1021_v34  ;;  %v470_v34 = vld [vmem:[%s3012_s29 + $0x6f0] sm:$0xff] }
 0x1df   : > { %v1149_v29 = vld [vmem:[%s3012_s29 + $0x1c28] sm:$0xff]  ;;  %1906 = vmatpush.msrb.mxu1 %v1089_v35  ;;  %v270_v35 = vld [vmem:[%s3012_s29 + $0xb0] sm:$0xff] }
 0x1e0   : > { %v1217_v36 = vld [vmem:[%s3012_s29 + $0x1e48] sm:$0xff]  ;;  %1927 = vmatpush.msrb.mxu2 %v1149_v29  ;;  %v338_v29 = vld [vmem:[%s3012_s29 + $0x2d0] sm:$0xff] }
 0x1e1   : > { %v1017_v38 = vld [vmem:[%s3012_s29 + $0x1808] sm:$0xff]  ;;  %1946 = vmatpush.msrb.mxu3 %v1217_v36  ;;  %v398_v36 = vld [vmem:[%s3012_s29 + $0x4b0] sm:$0xff] }
 0x1e2   : > { %v1085_v39 = vld [vmem:[%s3012_s29 + $0x1a28] sm:$0xff]  ;;  %1888 = vmatpush.msrb.mxu0 %v1017_v38  ;;  %v266_v38 = vld [vmem:[%s3012_s29 + $0x90] sm:$0xff] }
 0x1e3   : > { %v1145_v41 = vld [vmem:[%s3012_s29 + $0x1c08] sm:$0xff]  ;;  %1907 = vmatpush.msrb.mxu1 %v1085_v39  ;;  %1889 = vmatmul.f32.vlgmr.msrb.gmra.mxu0 %v2897_v54  ;;  %v334_v39 = vld [vmem:[%s3012_s29 + $0x2b0] sm:$0xff] }
 0x1e4   : > { %v1213_v42 = vld [vmem:[%s3012_s29 + $0x1e28] sm:$0xff]  ;;  %1928 = vmatpush.msrb.mxu2 %v1145_v41  ;;  %1953 = vmatpush.msra.mxu0 %v310_v44  ;;  %v462_v41 = vld [vmem:[%s3012_s29 + $0x6b0] sm:$0xff] }
 0x1e5   : > { %1947 = vmatpush.msrb.mxu3 %v1213_v42  ;;  %v1081_v51 = vld [vmem:[%s3012_s29 + $0x1a08] sm:$0xff]  ;;  %1929 = vmatmul.f32.vlgmr.msrb.gmra.mxu2 %v2898_v55  ;;  %v262_v42 = vld [vmem:[%s3012_s29 + $0x70] sm:$0xff] }
 0x1e6   : > { %v1209_v52 = vld [vmem:[%s3012_s29 + $0x1e08] sm:$0xff]  ;;  %1993 = vmatpush.msra.mxu2 %v438_v49  ;;  %1908 = vmatpush.msrb.mxu1 %v1081_v51  ;;  %v390_v44 = vld [vmem:[%s3012_s29 + $0x470] sm:$0xff] }
 0x1e7   : > { %1948 = vmatpush.msrb.mxu3 %v1209_v52  ;;  %v2899_v60 = vld.sshfl [vmem:[#allocation1 + $0x28] sm:$0xff pattern:$0x73625140]  ;;  %1954 = vmatpush.msra.mxu0 %v306_v56  ;;  %v458_v49 = vld [vmem:[%s3012_s29 + $0x690] sm:$0xff] }
 0x1e8   : > { %1909 = vmatmul.f32.vlgmr.msrb.gmra.mxu1 %v2899_v60  ;;  %1949 = vmatmul.f32.vlgmr.msrb.gmra.mxu3 %v2900_v1  ;;  %v326_v51 = vld [vmem:[%s3012_s29 + $0x270] sm:$0xff] }
 0x1e9   : > { %1973 = vmatpush.msra.mxu1 %v374_v57  ;;  %1994 = vmatpush.msra.mxu2 %v434_v58  ;;  %v386_v52 = vld [vmem:[%s3012_s29 + $0x450] sm:$0xff] }
 0x1ea   : > { %2013 = vmatpush.msra.mxu3 %v502_v59  ;;  %1955 = vmatpush.msra.mxu0 %v302_v2  ;;  %v454_v54 = vld [vmem:[%s3012_s29 + $0x670] sm:$0xff] }
 0x1eb   : > { %1974 = vmatpush.msra.mxu1 %v370_v3  ;;  %1995 = vmatpush.msra.mxu2 %v430_v4  ;;  %v254_v55 = vld [vmem:[%s3012_s29 + $0x30] sm:$0xff] }
 0x1ec   : > { %2014 = vmatpush.msra.mxu3 %v498_v5  ;;  %1956 = vmatpush.msra.mxu0 %v298_v6  ;;  %v322_v56 = vld [vmem:[%s3012_s29 + $0x250] sm:$0xff] }
 0x1ed   : > { %1975 = vmatpush.msra.mxu1 %v366_v7  ;;  %1996 = vmatpush.msra.mxu2 %v426_v8  ;;  %v382_v57 = vld [vmem:[%s3012_s29 + $0x430] sm:$0xff] }
 0x1ee   : > { %2015 = vmatpush.msra.mxu3 %v494_v9  ;;  %1957 = vmatpush.msra.mxu0 %v294_v10  ;;  %v450_v58 = vld [vmem:[%s3012_s29 + $0x650] sm:$0xff] }
 0x1ef   : > { %1976 = vmatpush.msra.mxu1 %v362_v11  ;;  %1997 = vmatpush.msra.mxu2 %v422_v12  ;;  %v250_v59 = vld [vmem:[%s3012_s29 + $0x10] sm:$0xff] }
 0x1f0   : > { %2016 = vmatpush.msra.mxu3 %v490_v13  ;;  %1958 = vmatpush.msra.mxu0 %v290_v14  ;;  %v318_v60 = vld [vmem:[%s3012_s29 + $0x230] sm:$0xff] }
 0x1f1   : > { %1977 = vmatpush.msra.mxu1 %v358_v15  ;;  %1998 = vmatpush.msra.mxu2 %v418_v16  ;;  %v378_v1 = vld [vmem:[%s3012_s29 + $0x410] sm:$0xff] }
 0x1f2   : > { %2017 = vmatpush.msra.mxu3 %v486_v17  ;;  %1959 = vmatpush.msra.mxu0 %v286_v18  ;;  %v446_v2 = vld [vmem:[%s3012_s29 + $0x630] sm:$0xff] }
 0x1f3   : > { %1978 = vmatpush.msra.mxu1 %v354_v19  ;;  %1999 = vmatpush.msra.mxu2 %v414_v20  ;;  %v566_v3 = vld [vmem:[%s3012_s29 + $0x9f0] sm:$0xff] }
 0x1f4   : > { %2018 = vmatpush.msra.mxu3 %v482_v21  ;;  %1960 = vmatpush.msra.mxu0 %v282_v22  ;;  %v694_v4 = vld [vmem:[%s3012_s29 + $0xdf0] sm:$0xff] }
 0x1f5   : > { %1979 = vmatpush.msra.mxu1 %v350_v23  ;;  %2000 = vmatpush.msra.mxu2 %v410_v24  ;;  %v314_v5 = vld [vmem:[%s3012_s29 + $0x210] sm:$0xff] }
 0x1f6   : > { %2019 = vmatpush.msra.mxu3 %v478_v25  ;;  %1961 = vmatpush.msra.mxu0 %v278_v26  ;;  %v442_v6 = vld [vmem:[%s3012_s29 + $0x610] sm:$0xff] }
 0x1f7   : > { %1980 = vmatpush.msra.mxu1 %v346_v27  ;;  %2001 = vmatpush.msra.mxu2 %v406_v28  ;;  %v562_v7 = vld [vmem:[%s3012_s29 + $0x9d0] sm:$0xff] }
 0x1f8   : > { %2020 = vmatpush.msra.mxu3 %v474_v30  ;;  %1962 = vmatpush.msra.mxu0 %v274_v31  ;;  %v630_v8 = vld [vmem:[%s3012_s29 + $0xbf0] sm:$0xff] }
 0x1f9   : > { %1981 = vmatpush.msra.mxu1 %v342_v32  ;;  %2002 = vmatpush.msra.mxu2 %v402_v33  ;;  %v690_v9 = vld [vmem:[%s3012_s29 + $0xdd0] sm:$0xff] }
 0x1fa   : > { %2021 = vmatpush.msra.mxu3 %v470_v34  ;;  %1963 = vmatpush.msra.mxu0 %v270_v35  ;;  %v758_v10 = vld [vmem:[%s3012_s29 + $0xff0] sm:$0xff] }
 0x1fb   : > { %1982 = vmatpush.msra.mxu1 %v338_v29  ;;  %2003 = vmatpush.msra.mxu2 %v398_v36  ;;  %v558_v11 = vld [vmem:[%s3012_s29 + $0x9b0] sm:$0xff] }
 0x1fc   : > { %2022 = vmatpush.msra.mxu3 %v466_v37  ;;  %1964 = vmatpush.msra.mxu0 %v266_v38  ;;  %v626_v12 = vld [vmem:[%s3012_s29 + $0xbd0] sm:$0xff] }
 0x1fd   : > { %1983 = vmatpush.msra.mxu1 %v334_v39  ;;  %2004 = vmatpush.msra.mxu2 %v394_v40  ;;  %v686_v13 = vld [vmem:[%s3012_s29 + $0xdb0] sm:$0xff] }
 0x1fe   : > { %2023 = vmatpush.msra.mxu3 %v462_v41  ;;  %1965 = vmatpush.msra.mxu0 %v262_v42  ;;  %v754_v14 = vld [vmem:[%s3012_s29 + $0xfd0] sm:$0xff] }
 0x1ff   : > { %1984 = vmatpush.msra.mxu1 %v330_v43  ;;  %2005 = vmatpush.msra.mxu2 %v390_v44  ;;  %v554_v15 = vld [vmem:[%s3012_s29 + $0x990] sm:$0xff] }
 0x200   : > { %2024 = vmatpush.msra.mxu3 %v458_v49  ;;  %1966 = vmatpush.msra.mxu0 %v258_v50  ;;  %v622_v16 = vld [vmem:[%s3012_s29 + $0xbb0] sm:$0xff] }
 0x201   : > { %1985 = vmatpush.msra.mxu1 %v326_v51  ;;  %2006 = vmatpush.msra.mxu2 %v386_v52  ;;  %v682_v17 = vld [vmem:[%s3012_s29 + $0xd90] sm:$0xff] }
 0x202   : > { %2025 = vmatpush.msra.mxu3 %v454_v54  ;;  %1967 = vmatpush.msra.mxu0 %v254_v55  ;;  %v750_v18 = vld [vmem:[%s3012_s29 + $0xfb0] sm:$0xff] }
 0x203   : > { %1986 = vmatpush.msra.mxu1 %v322_v56  ;;  %2007 = vmatpush.msra.mxu2 %v382_v57  ;;  %v550_v19 = vld [vmem:[%s3012_s29 + $0x970] sm:$0xff] }
 0x204   : > { %2026 = vmatpush.msra.mxu3 %v450_v58  ;;  %1968 = vmatpush.msra.mxu0 %v250_v59  ;;  %v618_v20 = vld [vmem:[%s3012_s29 + $0xb90] sm:$0xff]  ;;  %v1650_v58 = vpop.f32.mrf.mxu0 }
 0x205   : > { %1987 = vmatpush.msra.mxu1 %v318_v60  ;;  %2008 = vmatpush.msra.mxu2 %v378_v1  ;;  %v678_v21 = vld [vmem:[%s3012_s29 + $0xd70] sm:$0xff] }
 0x206   : > { %2027 = vmatpush.msra.mxu3 %v446_v2  ;;  %2033 = vmatpush.msrb.mxu0 %v566_v3  ;;  %v746_v22 = vld [vmem:[%s3012_s29 + $0xf90] sm:$0xff] }
 0x207   : > { %2073 = vmatpush.msrb.mxu2 %v694_v4  ;;  %1988 = vmatpush.msra.mxu1 %v314_v5  ;;  %v546_v23 = vld [vmem:[%s3012_s29 + $0x950] sm:$0xff]  ;;  %v1670_v5 = vpop.f32.mrf.mxu1 }
 0x208   : > { %2028 = vmatpush.msra.mxu3 %v442_v6  ;;  %2034 = vmatpush.msrb.mxu0 %v562_v7  ;;  %v614_v24 = vld [vmem:[%s3012_s29 + $0xb70] sm:$0xff] }
 0x209   : > { %2053 = vmatpush.msrb.mxu1 %v630_v8  ;;  %2074 = vmatpush.msrb.mxu2 %v690_v9  ;;  %v674_v25 = vld [vmem:[%s3012_s29 + $0xd50] sm:$0xff]  ;;  %v1671_v8 = vadd.f32 %v1670_v5, %v1650_v58  ;;  %v1690_v9 = vpop.f32.mrf.mxu2 }
 0x20a   : > { %2093 = vmatpush.msrb.mxu3 %v758_v10  ;;  %2035 = vmatpush.msrb.mxu0 %v558_v11  ;;  %v742_v26 = vld [vmem:[%s3012_s29 + $0xf70] sm:$0xff] }
 0x20b   : > { %2054 = vmatpush.msrb.mxu1 %v626_v12  ;;  %2075 = vmatpush.msrb.mxu2 %v686_v13  ;;  %v542_v27 = vld [vmem:[%s3012_s29 + $0x930] sm:$0xff]  ;;  %v1691_v13 = vadd.f32 %v1690_v9, %v1671_v8 }
 0x20c   : > { %2094 = vmatpush.msrb.mxu3 %v754_v14  ;;  %2036 = vmatpush.msrb.mxu0 %v554_v15  ;;  %v610_v28 = vld [vmem:[%s3012_s29 + $0xb50] sm:$0xff] }
 0x20d   : > { %2055 = vmatpush.msrb.mxu1 %v622_v16  ;;  %2076 = vmatpush.msrb.mxu2 %v682_v17  ;;  %v670_v30 = vld [vmem:[%s3012_s29 + $0xd30] sm:$0xff]  ;;  %v1710_v16 = vpop.f32.mrf.mxu3 }
 0x20e   : > { %2095 = vmatpush.msrb.mxu3 %v750_v18  ;;  %2037 = vmatpush.msrb.mxu0 %v550_v19  ;;  %v738_v31 = vld [vmem:[%s3012_s29 + $0xf50] sm:$0xff]  ;;  %v1711_v18 = vadd.f32 %v1710_v16, %v1691_v13 }
 0x20f   : > { %2056 = vmatpush.msrb.mxu1 %v618_v20  ;;  %2077 = vmatpush.msrb.mxu2 %v678_v21  ;;  %v538_v32 = vld [vmem:[%s3012_s29 + $0x910] sm:$0xff] }
 0x210   : > { %2096 = vmatpush.msrb.mxu3 %v746_v22  ;;  %2038 = vmatpush.msrb.mxu0 %v546_v23  ;;  %v606_v33 = vld [vmem:[%s3012_s29 + $0xb30] sm:$0xff]  ;;  %v1730_v22 = vpop.f32.mrf.mxu0 }
 0x211   : > { %2057 = vmatpush.msrb.mxu1 %v614_v24  ;;  %2078 = vmatpush.msrb.mxu2 %v674_v25  ;;  %v666_v34 = vld [vmem:[%s3012_s29 + $0xd10] sm:$0xff]  ;;  %v1731_v24 = vadd.f32 %v1730_v22, %v1711_v18 }
 0x212   : > { %2097 = vmatpush.msrb.mxu3 %v742_v26  ;;  %2039 = vmatpush.msrb.mxu0 %v542_v27  ;;  %v734_v35 = vld [vmem:[%s3012_s29 + $0xf30] sm:$0xff] }
 0x213   : > { %2058 = vmatpush.msrb.mxu1 %v610_v28  ;;  %2079 = vmatpush.msrb.mxu2 %v670_v30  ;;  %v534_v29 = vld [vmem:[%s3012_s29 + $0x8f0] sm:$0xff]  ;;  %v1750_v30 = vpop.f32.mrf.mxu1 }
 0x214   : > { %2098 = vmatpush.msrb.mxu3 %v738_v31  ;;  %v602_v36 = vld [vmem:[%s3012_s29 + $0xb10] sm:$0xff]  ;;  %2040 = vmatpush.msrb.mxu0 %v538_v32 }
 0x215   : > { %2059 = vmatpush.msrb.mxu1 %v606_v33  ;;  %v662_v37 = vld [vmem:[%s3012_s29 + $0xcf0] sm:$0xff]  ;;  %2080 = vmatpush.msrb.mxu2 %v666_v34  ;;  %v1751_v33 = vadd.f32 %v1750_v30, %v1731_v24  ;;  %v1770_v34 = vpop.f32.mrf.mxu2 }
 0x216   : > { %v730_v38 = vld [vmem:[%s3012_s29 + $0xf10] sm:$0xff]  ;;  %2099 = vmatpush.msrb.mxu3 %v734_v35  ;;  %2041 = vmatpush.msrb.mxu0 %v534_v29 }
 0x217   : > { %v530_v39 = vld [vmem:[%s3012_s29 + $0x8d0] sm:$0xff]  ;;  %2060 = vmatpush.msrb.mxu1 %v602_v36  ;;  %2081 = vmatpush.msrb.mxu2 %v662_v37  ;;  %v1771_v37 = vadd.f32 %v1770_v34, %v1751_v33 }
 0x218   : > { %v598_v40 = vld [vmem:[%s3012_s29 + $0xaf0] sm:$0xff]  ;;  %2100 = vmatpush.msrb.mxu3 %v730_v38  ;;  %2042 = vmatpush.msrb.mxu0 %v530_v39 }
 0x219   : > { %v658_v41 = vld [vmem:[%s3012_s29 + $0xcd0] sm:$0xff]  ;;  %2061 = vmatpush.msrb.mxu1 %v598_v40  ;;  %2009 = vmatmul.f32.vlgmr.msra.gmra.mxu2 %v3123_v45  ;;  %v1790_v40 = vpop.f32.mrf.mxu3 }
 0x21a   : > { %v726_v42 = vld [vmem:[%s3012_s29 + $0xef0] sm:$0xff]  ;;  %2082 = vmatpush.msrb.mxu2 %v658_v41  ;;  %1969 = vmatmul.f32.vlgmr.msra.gmra.mxu0 %v3125_v46 }
 0x21b   : > { %v526_v43 = vld [vmem:[%s3012_s29 + $0x8b0] sm:$0xff]  ;;  %2101 = vmatpush.msrb.mxu3 %v726_v42  ;;  %1989 = vmatmul.f32.vlgmr.msra.gmra.mxu1 %v3129_v48  ;;  %v3717_v42 = vadd.f32 %v1790_v40, %v1771_v37 }
 0x21c   : > { %v594_v44 = vld [vmem:[%s3012_s29 + $0xad0] sm:$0xff]  ;;  %2043 = vmatpush.msrb.mxu0 %v526_v43  ;;  %2029 = vmatmul.f32.vlgmr.msra.gmra.mxu3 %v3127_v47 }
 0x21d   : > { %v654_v49 = vld [vmem:[%s3012_s29 + $0xcb0] sm:$0xff]  ;;  %2062 = vmatpush.msrb.mxu1 %v594_v44 }
 0x21e   : > { %v722_v50 = vld [vmem:[%s3012_s29 + $0xed0] sm:$0xff]  ;;  %2083 = vmatpush.msrb.mxu2 %v654_v49 }
 0x21f   : > { %v522_v51 = vld [vmem:[%s3012_s29 + $0x890] sm:$0xff]  ;;  %2102 = vmatpush.msrb.mxu3 %v722_v50  ;;  %v1810_v22 = vpop.f32.mrf.mxu0 }
 0x220   : > { %v590_v52 = vld [vmem:[%s3012_s29 + $0xab0] sm:$0xff]  ;;  %2044 = vmatpush.msrb.mxu0 %v522_v51 }
 0x221   : > { %v650_v54 = vld [vmem:[%s3012_s29 + $0xc90] sm:$0xff]  ;;  %2063 = vmatpush.msrb.mxu1 %v590_v52 }
 0x222   : > { %v718_v55 = vld [vmem:[%s3012_s29 + $0xeb0] sm:$0xff]  ;;  %2084 = vmatpush.msrb.mxu2 %v650_v54 }
 0x223   : > { %v518_v56 = vld [vmem:[%s3012_s29 + $0x870] sm:$0xff]  ;;  %2103 = vmatpush.msrb.mxu3 %v718_v55 }
 0x224   : > { %v586_v57 = vld [vmem:[%s3012_s29 + $0xa90] sm:$0xff]  ;;  %2045 = vmatpush.msrb.mxu0 %v518_v56 }
 0x225   : > { %v646_v59 = vld [vmem:[%s3012_s29 + $0xc70] sm:$0xff]  ;;  %2064 = vmatpush.msrb.mxu1 %v586_v57 }
 0x226   : > { %v714_v60 = vld [vmem:[%s3012_s29 + $0xe90] sm:$0xff]  ;;  %2085 = vmatpush.msrb.mxu2 %v646_v59 }
 0x227   : > { %v514_v1 = vld [vmem:[%s3012_s29 + $0x850] sm:$0xff]  ;;  %2104 = vmatpush.msrb.mxu3 %v714_v60 }
 0x228   : > { %v582_v2 = vld [vmem:[%s3012_s29 + $0xa70] sm:$0xff]  ;;  %2046 = vmatpush.msrb.mxu0 %v514_v1 }
 0x229   : > { %v642_v3 = vld [vmem:[%s3012_s29 + $0xc50] sm:$0xff]  ;;  %2065 = vmatpush.msrb.mxu1 %v582_v2 }
 0x22a   : > { %v710_v4 = vld [vmem:[%s3012_s29 + $0xe70] sm:$0xff]  ;;  %2086 = vmatpush.msrb.mxu2 %v642_v3 }
 0x22b   : > { %v510_v6 = vld [vmem:[%s3012_s29 + $0x830] sm:$0xff]  ;;  %2105 = vmatpush.msrb.mxu3 %v710_v4 }
 0x22c   : > { %v578_v7 = vld [vmem:[%s3012_s29 + $0xa50] sm:$0xff]  ;;  %2047 = vmatpush.msrb.mxu0 %v510_v6 }
 0x22d   : > { %v638_v10 = vld [vmem:[%s3012_s29 + $0xc30] sm:$0xff]  ;;  %2066 = vmatpush.msrb.mxu1 %v578_v7 }
 0x22e   : > { %v706_v11 = vld [vmem:[%s3012_s29 + $0xe50] sm:$0xff]  ;;  %2087 = vmatpush.msrb.mxu2 %v638_v10 }
 0x22f   : > { %v506_v12 = vld [vmem:[%s3012_s29 + $0x810] sm:$0xff]  ;;  %2106 = vmatpush.msrb.mxu3 %v706_v11 }
 0x230   : > { %v574_v14 = vld [vmem:[%s3012_s29 + $0xa30] sm:$0xff]  ;;  %2048 = vmatpush.msrb.mxu0 %v506_v12 }
 0x231   : > { %v634_v15 = vld [vmem:[%s3012_s29 + $0xc10] sm:$0xff]  ;;  %2067 = vmatpush.msrb.mxu1 %v574_v14  ;;  %2049 = vmatmul.f32.vlgmr.msrb.gmra.mxu0 %v3145_v62 }
 0x232   : > { %v702_v17 = vld [vmem:[%s3012_s29 + $0xe30] sm:$0xff]  ;;  %2088 = vmatpush.msrb.mxu2 %v634_v15 }
 0x233   : > { %v822_v19 = vld [vmem:[%s3012_s29 + $0x11f0] sm:$0xff]  ;;  %2107 = vmatpush.msrb.mxu3 %v702_v17  ;;  %2089 = vmatmul.f32.vlgmr.msrb.gmra.mxu2 %v3143_v61 }
 0x234   : > { %v950_v20 = vld [vmem:[%s3012_s29 + $0x15f0] sm:$0xff]  ;;  %2113 = vmatpush.msra.mxu0 %v822_v19 }
 0x235   : > { %v570_v21 = vld [vmem:[%s3012_s29 + $0xa10] sm:$0xff]  ;;  %2153 = vmatpush.msra.mxu2 %v950_v20 }
 0x236   : > { %v698_v23 = vld [vmem:[%s3012_s29 + $0xe10] sm:$0xff]  ;;  %2068 = vmatpush.msrb.mxu1 %v570_v21 }
 0x237   : > { %v818_v25 = vld [vmem:[%s3012_s29 + $0x11d0] sm:$0xff]  ;;  %2108 = vmatpush.msrb.mxu3 %v698_v23  ;;  %2069 = vmatmul.f32.vlgmr.msrb.gmra.mxu1 %v3149_v0 }
 0x238   : > { %v886_v26 = vld [vmem:[%s3012_s29 + $0x13f0] sm:$0xff]  ;;  %2114 = vmatpush.msra.mxu0 %v818_v25  ;;  %2109 = vmatmul.f32.vlgmr.msrb.gmra.mxu3 %v3147_v63  ;;  %v1811_v25 = vadd.f32 %v1810_v22, %v3717_v42 }
 0x239   : > { %v946_v27 = vld [vmem:[%s3012_s29 + $0x15d0] sm:$0xff]  ;;  %2133 = vmatpush.msra.mxu1 %v886_v26 }
 0x23a   : > { %v1014_v28 = vld [vmem:[%s3012_s29 + $0x17f0] sm:$0xff]  ;;  %2154 = vmatpush.msra.mxu2 %v946_v27 }
 0x23b   : > { %v814_v31 = vld [vmem:[%s3012_s29 + $0x11b0] sm:$0xff]  ;;  %2173 = vmatpush.msra.mxu3 %v1014_v28 }
 0x23c   : > { %v882_v32 = vld [vmem:[%s3012_s29 + $0x13d0] sm:$0xff]  ;;  %2115 = vmatpush.msra.mxu0 %v814_v31  ;;  %v1830_v31 = vpop.f32.mrf.mxu1 }
 0x23d   : > { %v942_v35 = vld [vmem:[%s3012_s29 + $0x15b0] sm:$0xff]  ;;  %2134 = vmatpush.msra.mxu1 %v882_v32  ;;  %v1831_v34 = vadd.f32 %v1830_v31, %v1811_v25 }
 0x23e   : > { %v1010_v29 = vld [vmem:[%s3012_s29 + $0x17d0] sm:$0xff]  ;;  %2155 = vmatpush.msra.mxu2 %v942_v35 }
 0x23f   : > { %v810_v36 = vld [vmem:[%s3012_s29 + $0x1190] sm:$0xff]  ;;  %2174 = vmatpush.msra.mxu3 %v1010_v29 }
 0x240   : > { %v878_v38 = vld [vmem:[%s3012_s29 + $0x13b0] sm:$0xff]  ;;  %2116 = vmatpush.msra.mxu0 %v810_v36 }
 0x241   : > { %v938_v39 = vld [vmem:[%s3012_s29 + $0x1590] sm:$0xff]  ;;  %2135 = vmatpush.msra.mxu1 %v878_v38  ;;  %v1850_v38 = vpop.f32.mrf.mxu2 }
 0x242   : > { %v1006_v41 = vld [vmem:[%s3012_s29 + $0x17b0] sm:$0xff]  ;;  %2156 = vmatpush.msra.mxu2 %v938_v39 }
 0x243   : > { %v806_v43 = vld [vmem:[%s3012_s29 + $0x1170] sm:$0xff]  ;;  %2175 = vmatpush.msra.mxu3 %v1006_v41  ;;  %v1851_v41 = vadd.f32 %v1850_v38, %v1831_v34 }
 0x244   : > { %v874_v44 = vld [vmem:[%s3012_s29 + $0x1390] sm:$0xff]  ;;  %2117 = vmatpush.msra.mxu0 %v806_v43 }
 0x245   : > { %v934_v49 = vld [vmem:[%s3012_s29 + $0x1570] sm:$0xff]  ;;  %2136 = vmatpush.msra.mxu1 %v874_v44  ;;  %v1870_v44 = vpop.f32.mrf.mxu3 }
 0x246   : > { %v1002_v50 = vld [vmem:[%s3012_s29 + $0x1790] sm:$0xff]  ;;  %2157 = vmatpush.msra.mxu2 %v934_v49 }
 0x247   : > { %v802_v51 = vld [vmem:[%s3012_s29 + $0x1150] sm:$0xff]  ;;  %2176 = vmatpush.msra.mxu3 %v1002_v50 }
 0x248   : > { %v870_v52 = vld [vmem:[%s3012_s29 + $0x1370] sm:$0xff]  ;;  %2118 = vmatpush.msra.mxu0 %v802_v51  ;;  %v3776_v51 = vadd.f32 %v1870_v44, %v1851_v41 }
 0x249   : > { %v930_v54 = vld [vmem:[%s3012_s29 + $0x1550] sm:$0xff]  ;;  %2137 = vmatpush.msra.mxu1 %v870_v52  ;;  %v2901_v52 = vld.sshfl [vmem:[#allocation1] sm:$0xff pattern:$0x73625140] }
 0x24a   : > { %v998_v55 = vld [vmem:[%s3012_s29 + $0x1770] sm:$0xff]  ;;  %2158 = vmatpush.msra.mxu2 %v930_v54 }
 0x24b   : > { %v798_v56 = vld [vmem:[%s3012_s29 + $0x1130] sm:$0xff]  ;;  %2177 = vmatpush.msra.mxu3 %v998_v55 }
 0x24c   : > { %v866_v57 = vld [vmem:[%s3012_s29 + $0x1350] sm:$0xff]  ;;  %2119 = vmatpush.msra.mxu0 %v798_v56 }
 0x24d   : > { %v926_v58 = vld [vmem:[%s3012_s29 + $0x1530] sm:$0xff]  ;;  %2138 = vmatpush.msra.mxu1 %v866_v57 }
 0x24e   : > { %v994_v59 = vld [vmem:[%s3012_s29 + $0x1750] sm:$0xff]  ;;  %2159 = vmatpush.msra.mxu2 %v926_v58 }
 0x24f   : > { %v794_v60 = vld [vmem:[%s3012_s29 + $0x1110] sm:$0xff]  ;;  %2178 = vmatpush.msra.mxu3 %v994_v59  ;;  %v2903_v59 = vld.sshfl [vmem:[#allocation1 + $0x8] sm:$0xff pattern:$0x73625140] }
 0x250   : > { %v862_v1 = vld [vmem:[%s3012_s29 + $0x1330] sm:$0xff]  ;;  %2120 = vmatpush.msra.mxu0 %v794_v60  ;;  %v2904_v60 = vld.sshfl [vmem:[#allocation1 + $0x18] sm:$0xff pattern:$0x73625140] }
 0x251   : > { %v922_v2 = vld [vmem:[%s3012_s29 + $0x1510] sm:$0xff]  ;;  %2139 = vmatpush.msra.mxu1 %v862_v1 }
 0x252   : > { %v990_v3 = vld [vmem:[%s3012_s29 + $0x1730] sm:$0xff]  ;;  %2160 = vmatpush.msra.mxu2 %v922_v2 }
 0x253   : > { %v790_v4 = vld [vmem:[%s3012_s29 + $0x10f0] sm:$0xff]  ;;  %2179 = vmatpush.msra.mxu3 %v990_v3 }
 0x254   : > { %v858_v5 = vld [vmem:[%s3012_s29 + $0x1310] sm:$0xff]  ;;  %2121 = vmatpush.msra.mxu0 %v790_v4 }
 0x255   : > { %v918_v6 = vld [vmem:[%s3012_s29 + $0x14f0] sm:$0xff]  ;;  %2140 = vmatpush.msra.mxu1 %v858_v5 }
 0x256   : > { %v986_v7 = vld [vmem:[%s3012_s29 + $0x1710] sm:$0xff]  ;;  %2161 = vmatpush.msra.mxu2 %v918_v6 }
 0x257   : > { %v786_v8 = vld [vmem:[%s3012_s29 + $0x10d0] sm:$0xff]  ;;  %2180 = vmatpush.msra.mxu3 %v986_v7 }
 0x258   : > { %v854_v9 = vld [vmem:[%s3012_s29 + $0x12f0] sm:$0xff]  ;;  %2122 = vmatpush.msra.mxu0 %v786_v8 }
 0x259   : > { %v914_v10 = vld [vmem:[%s3012_s29 + $0x14d0] sm:$0xff]  ;;  %2141 = vmatpush.msra.mxu1 %v854_v9 }
 0x25a   : > { %v982_v11 = vld [vmem:[%s3012_s29 + $0x16f0] sm:$0xff]  ;;  %2162 = vmatpush.msra.mxu2 %v914_v10 }
 0x25b   : > { %v782_v12 = vld [vmem:[%s3012_s29 + $0x10b0] sm:$0xff]  ;;  %2181 = vmatpush.msra.mxu3 %v982_v11 }
 0x25c   : > { %v850_v13 = vld [vmem:[%s3012_s29 + $0x12d0] sm:$0xff]  ;;  %2123 = vmatpush.msra.mxu0 %v782_v12 }
 0x25d   : > { %v910_v14 = vld [vmem:[%s3012_s29 + $0x14b0] sm:$0xff]  ;;  %2142 = vmatpush.msra.mxu1 %v850_v13 }
 0x25e   : > { %v978_v15 = vld [vmem:[%s3012_s29 + $0x16d0] sm:$0xff]  ;;  %2163 = vmatpush.msra.mxu2 %v910_v14 }
 0x25f   : > { %v778_v16 = vld [vmem:[%s3012_s29 + $0x1090] sm:$0xff]  ;;  %2182 = vmatpush.msra.mxu3 %v978_v15 }
 0x260   : > { %v846_v17 = vld [vmem:[%s3012_s29 + $0x12b0] sm:$0xff]  ;;  %2124 = vmatpush.msra.mxu0 %v778_v16 }
 0x261   : > { %v906_v18 = vld [vmem:[%s3012_s29 + $0x1490] sm:$0xff]  ;;  %2143 = vmatpush.msra.mxu1 %v846_v17 }
 0x262   : > { %v974_v19 = vld [vmem:[%s3012_s29 + $0x16b0] sm:$0xff]  ;;  %2164 = vmatpush.msra.mxu2 %v906_v18 }
 0x263   : > { %v774_v20 = vld [vmem:[%s3012_s29 + $0x1070] sm:$0xff]  ;;  %2183 = vmatpush.msra.mxu3 %v974_v19 }
 0x264   : > { %v842_v21 = vld [vmem:[%s3012_s29 + $0x1290] sm:$0xff]  ;;  %2125 = vmatpush.msra.mxu0 %v774_v20 }
 0x265   : > { %v902_v23 = vld [vmem:[%s3012_s29 + $0x1470] sm:$0xff]  ;;  %2144 = vmatpush.msra.mxu1 %v842_v21 }
 0x266   : > { %v970_v24 = vld [vmem:[%s3012_s29 + $0x1690] sm:$0xff]  ;;  %2165 = vmatpush.msra.mxu2 %v902_v23 }
 0x267   : > { %v770_v26 = vld [vmem:[%s3012_s29 + $0x1050] sm:$0xff]  ;;  %2184 = vmatpush.msra.mxu3 %v970_v24 }
 0x268   : > { %v838_v27 = vld [vmem:[%s3012_s29 + $0x1270] sm:$0xff]  ;;  %2126 = vmatpush.msra.mxu0 %v770_v26 }
 0x269   : > { %v898_v28 = vld [vmem:[%s3012_s29 + $0x1450] sm:$0xff]  ;;  %2145 = vmatpush.msra.mxu1 %v838_v27 }
 0x26a   : > { %v966_v30 = vld [vmem:[%s3012_s29 + $0x1670] sm:$0xff]  ;;  %2166 = vmatpush.msra.mxu2 %v898_v28 }
 0x26b   : > { %v766_v32 = vld [vmem:[%s3012_s29 + $0x1030] sm:$0xff]  ;;  %2185 = vmatpush.msra.mxu3 %v966_v30 }
 0x26c   : > { %v834_v33 = vld [vmem:[%s3012_s29 + $0x1250] sm:$0xff]  ;;  %2127 = vmatpush.msra.mxu0 %v766_v32 }
 0x26d   : > { %v894_v35 = vld [vmem:[%s3012_s29 + $0x1430] sm:$0xff]  ;;  %2146 = vmatpush.msra.mxu1 %v834_v33 }
 0x26e   : > { %v962_v29 = vld [vmem:[%s3012_s29 + $0x1650] sm:$0xff]  ;;  %2167 = vmatpush.msra.mxu2 %v894_v35 }
 0x26f   : > { %v762_v36 = vld [vmem:[%s3012_s29 + $0x1010] sm:$0xff]  ;;  %2186 = vmatpush.msra.mxu3 %v962_v29 }
 0x270   : > { %v830_v37 = vld [vmem:[%s3012_s29 + $0x1230] sm:$0xff]  ;;  %2128 = vmatpush.msra.mxu0 %v762_v36 }
 0x271   : > { %v890_v39 = vld [vmem:[%s3012_s29 + $0x1410] sm:$0xff]  ;;  %2147 = vmatpush.msra.mxu1 %v830_v37  ;;  %2129 = vmatmul.f32.vlgmr.msra.gmra.mxu0 %v2901_v52 }
 0x272   : > { %v958_v40 = vld [vmem:[%s3012_s29 + $0x1630] sm:$0xff]  ;;  %2168 = vmatpush.msra.mxu2 %v890_v39 }
 0x273   : > { %v1078_v42 = vld [vmem:[%s3012_s29 + $0x19f0] sm:$0xff]  ;;  %2187 = vmatpush.msra.mxu3 %v958_v40 }
 0x274   : > { %v1206_v43 = vld [vmem:[%s3012_s29 + $0x1df0] sm:$0xff]  ;;  %2193 = vmatpush.msrb.mxu0 %v1078_v42 }
 0x275   : > { %v826_v49 = vld [vmem:[%s3012_s29 + $0x1210] sm:$0xff]  ;;  %2233 = vmatpush.msrb.mxu2 %v1206_v43  ;;  %v1890_v43 = vpop.f32.mrf.mxu0 }
 0x276   : > { %v954_v50 = vld [vmem:[%s3012_s29 + $0x1610] sm:$0xff]  ;;  %2148 = vmatpush.msra.mxu1 %v826_v49 }
 0x277   : > { %v2902_v54 = vld.sshfl [vmem:[#allocation1 + $0x10] sm:$0xff pattern:$0x73625140]  ;;  %2188 = vmatpush.msra.mxu3 %v954_v50  ;;  %2149 = vmatmul.f32.vlgmr.msra.gmra.mxu1 %v2903_v59  ;;  %v1891_v50 = vadd.f32 %v1890_v43, %v3776_v51  ;;  %v283_v43 = vld [vmem:[%s3012_s29 + $0x118] sm:$0xff] }
 0x278   : > { %2169 = vmatmul.f32.vlgmr.msra.gmra.mxu2 %v2902_v54  ;;  %v1074_v55 = vld [vmem:[%s3012_s29 + $0x19d0] sm:$0xff]  ;;  %2189 = vmatmul.f32.vlgmr.msra.gmra.mxu3 %v2904_v60 }
 0x279   : > { %v1142_v56 = vld [vmem:[%s3012_s29 + $0x1bf0] sm:$0xff]  ;;  %2194 = vmatpush.msrb.mxu0 %v1074_v55 }
 0x27a   : > { %v1202_v57 = vld [vmem:[%s3012_s29 + $0x1dd0] sm:$0xff]  ;;  %2213 = vmatpush.msrb.mxu1 %v1142_v56 }
 0x27b   : > { %v1270_v58 = vld [vmem:[%s3012_s29 + $0x1ff0] sm:$0xff]  ;;  %2234 = vmatpush.msrb.mxu2 %v1202_v57  ;;  %v1910_v57 = vpop.f32.mrf.mxu1 }
 0x27c   : > { %v1070_v1 = vld [vmem:[%s3012_s29 + $0x19b0] sm:$0xff]  ;;  %2253 = vmatpush.msrb.mxu3 %v1270_v58  ;;  %v1911_v51 = vadd.f32 %v1910_v57, %v1891_v50  ;;  %v479_v50 = vld [vmem:[%s3012_s29 + $0x738] sm:$0xff] }
 0x27d   : > { %v1138_v2 = vld [vmem:[%s3012_s29 + $0x1bd0] sm:$0xff]  ;;  %2195 = vmatpush.msrb.mxu0 %v1070_v1  ;;  %v275_v57 = vld [vmem:[%s3012_s29 + $0xd8] sm:$0xff] }
 0x27e   : > { %v1198_v3 = vld [vmem:[%s3012_s29 + $0x1db0] sm:$0xff]  ;;  %2214 = vmatpush.msrb.mxu1 %v1138_v2 }
 0x27f   : > { %v1266_v4 = vld [vmem:[%s3012_s29 + $0x1fd0] sm:$0xff]  ;;  %2235 = vmatpush.msrb.mxu2 %v1198_v3 }
 0x280   : > { %v1066_v5 = vld [vmem:[%s3012_s29 + $0x1990] sm:$0xff]  ;;  %2254 = vmatpush.msrb.mxu3 %v1266_v4  ;;  %v1930_v4 = vpop.f32.mrf.mxu2 }
 0x281   : > { %v1134_v6 = vld [vmem:[%s3012_s29 + $0x1bb0] sm:$0xff]  ;;  %2196 = vmatpush.msrb.mxu0 %v1066_v5 }
 0x282   : > { %v1194_v7 = vld [vmem:[%s3012_s29 + $0x1d90] sm:$0xff]  ;;  %2215 = vmatpush.msrb.mxu1 %v1134_v6 }
 0x283   : > { %v1262_v8 = vld [vmem:[%s3012_s29 + $0x1fb0] sm:$0xff]  ;;  %2236 = vmatpush.msrb.mxu2 %v1194_v7  ;;  %v1931_v7 = vadd.f32 %v1930_v4, %v1911_v51  ;;  %v471_v51 = vld [vmem:[%s3012_s29 + $0x6f8] sm:$0xff] }
 0x284   : > { %v1062_v9 = vld [vmem:[%s3012_s29 + $0x1970] sm:$0xff]  ;;  %2255 = vmatpush.msrb.mxu3 %v1262_v8  ;;  %v311_v8 = vld [vmem:[%s3012_s29 + $0x1f8] sm:$0xff] }
 0x285   : > { %v1130_v10 = vld [vmem:[%s3012_s29 + $0x1b90] sm:$0xff]  ;;  %2197 = vmatpush.msrb.mxu0 %v1062_v9  ;;  %v439_v9 = vld [vmem:[%s3012_s29 + $0x5f8] sm:$0xff] }
 0x286   : > { %v1190_v11 = vld [vmem:[%s3012_s29 + $0x1d70] sm:$0xff]  ;;  %2216 = vmatpush.msrb.mxu1 %v1130_v10  ;;  %v1950_v10 = vpop.f32.mrf.mxu3  ;;  %v267_v4 = vld [vmem:[%s3012_s29 + $0x98] sm:$0xff] }
 0x287   : > { %v1258_v12 = vld [vmem:[%s3012_s29 + $0x1f90] sm:$0xff]  ;;  %2237 = vmatpush.msrb.mxu2 %v1190_v11 }
 0x288   : > { %v1058_v13 = vld [vmem:[%s3012_s29 + $0x1950] sm:$0xff]  ;;  %2256 = vmatpush.msrb.mxu3 %v1258_v12 }
 0x289   : > { %v1126_v14 = vld [vmem:[%s3012_s29 + $0x1b70] sm:$0xff]  ;;  %2198 = vmatpush.msrb.mxu0 %v1058_v13  ;;  %v1951_v13 = vadd.f32 %v1950_v10, %v1931_v7  ;;  %v463_v7 = vld [vmem:[%s3012_s29 + $0x6b8] sm:$0xff] }
 0x28a   : > { %v1186_v15 = vld [vmem:[%s3012_s29 + $0x1d50] sm:$0xff]  ;;  %2217 = vmatpush.msrb.mxu1 %v1126_v14  ;;  %v2905_v14 = vld.sshfl [vmem:[#allocation1 + $0x20] sm:$0xff pattern:$0x73625140]  ;;  %v391_v10 = vld [vmem:[%s3012_s29 + $0x478] sm:$0xff] }
 0x28b   : > { %v1254_v16 = vld [vmem:[%s3012_s29 + $0x1f70] sm:$0xff]  ;;  %2238 = vmatpush.msrb.mxu2 %v1186_v15 }
 0x28c   : > { %v1054_v17 = vld [vmem:[%s3012_s29 + $0x1930] sm:$0xff]  ;;  %2257 = vmatpush.msrb.mxu3 %v1254_v16  ;;  %v307_v16 = vld [vmem:[%s3012_s29 + $0x1d8] sm:$0xff] }
 0x28d   : > { %v1122_v18 = vld [vmem:[%s3012_s29 + $0x1b50] sm:$0xff]  ;;  %2199 = vmatpush.msrb.mxu0 %v1054_v17  ;;  %v375_v17 = vld [vmem:[%s3012_s29 + $0x3f8] sm:$0xff] }
 0x28e   : > { %v1182_v19 = vld [vmem:[%s3012_s29 + $0x1d30] sm:$0xff]  ;;  %2218 = vmatpush.msrb.mxu1 %v1122_v18  ;;  %v2597_v18 = vrot.slane %v1951_v13, 6  ;;  %v327_v13 = vld [vmem:[%s3012_s29 + $0x278] sm:$0xff] }
 0x28f   : > { %v1250_v20 = vld [vmem:[%s3012_s29 + $0x1f50] sm:$0xff]  ;;  %2239 = vmatpush.msrb.mxu2 %v1182_v19  ;;  %v435_v19 = vld [vmem:[%s3012_s29 + $0x5d8] sm:$0xff] }
 0x290   : > { %v1050_v21 = vld [vmem:[%s3012_s29 + $0x1910] sm:$0xff]  ;;  %2258 = vmatpush.msrb.mxu3 %v1250_v20  ;;  %v503_v20 = vld [vmem:[%s3012_s29 + $0x7f8] sm:$0xff] }
 0x291   : > { %v1118_v22 = vld [vmem:[%s3012_s29 + $0x1b30] sm:$0xff]  ;;  %2200 = vmatpush.msrb.mxu0 %v1050_v21  ;;  %v2907_v21 = vld.sshfl [vmem:[#allocation1 + $0x28] sm:$0xff pattern:$0x73625140] }
 0x292   : > { %v1178_v23 = vld [vmem:[%s3012_s29 + $0x1d10] sm:$0xff]  ;;  %2219 = vmatpush.msrb.mxu1 %v1118_v22  ;;  %v2908_v22 = vld.sshfl [vmem:[#allocation1 + $0x38] sm:$0xff pattern:$0x73625140] }
 0x293   : > { %v1246_v24 = vld [vmem:[%s3012_s29 + $0x1f30] sm:$0xff]  ;;  %2240 = vmatpush.msrb.mxu2 %v1178_v23  ;;  %v303_v23 = vld [vmem:[%s3012_s29 + $0x1b8] sm:$0xff] }
 0x294   : > { %v1046_v25 = vld [vmem:[%s3012_s29 + $0x18f0] sm:$0xff]  ;;  %2259 = vmatpush.msrb.mxu3 %v1246_v24  ;;  %v371_v24 = vld [vmem:[%s3012_s29 + $0x3d8] sm:$0xff] }
 0x295   : > { %v1114_v26 = vld [vmem:[%s3012_s29 + $0x1b10] sm:$0xff]  ;;  %2201 = vmatpush.msrb.mxu0 %v1046_v25  ;;  %v3851_v25 = vsel %vm2600_vm0, %v3571_v53, %v2597_v18  ;;  %v295_v53 = vld [vmem:[%s3012_s29 + $0x178] sm:$0xff] }
 0x296   : > { %v1174_v27 = vld [vmem:[%s3012_s29 + $0x1cf0] sm:$0xff]  ;;  %2220 = vmatpush.msrb.mxu1 %v1114_v26  ;;  %v431_v26 = vld [vmem:[%s3012_s29 + $0x5b8] sm:$0xff] }
 0x297   : > { %v1242_v28 = vld [vmem:[%s3012_s29 + $0x1f10] sm:$0xff]  ;;  %2241 = vmatpush.msrb.mxu2 %v1174_v27  ;;  %v499_v27 = vld [vmem:[%s3012_s29 + $0x7d8] sm:$0xff] }
 0x298   : > { %v1042_v30 = vld [vmem:[%s3012_s29 + $0x18d0] sm:$0xff]  ;;  %2260 = vmatpush.msrb.mxu3 %v1242_v28  ;;  %v299_v28 = vld [vmem:[%s3012_s29 + $0x198] sm:$0xff] }
 0x299   : > { %v1110_v31 = vld [vmem:[%s3012_s29 + $0x1af0] sm:$0xff]  ;;  %2202 = vmatpush.msrb.mxu0 %v1042_v30  ;;  %v367_v30 = vld [vmem:[%s3012_s29 + $0x3b8] sm:$0xff] }
 0x29a   : > { %v1170_v32 = vld [vmem:[%s3012_s29 + $0x1cd0] sm:$0xff]  ;;  %2221 = vmatpush.msrb.mxu1 %v1110_v31  ;;  %v427_v31 = vld [vmem:[%s3012_s29 + $0x598] sm:$0xff] }
 0x29b   : > { %v1238_v33 = vld [vmem:[%s3012_s29 + $0x1ef0] sm:$0xff]  ;;  %2242 = vmatpush.msrb.mxu2 %v1170_v32  ;;  %v495_v32 = vld [vmem:[%s3012_s29 + $0x7b8] sm:$0xff] }
 0x29c   : > { %v1038_v34 = vld [vmem:[%s3012_s29 + $0x18b0] sm:$0xff]  ;;  %2261 = vmatpush.msrb.mxu3 %v1238_v33  ;;  %v363_v33 = vld [vmem:[%s3012_s29 + $0x398] sm:$0xff] }
 0x29d   : > { %v1106_v35 = vld [vmem:[%s3012_s29 + $0x1ad0] sm:$0xff]  ;;  %2203 = vmatpush.msrb.mxu0 %v1038_v34  ;;  %v423_v34 = vld [vmem:[%s3012_s29 + $0x578] sm:$0xff] }
 0x29e   : > { %v1166_v29 = vld [vmem:[%s3012_s29 + $0x1cb0] sm:$0xff]  ;;  %2222 = vmatpush.msrb.mxu1 %v1106_v35  ;;  %v491_v35 = vld [vmem:[%s3012_s29 + $0x798] sm:$0xff] }
 0x29f   : > { %v1234_v36 = vld [vmem:[%s3012_s29 + $0x1ed0] sm:$0xff]  ;;  %2243 = vmatpush.msrb.mxu2 %v1166_v29  ;;  %v291_v29 = vld [vmem:[%s3012_s29 + $0x158] sm:$0xff] }
 0x2a0   : > { %v1034_v37 = vld [vmem:[%s3012_s29 + $0x1890] sm:$0xff]  ;;  %2262 = vmatpush.msrb.mxu3 %v1234_v36  ;;  %v359_v36 = vld [vmem:[%s3012_s29 + $0x378] sm:$0xff] }
 0x2a1   : > { %v1102_v38 = vld [vmem:[%s3012_s29 + $0x1ab0] sm:$0xff]  ;;  %2204 = vmatpush.msrb.mxu0 %v1034_v37  ;;  %v419_v37 = vld [vmem:[%s3012_s29 + $0x558] sm:$0xff] }
 0x2a2   : > { %v1162_v39 = vld [vmem:[%s3012_s29 + $0x1c90] sm:$0xff]  ;;  %2223 = vmatpush.msrb.mxu1 %v1102_v38  ;;  %v487_v38 = vld [vmem:[%s3012_s29 + $0x778] sm:$0xff] }
 0x2a3   : > { %v1230_v40 = vld [vmem:[%s3012_s29 + $0x1eb0] sm:$0xff]  ;;  %2244 = vmatpush.msrb.mxu2 %v1162_v39  ;;  %v287_v39 = vld [vmem:[%s3012_s29 + $0x138] sm:$0xff] }
 0x2a4   : > { %v1030_v41 = vld [vmem:[%s3012_s29 + $0x1870] sm:$0xff]  ;;  %2263 = vmatpush.msrb.mxu3 %v1230_v40  ;;  %v355_v40 = vld [vmem:[%s3012_s29 + $0x358] sm:$0xff] }
 0x2a5   : > { %v1098_v42 = vld [vmem:[%s3012_s29 + $0x1a90] sm:$0xff]  ;;  %2205 = vmatpush.msrb.mxu0 %v1030_v41  ;;  %v415_v41 = vld [vmem:[%s3012_s29 + $0x538] sm:$0xff] }
 0x2a6   : > { %v1158_v44 = vld [vmem:[%s3012_s29 + $0x1c70] sm:$0xff]  ;;  %2224 = vmatpush.msrb.mxu1 %v1098_v42  ;;  %v483_v42 = vld [vmem:[%s3012_s29 + $0x758] sm:$0xff] }
 0x2a7   : > { %v1226_v49 = vld [vmem:[%s3012_s29 + $0x1e90] sm:$0xff]  ;;  %2245 = vmatpush.msrb.mxu2 %v1158_v44  ;;  %v351_v44 = vld [vmem:[%s3012_s29 + $0x338] sm:$0xff] }
 0x2a8   : > { %v1026_v52 = vld [vmem:[%s3012_s29 + $0x1850] sm:$0xff]  ;;  %2264 = vmatpush.msrb.mxu3 %v1226_v49  ;;  %v411_v49 = vld [vmem:[%s3012_s29 + $0x518] sm:$0xff] }
 0x2a9   : > { %v1094_v54 = vld [vmem:[%s3012_s29 + $0x1a70] sm:$0xff]  ;;  %2206 = vmatpush.msrb.mxu0 %v1026_v52  ;;  %v279_v52 = vld [vmem:[%s3012_s29 + $0xf8] sm:$0xff] }
 0x2aa   : > { %v1154_v55 = vld [vmem:[%s3012_s29 + $0x1c50] sm:$0xff]  ;;  %2225 = vmatpush.msrb.mxu1 %v1094_v54  ;;  %v347_v54 = vld [vmem:[%s3012_s29 + $0x318] sm:$0xff] }
 0x2ab   : > { %v1222_v56 = vld [vmem:[%s3012_s29 + $0x1e70] sm:$0xff]  ;;  %2246 = vmatpush.msrb.mxu2 %v1154_v55  ;;  %v407_v55 = vld [vmem:[%s3012_s29 + $0x4f8] sm:$0xff] }
 0x2ac   : > { %v1022_v58 = vld [vmem:[%s3012_s29 + $0x1830] sm:$0xff]  ;;  %2265 = vmatpush.msrb.mxu3 %v1222_v56  ;;  %v475_v56 = vld [vmem:[%s3012_s29 + $0x718] sm:$0xff] }
 0x2ad   : > { %v1090_v59 = vld [vmem:[%s3012_s29 + $0x1a50] sm:$0xff]  ;;  %2207 = vmatpush.msrb.mxu0 %v1022_v58  ;;  %v343_v58 = vld [vmem:[%s3012_s29 + $0x2f8] sm:$0xff] }
 0x2ae   : > { %v1150_v60 = vld [vmem:[%s3012_s29 + $0x1c30] sm:$0xff]  ;;  %2226 = vmatpush.msrb.mxu1 %v1090_v59  ;;  %v403_v59 = vld [vmem:[%s3012_s29 + $0x4d8] sm:$0xff] }
 0x2af   : > { %v1218_v1 = vld [vmem:[%s3012_s29 + $0x1e50] sm:$0xff]  ;;  %2247 = vmatpush.msrb.mxu2 %v1150_v60  ;;  %v271_v60 = vld [vmem:[%s3012_s29 + $0xb8] sm:$0xff] }
 0x2b0   : > { %v1018_v2 = vld [vmem:[%s3012_s29 + $0x1810] sm:$0xff]  ;;  %2266 = vmatpush.msrb.mxu3 %v1218_v1  ;;  %v339_v1 = vld [vmem:[%s3012_s29 + $0x2d8] sm:$0xff] }
 0x2b1   : > { %v1086_v3 = vld [vmem:[%s3012_s29 + $0x1a30] sm:$0xff]  ;;  %2208 = vmatpush.msrb.mxu0 %v1018_v2  ;;  %v399_v2 = vld [vmem:[%s3012_s29 + $0x4b8] sm:$0xff] }
 0x2b2   : > { %v1146_v5 = vld [vmem:[%s3012_s29 + $0x1c10] sm:$0xff]  ;;  %2227 = vmatpush.msrb.mxu1 %v1086_v3  ;;  %2209 = vmatmul.f32.vlgmr.msrb.gmra.mxu0 %v2905_v14  ;;  %v467_v3 = vld [vmem:[%s3012_s29 + $0x6d8] sm:$0xff] }
 0x2b3   : > { %v1214_v6 = vld [vmem:[%s3012_s29 + $0x1e30] sm:$0xff]  ;;  %2248 = vmatpush.msrb.mxu2 %v1146_v5  ;;  %2273 = vmatpush.msra.mxu0 %v311_v8  ;;  %v335_v5 = vld [vmem:[%s3012_s29 + $0x2b8] sm:$0xff] }
 0x2b4   : > { %2267 = vmatpush.msrb.mxu3 %v1214_v6  ;;  %v1082_v11 = vld [vmem:[%s3012_s29 + $0x1a10] sm:$0xff]  ;;  %v395_v6 = vld [vmem:[%s3012_s29 + $0x498] sm:$0xff] }
 0x2b5   : > { %v1210_v12 = vld [vmem:[%s3012_s29 + $0x1e10] sm:$0xff]  ;;  %2313 = vmatpush.msra.mxu2 %v439_v9  ;;  %2228 = vmatpush.msrb.mxu1 %v1082_v11  ;;  %v263_v8 = vld [vmem:[%s3012_s29 + $0x78] sm:$0xff] }
 0x2b6   : > { %v2906_v15 = vld.sshfl [vmem:[#allocation1 + $0x30] sm:$0xff pattern:$0x73625140]  ;;  %2268 = vmatpush.msrb.mxu3 %v1210_v12  ;;  %2229 = vmatmul.f32.vlgmr.msrb.gmra.mxu1 %v2907_v21  ;;  %v331_v9 = vld [vmem:[%s3012_s29 + $0x298] sm:$0xff] }
 0x2b7   : > { %2249 = vmatmul.f32.vlgmr.msrb.gmra.mxu2 %v2906_v15  ;;  %2269 = vmatmul.f32.vlgmr.msrb.gmra.mxu3 %v2908_v22  ;;  %v459_v11 = vld [vmem:[%s3012_s29 + $0x698] sm:$0xff] }
 0x2b8   : > { %2274 = vmatpush.msra.mxu0 %v307_v16  ;;  %2293 = vmatpush.msra.mxu1 %v375_v17  ;;  %v259_v12 = vld [vmem:[%s3012_s29 + $0x58] sm:$0xff] }
 0x2b9   : > { %2314 = vmatpush.msra.mxu2 %v435_v19  ;;  %2333 = vmatpush.msra.mxu3 %v503_v20  ;;  %v387_v14 = vld [vmem:[%s3012_s29 + $0x458] sm:$0xff] }
 0x2ba   : > { %2275 = vmatpush.msra.mxu0 %v303_v23  ;;  %2294 = vmatpush.msra.mxu1 %v371_v24  ;;  %v455_v15 = vld [vmem:[%s3012_s29 + $0x678] sm:$0xff] }
 0x2bb   : > { %2315 = vmatpush.msra.mxu2 %v431_v26  ;;  %2334 = vmatpush.msra.mxu3 %v499_v27  ;;  %v255_v16 = vld [vmem:[%s3012_s29 + $0x38] sm:$0xff] }
 0x2bc   : > { %2276 = vmatpush.msra.mxu0 %v299_v28  ;;  %2295 = vmatpush.msra.mxu1 %v367_v30  ;;  %v323_v17 = vld [vmem:[%s3012_s29 + $0x258] sm:$0xff] }
 0x2bd   : > { %2316 = vmatpush.msra.mxu2 %v427_v31  ;;  %2335 = vmatpush.msra.mxu3 %v495_v32  ;;  %v383_v18 = vld [vmem:[%s3012_s29 + $0x438] sm:$0xff] }
 0x2be   : > { %2277 = vmatpush.msra.mxu0 %v295_v53  ;;  %2296 = vmatpush.msra.mxu1 %v363_v33  ;;  %v451_v19 = vld [vmem:[%s3012_s29 + $0x658] sm:$0xff] }
 0x2bf   : > { %2317 = vmatpush.msra.mxu2 %v423_v34  ;;  %2336 = vmatpush.msra.mxu3 %v491_v35  ;;  %v251_v20 = vld [vmem:[%s3012_s29 + $0x18] sm:$0xff] }
 0x2c0   : > { %2278 = vmatpush.msra.mxu0 %v291_v29  ;;  %2297 = vmatpush.msra.mxu1 %v359_v36  ;;  %v319_v21 = vld [vmem:[%s3012_s29 + $0x238] sm:$0xff] }
 0x2c1   : > { %2318 = vmatpush.msra.mxu2 %v419_v37  ;;  %2337 = vmatpush.msra.mxu3 %v487_v38  ;;  %v379_v22 = vld [vmem:[%s3012_s29 + $0x418] sm:$0xff] }
 0x2c2   : > { %2279 = vmatpush.msra.mxu0 %v287_v39  ;;  %2298 = vmatpush.msra.mxu1 %v355_v40  ;;  %v447_v23 = vld [vmem:[%s3012_s29 + $0x638] sm:$0xff] }
 0x2c3   : > { %2319 = vmatpush.msra.mxu2 %v415_v41  ;;  %2338 = vmatpush.msra.mxu3 %v483_v42  ;;  %v567_v24 = vld [vmem:[%s3012_s29 + $0x9f8] sm:$0xff] }
 0x2c4   : > { %2280 = vmatpush.msra.mxu0 %v283_v43  ;;  %2299 = vmatpush.msra.mxu1 %v351_v44  ;;  %v695_v26 = vld [vmem:[%s3012_s29 + $0xdf8] sm:$0xff] }
 0x2c5   : > { %2320 = vmatpush.msra.mxu2 %v411_v49  ;;  %2339 = vmatpush.msra.mxu3 %v479_v50  ;;  %v315_v27 = vld [vmem:[%s3012_s29 + $0x218] sm:$0xff] }
 0x2c6   : > { %2281 = vmatpush.msra.mxu0 %v279_v52  ;;  %2300 = vmatpush.msra.mxu1 %v347_v54  ;;  %v443_v28 = vld [vmem:[%s3012_s29 + $0x618] sm:$0xff] }
 0x2c7   : > { %2321 = vmatpush.msra.mxu2 %v407_v55  ;;  %2340 = vmatpush.msra.mxu3 %v475_v56  ;;  %v563_v30 = vld [vmem:[%s3012_s29 + $0x9d8] sm:$0xff] }
 0x2c8   : > { %2282 = vmatpush.msra.mxu0 %v275_v57  ;;  %2301 = vmatpush.msra.mxu1 %v343_v58  ;;  %v631_v31 = vld [vmem:[%s3012_s29 + $0xbf8] sm:$0xff] }
 0x2c9   : > { %2322 = vmatpush.msra.mxu2 %v403_v59  ;;  %2341 = vmatpush.msra.mxu3 %v471_v51  ;;  %v691_v32 = vld [vmem:[%s3012_s29 + $0xdd8] sm:$0xff] }
 0x2ca   : > { %2283 = vmatpush.msra.mxu0 %v271_v60  ;;  %2302 = vmatpush.msra.mxu1 %v339_v1  ;;  %v759_v53 = vld [vmem:[%s3012_s29 + $0xff8] sm:$0xff] }
 0x2cb   : > { %2323 = vmatpush.msra.mxu2 %v399_v2  ;;  %2342 = vmatpush.msra.mxu3 %v467_v3  ;;  %v559_v33 = vld [vmem:[%s3012_s29 + $0x9b8] sm:$0xff] }
 0x2cc   : > { %2284 = vmatpush.msra.mxu0 %v267_v4  ;;  %2303 = vmatpush.msra.mxu1 %v335_v5  ;;  %v627_v34 = vld [vmem:[%s3012_s29 + $0xbd8] sm:$0xff] }
 0x2cd   : > { %2324 = vmatpush.msra.mxu2 %v395_v6  ;;  %2343 = vmatpush.msra.mxu3 %v463_v7  ;;  %v687_v35 = vld [vmem:[%s3012_s29 + $0xdb8] sm:$0xff] }
 0x2ce   : > { %2285 = vmatpush.msra.mxu0 %v263_v8  ;;  %2304 = vmatpush.msra.mxu1 %v331_v9  ;;  %v755_v29 = vld [vmem:[%s3012_s29 + $0xfd8] sm:$0xff] }
 0x2cf   : > { %2325 = vmatpush.msra.mxu2 %v391_v10  ;;  %2344 = vmatpush.msra.mxu3 %v459_v11  ;;  %v555_v36 = vld [vmem:[%s3012_s29 + $0x998] sm:$0xff] }
 0x2d0   : > { %2286 = vmatpush.msra.mxu0 %v259_v12  ;;  %2305 = vmatpush.msra.mxu1 %v327_v13  ;;  %v623_v37 = vld [vmem:[%s3012_s29 + $0xbb8] sm:$0xff] }
 0x2d1   : > { %2326 = vmatpush.msra.mxu2 %v387_v14  ;;  %2345 = vmatpush.msra.mxu3 %v455_v15  ;;  %v683_v38 = vld [vmem:[%s3012_s29 + $0xd98] sm:$0xff] }
 0x2d2   : > { %2287 = vmatpush.msra.mxu0 %v255_v16  ;;  %2306 = vmatpush.msra.mxu1 %v323_v17  ;;  %v751_v39 = vld [vmem:[%s3012_s29 + $0xfb8] sm:$0xff] }
 0x2d3   : > { %2327 = vmatpush.msra.mxu2 %v383_v18  ;;  %2346 = vmatpush.msra.mxu3 %v451_v19  ;;  %v551_v40 = vld [vmem:[%s3012_s29 + $0x978] sm:$0xff] }
 0x2d4   : > { %2288 = vmatpush.msra.mxu0 %v251_v20  ;;  %2307 = vmatpush.msra.mxu1 %v319_v21  ;;  %v619_v41 = vld [vmem:[%s3012_s29 + $0xb98] sm:$0xff] }
 0x2d5   : > { %2328 = vmatpush.msra.mxu2 %v379_v22  ;;  %2347 = vmatpush.msra.mxu3 %v447_v23  ;;  %v679_v42 = vld [vmem:[%s3012_s29 + $0xd78] sm:$0xff] }
 0x2d6   : > { %2353 = vmatpush.msrb.mxu0 %v567_v24  ;;  %2308 = vmatpush.msra.mxu1 %v315_v27  ;;  %v747_v43 = vld [vmem:[%s3012_s29 + $0xf98] sm:$0xff] }
 0x2d7   : > { %2393 = vmatpush.msrb.mxu2 %v695_v26  ;;  %2348 = vmatpush.msra.mxu3 %v443_v28  ;;  %v547_v44 = vld [vmem:[%s3012_s29 + $0x958] sm:$0xff] }
 0x2d8   : > { %2354 = vmatpush.msrb.mxu0 %v563_v30  ;;  %2373 = vmatpush.msrb.mxu1 %v631_v31  ;;  %v615_v49 = vld [vmem:[%s3012_s29 + $0xb78] sm:$0xff] }
 0x2d9   : > { %2394 = vmatpush.msrb.mxu2 %v691_v32  ;;  %2413 = vmatpush.msrb.mxu3 %v759_v53  ;;  %v675_v50 = vld [vmem:[%s3012_s29 + $0xd58] sm:$0xff] }
 0x2da   : > { %2355 = vmatpush.msrb.mxu0 %v559_v33  ;;  %2374 = vmatpush.msrb.mxu1 %v627_v34  ;;  %v743_v52 = vld [vmem:[%s3012_s29 + $0xf78] sm:$0xff] }
 0x2db   : > { %2395 = vmatpush.msrb.mxu2 %v687_v35  ;;  %2414 = vmatpush.msrb.mxu3 %v755_v29  ;;  %v543_v54 = vld [vmem:[%s3012_s29 + $0x938] sm:$0xff] }
 0x2dc   : > { %2356 = vmatpush.msrb.mxu0 %v555_v36  ;;  %2375 = vmatpush.msrb.mxu1 %v623_v37  ;;  %v611_v55 = vld [vmem:[%s3012_s29 + $0xb58] sm:$0xff] }
 0x2dd   : > { %2396 = vmatpush.msrb.mxu2 %v683_v38  ;;  %2415 = vmatpush.msrb.mxu3 %v751_v39  ;;  %v671_v56 = vld [vmem:[%s3012_s29 + $0xd38] sm:$0xff] }
 0x2de   : > { %2357 = vmatpush.msrb.mxu0 %v551_v40  ;;  %2376 = vmatpush.msrb.mxu1 %v619_v41  ;;  %v739_v57 = vld [vmem:[%s3012_s29 + $0xf58] sm:$0xff] }
 0x2df   : > { %2397 = vmatpush.msrb.mxu2 %v679_v42  ;;  %2416 = vmatpush.msrb.mxu3 %v747_v43  ;;  %v539_v58 = vld [vmem:[%s3012_s29 + $0x918] sm:$0xff] }
 0x2e0   : > { %2358 = vmatpush.msrb.mxu0 %v547_v44  ;;  %2377 = vmatpush.msrb.mxu1 %v615_v49  ;;  %v607_v59 = vld [vmem:[%s3012_s29 + $0xb38] sm:$0xff] }
 0x2e1   : > { %2398 = vmatpush.msrb.mxu2 %v675_v50  ;;  %2417 = vmatpush.msrb.mxu3 %v743_v52  ;;  %v667_v51 = vld [vmem:[%s3012_s29 + $0xd18] sm:$0xff] }
 0x2e2   : > { %2359 = vmatpush.msrb.mxu0 %v543_v54  ;;  %2378 = vmatpush.msrb.mxu1 %v611_v55  ;;  %v735_v60 = vld [vmem:[%s3012_s29 + $0xf38] sm:$0xff] }
 0x2e3   : > { %2399 = vmatpush.msrb.mxu2 %v671_v56  ;;  %2418 = vmatpush.msrb.mxu3 %v739_v57  ;;  %v535_v1 = vld [vmem:[%s3012_s29 + $0x8f8] sm:$0xff] }
 0x2e4   : > { %v603_v2 = vld [vmem:[%s3012_s29 + $0xb18] sm:$0xff]  ;;  %2360 = vmatpush.msrb.mxu0 %v539_v58  ;;  %2379 = vmatpush.msrb.mxu1 %v607_v59 }
 0x2e5   : > { %v663_v3 = vld [vmem:[%s3012_s29 + $0xcf8] sm:$0xff]  ;;  %2400 = vmatpush.msrb.mxu2 %v667_v51  ;;  %2419 = vmatpush.msrb.mxu3 %v735_v60 }
 0x2e6   : > { %v731_v4 = vld [vmem:[%s3012_s29 + $0xf18] sm:$0xff]  ;;  %2361 = vmatpush.msrb.mxu0 %v535_v1  ;;  %2380 = vmatpush.msrb.mxu1 %v603_v2 }
 0x2e7   : > { %v531_v5 = vld [vmem:[%s3012_s29 + $0x8d8] sm:$0xff]  ;;  %2401 = vmatpush.msrb.mxu2 %v663_v3  ;;  %2420 = vmatpush.msrb.mxu3 %v731_v4 }
 0x2e8   : > { %v599_v6 = vld [vmem:[%s3012_s29 + $0xaf8] sm:$0xff]  ;;  %2362 = vmatpush.msrb.mxu0 %v531_v5  ;;  %2329 = vmatmul.f32.vlgmr.msra.gmra.mxu2 %v3123_v45 }
 0x2e9   : > { %v659_v7 = vld [vmem:[%s3012_s29 + $0xcd8] sm:$0xff]  ;;  %2381 = vmatpush.msrb.mxu1 %v599_v6  ;;  %2289 = vmatmul.f32.vlgmr.msra.gmra.mxu0 %v3125_v46 }
 0x2ea   : > { %v727_v8 = vld [vmem:[%s3012_s29 + $0xef8] sm:$0xff]  ;;  %2402 = vmatpush.msrb.mxu2 %v659_v7  ;;  %2349 = vmatmul.f32.vlgmr.msra.gmra.mxu3 %v3127_v47 }
 0x2eb   : > { %v527_v9 = vld [vmem:[%s3012_s29 + $0x8b8] sm:$0xff]  ;;  %2421 = vmatpush.msrb.mxu3 %v727_v8  ;;  %2309 = vmatmul.f32.vlgmr.msra.gmra.mxu1 %v3129_v48 }
 0x2ec   : > { %v595_v10 = vld [vmem:[%s3012_s29 + $0xad8] sm:$0xff]  ;;  %2363 = vmatpush.msrb.mxu0 %v527_v9 }
 0x2ed   : > { %v655_v11 = vld [vmem:[%s3012_s29 + $0xcb8] sm:$0xff]  ;;  %2382 = vmatpush.msrb.mxu1 %v595_v10 }
 0x2ee   : > { %v723_v12 = vld [vmem:[%s3012_s29 + $0xed8] sm:$0xff]  ;;  %2403 = vmatpush.msrb.mxu2 %v655_v11 }
 0x2ef   : > { %v523_v13 = vld [vmem:[%s3012_s29 + $0x898] sm:$0xff]  ;;  %2422 = vmatpush.msrb.mxu3 %v723_v12 }
 0x2f0   : > { %v591_v14 = vld [vmem:[%s3012_s29 + $0xab8] sm:$0xff]  ;;  %2364 = vmatpush.msrb.mxu0 %v523_v13 }
 0x2f1   : > { %v651_v15 = vld [vmem:[%s3012_s29 + $0xc98] sm:$0xff]  ;;  %2383 = vmatpush.msrb.mxu1 %v591_v14 }
 0x2f2   : > { %v719_v16 = vld [vmem:[%s3012_s29 + $0xeb8] sm:$0xff]  ;;  %2404 = vmatpush.msrb.mxu2 %v651_v15 }
 0x2f3   : > { %v519_v17 = vld [vmem:[%s3012_s29 + $0x878] sm:$0xff]  ;;  %2423 = vmatpush.msrb.mxu3 %v719_v16 }
 0x2f4   : > { %v587_v18 = vld [vmem:[%s3012_s29 + $0xa98] sm:$0xff]  ;;  %2365 = vmatpush.msrb.mxu0 %v519_v17 }
 0x2f5   : > { %v647_v19 = vld [vmem:[%s3012_s29 + $0xc78] sm:$0xff]  ;;  %2384 = vmatpush.msrb.mxu1 %v587_v18 }
 0x2f6   : > { %v715_v20 = vld [vmem:[%s3012_s29 + $0xe98] sm:$0xff]  ;;  %2405 = vmatpush.msrb.mxu2 %v647_v19 }
 0x2f7   : > { %v515_v21 = vld [vmem:[%s3012_s29 + $0x858] sm:$0xff]  ;;  %2424 = vmatpush.msrb.mxu3 %v715_v20 }
 0x2f8   : > { %v583_v22 = vld [vmem:[%s3012_s29 + $0xa78] sm:$0xff]  ;;  %2366 = vmatpush.msrb.mxu0 %v515_v21 }
 0x2f9   : > { %v643_v23 = vld [vmem:[%s3012_s29 + $0xc58] sm:$0xff]  ;;  %2385 = vmatpush.msrb.mxu1 %v583_v22 }
 0x2fa   : > { %v711_v24 = vld [vmem:[%s3012_s29 + $0xe78] sm:$0xff]  ;;  %2406 = vmatpush.msrb.mxu2 %v643_v23 }
 0x2fb   : > { %v511_v26 = vld [vmem:[%s3012_s29 + $0x838] sm:$0xff]  ;;  %2425 = vmatpush.msrb.mxu3 %v711_v24 }
 0x2fc   : > { %v579_v27 = vld [vmem:[%s3012_s29 + $0xa58] sm:$0xff]  ;;  %2367 = vmatpush.msrb.mxu0 %v511_v26 }
 0x2fd   : > { %v639_v28 = vld [vmem:[%s3012_s29 + $0xc38] sm:$0xff]  ;;  %2386 = vmatpush.msrb.mxu1 %v579_v27 }
 0x2fe   : > { %v707_v30 = vld [vmem:[%s3012_s29 + $0xe58] sm:$0xff]  ;;  %2407 = vmatpush.msrb.mxu2 %v639_v28 }
 0x2ff   : > { %v507_v31 = vld [vmem:[%s3012_s29 + $0x818] sm:$0xff]  ;;  %2426 = vmatpush.msrb.mxu3 %v707_v30 }
 0x300   : > { %v575_v32 = vld [vmem:[%s3012_s29 + $0xa38] sm:$0xff]  ;;  %2368 = vmatpush.msrb.mxu0 %v507_v31 }
 0x301   : > { %v635_v53 = vld [vmem:[%s3012_s29 + $0xc18] sm:$0xff]  ;;  %2387 = vmatpush.msrb.mxu1 %v575_v32  ;;  %2369 = vmatmul.f32.vlgmr.msrb.gmra.mxu0 %v3145_v62 }
 0x302   : > { %v703_v33 = vld [vmem:[%s3012_s29 + $0xe38] sm:$0xff]  ;;  %2408 = vmatpush.msrb.mxu2 %v635_v53 }
 0x303   : > { %v823_v34 = vld [vmem:[%s3012_s29 + $0x11f8] sm:$0xff]  ;;  %2427 = vmatpush.msrb.mxu3 %v703_v33  ;;  %2409 = vmatmul.f32.vlgmr.msrb.gmra.mxu2 %v3143_v61 }
 0x304   : > { %v951_v35 = vld [vmem:[%s3012_s29 + $0x15f8] sm:$0xff]  ;;  %2433 = vmatpush.msra.mxu0 %v823_v34 }
 0x305   : > { %v571_v29 = vld [vmem:[%s3012_s29 + $0xa18] sm:$0xff]  ;;  %2473 = vmatpush.msra.mxu2 %v951_v35 }
 0x306   : > { %v699_v36 = vld [vmem:[%s3012_s29 + $0xe18] sm:$0xff]  ;;  %2388 = vmatpush.msrb.mxu1 %v571_v29 }
 0x307   : > { %v819_v45 = vld [vmem:[%s3012_s29 + $0x11d8] sm:$0xff]  ;;  %2428 = vmatpush.msrb.mxu3 %v699_v36  ;;  %2389 = vmatmul.f32.vlgmr.msrb.gmra.mxu1 %v3149_v0 }
 0x308   : > { %v887_v37 = vld [vmem:[%s3012_s29 + $0x13f8] sm:$0xff]  ;;  %2434 = vmatpush.msra.mxu0 %v819_v45  ;;  %2429 = vmatmul.f32.vlgmr.msrb.gmra.mxu3 %v3147_v63 }
 0x309   : > { %v947_v38 = vld [vmem:[%s3012_s29 + $0x15d8] sm:$0xff]  ;;  %2453 = vmatpush.msra.mxu1 %v887_v37  ;;  %v2909_v37 = vld.sshfl [vmem:[#allocation1] sm:$0xff pattern:$0x73625140] }
 0x30a   : > { %v1015_v39 = vld [vmem:[%s3012_s29 + $0x17f8] sm:$0xff]  ;;  %2474 = vmatpush.msra.mxu2 %v947_v38  ;;  %v2910_v38 = vld.sshfl [vmem:[#allocation1 + $0x10] sm:$0xff pattern:$0x73625140] }
 0x30b   : > { %v815_v46 = vld [vmem:[%s3012_s29 + $0x11b8] sm:$0xff]  ;;  %2493 = vmatpush.msra.mxu3 %v1015_v39 }
 0x30c   : > { %v883_v40 = vld [vmem:[%s3012_s29 + $0x13d8] sm:$0xff]  ;;  %2435 = vmatpush.msra.mxu0 %v815_v46 }
 0x30d   : > { %v943_v47 = vld [vmem:[%s3012_s29 + $0x15b8] sm:$0xff]  ;;  %2454 = vmatpush.msra.mxu1 %v883_v40 }
 0x30e   : > { %v1011_v41 = vld [vmem:[%s3012_s29 + $0x17d8] sm:$0xff]  ;;  %2475 = vmatpush.msra.mxu2 %v943_v47 }
 0x30f   : > { %v811_v42 = vld [vmem:[%s3012_s29 + $0x1198] sm:$0xff]  ;;  %2494 = vmatpush.msra.mxu3 %v1011_v41  ;;  %v2911_v41 = vld.sshfl [vmem:[#allocation1 + $0x8] sm:$0xff pattern:$0x73625140] }
 0x310   : > { %v879_v43 = vld [vmem:[%s3012_s29 + $0x13b8] sm:$0xff]  ;;  %2436 = vmatpush.msra.mxu0 %v811_v42 }
 0x311   : > { %v939_v44 = vld [vmem:[%s3012_s29 + $0x1598] sm:$0xff]  ;;  %2455 = vmatpush.msra.mxu1 %v879_v43 }
 0x312   : > { %v1007_v48 = vld [vmem:[%s3012_s29 + $0x17b8] sm:$0xff]  ;;  %2476 = vmatpush.msra.mxu2 %v939_v44 }
 0x313   : > { %v807_v49 = vld [vmem:[%s3012_s29 + $0x1178] sm:$0xff]  ;;  %2495 = vmatpush.msra.mxu3 %v1007_v48 }
 0x314   : > { %v875_v50 = vld [vmem:[%s3012_s29 + $0x1398] sm:$0xff]  ;;  %2437 = vmatpush.msra.mxu0 %v807_v49 }
 0x315   : > { %v935_v52 = vld [vmem:[%s3012_s29 + $0x1578] sm:$0xff]  ;;  %2456 = vmatpush.msra.mxu1 %v875_v50 }
 0x316   : > { %v1003_v54 = vld [vmem:[%s3012_s29 + $0x1798] sm:$0xff]  ;;  %2477 = vmatpush.msra.mxu2 %v935_v52 }
 0x317   : > { %v803_v61 = vld [vmem:[%s3012_s29 + $0x1158] sm:$0xff]  ;;  %2496 = vmatpush.msra.mxu3 %v1003_v54 }
 0x318   : > { %v871_v55 = vld [vmem:[%s3012_s29 + $0x1378] sm:$0xff]  ;;  %2438 = vmatpush.msra.mxu0 %v803_v61 }
 0x319   : > { %v931_v56 = vld [vmem:[%s3012_s29 + $0x1558] sm:$0xff]  ;;  %2457 = vmatpush.msra.mxu1 %v871_v55 }
 0x31a   : > { %v999_v57 = vld [vmem:[%s3012_s29 + $0x1778] sm:$0xff]  ;;  %2478 = vmatpush.msra.mxu2 %v931_v56 }
 0x31b   : > { %v799_v62 = vld [vmem:[%s3012_s29 + $0x1138] sm:$0xff]  ;;  %2497 = vmatpush.msra.mxu3 %v999_v57 }
 0x31c   : > { %v867_v58 = vld [vmem:[%s3012_s29 + $0x1358] sm:$0xff]  ;;  %2439 = vmatpush.msra.mxu0 %v799_v62 }
 0x31d   : > { %v927_v63 = vld [vmem:[%s3012_s29 + $0x1538] sm:$0xff]  ;;  %2458 = vmatpush.msra.mxu1 %v867_v58 }
 0x31e   : > { %v995_v59 = vld [vmem:[%s3012_s29 + $0x1758] sm:$0xff]  ;;  %2479 = vmatpush.msra.mxu2 %v927_v63 }
 0x31f   : > { %v795_v51 = vld [vmem:[%s3012_s29 + $0x1118] sm:$0xff]  ;;  %2498 = vmatpush.msra.mxu3 %v995_v59 }
 0x320   : > { %v863_v60 = vld [vmem:[%s3012_s29 + $0x1338] sm:$0xff]  ;;  %2440 = vmatpush.msra.mxu0 %v795_v51 }
 0x321   : > { %v923_v1 = vld [vmem:[%s3012_s29 + $0x1518] sm:$0xff]  ;;  %2459 = vmatpush.msra.mxu1 %v863_v60 }
 0x322   : > { %v991_v0 = vld [vmem:[%s3012_s29 + $0x1738] sm:$0xff]  ;;  %2480 = vmatpush.msra.mxu2 %v923_v1 }
 0x323   : > { %v791_v2 = vld [vmem:[%s3012_s29 + $0x10f8] sm:$0xff]  ;;  %2499 = vmatpush.msra.mxu3 %v991_v0 }
 0x324   : > { %v859_v3 = vld [vmem:[%s3012_s29 + $0x1318] sm:$0xff]  ;;  %2441 = vmatpush.msra.mxu0 %v791_v2 }
 0x325   : > { %v919_v4 = vld [vmem:[%s3012_s29 + $0x14f8] sm:$0xff]  ;;  %2460 = vmatpush.msra.mxu1 %v859_v3 }
 0x326   : > { %v987_v5 = vld [vmem:[%s3012_s29 + $0x1718] sm:$0xff]  ;;  %2481 = vmatpush.msra.mxu2 %v919_v4 }
 0x327   : > { %v787_v6 = vld [vmem:[%s3012_s29 + $0x10d8] sm:$0xff]  ;;  %2500 = vmatpush.msra.mxu3 %v987_v5 }
 0x328   : > { %v855_v7 = vld [vmem:[%s3012_s29 + $0x12f8] sm:$0xff]  ;;  %2442 = vmatpush.msra.mxu0 %v787_v6 }
 0x329   : > { %v915_v8 = vld [vmem:[%s3012_s29 + $0x14d8] sm:$0xff]  ;;  %2461 = vmatpush.msra.mxu1 %v855_v7 }
 0x32a   : > { %v983_v9 = vld [vmem:[%s3012_s29 + $0x16f8] sm:$0xff]  ;;  %2482 = vmatpush.msra.mxu2 %v915_v8 }
 0x32b   : > { %v783_v10 = vld [vmem:[%s3012_s29 + $0x10b8] sm:$0xff]  ;;  %2501 = vmatpush.msra.mxu3 %v983_v9 }
 0x32c   : > { %v851_v11 = vld [vmem:[%s3012_s29 + $0x12d8] sm:$0xff]  ;;  %2443 = vmatpush.msra.mxu0 %v783_v10 }
 0x32d   : > { %v911_v12 = vld [vmem:[%s3012_s29 + $0x14b8] sm:$0xff]  ;;  %2462 = vmatpush.msra.mxu1 %v851_v11 }
 0x32e   : > { %v979_v13 = vld [vmem:[%s3012_s29 + $0x16d8] sm:$0xff]  ;;  %2483 = vmatpush.msra.mxu2 %v911_v12 }
 0x32f   : > { %v779_v14 = vld [vmem:[%s3012_s29 + $0x1098] sm:$0xff]  ;;  %2502 = vmatpush.msra.mxu3 %v979_v13 }
 0x330   : > { %v847_v15 = vld [vmem:[%s3012_s29 + $0x12b8] sm:$0xff]  ;;  %2444 = vmatpush.msra.mxu0 %v779_v14 }
 0x331   : > { %v907_v16 = vld [vmem:[%s3012_s29 + $0x1498] sm:$0xff]  ;;  %2463 = vmatpush.msra.mxu1 %v847_v15 }
 0x332   : > { %v975_v17 = vld [vmem:[%s3012_s29 + $0x16b8] sm:$0xff]  ;;  %2484 = vmatpush.msra.mxu2 %v907_v16 }
 0x333   : > { %v775_v18 = vld [vmem:[%s3012_s29 + $0x1078] sm:$0xff]  ;;  %2503 = vmatpush.msra.mxu3 %v975_v17 }
 0x334   : > { %v843_v19 = vld [vmem:[%s3012_s29 + $0x1298] sm:$0xff]  ;;  %2445 = vmatpush.msra.mxu0 %v775_v18 }
 0x335   : > { %v903_v20 = vld [vmem:[%s3012_s29 + $0x1478] sm:$0xff]  ;;  %2464 = vmatpush.msra.mxu1 %v843_v19 }
 0x336   : > { %v971_v21 = vld [vmem:[%s3012_s29 + $0x1698] sm:$0xff]  ;;  %2485 = vmatpush.msra.mxu2 %v903_v20 }
 0x337   : > { %v771_v22 = vld [vmem:[%s3012_s29 + $0x1058] sm:$0xff]  ;;  %2504 = vmatpush.msra.mxu3 %v971_v21 }
 0x338   : > { %v839_v23 = vld [vmem:[%s3012_s29 + $0x1278] sm:$0xff]  ;;  %2446 = vmatpush.msra.mxu0 %v771_v22 }
 0x339   : > { %v899_v24 = vld [vmem:[%s3012_s29 + $0x1458] sm:$0xff]  ;;  %2465 = vmatpush.msra.mxu1 %v839_v23 }
 0x33a   : > { %v967_v26 = vld [vmem:[%s3012_s29 + $0x1678] sm:$0xff]  ;;  %2486 = vmatpush.msra.mxu2 %v899_v24 }
 0x33b   : > { %v767_v27 = vld [vmem:[%s3012_s29 + $0x1038] sm:$0xff]  ;;  %2505 = vmatpush.msra.mxu3 %v967_v26 }
 0x33c   : > { %v835_v28 = vld [vmem:[%s3012_s29 + $0x1258] sm:$0xff]  ;;  %2447 = vmatpush.msra.mxu0 %v767_v27 }
 0x33d   : > { %v895_v30 = vld [vmem:[%s3012_s29 + $0x1438] sm:$0xff]  ;;  %2466 = vmatpush.msra.mxu1 %v835_v28 }
 0x33e   : > { %v963_v31 = vld [vmem:[%s3012_s29 + $0x1658] sm:$0xff]  ;;  %2487 = vmatpush.msra.mxu2 %v895_v30 }
 0x33f   : > { %v763_v32 = vld [vmem:[%s3012_s29 + $0x1018] sm:$0xff]  ;;  %2506 = vmatpush.msra.mxu3 %v963_v31 }
 0x340   : > { %v831_v53 = vld [vmem:[%s3012_s29 + $0x1238] sm:$0xff]  ;;  %2448 = vmatpush.msra.mxu0 %v763_v32 }
 0x341   : > { %v891_v33 = vld [vmem:[%s3012_s29 + $0x1418] sm:$0xff]  ;;  %2467 = vmatpush.msra.mxu1 %v831_v53  ;;  %2449 = vmatmul.f32.vlgmr.msra.gmra.mxu0 %v2909_v37 }
 0x342   : > { %v959_v34 = vld [vmem:[%s3012_s29 + $0x1638] sm:$0xff]  ;;  %2488 = vmatpush.msra.mxu2 %v891_v33 }
 0x343   : > { %v1079_v35 = vld [vmem:[%s3012_s29 + $0x19f8] sm:$0xff]  ;;  %2507 = vmatpush.msra.mxu3 %v959_v34  ;;  %2489 = vmatmul.f32.vlgmr.msra.gmra.mxu2 %v2910_v38 }
 0x344   : > { %v1207_v29 = vld [vmem:[%s3012_s29 + $0x1df8] sm:$0xff]  ;;  %2513 = vmatpush.msrb.mxu0 %v1079_v35 }
 0x345   : > { %v827_v36 = vld [vmem:[%s3012_s29 + $0x1218] sm:$0xff]  ;;  %2553 = vmatpush.msrb.mxu2 %v1207_v29 }
 0x346   : > { %v955_v45 = vld [vmem:[%s3012_s29 + $0x1618] sm:$0xff]  ;;  %2468 = vmatpush.msra.mxu1 %v827_v36 }
 0x347   : > { %v1075_v39 = vld [vmem:[%s3012_s29 + $0x19d8] sm:$0xff]  ;;  %2508 = vmatpush.msra.mxu3 %v955_v45  ;;  %2469 = vmatmul.f32.vlgmr.msra.gmra.mxu1 %v2911_v41 }
 0x348   : > { %v1143_v46 = vld [vmem:[%s3012_s29 + $0x1bf8] sm:$0xff]  ;;  %2514 = vmatpush.msrb.mxu0 %v1075_v39 }
 0x349   : > { %v1203_v40 = vld [vmem:[%s3012_s29 + $0x1dd8] sm:$0xff]  ;;  %2533 = vmatpush.msrb.mxu1 %v1143_v46  ;;  %v2913_v46 = vld.sshfl [vmem:[#allocation1 + $0x20] sm:$0xff pattern:$0x73625140] }
 0x34a   : > { %v1271_v47 = vld [vmem:[%s3012_s29 + $0x1ff8] sm:$0xff]  ;;  %2554 = vmatpush.msrb.mxu2 %v1203_v40  ;;  %v2914_v40 = vld.sshfl [vmem:[#allocation1 + $0x30] sm:$0xff pattern:$0x73625140] }
 0x34b   : > { %v2912_v42 = vld.sshfl [vmem:[#allocation1 + $0x18] sm:$0xff pattern:$0x73625140]  ;;  %2573 = vmatpush.msrb.mxu3 %v1271_v47  ;;  %v2915_v47 = vld.sshfl [vmem:[#allocation1 + $0x28] sm:$0xff pattern:$0x73625140] }
 0x34c   : > { %2509 = vmatmul.f32.vlgmr.msra.gmra.mxu3 %v2912_v42  ;;  %v1071_v43 = vld [vmem:[%s3012_s29 + $0x19b8] sm:$0xff]  ;;  %v1990_v42 = vpop.f32.mrf.mxu1 }
 0x34d   : > { %v1139_v44 = vld [vmem:[%s3012_s29 + $0x1bd8] sm:$0xff]  ;;  %2515 = vmatpush.msrb.mxu0 %v1071_v43  ;;  %v1970_v43 = vpop.f32.mrf.mxu0 }
 0x34e   : > { %v1199_v48 = vld [vmem:[%s3012_s29 + $0x1db8] sm:$0xff]  ;;  %2534 = vmatpush.msrb.mxu1 %v1139_v44  ;;  %v2010_v44 = vpop.f32.mrf.mxu2 }
 0x34f   : > { %v1267_v49 = vld [vmem:[%s3012_s29 + $0x1fd8] sm:$0xff]  ;;  %2555 = vmatpush.msrb.mxu2 %v1199_v48  ;;  %v2030_v48 = vpop.f32.mrf.mxu3 }
 0x350   : > { %v1067_v50 = vld [vmem:[%s3012_s29 + $0x1998] sm:$0xff]  ;;  %2574 = vmatpush.msrb.mxu3 %v1267_v49 }
 0x351   : > { %v1135_v52 = vld [vmem:[%s3012_s29 + $0x1bb8] sm:$0xff]  ;;  %2516 = vmatpush.msrb.mxu0 %v1067_v50 }
 0x352   : > { %v1195_v54 = vld [vmem:[%s3012_s29 + $0x1d98] sm:$0xff]  ;;  %2535 = vmatpush.msrb.mxu1 %v1135_v52 }
 0x353   : > { %v1263_v61 = vld [vmem:[%s3012_s29 + $0x1fb8] sm:$0xff]  ;;  %2556 = vmatpush.msrb.mxu2 %v1195_v54 }
 0x354   : > { %v1063_v55 = vld [vmem:[%s3012_s29 + $0x1978] sm:$0xff]  ;;  %2575 = vmatpush.msrb.mxu3 %v1263_v61  ;;  %v2070_v49 = vpop.f32.mrf.mxu1 }
 0x355   : > { %v1131_v56 = vld [vmem:[%s3012_s29 + $0x1b98] sm:$0xff]  ;;  %2517 = vmatpush.msrb.mxu0 %v1063_v55  ;;  %v2050_v50 = vpop.f32.mrf.mxu0 }
 0x356   : > { %v1191_v57 = vld [vmem:[%s3012_s29 + $0x1d78] sm:$0xff]  ;;  %2536 = vmatpush.msrb.mxu1 %v1131_v56  ;;  %v2090_v52 = vpop.f32.mrf.mxu2 }
 0x357   : > { %v1259_v62 = vld [vmem:[%s3012_s29 + $0x1f98] sm:$0xff]  ;;  %2557 = vmatpush.msrb.mxu2 %v1191_v57  ;;  %v2110_v54 = vpop.f32.mrf.mxu3 }
 0x358   : > { %v1059_v58 = vld [vmem:[%s3012_s29 + $0x1958] sm:$0xff]  ;;  %2576 = vmatpush.msrb.mxu3 %v1259_v62 }
 0x359   : > { %v1127_v63 = vld [vmem:[%s3012_s29 + $0x1b78] sm:$0xff]  ;;  %2518 = vmatpush.msrb.mxu0 %v1059_v58 }
 0x35a   : > { %v1187_v59 = vld [vmem:[%s3012_s29 + $0x1d58] sm:$0xff]  ;;  %2537 = vmatpush.msrb.mxu1 %v1127_v63 }
 0x35b   : > { %v1255_v51 = vld [vmem:[%s3012_s29 + $0x1f78] sm:$0xff]  ;;  %2558 = vmatpush.msrb.mxu2 %v1187_v59  ;;  %v1991_v59 = vadd.f32 %v1990_v42, %v1970_v43  ;;  %v243_v43 = vld [vmem:[#allocation2] sm:$0xff] }
 0x35c   : > { %v1055_v60 = vld [vmem:[%s3012_s29 + $0x1938] sm:$0xff]  ;;  %2577 = vmatpush.msrb.mxu3 %v1255_v51  ;;  %v2150_v61 = vpop.f32.mrf.mxu1 }
 0x35d   : > { %v1123_v1 = vld [vmem:[%s3012_s29 + $0x1b58] sm:$0xff]  ;;  %2519 = vmatpush.msrb.mxu0 %v1055_v60  ;;  %v2130_v55 = vpop.f32.mrf.mxu0 }
 0x35e   : > { %v1183_v0 = vld [vmem:[%s3012_s29 + $0x1d38] sm:$0xff]  ;;  %2538 = vmatpush.msrb.mxu1 %v1123_v1  ;;  %v2170_v56 = vpop.f32.mrf.mxu2 }
 0x35f   : > { %v1251_v2 = vld [vmem:[%s3012_s29 + $0x1f58] sm:$0xff]  ;;  %2559 = vmatpush.msrb.mxu2 %v1183_v0  ;;  %v2190_v57 = vpop.f32.mrf.mxu3  ;;  %v2011_v0 = vadd.f32 %v2010_v44, %v1991_v59 }
 0x360   : > { %v1051_v3 = vld [vmem:[%s3012_s29 + $0x1918] sm:$0xff]  ;;  %2578 = vmatpush.msrb.mxu3 %v1251_v2 }
 0x361   : > { %v1119_v4 = vld [vmem:[%s3012_s29 + $0x1b38] sm:$0xff]  ;;  %2520 = vmatpush.msrb.mxu0 %v1051_v3 }
 0x362   : > { %v1179_v5 = vld [vmem:[%s3012_s29 + $0x1d18] sm:$0xff]  ;;  %2539 = vmatpush.msrb.mxu1 %v1119_v4  ;;  %v2031_v4 = vadd.f32 %v2030_v48, %v2011_v0 }
 0x363   : > { %v1247_v6 = vld [vmem:[%s3012_s29 + $0x1f38] sm:$0xff]  ;;  %2560 = vmatpush.msrb.mxu2 %v1179_v5 }
 0x364   : > { %v1047_v7 = vld [vmem:[%s3012_s29 + $0x18f8] sm:$0xff]  ;;  %2579 = vmatpush.msrb.mxu3 %v1247_v6  ;;  %v2230_v62 = vpop.f32.mrf.mxu1 }
 0x365   : > { %v1115_v8 = vld [vmem:[%s3012_s29 + $0x1b18] sm:$0xff]  ;;  %2521 = vmatpush.msrb.mxu0 %v1047_v7  ;;  %v2210_v58 = vpop.f32.mrf.mxu0  ;;  %v2051_v7 = vadd.f32 %v2050_v50, %v2031_v4 }
 0x366   : > { %v1175_v9 = vld [vmem:[%s3012_s29 + $0x1cf8] sm:$0xff]  ;;  %2540 = vmatpush.msrb.mxu1 %v1115_v8  ;;  %v2250_v63 = vpop.f32.mrf.mxu2 }
 0x367   : > { %v1243_v10 = vld [vmem:[%s3012_s29 + $0x1f18] sm:$0xff]  ;;  %2561 = vmatpush.msrb.mxu2 %v1175_v9  ;;  %v2270_v51 = vpop.f32.mrf.mxu3 }
 0x368   : > { %v1043_v11 = vld [vmem:[%s3012_s29 + $0x18d8] sm:$0xff]  ;;  %2580 = vmatpush.msrb.mxu3 %v1243_v10  ;;  %v2071_v10 = vadd.f32 %v2070_v49, %v2051_v7 }
 0x369   : > { %v1111_v12 = vld [vmem:[%s3012_s29 + $0x1af8] sm:$0xff]  ;;  %2522 = vmatpush.msrb.mxu0 %v1043_v11 }
 0x36a   : > { %v1171_v13 = vld [vmem:[%s3012_s29 + $0x1cd8] sm:$0xff]  ;;  %2541 = vmatpush.msrb.mxu1 %v1111_v12 }
 0x36b   : > { %v1239_v14 = vld [vmem:[%s3012_s29 + $0x1ef8] sm:$0xff]  ;;  %2562 = vmatpush.msrb.mxu2 %v1171_v13  ;;  %v2091_v13 = vadd.f32 %v2090_v52, %v2071_v10 }
 0x36c   : > { %v1039_v15 = vld [vmem:[%s3012_s29 + $0x18b8] sm:$0xff]  ;;  %2581 = vmatpush.msrb.mxu3 %v1239_v14  ;;  %v2310_v60 = vpop.f32.mrf.mxu1 }
 0x36d   : > { %v1107_v16 = vld [vmem:[%s3012_s29 + $0x1ad8] sm:$0xff]  ;;  %2523 = vmatpush.msrb.mxu0 %v1039_v15  ;;  %v2290_v1 = vpop.f32.mrf.mxu0 }
 0x36e   : > { %v1167_v17 = vld [vmem:[%s3012_s29 + $0x1cb8] sm:$0xff]  ;;  %2542 = vmatpush.msrb.mxu1 %v1107_v16  ;;  %v2311_v2 = vadd.f32 %v2310_v60, %v2290_v1  ;;  %v2330_v3 = vpop.f32.mrf.mxu2  ;;  %v2111_v16 = vadd.f32 %v2110_v54, %v2091_v13 }
 0x36f   : > { %v1235_v18 = vld [vmem:[%s3012_s29 + $0x1ed8] sm:$0xff]  ;;  %2563 = vmatpush.msrb.mxu2 %v1167_v17  ;;  %v2350_v6 = vpop.f32.mrf.mxu3 }
 0x370   : > { %v1035_v19 = vld [vmem:[%s3012_s29 + $0x1898] sm:$0xff]  ;;  %2582 = vmatpush.msrb.mxu3 %v1235_v18  ;;  %v2331_v5 = vadd.f32 %v2330_v3, %v2311_v2 }
 0x371   : > { %v1103_v20 = vld [vmem:[%s3012_s29 + $0x1ab8] sm:$0xff]  ;;  %2524 = vmatpush.msrb.mxu0 %v1035_v19  ;;  %v2131_v19 = vadd.f32 %v2130_v55, %v2111_v16 }
 0x372   : > { %v1163_v21 = vld [vmem:[%s3012_s29 + $0x1c98] sm:$0xff]  ;;  %2543 = vmatpush.msrb.mxu1 %v1103_v20  ;;  %v2351_v8 = vadd.f32 %v2350_v6, %v2331_v5 }
 0x373   : > { %v1231_v22 = vld [vmem:[%s3012_s29 + $0x1eb8] sm:$0xff]  ;;  %2564 = vmatpush.msrb.mxu2 %v1163_v21 }
 0x374   : > { %v1031_v23 = vld [vmem:[%s3012_s29 + $0x1878] sm:$0xff]  ;;  %2583 = vmatpush.msrb.mxu3 %v1231_v22  ;;  %v2151_v22 = vadd.f32 %v2150_v61, %v2131_v19 }
 0x375   : > { %v1099_v24 = vld [vmem:[%s3012_s29 + $0x1a98] sm:$0xff]  ;;  %2525 = vmatpush.msrb.mxu0 %v1031_v23 }
 0x376   : > { %v1159_v26 = vld [vmem:[%s3012_s29 + $0x1c78] sm:$0xff]  ;;  %2544 = vmatpush.msrb.mxu1 %v1099_v24 }
 0x377   : > { %v1227_v27 = vld [vmem:[%s3012_s29 + $0x1e98] sm:$0xff]  ;;  %2565 = vmatpush.msrb.mxu2 %v1159_v26  ;;  %v2171_v26 = vadd.f32 %v2170_v56, %v2151_v22 }
 0x378   : > { %v1027_v28 = vld [vmem:[%s3012_s29 + $0x1858] sm:$0xff]  ;;  %2584 = vmatpush.msrb.mxu3 %v1227_v27 }
 0x379   : > { %v1095_v30 = vld [vmem:[%s3012_s29 + $0x1a78] sm:$0xff]  ;;  %2526 = vmatpush.msrb.mxu0 %v1027_v28 }
 0x37a   : > { %v1155_v31 = vld [vmem:[%s3012_s29 + $0x1c58] sm:$0xff]  ;;  %2545 = vmatpush.msrb.mxu1 %v1095_v30  ;;  %v2191_v30 = vadd.f32 %v2190_v57, %v2171_v26 }
 0x37b   : > { %v1223_v32 = vld [vmem:[%s3012_s29 + $0x1e78] sm:$0xff]  ;;  %2566 = vmatpush.msrb.mxu2 %v1155_v31 }
 0x37c   : > { %v1023_v53 = vld [vmem:[%s3012_s29 + $0x1838] sm:$0xff]  ;;  %2585 = vmatpush.msrb.mxu3 %v1223_v32 }
 0x37d   : > { %v1091_v33 = vld [vmem:[%s3012_s29 + $0x1a58] sm:$0xff]  ;;  %2527 = vmatpush.msrb.mxu0 %v1023_v53  ;;  %v2211_v53 = vadd.f32 %v2210_v58, %v2191_v30 }
 0x37e   : > { %v1151_v34 = vld [vmem:[%s3012_s29 + $0x1c38] sm:$0xff]  ;;  %2546 = vmatpush.msrb.mxu1 %v1091_v33  ;;  %v2370_v9 = vpop.f32.mrf.mxu0 }
 0x37f   : > { %v1219_v35 = vld [vmem:[%s3012_s29 + $0x1e58] sm:$0xff]  ;;  %2567 = vmatpush.msrb.mxu2 %v1151_v34  ;;  %v2371_v11 = vadd.f32 %v2370_v9, %v2351_v8 }
 0x380   : > { %v1019_v29 = vld [vmem:[%s3012_s29 + $0x1818] sm:$0xff]  ;;  %2586 = vmatpush.msrb.mxu3 %v1219_v35  ;;  %v2231_v35 = vadd.f32 %v2230_v62, %v2211_v53 }
 0x381   : > { %v1087_v36 = vld [vmem:[%s3012_s29 + $0x1a38] sm:$0xff]  ;;  %2528 = vmatpush.msrb.mxu0 %v1019_v29 }
 0x382   : > { %v1147_v45 = vld [vmem:[%s3012_s29 + $0x1c18] sm:$0xff]  ;;  %2547 = vmatpush.msrb.mxu1 %v1087_v36  ;;  %2529 = vmatmul.f32.vlgmr.msrb.gmra.mxu0 %v2913_v46 }
 0x383   : > { %v1215_v37 = vld [vmem:[%s3012_s29 + $0x1e38] sm:$0xff]  ;;  %2568 = vmatpush.msrb.mxu2 %v1147_v45  ;;  %v2251_v45 = vadd.f32 %v2250_v63, %v2231_v35 }
 0x384   : > { %v1083_v38 = vld [vmem:[%s3012_s29 + $0x1a18] sm:$0xff]  ;;  %2587 = vmatpush.msrb.mxu3 %v1215_v37  ;;  %2569 = vmatmul.f32.vlgmr.msrb.gmra.mxu2 %v2914_v40  ;;  %v2390_v12 = vpop.f32.mrf.mxu1 }
 0x385   : > { %v1211_v39 = vld [vmem:[%s3012_s29 + $0x1e18] sm:$0xff]  ;;  %2548 = vmatpush.msrb.mxu1 %v1083_v38  ;;  %v2391_v14 = vadd.f32 %v2390_v12, %v2371_v11 }
 0x386   : > { %2588 = vmatpush.msrb.mxu3 %v1211_v39  ;;  %2549 = vmatmul.f32.vlgmr.msrb.gmra.mxu1 %v2915_v47  ;;  %v2916_v41 = vld.sshfl [vmem:[#allocation1 + $0x38] sm:$0xff pattern:$0x73625140]  ;;  %v2410_v15 = vpop.f32.mrf.mxu2  ;;  %v2271_v39 = vadd.f32 %v2270_v51, %v2251_v45 }
 0x387   : > { %2589 = vmatmul.f32.vlgmr.msrb.gmra.mxu3 %v2916_v41  ;;  %v2411_v17 = vadd.f32 %v2410_v15, %v2391_v14 }
 0x388   : > { %v2598_v41 = vrot.slane %v2271_v39, 4 }
 0x38b   : > { %v2430_v18 = vpop.f32.mrf.mxu3 }
 0x38c   : > { %v2431_v21 = vadd.f32 %v2430_v18, %v2411_v17 }
 0x3be   : > { %v2450_v20 = vpop.f32.mrf.mxu0 }
 0x3bf   : > { %v2451_v23 = vadd.f32 %v2450_v20, %v2431_v21 }
 0x3c4   : > { %v2470_v24 = vpop.f32.mrf.mxu1 }
 0x3c5   : > { %v2471_v28 = vadd.f32 %v2470_v24, %v2451_v23 }
 0x3c6   : > { %v2490_v27 = vpop.f32.mrf.mxu2 }
 0x3c7   : > { %v2491_v31 = vadd.f32 %v2490_v27, %v2471_v28 }
 0x3cf   : > { %v2510_v32 = vpop.f32.mrf.mxu3 }
 0x3d0   : > { %v2511_v33 = vadd.f32 %v2510_v32, %v2491_v31 }
 0x3ff   : > { %v2530_v34 = vpop.f32.mrf.mxu0 }
 0x400   : > { %v2531_v29 = vadd.f32 %v2530_v34, %v2511_v33 }
 0x403   : > { %v2550_v36 = vpop.f32.mrf.mxu1 }
 0x404   : > { %v2551_v37 = vadd.f32 %v2550_v36, %v2531_v29 }
 0x407   : > { %v2570_v38 = vpop.f32.mrf.mxu2 }
 0x408   : > { %v2571_v46 = vadd.f32 %v2570_v38, %v2551_v37 }
 0x40a   : > { %v2590_v40 = vpop.f32.mrf.mxu3 }
 0x40b   : > { %v2591_v47 = vadd.f32 %v2590_v40, %v2571_v46 }
 0x40d   : > { %v2599_v42 = vrot.slane %v2591_v47, 2 }
 0x40f   : > { %v2603_v44 = vsel %vm2602_vm1, %v2598_v41, %v2599_v42  ;;  %2612 = sbr.rel (%p2870_p6) target bundleno = 1453 (0x5ad), region = 48 }
 0x410   : > { %v2605_v48 = vsel %vm2604_vm2, %v3851_v25, %v2603_v44 }
 0x411   : > { %v2607_v49 = vadd.f32 %v2605_v48, %v243_v43 }
 0x413   : > { %2608 = vst [vmem:[#allocation2] sm:$0xff] %v2607_v49 }
 0x414   : > { %v2676_v50 = vld [vmem:[%s4324_s3 + $0x178] sm:$0xff]  ;;  %v2675_v54 = vld [vmem:[%s4324_s3 + $0x170] sm:$0xff]  ;;  %v2674_v56 = vld [vmem:[%s4324_s3 + $0x168] sm:$0xff]  ;;  %vm2787_vm3 = vcmask 41984  }
 0x415   : > { %v2644_v52 = vld [vmem:[%s4324_s3 + $0x78] sm:$0xff]  ;;  %2747 = vmatpush.msra.mxu2 %v2676_v50  ;;  %v2643_v61 = vld [vmem:[%s4324_s3 + $0x70] sm:$0xff]  ;;  %v2642_v62 = vld [vmem:[%s4324_s3 + $0x68] sm:$0xff] }
 0x416   : > { %2707 = vmatpush.msra.mxu0 %v2644_v52  ;;  %v2692_v25 = vld [vmem:[%s4324_s3 + $0x1f8] sm:$0xff]  ;;  %v2691_v57 = vld [vmem:[%s4324_s3 + $0x1f0] sm:$0xff]  ;;  %v2690_v63 = vld [vmem:[%s4324_s3 + $0x1e8] sm:$0xff] }
 0x417   : > { %v2660_v55 = vld [vmem:[%s4324_s3 + $0xf8] sm:$0xff]  ;;  %2767 = vmatpush.msra.mxu3 %v2692_v25  ;;  %2748 = vmatpush.msra.mxu2 %v2675_v54  ;;  %v2659_v58 = vld [vmem:[%s4324_s3 + $0xf0] sm:$0xff]  ;;  %v2673_v59 = vld [vmem:[%s4324_s3 + $0x160] sm:$0xff] }
 0x418   : > { %2727 = vmatpush.msra.mxu1 %v2660_v55  ;;  %2708 = vmatpush.msra.mxu0 %v2643_v61  ;;  %v2641_v51 = vld [vmem:[%s4324_s3 + $0x60] sm:$0xff]  ;;  %v2658_v60 = vld [vmem:[%s4324_s3 + $0xe8] sm:$0xff]  ;;  %v2672_v2 = vld [vmem:[%s4324_s3 + $0x158] sm:$0xff] }
 0x419   : > { %2768 = vmatpush.msra.mxu3 %v2691_v57  ;;  %2749 = vmatpush.msra.mxu2 %v2674_v56  ;;  %v2689_v1 = vld [vmem:[%s4324_s3 + $0x1e0] sm:$0xff]  ;;  %v2640_v3 = vld [vmem:[%s4324_s3 + $0x58] sm:$0xff]  ;;  %v2671_v6 = vld [vmem:[%s4324_s3 + $0x150] sm:$0xff] }
 0x41a   : > { %2728 = vmatpush.msra.mxu1 %v2659_v58  ;;  %2709 = vmatpush.msra.mxu0 %v2642_v62  ;;  %v2657_v0 = vld [vmem:[%s4324_s3 + $0xe0] sm:$0xff]  ;;  %v2688_v4 = vld [vmem:[%s4324_s3 + $0x1d8] sm:$0xff]  ;;  %v2639_v7 = vld [vmem:[%s4324_s3 + $0x50] sm:$0xff] }
 0x41b   : > { %2769 = vmatpush.msra.mxu3 %v2690_v63  ;;  %2750 = vmatpush.msra.mxu2 %v2673_v59  ;;  %v2656_v5 = vld [vmem:[%s4324_s3 + $0xd8] sm:$0xff]  ;;  %v2687_v8 = vld [vmem:[%s4324_s3 + $0x1d0] sm:$0xff]  ;;  %v2670_v10 = vld [vmem:[%s4324_s3 + $0x148] sm:$0xff] }
 0x41c   : > { %2729 = vmatpush.msra.mxu1 %v2658_v60  ;;  %2710 = vmatpush.msra.mxu0 %v2641_v51  ;;  %v2655_v9 = vld [vmem:[%s4324_s3 + $0xd0] sm:$0xff]  ;;  %v2638_v11 = vld [vmem:[%s4324_s3 + $0x48] sm:$0xff]  ;;  %v2669_v14 = vld [vmem:[%s4324_s3 + $0x140] sm:$0xff] }
 0x41d   : > { %2770 = vmatpush.msra.mxu3 %v2689_v1  ;;  %2751 = vmatpush.msra.mxu2 %v2672_v2  ;;  %v2686_v12 = vld [vmem:[%s4324_s3 + $0x1c8] sm:$0xff]  ;;  %v2637_v15 = vld [vmem:[%s4324_s3 + $0x40] sm:$0xff]  ;;  %v2668_v18 = vld [vmem:[%s4324_s3 + $0x138] sm:$0xff] }
 0x41e   : > { %2730 = vmatpush.msra.mxu1 %v2657_v0  ;;  %2711 = vmatpush.msra.mxu0 %v2640_v3  ;;  %v2654_v13 = vld [vmem:[%s4324_s3 + $0xc8] sm:$0xff]  ;;  %v2685_v16 = vld [vmem:[%s4324_s3 + $0x1c0] sm:$0xff]  ;;  %v2636_v19 = vld [vmem:[%s4324_s3 + $0x38] sm:$0xff] }
 0x41f   : > { %2771 = vmatpush.msra.mxu3 %v2688_v4  ;;  %2752 = vmatpush.msra.mxu2 %v2671_v6  ;;  %v2653_v17 = vld [vmem:[%s4324_s3 + $0xc0] sm:$0xff]  ;;  %v2684_v20 = vld [vmem:[%s4324_s3 + $0x1b8] sm:$0xff]  ;;  %v2667_v22 = vld [vmem:[%s4324_s3 + $0x130] sm:$0xff] }
 0x420   : > { %2731 = vmatpush.msra.mxu1 %v2656_v5  ;;  %2712 = vmatpush.msra.mxu0 %v2639_v7  ;;  %v2652_v21 = vld [vmem:[%s4324_s3 + $0xb8] sm:$0xff]  ;;  %v2635_v23 = vld [vmem:[%s4324_s3 + $0x30] sm:$0xff]  ;;  %v2666_v27 = vld [vmem:[%s4324_s3 + $0x128] sm:$0xff] }
 0x421   : > { %2772 = vmatpush.msra.mxu3 %v2687_v8  ;;  %2753 = vmatpush.msra.mxu2 %v2670_v10  ;;  %v2683_v24 = vld [vmem:[%s4324_s3 + $0x1b0] sm:$0xff]  ;;  %v2634_v28 = vld [vmem:[%s4324_s3 + $0x28] sm:$0xff]  ;;  %v2665_v32 = vld [vmem:[%s4324_s3 + $0x120] sm:$0xff] }
 0x422   : > { %2732 = vmatpush.msra.mxu1 %v2655_v9  ;;  %2713 = vmatpush.msra.mxu0 %v2638_v11  ;;  %v2651_v26 = vld [vmem:[%s4324_s3 + $0xb0] sm:$0xff]  ;;  %v2682_v30 = vld [vmem:[%s4324_s3 + $0x1a8] sm:$0xff]  ;;  %v2633_v53 = vld [vmem:[%s4324_s3 + $0x20] sm:$0xff] }
 0x423   : > { %2773 = vmatpush.msra.mxu3 %v2686_v12  ;;  %2754 = vmatpush.msra.mxu2 %v2669_v14  ;;  %v2650_v31 = vld [vmem:[%s4324_s3 + $0xa8] sm:$0xff]  ;;  %v2614_v33 = vld [vmem:[%s4323_s2] sm:$0xf]  ;;  %v2664_v38 = vld [vmem:[%s4324_s3 + $0x118] sm:$0xff]  ;;  %v2960_v14 = vmov 6  }
 0x424   : > { %2733 = vmatpush.msra.mxu1 %v2654_v13  ;;  %2714 = vmatpush.msra.mxu0 %v2637_v15  ;;  %v2681_v34 = vld [vmem:[%s4324_s3 + $0x1a0] sm:$0xff]  ;;  %v2616_v29 = vperm.slane %v2614_v33, 0  ;;  %v2617_v36 = vperm.slane %v2614_v33, 1  ;;  %v2618_v45 = vperm.slane %v2614_v33, 2  ;;  %v2619_v37 = vperm.slane %v2614_v33, 3  ;;  %v2632_v39 = vld [vmem:[%s4324_s3 + $0x18] sm:$0xff] }
 0x425   : > { %2774 = vmatpush.msra.mxu3 %v2685_v16  ;;  %2755 = vmatpush.msra.mxu2 %v2668_v18  ;;  %v2649_v35 = vld [vmem:[%s4324_s3 + $0xa0] sm:$0xff]  ;;  %v2680_v46 = vld [vmem:[%s4324_s3 + $0x198] sm:$0xff]  ;;  %v2663_v43 = vld [vmem:[%s4324_s3 + $0x110] sm:$0xff] }
 0x426   : > { %2734 = vmatpush.msra.mxu1 %v2653_v17  ;;  %2715 = vmatpush.msra.mxu0 %v2636_v19  ;;  %v2648_v40 = vld [vmem:[%s4324_s3 + $0x98] sm:$0xff]  ;;  %v2620_v47 = vrot.slane %v2617_v36, 6  ;;  %v2621_v41 = vrot.slane %v2618_v45, 4  ;;  %v2622_v42 = vrot.slane %v2619_v37, 2  ;;  %v2631_v44 = vld [vmem:[%s4324_s3 + $0x10] sm:$0xff]  ;;  %v2613_v48 = vld [vmem:[#allocation2] sm:$0xff] }
 0x427   : > { %2775 = vmatpush.msra.mxu3 %v2684_v20  ;;  %2756 = vmatpush.msra.mxu2 %v2667_v22  ;;  %v2679_v49 = vld [vmem:[%s4324_s3 + $0x190] sm:$0xff]  ;;  %v2662_v25 = vld [vmem:[%s4324_s3 + $0x108] sm:$0xff]  ;;  %v2661_v58 = vld [vmem:[%s4324_s3 + $0x100] sm:$0xff] }
 0x428   : > { %2735 = vmatpush.msra.mxu1 %v2652_v21  ;;  %2716 = vmatpush.msra.mxu0 %v2635_v23  ;;  %v2647_v50 = vld [vmem:[%s4324_s3 + $0x90] sm:$0xff]  ;;  %v2623_v52 = vsel %vm2600_vm0, %v2616_v29, %v2620_v47  ;;  %v2624_v54 = vsel %vm2602_vm1, %v2621_v41, %v2622_v42  ;;  %v2630_v61 = vld [vmem:[%s4324_s3 + $0x8] sm:$0xff]  ;;  %v2629_v63 = vld [vmem:[%s4324_s3] sm:$0xff] }
 0x429   : > { %2776 = vmatpush.msra.mxu3 %v2683_v24  ;;  %2757 = vmatpush.msra.mxu2 %v2666_v27  ;;  %v2625_v55 = vsel %vm2604_vm2, %v2623_v52, %v2624_v54  ;;  %v2678_v56 = vld [vmem:[%s4324_s3 + $0x188] sm:$0xff]  ;;  %v2677_v51 = vld [vmem:[%s4324_s3 + $0x180] sm:$0xff] }
 0x42a   : > { %2736 = vmatpush.msra.mxu1 %v2651_v26  ;;  %2717 = vmatpush.msra.mxu0 %v2634_v28  ;;  %v2627_v57 = vadd.f32 %v2625_v55, %v2613_v48  ;;  %v2646_v62 = vld [vmem:[%s4324_s3 + $0x88] sm:$0xff]  ;;  %v2645_v60 = vld [vmem:[%s4324_s3 + $0x80] sm:$0xff] }
 0x42b   : > { %2777 = vmatpush.msra.mxu3 %v2682_v30  ;;  %2758 = vmatpush.msra.mxu2 %v2665_v32  ;;  %v2918_v4 = vld [vmem:[%s4325_s4] ss:$0 sm:$0xff] }
 0x42c   : > { %2737 = vmatpush.msra.mxu1 %v2650_v31  ;;  %2718 = vmatpush.msra.mxu0 %v2633_v53  ;;  %v2628_v59 = vmax.f32 %v2627_v57, 0.0 }
 0x42d   : > { %2778 = vmatpush.msra.mxu3 %v2681_v34  ;;  %2759 = vmatpush.msra.mxu2 %v2664_v38 }
 0x42e   : > { %2738 = vmatpush.msra.mxu1 %v2649_v35  ;;  %2719 = vmatpush.msra.mxu0 %v2632_v39  ;;  %2698 = vst [vmem:[#allocation1] ss:$4 sm:$0xff] %v2628_v59 }
 0x42f   : > { %2779 = vmatpush.msra.mxu3 %v2680_v46  ;;  %2760 = vmatpush.msra.mxu2 %v2663_v43 }
 0x430   : > { %2739 = vmatpush.msra.mxu1 %v2648_v40  ;;  %2720 = vmatpush.msra.mxu0 %v2631_v44 }
 0x431   : > { %2780 = vmatpush.msra.mxu3 %v2679_v49  ;;  %2761 = vmatpush.msra.mxu2 %v2662_v25 }
 0x432   : > { %2740 = vmatpush.msra.mxu1 %v2647_v50  ;;  %2721 = vmatpush.msra.mxu0 %v2630_v61 }
 0x433   : > { %2781 = vmatpush.msra.mxu3 %v2678_v56  ;;  %2762 = vmatpush.msra.mxu2 %v2661_v58 }
 0x434   : > { %2741 = vmatpush.msra.mxu1 %v2646_v62  ;;  %2722 = vmatpush.msra.mxu0 %v2629_v63 }
 0x435   : > { %2782 = vmatpush.msra.mxu3 %v2677_v51  ;;  %v2701_v1 = vld.sshfl [vmem:[#allocation1 + $0x10] sm:$0xff pattern:$0x73625140]  ;;  %v2699_v0 = vld.sshfl [vmem:[#allocation1] sm:$0xff pattern:$0x73625140]  ;;  %2917 = vset.pattern.permute.xlu0 %v2960_v14 }
 0x436   : > { %2742 = vmatpush.msra.mxu1 %v2645_v60  ;;  %2763 = vmatmul.f32.vlgmr.msra.gmra.mxu2 %v2701_v1  ;;  %v2702_v2 = vld.sshfl [vmem:[#allocation1 + $0x18] sm:$0xff pattern:$0x73625140]  ;;  %v2700_v3 = vld.sshfl [vmem:[#allocation1 + $0x8] sm:$0xff pattern:$0x73625140] }
 0x437   : > { %2723 = vmatmul.f32.vlgmr.msra.gmra.mxu0 %v2699_v0  ;;  %2783 = vmatmul.f32.vlgmr.msra.gmra.mxu3 %v2702_v2 }
 0x438   : > { %2743 = vmatmul.f32.vlgmr.msra.gmra.mxu1 %v2700_v3 }
 0x4b4   : > { %v2724_v5 = vpop.f32.mrf.mxu0 }
 0x4b5   : > { %v2725_v6 = vadd.f32 %v2918_v4, %v2724_v5  ;;  %v2744_v7 = vpop.f32.mrf.mxu1 }
 0x4b7   : > { %v2745_v8 = vadd.f32 %v2744_v7, %v2725_v6 }
 0x4b9   : > { %v2764_v9 = vpop.f32.mrf.mxu2 }
 0x4ba   : > { %v2765_v10 = vadd.f32 %v2764_v9, %v2745_v8  ;;  %v2784_v11 = vpop.f32.mrf.mxu3 }
 0x4bc   : > { %v2785_v12 = vadd.f32 %v2784_v11, %v2765_v10 }
 0x4be   : > { %v2788_v13 = vsel %vm2787_vm3, %v2785_v12, 0.0 }
 0x4bf   : > { %2789 = vadd.xlane.f32.xlu0 %v2788_v13 }
 0x532   : > { %v2790_v15 = vpop.xlane.xlu0 %2789 }
 0x533   : > { %v2791_v16 = vmul.f32 0.16666667, %v2790_v15 }
 0x535   : > { %v2792_v17 = vsub.f32 %v2785_v12, %v2791_v16 }
 0x537   : > { %2795 = vperm.xlu0 %2917, %v2792_v17  }
 0x5a9   : > { %v2796_v18 = vpop.permute.xlu0 %2795 }
 0x5aa   : > { %v2798_v19 = vadd.f32 %v2796_v18, %v2785_v12 }
 0x5ac   : > { %2799 = vst.msk [vmem:[#allocation3] sm:$0x3] %vm2787_vm3, %v2798_v19 }
 0x5ad PF: > { %p2880_p7 = scmp.eq.s32.totalorder %s2998_s19, 1  ;;  %s2961_s24 = smov [#allocation3]  }
 0x5ae   : > { %s2806_s25 = sshll.u32 %s2961_s24, 4  ;;  %s2808_s28 = sshll.u32 %s4326_s5, 4  ;;  %s2807_s25 = int_to_ptr.vmem [resolvable:$true] %s2806_s25  ;;  %s2809_s28 = int_to_ptr.hbm [resolvable:$true] %s2808_s28 }
 0x5af   : > { %2877 = dma.vmem_to_hbm [thread:$0]  (%p2880_p7), %s2807_s25, 32, %s2809_s28, [#allocation4]  }
 0x5b0   : > { %2952 = dma.done.wait (%p2880_p7), [#allocation4], 32  }
 0x5b1   : > { %2954 = vsyncadd (%p2880_p7), [#allocation4], 4294967264 }
 0x5b2 PF: > { %s16_s18 = sadd.s32 1, %s2957_s18  }
 0x5b3   : > { %p13_p8 = scmp.ge.s32.totalorder %s16_s18, 4  }
 0x5b5   :  { %15 = sbr.rel (!%p13_p8) target bundleno = 1 (0x1), region = 79 }
 0x5ba   :  { %2822 = vsyncpa [#allocation4], 1 }
 0x5bb   :  { %2824 = vsyncpa [#allocation4 + $0x1], 1 }

</bundles_post_ra>
